<compile_context>
chip_gen: v6e
topology: v6e:2x2x1
jax: 0.10.0
libtpu: 0.0.40
codegen_flags: <defaults>
</compile_context>

<pallas_src>
import functools

import jax
import jax.numpy as jnp
from jax.experimental import pallas as pl
from jax.experimental.pallas import tpu as pltpu


def _round_up(a, b):
    return ((a + b - 1) // b) * b


# ----------------------------------------------------------------------------
# Pallas kernel 1: fused 1x1 conv (matmul) + folded-BN + optional SiLU
#   - grid tiles the token dimension M (double-buffered DMA overlapped with MXU)
#   - bf16 operands, f32 accumulation; epilogue math stays f32 (v5e-friendly)
# ----------------------------------------------------------------------------
def _pointwise_kernel(x_ref, w_ref, s_ref, b_ref, o_ref, *, apply_act):
    x = x_ref[...].astype(jnp.bfloat16)
    w = w_ref[...].astype(jnp.bfloat16)
    acc = jnp.dot(x, w, preferred_element_type=jnp.float32)
    acc = acc * s_ref[...] + b_ref[...]
    if apply_act:
        acc = acc * jax.nn.sigmoid(acc)  # SiLU
    o_ref[...] = acc.astype(o_ref.dtype)


def pointwise_proj(x2d, w, scale, bias, apply_act, out_dtype=jnp.float32, tile_m=512):
    M, Cin = x2d.shape
    Cout = w.shape[1]
    # tile tokens; TM=512 keeps per-buffer blocks small enough for v7x's 64 MiB VMEM
    TM = min(tile_m, _round_up(M, 8))
    Mp = _round_up(M, TM)
    if Mp != M:
        x2d = jnp.pad(x2d, ((0, Mp - M), (0, 0)))
    out = pl.pallas_call(
        functools.partial(_pointwise_kernel, apply_act=apply_act),
        out_shape=jax.ShapeDtypeStruct((Mp, Cout), out_dtype),
        grid=(Mp // TM,),
        in_specs=[pl.BlockSpec((TM, Cin), lambda i: (i, 0)),
                  pl.BlockSpec((Cin, Cout), lambda i: (0, 0)),   # weights stay resident
                  pl.BlockSpec((1, Cout), lambda i: (0, 0)),
                  pl.BlockSpec((1, Cout), lambda i: (0, 0))],
        out_specs=pl.BlockSpec((TM, Cout), lambda i: (i, 0)),
        compiler_params=pltpu.CompilerParams(dimension_semantics=("parallel",)),
    )(x2d, w.astype(jnp.bfloat16),
      scale.reshape(1, Cout).astype(jnp.float32),
      bias.reshape(1, Cout).astype(jnp.float32))
    return out[:M] if Mp != M else out


# ----------------------------------------------------------------------------
# Pallas kernel 2: depthwise k x k conv (stride 1, "same" padding done outside)
#   - grid over (batch, 128-lane channel chunks) to bound per-block VMEM
# ----------------------------------------------------------------------------
def _dwconv_kernel(x_ref, w_ref, b_ref, o_ref, *, k, H, W):
    Cc = o_ref.shape[-1]
    w_all = w_ref[...]  # (k*k, Cc)
    acc = jnp.zeros((H, W, Cc), jnp.float32)
    for dy in range(k):
        for dx in range(k):
            tap = x_ref[0, dy:dy + H, dx:dx + W, :].astype(jnp.float32)
            acc = acc + tap * w_all[dy * k + dx][None, None, :]
    acc = acc + b_ref[0][None, None, :]
    o_ref[0] = acc.astype(o_ref.dtype)


def depthwise_conv(x_nhwc, w, bias, k, c_chunk=128):
    # TODO(synk): for very large spatial extents add row-band tiling with a (k-1) halo;
    # channel chunking alone bounds VMEM for the feature-map sizes this module sees.
    N, H, W, C = x_nhwc.shape
    p = k // 2
    xp = jnp.pad(x_nhwc, ((0, 0), (p, p), (p, p), (0, 0)))
    Hp, Wp = H + 2 * p, W + 2 * p
    Cc = min(c_chunk, C)
    grid = (N, pl.cdiv(C, Cc))
    return pl.pallas_call(
        functools.partial(_dwconv_kernel, k=k, H=H, W=W),
        out_shape=jax.ShapeDtypeStruct((N, H, W, C), x_nhwc.dtype),
        grid=grid,
        in_specs=[pl.BlockSpec((1, Hp, Wp, Cc), lambda n, c: (n, 0, 0, c)),
                  pl.BlockSpec((k * k, Cc), lambda n, c: (0, c)),
                  pl.BlockSpec((1, Cc), lambda n, c: (0, c))],
        out_specs=pl.BlockSpec((1, H, W, Cc), lambda n, c: (n, 0, 0, c)),
        compiler_params=pltpu.CompilerParams(
            dimension_semantics=("parallel", "parallel")),
    )(xp, w, bias.reshape(1, C))


# ----------------------------------------------------------------------------
# Pallas kernel 3: window-level routing logits  (q_win * scale) @ k_win^T
#   - single batched, transpose-free einsum over all images (tiny tensor)
# ----------------------------------------------------------------------------
def _routing_kernel(q_ref, k_ref, o_ref, *, scale):
    q = (q_ref[...] * scale).astype(jnp.bfloat16)   # (N, p2, c)
    k = k_ref[...].astype(jnp.bfloat16)             # (N, p2, c)
    o_ref[...] = jnp.einsum("npc,nqc->npq", q, k,
                            preferred_element_type=jnp.float32).astype(o_ref.dtype)


def routing_logits(q_win, k_win, scale):
    N, p2, c = q_win.shape
    return pl.pallas_call(
        functools.partial(_routing_kernel, scale=scale),
        out_shape=jax.ShapeDtypeStruct((N, p2, p2), jnp.float32),
        grid=(1,),
        in_specs=[pl.BlockSpec((N, p2, c), lambda i: (0, 0, 0)),
                  pl.BlockSpec((N, p2, c), lambda i: (0, 0, 0))],
        out_specs=pl.BlockSpec((N, p2, p2), lambda i: (0, 0, 0)),
    )(q_win.astype(jnp.float32), k_win.astype(jnp.float32))


# ----------------------------------------------------------------------------
# Pallas kernel 4: fine-grained window attention  softmax(q*scale @ k^T) @ v
#   - TB windows per grid step, per-head batched matmuls (bf16 operands, f32 acc)
#   - softmax uses pl.reciprocal(approx=True) (EUP slot)
#   - lane-dense output (TB, w2, heads*cv)
# ----------------------------------------------------------------------------
def _window_attn_kernel(q_ref, k_ref, v_ref, o_ref, *, scale, num_heads):
    q_all = q_ref[...]   # (TB, m, w2, cq)  f32
    k_all = k_ref[...]   # (TB, m, L,  cq)  f32
    v_all = v_ref[...]   # (TB, m, L,  cv)  f32
    outs = []
    for hd in range(num_heads):
        q = (q_all[:, hd] * scale).astype(jnp.bfloat16)          # (TB, w2, cq)
        k = k_all[:, hd].astype(jnp.bfloat16)                    # (TB, L,  cq)
        v = v_all[:, hd].astype(jnp.bfloat16)                    # (TB, L,  cv)
        logits = jnp.einsum("bqc,blc->bql", q, k,
                            preferred_element_type=jnp.float32)  # (TB, w2, L)
        logits = logits - jnp.max(logits, axis=-1, keepdims=True)
        p = jnp.exp(logits)
        inv = pl.reciprocal(jnp.sum(p, axis=-1, keepdims=True), approx=True)
        p = p * inv
        o = jnp.einsum("bql,blc->bqc", p.astype(jnp.bfloat16), v,
                       preferred_element_type=jnp.float32)       # (TB, w2, cv)
        outs.append(o)
    # single full-width (lane-dense) store of all heads
    o_ref[...] = jnp.concatenate(outs, axis=-1).astype(o_ref.dtype)  # (TB, w2, m*cv)


def window_attention(q, k, v, scale, tb=8):
    # q: (B, m, w2, cq)  k: (B, m, L, cq)  v: (B, m, L, cv)  ->  (B, w2, m*cv)
    B, m, w2, cq = q.shape
    L = k.shape[2]
    cv = v.shape[3]
    TB = min(tb, B)
    Bp = _round_up(B, TB)
    if Bp != B:
        padB = ((0, Bp - B), (0, 0), (0, 0), (0, 0))
        q = jnp.pad(q, padB)
        k = jnp.pad(k, padB)
        v = jnp.pad(v, padB)
    out = pl.pallas_call(
        functools.partial(_window_attn_kernel, scale=scale, num_heads=m),
        out_shape=jax.ShapeDtypeStruct((Bp, w2, m * cv), jnp.float32),
        grid=(Bp // TB,),
        in_specs=[pl.BlockSpec((TB, m, w2, cq), lambda b: (b, 0, 0, 0)),
                  pl.BlockSpec((TB, m, L, cq), lambda b: (b, 0, 0, 0)),
                  pl.BlockSpec((TB, m, L, cv), lambda b: (b, 0, 0, 0))],
        # output is 3-D -> index_map must return exactly 3 block indices
        out_specs=pl.BlockSpec((TB, w2, m * cv), lambda b: (b, 0, 0)),
        compiler_params=pltpu.CompilerParams(dimension_semantics=("parallel",)),
    )(q, k, v)
    return out[:B] if Bp != B else out


# ----------------------------------------------------------------------------
# JAX glue (gather-heavy ops without a clean TPU-Pallas equivalent)
# ----------------------------------------------------------------------------
def grid_sample_bilinear_nhwc(x, grid):
    # x: (N, H, W, C), grid: (N, Hg, Wg, 2) with (x, y) in [-1, 1], align_corners=True,
    # padding_mode='zeros' (matches F.grid_sample defaults used by the module).
    # TODO(synk): bilinear gather kept in plain JAX; no clean TPU-Pallas gather primitive.
    N, H, W, C = x.shape
    gx, gy = grid[..., 0], grid[..., 1]
    ix = (gx + 1.0) * 0.5 * (W - 1)
    iy = (gy + 1.0) * 0.5 * (H - 1)
    ix0 = jnp.floor(ix)
    iy0 = jnp.floor(iy)
    xf = x.reshape(N, H * W, C)

    def gather(iy_, ix_):
        iyc = jnp.clip(iy_, 0, H - 1).astype(jnp.int32)
        ixc = jnp.clip(ix_, 0, W - 1).astype(jnp.int32)
        inb = ((iy_ >= 0) & (iy_ <= H - 1) & (ix_ >= 0) & (ix_ <= W - 1))
        flat = (iyc * W + ixc).reshape(N, -1, 1)
        v = jnp.take_along_axis(xf, flat, axis=1)
        v = v.reshape(N, iy_.shape[1], iy_.shape[2], C)
        return v * inb[..., None].astype(x.dtype)

    wx1 = ix - ix0
    wx0 = 1.0 - wx1
    wy1 = iy - iy0
    wy0 = 1.0 - wy1
    v00 = gather(iy0, ix0)
    v01 = gather(iy0, ix0 + 1)
    v10 = gather(iy0 + 1, ix0)
    v11 = gather(iy0 + 1, ix0 + 1)
    return (v00 * (wy0 * wx0)[..., None] + v01 * (wy0 * wx1)[..., None]
            + v10 * (wy1 * wx0)[..., None] + v11 * (wy1 * wx1)[..., None])


def adaptive_max_pool_nhwc(x, out_size):
    # Matches nn.AdaptiveMaxPool2d. Fast path: single fused reshape+max when divisible.
    B, H, W, C = x.shape
    if H % out_size == 0 and W % out_size == 0:
        kh, kw = H // out_size, W // out_size
        return jnp.max(x.reshape(B, out_size, kh, out_size, kw, C), axis=(2, 4))
    rows = []
    for i in range(out_size):
        hs = (i * H) // out_size
        he = -(-((i + 1) * H) // out_size)
        cols = []
        for j in range(out_size):
            ws = (j * W) // out_size
            we = -(-((j + 1) * W) // out_size)
            cols.append(jnp.max(x[:, hs:he, ws:we, :], axis=(1, 2)))
        rows.append(jnp.stack(cols, axis=1))
    return jnp.stack(rows, axis=1)  # (B, out, out, C)


def gather_topk_kv(kv_pixel, topk_idx):
    # kv_pixel: (N, p2, kp2, C); topk_idx: (N, p2, topk) -> (N, p2, topk, kp2, C)
    # Single XLA gather; avoids materializing the (N, p2, p2, kp2, C) broadcast.
    # TODO(synk): could be replaced by scalar-prefetch indexed KV BlockSpecs feeding the
    # attention kernel directly (flash-style over topk) to skip the HBM round-trip.
    return jax.vmap(lambda kvn, idxn: kvn[idxn])(kv_pixel, topk_idx)


# ----------------------------------------------------------------------------
# Full forward pass
# ----------------------------------------------------------------------------
def bilevel_routing_deformable_attention(x_nchw, params, cfg):
    dim = cfg["dim"]
    nw = cfg["num_windows"]
    m = cfg["num_heads"]
    qk_dim = cfg["qk_dim"]
    scale = cfg["scale"]
    topk = cfg["topk"]
    kpw = cfg["kv_per_window"]

    N, _, H_in, W_in = x_nchw.shape
    x = jnp.transpose(x_nchw, (0, 2, 3, 1)).astype(jnp.float32)  # NHWC
    pad_b = (nw - H_in % nw) % nw
    pad_r = (nw - W_in % nw) % nw
    x = jnp.pad(x, ((0, 0), (0, pad_b), (0, pad_r), (0, 0)))
    H, W = x.shape[1], x.shape[2]
    h, w = H // nw, W // nw
    p2 = nw * nw
    w2 = h * w
    kp2 = kpw * kpw

    # ---- query projection: 1x1 conv + BN(eval) + SiLU, fused tiled Pallas matmul ----
    q_flat = pointwise_proj(x.reshape(-1, dim), params["qp_w"],
                            params["qp_s"], params["qp_b"], apply_act=True)
    query = q_flat.reshape(N, H, W, dim)

    # ---- offset predictor: depthwise conv (BN folded) -> 1x1 conv (dim -> 2) ----
    off = depthwise_conv(query, params["off_dw_w"], params["off_dw_b"], cfg["off_conv"])
    off = pointwise_proj(off.reshape(-1, dim), params["off_pw_w"],
                         jnp.ones((2,), jnp.float32), jnp.zeros((2,), jnp.float32),
                         apply_act=False)
    offset = off.reshape(N, H, W, 2)  # (..., (dy, dx)) normalized offsets

    # ---- reference points + deformable bilinear sampling (glue; gather-heavy) ----
    ry = (jnp.linspace(0.5, H - 0.5, H, dtype=jnp.float32) / (H - 1.0)) * 2.0 - 1.0
    rx = (jnp.linspace(0.5, W - 0.5, W, dtype=jnp.float32) / (W - 1.0)) * 2.0 - 1.0
    reference = jnp.stack(jnp.meshgrid(ry, rx, indexing="ij"), axis=-1)  # (H, W, 2)
    reference = jnp.broadcast_to(reference[None], (N, H, W, 2))
    pos = jnp.clip(offset + reference, -0.05, 0.05)   # matches torch: clamp of (offset+ref)
    x_sampled = grid_sample_bilinear_nhwc(x, pos[..., ::-1])  # grid takes (x, y)
    x_sampled = x_sampled.astype(jnp.bfloat16)  # halve HBM round-trip into kv projection

    # ---- kv projection: 1x1 conv + BN(eval) + SiLU (dim -> 2*dim) ----
    kv_flat = pointwise_proj(x_sampled.reshape(-1, dim), params["kvp_w"],
                             params["kvp_s"], params["kvp_b"], apply_act=True)
    kv = kv_flat.reshape(N, H, W, 2 * dim)

    # ---- window partition / merge helpers ----
    def window_partition(t):  # (N, H, W, c) -> (N, p2, h, w, c)
        c = t.shape[-1]
        t = t.reshape(N, nw, h, nw, w, c)
        return jnp.transpose(t, (0, 1, 3, 2, 4, 5)).reshape(N, p2, h, w, c)

    def window_merge(t):  # (N, p2, h, w, c) -> (N, H, W, c)
        c = t.shape[-1]
        t = t.reshape(N, nw, nw, h, w, c)
        return jnp.transpose(t, (0, 1, 3, 2, 4, 5)).reshape(N, H, W, c)

    q_win_sp = window_partition(query)   # (N, p2, h, w, dim)
    kv_win_sp = window_partition(kv)     # (N, p2, h, w, 2*dim)
    query_pixel = q_win_sp.reshape(N, p2, w2, dim)

    # ---- kv downsample: adaptive max pool per window (glue) ----
    kv_pool = adaptive_max_pool_nhwc(kv_win_sp.reshape(N * p2, h, w, 2 * dim), kpw)
    kv_pixel = kv_pool.reshape(N, p2, kp2, 2 * dim)

    # ---- window-level summary tokens ----
    query_window = jnp.mean(q_win_sp, axis=(2, 3))                # (N, p2, dim)
    key_window = jnp.mean(kv_win_sp[..., :qk_dim], axis=(2, 3))   # (N, p2, qk_dim)

    # ---- side depthwise conv (LEPE-style) on the value half (Pallas dwconv) ----
    v_full = window_merge(kv_win_sp[..., qk_dim:])                # (N, H, W, dim)
    sec = depthwise_conv(v_full, params["sec_w"], params["sec_b"], cfg["side_conv"])

    # ---- top-k routing: logits in Pallas, top-k selection in JAX ----
    logits = routing_logits(query_window, key_window, scale)      # (N, p2, p2)
    _, topk_idx = jax.lax.top_k(logits, topk)
    # routing softmax weights are unused by KVGather in the reference module -> skipped.

    # ---- KV gather (torch.gather equivalent) without the p2^2 broadcast ----
    kv_sel = gather_topk_kv(kv_pixel, topk_idx)                   # (N, p2, topk, kp2, 2*dim)

    k_sel = kv_sel[..., :qk_dim]
    v_sel = kv_sel[..., qk_dim:]
    cq = qk_dim // m
    cv = dim // m
    L = topk * kp2
    B = N * p2

    k_sel = k_sel.reshape(N, p2, topk, kp2, m, cq)
    k_sel = jnp.transpose(k_sel, (0, 1, 4, 2, 3, 5)).reshape(B, m, L, cq)
    v_sel = v_sel.reshape(N, p2, topk, kp2, m, cv)
    v_sel = jnp.transpose(v_sel, (0, 1, 4, 2, 3, 5)).reshape(B, m, L, cv)
    q_pix = query_pixel.reshape(N, p2, w2, m, cq)
    q_pix = jnp.transpose(q_pix, (0, 1, 3, 2, 4)).reshape(B, m, w2, cq)

    # ---- fine-grained attention (Pallas hot path), lane-dense (B, w2, m*cv) output ----
    out = window_attention(q_pix, k_sel, v_sel, scale)            # (B, w2, dim)

    # '(n j i) (h w) (m c) -> n (j h) (i w) (m c)'
    out = out.reshape(N, nw, nw, h, w, dim)
    out = jnp.transpose(out, (0, 1, 3, 2, 4, 5)).reshape(N, H, W, dim)
    out = out + sec
    out = out[:, :H_in, :W_in, :]
    return jnp.transpose(out, (0, 3, 1, 2))  # back to NCHW


# ----------------------------------------------------------------------------
# Deterministic synthetic parameters
# ----------------------------------------------------------------------------
def init_params(key, dim, side_conv, off_conv):
    ks = jax.random.split(key, 10)

    def bn_fold(kg, c, eps=1e-5):
        k1, k2, k3, k4 = jax.random.split(kg, 4)
        gamma = 1.0 + 0.1 * jax.random.normal(k1, (c,))
        beta = 0.1 * jax.random.normal(k2, (c,))
        mean = 0.1 * jax.random.normal(k3, (c,))
        var = jnp.abs(jax.random.normal(k4, (c,))) * 0.1 + 0.5
        s = gamma / jnp.sqrt(var + eps)
        b = beta - mean * s
        return s.astype(jnp.float32), b.astype(jnp.float32)

    p = {}
    p["qp_w"] = (0.2 * jax.random.normal(ks[0], (dim, dim))).astype(jnp.float32)
    p["qp_s"], p["qp_b"] = bn_fold(ks[1], dim)
    p["kvp_w"] = (0.2 * jax.random.normal(ks[2], (dim, 2 * dim))).astype(jnp.float32)
    p["kvp_s"], p["kvp_b"] = bn_fold(ks[3], 2 * dim)
    p["sec_w"] = (0.2 * jax.random.normal(ks[4], (side_conv * side_conv, dim))).astype(jnp.float32)
    p["sec_b"] = (0.1 * jax.random.normal(ks[5], (dim,))).astype(jnp.float32)
    # offset predictor: depthwise conv -> BN(eval) -> 1x1 conv (no bias); BN folded into dw weights
    dw_w = 0.2 * jax.random.normal(ks[6], (off_conv * off_conv, dim))
    dw_b = 0.1 * jax.random.normal(ks[7], (dim,))
    bn_s, bn_b = bn_fold(ks[8], dim)
    p["off_dw_w"] = (dw_w * bn_s[None, :]).astype(jnp.float32)
    p["off_dw_b"] = (dw_b * bn_s + bn_b).astype(jnp.float32)
    p["off_pw_w"] = (0.05 * jax.random.normal(ks[9], (dim, 2))).astype(jnp.float32)
    return p


if __name__ == "__main__":
    dim = 8
    cfg = dict(
        dim=dim,
        num_windows=2,
        num_heads=2,
        qk_dim=dim,
        scale=dim ** (-0.5),
        kv_per_window=2,
        topk=2,
        side_conv=3,
        off_conv=3,
    )
    key = jax.random.PRNGKey(0)
    kx, kp = jax.random.split(key)
    # NCHW input; 15x15 exercises the auto-padding path (padded to 16x16, 2x2 windows of 8x8)
    x = jax.random.normal(kx, (2, dim, 15, 15), dtype=jnp.float32)
    params = init_params(kp, dim, cfg["side_conv"], cfg["off_conv"])

    fwd = jax.jit(functools.partial(bilevel_routing_deformable_attention, cfg=cfg))
    out = fwd(x, params)
    jax.block_until_ready(out)
    assert out.shape == (2, dim, 15, 15), out.shape
    assert bool(jnp.all(jnp.isfinite(out)))
    print("KERNEL_OK")
</pallas_src>

<mosaic_0001>
module attributes {stable_mosaic.version = 11 : i64} {
  func.func @_pointwise_kernel(%arg0: i32, %arg1: memref<512x8xf32, #tpu.memory_space<vmem>>, %arg2: memref<8x8xbf16, #tpu.memory_space<vmem>>, %arg3: memref<1x8xf32, #tpu.memory_space<vmem>>, %arg4: memref<1x8xf32, #tpu.memory_space<vmem>>, %arg5: memref<512x8xf32, #tpu.memory_space<vmem>>) attributes {dimension_semantics = [#tpu.dimension_semantics<parallel>], iteration_bounds = array<i64: 1>, scalar_prefetch = 0 : i64, scratch_operands = 0 : i64, tpu.core_type = #tpu.core_type<tc>, window_params = [{transform_indices = @transform_0, window_bounds = array<i64: 512, 8>}, {pipeline_mode = #tpu.pipeline_mode<synchronous>, transform_indices = @transform_1, window_bounds = array<i64: 8, 8>}, {pipeline_mode = #tpu.pipeline_mode<synchronous>, transform_indices = @transform_2, window_bounds = array<i64: 1, 8>}, {pipeline_mode = #tpu.pipeline_mode<synchronous>, transform_indices = @transform_3, window_bounds = array<i64: 1, 8>}, {transform_indices = @transform_4, window_bounds = array<i64: 512, 8>}]} {
    %c0 = arith.constant 0 : index
    %c0_0 = arith.constant 0 : index
    %0 = vector.load %arg1[%c0, %c0_0] : memref<512x8xf32, #tpu.memory_space<vmem>>, vector<512x8xf32>
    %1 = arith.truncf %0 : vector<512x8xf32> to vector<512x8xbf16>
    %c0_1 = arith.constant 0 : index
    %c0_2 = arith.constant 0 : index
    %2 = vector.load %arg2[%c0_1, %c0_2] : memref<8x8xbf16, #tpu.memory_space<vmem>>, vector<8x8xbf16>
    %cst = arith.constant dense<0.000000e+00> : vector<512x8xf32>
    %3 = tpu.matmul %1, %2, %cst {dimension_numbers = #tpu.dot_dimension_numbers<[1], [0], [0], [1], [0, 0, 1, 1], [], []>} : vector<512x8xbf16>, vector<8x8xbf16>, vector<512x8xf32> -> vector<512x8xf32>
    %c0_3 = arith.constant 0 : index
    %c0_4 = arith.constant 0 : index
    %4 = vector.load %arg3[%c0_3, %c0_4] : memref<1x8xf32, #tpu.memory_space<vmem>>, vector<1x8xf32>
    %5 = vector.broadcast %4 : vector<1x8xf32> to vector<512x8xf32>
    %6 = arith.mulf %3, %5 : vector<512x8xf32>
    %c0_5 = arith.constant 0 : index
    %c0_6 = arith.constant 0 : index
    %7 = vector.load %arg4[%c0_5, %c0_6] : memref<1x8xf32, #tpu.memory_space<vmem>>, vector<1x8xf32>
    %8 = vector.broadcast %7 : vector<1x8xf32> to vector<512x8xf32>
    %9 = arith.addf %6, %8 : vector<512x8xf32>
    %10 = arith.negf %9 : vector<512x8xf32>
    %11 = math.exp %10 : vector<512x8xf32>
    %cst_7 = arith.constant 1.000000e+00 : f32
    %12 = vector.broadcast %cst_7 : f32 to vector<512x8xf32>
    %13 = arith.addf %12, %11 : vector<512x8xf32>
    %14 = arith.divf %12, %13 : vector<512x8xf32>
    %15 = arith.mulf %9, %14 : vector<512x8xf32>
    %c0_8 = arith.constant 0 : index
    %c0_9 = arith.constant 0 : index
    %16 = vector.load %arg5[%c0_8, %c0_9] : memref<512x8xf32, #tpu.memory_space<vmem>>, vector<512x8xf32>
    tpu.vector_store %arg5[%c0_8, %c0_9], %15 {strides = array<i32>} : memref<512x8xf32, #tpu.memory_space<vmem>>, vector<512x8xf32>,
    return
  }
  func.func @transform_0(%arg0: i32) -> (i32, i32) {
    %c0_i32 = arith.constant 0 : i32
    %c0_i32_0 = arith.constant 0 : i32
    return %arg0, %c0_i32 : i32, i32
  }
  func.func @transform_1(%arg0: i32) -> (i32, i32) {
    %c0_i32 = arith.constant 0 : i32
    %c0_i32_0 = arith.constant 0 : i32
    %c0_i32_1 = arith.constant 0 : i32
    return %c0_i32, %c0_i32_0 : i32, i32
  }
  func.func @transform_2(%arg0: i32) -> (i32, i32) {
    %c0_i32 = arith.constant 0 : i32
    %c0_i32_0 = arith.constant 0 : i32
    %c0_i32_1 = arith.constant 0 : i32
    return %c0_i32, %c0_i32_0 : i32, i32
  }
  func.func @transform_3(%arg0: i32) -> (i32, i32) {
    %c0_i32 = arith.constant 0 : i32
    %c0_i32_0 = arith.constant 0 : i32
    %c0_i32_1 = arith.constant 0 : i32
    return %c0_i32, %c0_i32_0 : i32, i32
  }
  func.func @transform_4(%arg0: i32) -> (i32, i32) {
    %c0_i32 = arith.constant 0 : i32
    %c0_i32_0 = arith.constant 0 : i32
    return %arg0, %c0_i32 : i32, i32
  }
}

module attributes {stable_mosaic.version = 11 : i64} {
  func.func @_dwconv_kernel(%arg0: i32, %arg1: i32, %arg2: memref<1x18x18x8xf32, #tpu.memory_space<vmem>>, %arg3: memref<9x8xf32, #tpu.memory_space<vmem>>, %arg4: memref<1x8xf32, #tpu.memory_space<vmem>>, %arg5: memref<1x16x16x8xf32, #tpu.memory_space<vmem>>) attributes {dimension_semantics = [#tpu.dimension_semantics<parallel>, #tpu.dimension_semantics<parallel>], iteration_bounds = array<i64: 2, 1>, scalar_prefetch = 0 : i64, scratch_operands = 0 : i64, tpu.core_type = #tpu.core_type<tc>, window_params = [{transform_indices = @transform_0, window_bounds = array<i64: 1, 18, 18, 8>}, {transform_indices = @transform_1, window_bounds = array<i64: 9, 8>}, {transform_indices = @transform_2, window_bounds = array<i64: 1, 8>}, {transform_indices = @transform_3, window_bounds = array<i64: 1, 16, 16, 8>}]} {
    %c0 = arith.constant 0 : index
    %c0_0 = arith.constant 0 : index
    %0 = vector.load %arg3[%c0, %c0_0] : memref<9x8xf32, #tpu.memory_space<vmem>>, vector<9x8xf32>
    %cst = arith.constant 0.000000e+00 : f32
    %1 = vector.broadcast %cst : f32 to vector<16x16x8xf32>
    %c0_1 = arith.constant 0 : index
    %c0_2 = arith.constant 0 : index
    %c0_3 = arith.constant 0 : index
    %c0_4 = arith.constant 0 : index
    %2 = vector.load %arg2[%c0_1, %c0_2, %c0_3, %c0_4] : memref<1x18x18x8xf32, #tpu.memory_space<vmem>>, vector<1x16x16x8xf32>
    %3 = vector.shape_cast %2 : vector<1x16x16x8xf32> to vector<16x16x8xf32>
    %4 = vector.extract_strided_slice %0 {offsets = [0, 0], sizes = [1, 8], strides = [1, 1]} : vector<9x8xf32> to vector<1x8xf32>
    %5 = vector.shape_cast %4 : vector<1x8xf32> to vector<8xf32>
    %6 = vector.shape_cast %5 : vector<8xf32> to vector<1x1x8xf32>
    %7 = vector.broadcast %6 : vector<1x1x8xf32> to vector<16x16x8xf32>
    %8 = arith.mulf %3, %7 : vector<16x16x8xf32>
    %9 = arith.addf %1, %8 : vector<16x16x8xf32>
    %c0_5 = arith.constant 0 : index
    %c0_6 = arith.constant 0 : index
    %c1 = arith.constant 1 : index
    %c0_7 = arith.constant 0 : index
    %10 = vector.load %arg2[%c0_5, %c0_6, %c1, %c0_7] : memref<1x18x18x8xf32, #tpu.memory_space<vmem>>, vector<1x16x16x8xf32>
    %11 = vector.shape_cast %10 : vector<1x16x16x8xf32> to vector<16x16x8xf32>
    %12 = vector.extract_strided_slice %0 {offsets = [1, 0], sizes = [1, 8], strides = [1, 1]} : vector<9x8xf32> to vector<1x8xf32>
    %13 = vector.shape_cast %12 : vector<1x8xf32> to vector<8xf32>
    %14 = vector.shape_cast %13 : vector<8xf32> to vector<1x1x8xf32>
    %15 = vector.broadcast %14 : vector<1x1x8xf32> to vector<16x16x8xf32>
    %16 = arith.mulf %11, %15 : vector<16x16x8xf32>
    %17 = arith.addf %9, %16 : vector<16x16x8xf32>
    %c0_8 = arith.constant 0 : index
    %c0_9 = arith.constant 0 : index
    %c2 = arith.constant 2 : index
    %c0_10 = arith.constant 0 : index
    %18 = vector.load %arg2[%c0_8, %c0_9, %c2, %c0_10] : memref<1x18x18x8xf32, #tpu.memory_space<vmem>>, vector<1x16x16x8xf32>
    %19 = vector.shape_cast %18 : vector<1x16x16x8xf32> to vector<16x16x8xf32>
    %20 = vector.extract_strided_slice %0 {offsets = [2, 0], sizes = [1, 8], strides = [1, 1]} : vector<9x8xf32> to vector<1x8xf32>
    %21 = vector.shape_cast %20 : vector<1x8xf32> to vector<8xf32>
    %22 = vector.shape_cast %21 : vector<8xf32> to vector<1x1x8xf32>
    %23 = vector.broadcast %22 : vector<1x1x8xf32> to vector<16x16x8xf32>
    %24 = arith.mulf %19, %23 : vector<16x16x8xf32>
    %25 = arith.addf %17, %24 : vector<16x16x8xf32>
    %c0_11 = arith.constant 0 : index
    %c1_12 = arith.constant 1 : index
    %c0_13 = arith.constant 0 : index
    %c0_14 = arith.constant 0 : index
    %26 = vector.load %arg2[%c0_11, %c1_12, %c0_13, %c0_14] : memref<1x18x18x8xf32, #tpu.memory_space<vmem>>, vector<1x16x16x8xf32>
    %27 = vector.shape_cast %26 : vector<1x16x16x8xf32> to vector<16x16x8xf32>
    %28 = vector.extract_strided_slice %0 {offsets = [3, 0], sizes = [1, 8], strides = [1, 1]} : vector<9x8xf32> to vector<1x8xf32>
    %29 = vector.shape_cast %28 : vector<1x8xf32> to vector<8xf32>
    %30 = vector.shape_cast %29 : vector<8xf32> to vector<1x1x8xf32>
    %31 = vector.broadcast %30 : vector<1x1x8xf32> to vector<16x16x8xf32>
    %32 = arith.mulf %27, %31 : vector<16x16x8xf32>
    %33 = arith.addf %25, %32 : vector<16x16x8xf32>
    %c0_15 = arith.constant 0 : index
    %c1_16 = arith.constant 1 : index
    %c1_17 = arith.constant 1 : index
    %c0_18 = arith.constant 0 : index
    %34 = vector.load %arg2[%c0_15, %c1_16, %c1_17, %c0_18] : memref<1x18x18x8xf32, #tpu.memory_space<vmem>>, vector<1x16x16x8xf32>
    %35 = vector.shape_cast %34 : vector<1x16x16x8xf32> to vector<16x16x8xf32>
    %36 = vector.extract_strided_slice %0 {offsets = [4, 0], sizes = [1, 8], strides = [1, 1]} : vector<9x8xf32> to vector<1x8xf32>
    %37 = vector.shape_cast %36 : vector<1x8xf32> to vector<8xf32>
    %38 = vector.shape_cast %37 : vector<8xf32> to vector<1x1x8xf32>
    %39 = vector.broadcast %38 : vector<1x1x8xf32> to vector<16x16x8xf32>
    %40 = arith.mulf %35, %39 : vector<16x16x8xf32>
    %41 = arith.addf %33, %40 : vector<16x16x8xf32>
    %c0_19 = arith.constant 0 : index
    %c1_20 = arith.constant 1 : index
    %c2_21 = arith.constant 2 : index
    %c0_22 = arith.constant 0 : index
    %42 = vector.load %arg2[%c0_19, %c1_20, %c2_21, %c0_22] : memref<1x18x18x8xf32, #tpu.memory_space<vmem>>, vector<1x16x16x8xf32>
    %43 = vector.shape_cast %42 : vector<1x16x16x8xf32> to vector<16x16x8xf32>
    %44 = vector.extract_strided_slice %0 {offsets = [5, 0], sizes = [1, 8], strides = [1, 1]} : vector<9x8xf32> to vector<1x8xf32>
    %45 = vector.shape_cast %44 : vector<1x8xf32> to vector<8xf32>
    %46 = vector.shape_cast %45 : vector<8xf32> to vector<1x1x8xf32>
    %47 = vector.broadcast %46 : vector<1x1x8xf32> to vector<16x16x8xf32>
    %48 = arith.mulf %43, %47 : vector<16x16x8xf32>
    %49 = arith.addf %41, %48 : vector<16x16x8xf32>
    %c0_23 = arith.constant 0 : index
    %c2_24 = arith.constant 2 : index
    %c0_25 = arith.constant 0 : index
    %c0_26 = arith.constant 0 : index
    %50 = vector.load %arg2[%c0_23, %c2_24, %c0_25, %c0_26] : memref<1x18x18x8xf32, #tpu.memory_space<vmem>>, vector<1x16x16x8xf32>
    %51 = vector.shape_cast %50 : vector<1x16x16x8xf32> to vector<16x16x8xf32>
    %52 = vector.extract_strided_slice %0 {offsets = [6, 0], sizes = [1, 8], strides = [1, 1]} : vector<9x8xf32> to vector<1x8xf32>
    %53 = vector.shape_cast %52 : vector<1x8xf32> to vector<8xf32>
    %54 = vector.shape_cast %53 : vector<8xf32> to vector<1x1x8xf32>
    %55 = vector.broadcast %54 : vector<1x1x8xf32> to vector<16x16x8xf32>
    %56 = arith.mulf %51, %55 : vector<16x16x8xf32>
    %57 = arith.addf %49, %56 : vector<16x16x8xf32>
    %c0_27 = arith.constant 0 : index
    %c2_28 = arith.constant 2 : index
    %c1_29 = arith.constant 1 : index
    %c0_30 = arith.constant 0 : index
    %58 = vector.load %arg2[%c0_27, %c2_28, %c1_29, %c0_30] : memref<1x18x18x8xf32, #tpu.memory_space<vmem>>, vector<1x16x16x8xf32>
    %59 = vector.shape_cast %58 : vector<1x16x16x8xf32> to vector<16x16x8xf32>
    %60 = vector.extract_strided_slice %0 {offsets = [7, 0], sizes = [1, 8], strides = [1, 1]} : vector<9x8xf32> to vector<1x8xf32>
    %61 = vector.shape_cast %60 : vector<1x8xf32> to vector<8xf32>
    %62 = vector.shape_cast %61 : vector<8xf32> to vector<1x1x8xf32>
    %63 = vector.broadcast %62 : vector<1x1x8xf32> to vector<16x16x8xf32>
    %64 = arith.mulf %59, %63 : vector<16x16x8xf32>
    %65 = arith.addf %57, %64 : vector<16x16x8xf32>
    %c0_31 = arith.constant 0 : index
    %c2_32 = arith.constant 2 : index
    %c2_33 = arith.constant 2 : index
    %c0_34 = arith.constant 0 : index
    %66 = vector.load %arg2[%c0_31, %c2_32, %c2_33, %c0_34] : memref<1x18x18x8xf32, #tpu.memory_space<vmem>>, vector<1x16x16x8xf32>
    %67 = vector.shape_cast %66 : vector<1x16x16x8xf32> to vector<16x16x8xf32>
    %68 = vector.extract_strided_slice %0 {offsets = [8, 0], sizes = [1, 8], strides = [1, 1]} : vector<9x8xf32> to vector<1x8xf32>
    %69 = vector.shape_cast %68 : vector<1x8xf32> to vector<8xf32>
    %70 = vector.shape_cast %69 : vector<8xf32> to vector<1x1x8xf32>
    %71 = vector.broadcast %70 : vector<1x1x8xf32> to vector<16x16x8xf32>
    %72 = arith.mulf %67, %71 : vector<16x16x8xf32>
    %73 = arith.addf %65, %72 : vector<16x16x8xf32>
    %c0_35 = arith.constant 0 : index
    %c0_36 = arith.constant 0 : index
    %74 = vector.load %arg4[%c0_35, %c0_36] : memref<1x8xf32, #tpu.memory_space<vmem>>, vector<1x8xf32>
    %75 = vector.shape_cast %74 : vector<1x8xf32> to vector<8xf32>
    %76 = vector.shape_cast %75 : vector<8xf32> to vector<1x1x8xf32>
    %77 = vector.broadcast %76 : vector<1x1x8xf32> to vector<16x16x8xf32>
    %78 = arith.addf %73, %77 : vector<16x16x8xf32>
    %c0_37 = arith.constant 0 : index
    %c0_38 = arith.constant 0 : index
    %c0_39 = arith.constant 0 : index
    %c0_40 = arith.constant 0 : index
    %79 = vector.load %arg5[%c0_37, %c0_38, %c0_39, %c0_40] : memref<1x16x16x8xf32, #tpu.memory_space<vmem>>, vector<1x16x16x8xf32>
    %80 = vector.shape_cast %79 : vector<1x16x16x8xf32> to vector<16x16x8xf32>
    %81 = vector.shape_cast %78 : vector<16x16x8xf32> to vector<1x16x16x8xf32>
    tpu.vector_store %arg5[%c0_37, %c0_38, %c0_39, %c0_40], %81 {strides = array<i32>} : memref<1x16x16x8xf32, #tpu.memory_space<vmem>>, vector<1x16x16x8xf32>,
    return
  }
  func.func @transform_0(%arg0: i32, %arg1: i32) -> (i32, i32, i32, i32) {
    %c0_i32 = arith.constant 0 : i32
    %c0_i32_0 = arith.constant 0 : i32
    %c0_i32_1 = arith.constant 0 : i32
    return %arg0, %c0_i32, %c0_i32_0, %arg1 : i32, i32, i32, i32
  }
  func.func @transform_1(%arg0: i32, %arg1: i32) -> (i32, i32) {
    %c0_i32 = arith.constant 0 : i32
    %c0_i32_0 = arith.constant 0 : i32
    return %c0_i32, %arg1 : i32, i32
  }
  func.func @transform_2(%arg0: i32, %arg1: i32) -> (i32, i32) {
    %c0_i32 = arith.constant 0 : i32
    %c0_i32_0 = arith.constant 0 : i32
    return %c0_i32, %arg1 : i32, i32
  }
  func.func @transform_3(%arg0: i32, %arg1: i32) -> (i32, i32, i32, i32) {
    %c0_i32 = arith.constant 0 : i32
    %c0_i32_0 = arith.constant 0 : i32
    %c0_i32_1 = arith.constant 0 : i32
    return %arg0, %c0_i32, %c0_i32_0, %arg1 : i32, i32, i32, i32
  }
}

module attributes {stable_mosaic.version = 11 : i64} {
  func.func @_pointwise_kernel(%arg0: i32, %arg1: memref<512x8xf32, #tpu.memory_space<vmem>>, %arg2: memref<8x2xbf16, #tpu.memory_space<vmem>>, %arg3: memref<1x2xf32, #tpu.memory_space<vmem>>, %arg4: memref<1x2xf32, #tpu.memory_space<vmem>>, %arg5: memref<512x2xf32, #tpu.memory_space<vmem>>) attributes {dimension_semantics = [#tpu.dimension_semantics<parallel>], iteration_bounds = array<i64: 1>, scalar_prefetch = 0 : i64, scratch_operands = 0 : i64, tpu.core_type = #tpu.core_type<tc>, window_params = [{transform_indices = @transform_0, window_bounds = array<i64: 512, 8>}, {pipeline_mode = #tpu.pipeline_mode<synchronous>, transform_indices = @transform_1, window_bounds = array<i64: 8, 2>}, {pipeline_mode = #tpu.pipeline_mode<synchronous>, transform_indices = @transform_2, window_bounds = array<i64: 1, 2>}, {pipeline_mode = #tpu.pipeline_mode<synchronous>, transform_indices = @transform_3, window_bounds = array<i64: 1, 2>}, {transform_indices = @transform_4, window_bounds = array<i64: 512, 2>}]} {
    %c0 = arith.constant 0 : index
    %c0_0 = arith.constant 0 : index
    %0 = vector.load %arg1[%c0, %c0_0] : memref<512x8xf32, #tpu.memory_space<vmem>>, vector<512x8xf32>
    %1 = arith.truncf %0 : vector<512x8xf32> to vector<512x8xbf16>
    %c0_1 = arith.constant 0 : index
    %c0_2 = arith.constant 0 : index
    %2 = vector.load %arg2[%c0_1, %c0_2] : memref<8x2xbf16, #tpu.memory_space<vmem>>, vector<8x2xbf16>
    %cst = arith.constant dense<0.000000e+00> : vector<512x2xf32>
    %3 = tpu.matmul %1, %2, %cst {dimension_numbers = #tpu.dot_dimension_numbers<[1], [0], [0], [1], [0, 0, 1, 1], [], []>} : vector<512x8xbf16>, vector<8x2xbf16>, vector<512x2xf32> -> vector<512x2xf32>
    %c0_3 = arith.constant 0 : index
    %c0_4 = arith.constant 0 : index
    %4 = vector.load %arg3[%c0_3, %c0_4] : memref<1x2xf32, #tpu.memory_space<vmem>>, vector<1x2xf32>
    %5 = vector.broadcast %4 : vector<1x2xf32> to vector<512x2xf32>
    %6 = arith.mulf %3, %5 : vector<512x2xf32>
    %c0_5 = arith.constant 0 : index
    %c0_6 = arith.constant 0 : index
    %7 = vector.load %arg4[%c0_5, %c0_6] : memref<1x2xf32, #tpu.memory_space<vmem>>, vector<1x2xf32>
    %8 = vector.broadcast %7 : vector<1x2xf32> to vector<512x2xf32>
    %9 = arith.addf %6, %8 : vector<512x2xf32>
    %c0_7 = arith.constant 0 : index
    %c0_8 = arith.constant 0 : index
    %10 = vector.load %arg5[%c0_7, %c0_8] : memref<512x2xf32, #tpu.memory_space<vmem>>, vector<512x2xf32>
    tpu.vector_store %arg5[%c0_7, %c0_8], %9 {strides = array<i32>} : memref<512x2xf32, #tpu.memory_space<vmem>>, vector<512x2xf32>,
    return
  }
  func.func @transform_0(%arg0: i32) -> (i32, i32) {
    %c0_i32 = arith.constant 0 : i32
    %c0_i32_0 = arith.constant 0 : i32
    return %arg0, %c0_i32 : i32, i32
  }
  func.func @transform_1(%arg0: i32) -> (i32, i32) {
    %c0_i32 = arith.constant 0 : i32
    %c0_i32_0 = arith.constant 0 : i32
    %c0_i32_1 = arith.constant 0 : i32
    return %c0_i32, %c0_i32_0 : i32, i32
  }
  func.func @transform_2(%arg0: i32) -> (i32, i32) {
    %c0_i32 = arith.constant 0 : i32
    %c0_i32_0 = arith.constant 0 : i32
    %c0_i32_1 = arith.constant 0 : i32
    return %c0_i32, %c0_i32_0 : i32, i32
  }
  func.func @transform_3(%arg0: i32) -> (i32, i32) {
    %c0_i32 = arith.constant 0 : i32
    %c0_i32_0 = arith.constant 0 : i32
    %c0_i32_1 = arith.constant 0 : i32
    return %c0_i32, %c0_i32_0 : i32, i32
  }
  func.func @transform_4(%arg0: i32) -> (i32, i32) {
    %c0_i32 = arith.constant 0 : i32
    %c0_i32_0 = arith.constant 0 : i32
    return %arg0, %c0_i32 : i32, i32
  }
}

module attributes {stable_mosaic.version = 11 : i64} {
  func.func @_pointwise_kernel(%arg0: i32, %arg1: memref<512x8xbf16, #tpu.memory_space<vmem>>, %arg2: memref<8x16xbf16, #tpu.memory_space<vmem>>, %arg3: memref<1x16xf32, #tpu.memory_space<vmem>>, %arg4: memref<1x16xf32, #tpu.memory_space<vmem>>, %arg5: memref<512x16xf32, #tpu.memory_space<vmem>>) attributes {dimension_semantics = [#tpu.dimension_semantics<parallel>], iteration_bounds = array<i64: 1>, scalar_prefetch = 0 : i64, scratch_operands = 0 : i64, tpu.core_type = #tpu.core_type<tc>, window_params = [{transform_indices = @transform_0, window_bounds = array<i64: 512, 8>}, {pipeline_mode = #tpu.pipeline_mode<synchronous>, transform_indices = @transform_1, window_bounds = array<i64: 8, 16>}, {pipeline_mode = #tpu.pipeline_mode<synchronous>, transform_indices = @transform_2, window_bounds = array<i64: 1, 16>}, {pipeline_mode = #tpu.pipeline_mode<synchronous>, transform_indices = @transform_3, window_bounds = array<i64: 1, 16>}, {transform_indices = @transform_4, window_bounds = array<i64: 512, 16>}]} {
    %c0 = arith.constant 0 : index
    %c0_0 = arith.constant 0 : index
    %0 = vector.load %arg1[%c0, %c0_0] : memref<512x8xbf16, #tpu.memory_space<vmem>>, vector<512x8xbf16>
    %c0_1 = arith.constant 0 : index
    %c0_2 = arith.constant 0 : index
    %1 = vector.load %arg2[%c0_1, %c0_2] : memref<8x16xbf16, #tpu.memory_space<vmem>>, vector<8x16xbf16>
    %cst = arith.constant dense<0.000000e+00> : vector<512x16xf32>
    %2 = tpu.matmul %0, %1, %cst {dimension_numbers = #tpu.dot_dimension_numbers<[1], [0], [0], [1], [0, 0, 1, 1], [], []>} : vector<512x8xbf16>, vector<8x16xbf16>, vector<512x16xf32> -> vector<512x16xf32>
    %c0_3 = arith.constant 0 : index
    %c0_4 = arith.constant 0 : index
    %3 = vector.load %arg3[%c0_3, %c0_4] : memref<1x16xf32, #tpu.memory_space<vmem>>, vector<1x16xf32>
    %4 = vector.broadcast %3 : vector<1x16xf32> to vector<512x16xf32>
    %5 = arith.mulf %2, %4 : vector<512x16xf32>
    %c0_5 = arith.constant 0 : index
    %c0_6 = arith.constant 0 : index
    %6 = vector.load %arg4[%c0_5, %c0_6] : memref<1x16xf32, #tpu.memory_space<vmem>>, vector<1x16xf32>
    %7 = vector.broadcast %6 : vector<1x16xf32> to vector<512x16xf32>
    %8 = arith.addf %5, %7 : vector<512x16xf32>
    %9 = arith.negf %8 : vector<512x16xf32>
    %10 = math.exp %9 : vector<512x16xf32>
    %cst_7 = arith.constant 1.000000e+00 : f32
    %11 = vector.broadcast %cst_7 : f32 to vector<512x16xf32>
    %12 = arith.addf %11, %10 : vector<512x16xf32>
    %13 = arith.divf %11, %12 : vector<512x16xf32>
    %14 = arith.mulf %8, %13 : vector<512x16xf32>
    %c0_8 = arith.constant 0 : index
    %c0_9 = arith.constant 0 : index
    %15 = vector.load %arg5[%c0_8, %c0_9] : memref<512x16xf32, #tpu.memory_space<vmem>>, vector<512x16xf32>
    tpu.vector_store %arg5[%c0_8, %c0_9], %14 {strides = array<i32>} : memref<512x16xf32, #tpu.memory_space<vmem>>, vector<512x16xf32>,
    return
  }
  func.func @transform_0(%arg0: i32) -> (i32, i32) {
    %c0_i32 = arith.constant 0 : i32
    %c0_i32_0 = arith.constant 0 : i32
    return %arg0, %c0_i32 : i32, i32
  }
  func.func @transform_1(%arg0: i32) -> (i32, i32) {
    %c0_i32 = arith.constant 0 : i32
    %c0_i32_0 = arith.constant 0 : i32
    %c0_i32_1 = arith.constant 0 : i32
    return %c0_i32, %c0_i32_0 : i32, i32
  }
  func.func @transform_2(%arg0: i32) -> (i32, i32) {
    %c0_i32 = arith.constant 0 : i32
    %c0_i32_0 = arith.constant 0 : i32
    %c0_i32_1 = arith.constant 0 : i32
    return %c0_i32, %c0_i32_0 : i32, i32
  }
  func.func @transform_3(%arg0: i32) -> (i32, i32) {
    %c0_i32 = arith.constant 0 : i32
    %c0_i32_0 = arith.constant 0 : i32
    %c0_i32_1 = arith.constant 0 : i32
    return %c0_i32, %c0_i32_0 : i32, i32
  }
  func.func @transform_4(%arg0: i32) -> (i32, i32) {
    %c0_i32 = arith.constant 0 : i32
    %c0_i32_0 = arith.constant 0 : i32
    return %arg0, %c0_i32 : i32, i32
  }
}

module attributes {stable_mosaic.version = 11 : i64} {
  func.func @_routing_kernel(%arg0: i32, %arg1: memref<2x4x8xf32, #tpu.memory_space<vmem>>, %arg2: memref<2x4x8xf32, #tpu.memory_space<vmem>>, %arg3: memref<2x4x4xf32, #tpu.memory_space<vmem>>) attributes {dimension_semantics = [#tpu.dimension_semantics<arbitrary>], iteration_bounds = array<i64: 1>, scalar_prefetch = 0 : i64, scratch_operands = 0 : i64, tpu.core_type = #tpu.core_type<tc>, window_params = [{pipeline_mode = #tpu.pipeline_mode<synchronous>, transform_indices = @transform_0, window_bounds = array<i64: 2, 4, 8>}, {pipeline_mode = #tpu.pipeline_mode<synchronous>, transform_indices = @transform_1, window_bounds = array<i64: 2, 4, 8>}, {pipeline_mode = #tpu.pipeline_mode<synchronous>, transform_indices = @transform_2, window_bounds = array<i64: 2, 4, 4>}]} {
    %c0 = arith.constant 0 : index
    %c0_0 = arith.constant 0 : index
    %c0_1 = arith.constant 0 : index
    %0 = vector.load %arg1[%c0, %c0_0, %c0_1] : memref<2x4x8xf32, #tpu.memory_space<vmem>>, vector<2x4x8xf32>
    %cst = arith.constant 0.353553385 : f32
    %1 = vector.broadcast %cst : f32 to vector<2x4x8xf32>
    %2 = arith.mulf %0, %1 : vector<2x4x8xf32>
    %3 = arith.truncf %2 : vector<2x4x8xf32> to vector<2x4x8xbf16>
    %c0_2 = arith.constant 0 : index
    %c0_3 = arith.constant 0 : index
    %c0_4 = arith.constant 0 : index
    %4 = vector.load %arg2[%c0_2, %c0_3, %c0_4] : memref<2x4x8xf32, #tpu.memory_space<vmem>>, vector<2x4x8xf32>
    %5 = arith.truncf %4 : vector<2x4x8xf32> to vector<2x4x8xbf16>
    "tpu.trace_start"() <{level = 10 : i32, message = "npc,nqc->npq"}> : () -> ()
    %cst_5 = arith.constant dense<0.000000e+00> : vector<2x4x4xf32>
    %6 = tpu.matmul %3, %5, %cst_5 {dimension_numbers = #tpu.dot_dimension_numbers<[2], [2], [1], [1], [0, 0, 0, 1, 1, 1], [0], [0]>} : vector<2x4x8xbf16>, vector<2x4x8xbf16>, vector<2x4x4xf32> -> vector<2x4x4xf32>
    "tpu.trace_stop"() : () -> ()
    %c0_6 = arith.constant 0 : index
    %c0_7 = arith.constant 0 : index
    %c0_8 = arith.constant 0 : index
    %7 = vector.load %arg3[%c0_6, %c0_7, %c0_8] : memref<2x4x4xf32, #tpu.memory_space<vmem>>, vector<2x4x4xf32>
    tpu.vector_store %arg3[%c0_6, %c0_7, %c0_8], %6 {strides = array<i32>} : memref<2x4x4xf32, #tpu.memory_space<vmem>>, vector<2x4x4xf32>,
    return
  }
  func.func @transform_0(%arg0: i32) -> (i32, i32, i32) {
    %c0_i32 = arith.constant 0 : i32
    %c0_i32_0 = arith.constant 0 : i32
    %c0_i32_1 = arith.constant 0 : i32
    %c0_i32_2 = arith.constant 0 : i32
    return %c0_i32, %c0_i32_0, %c0_i32_1 : i32, i32, i32
  }
  func.func @transform_1(%arg0: i32) -> (i32, i32, i32) {
    %c0_i32 = arith.constant 0 : i32
    %c0_i32_0 = arith.constant 0 : i32
    %c0_i32_1 = arith.constant 0 : i32
    %c0_i32_2 = arith.constant 0 : i32
    return %c0_i32, %c0_i32_0, %c0_i32_1 : i32, i32, i32
  }
  func.func @transform_2(%arg0: i32) -> (i32, i32, i32) {
    %c0_i32 = arith.constant 0 : i32
    %c0_i32_0 = arith.constant 0 : i32
    %c0_i32_1 = arith.constant 0 : i32
    %c0_i32_2 = arith.constant 0 : i32
    return %c0_i32, %c0_i32_0, %c0_i32_1 : i32, i32, i32
  }
}

module attributes {stable_mosaic.version = 11 : i64} {
  func.func @_window_attn_kernel(%arg0: i32, %arg1: memref<8x2x64x4xf32, #tpu.memory_space<vmem>>, %arg2: memref<8x2x8x4xf32, #tpu.memory_space<vmem>>, %arg3: memref<8x2x8x4xf32, #tpu.memory_space<vmem>>, %arg4: memref<8x64x8xf32, #tpu.memory_space<vmem>>) attributes {dimension_semantics = [#tpu.dimension_semantics<parallel>], iteration_bounds = array<i64: 1>, scalar_prefetch = 0 : i64, scratch_operands = 0 : i64, tpu.core_type = #tpu.core_type<tc>, window_params = [{transform_indices = @transform_0, window_bounds = array<i64: 8, 2, 64, 4>}, {transform_indices = @transform_1, window_bounds = array<i64: 8, 2, 8, 4>}, {transform_indices = @transform_2, window_bounds = array<i64: 8, 2, 8, 4>}, {transform_indices = @transform_3, window_bounds = array<i64: 8, 64, 8>}]} {
    %c0 = arith.constant 0 : index
    %c0_0 = arith.constant 0 : index
    %c0_1 = arith.constant 0 : index
    %c0_2 = arith.constant 0 : index
    %0 = vector.load %arg1[%c0, %c0_0, %c0_1, %c0_2] : memref<8x2x64x4xf32, #tpu.memory_space<vmem>>, vector<8x2x64x4xf32>
    %c0_3 = arith.constant 0 : index
    %c0_4 = arith.constant 0 : index
    %c0_5 = arith.constant 0 : index
    %c0_6 = arith.constant 0 : index
    %1 = vector.load %arg2[%c0_3, %c0_4, %c0_5, %c0_6] : memref<8x2x8x4xf32, #tpu.memory_space<vmem>>, vector<8x2x8x4xf32>
    %c0_7 = arith.constant 0 : index
    %c0_8 = arith.constant 0 : index
    %c0_9 = arith.constant 0 : index
    %c0_10 = arith.constant 0 : index
    %2 = vector.load %arg3[%c0_7, %c0_8, %c0_9, %c0_10] : memref<8x2x8x4xf32, #tpu.memory_space<vmem>>, vector<8x2x8x4xf32>
    %3 = vector.extract_strided_slice %0 {offsets = [0, 0, 0, 0], sizes = [8, 1, 64, 4], strides = [1, 1, 1, 1]} : vector<8x2x64x4xf32> to vector<8x1x64x4xf32>
    %4 = vector.shape_cast %3 : vector<8x1x64x4xf32> to vector<8x64x4xf32>
    %cst = arith.constant 0.353553385 : f32
    %5 = vector.broadcast %cst : f32 to vector<8x64x4xf32>
    %6 = arith.mulf %4, %5 : vector<8x64x4xf32>
    %7 = arith.truncf %6 : vector<8x64x4xf32> to vector<8x64x4xbf16>
    %8 = vector.extract_strided_slice %1 {offsets = [0, 0, 0, 0], sizes = [8, 1, 8, 4], strides = [1, 1, 1, 1]} : vector<8x2x8x4xf32> to vector<8x1x8x4xf32>
    %9 = vector.shape_cast %8 : vector<8x1x8x4xf32> to vector<8x8x4xf32>
    %10 = arith.truncf %9 : vector<8x8x4xf32> to vector<8x8x4xbf16>
    %11 = vector.extract_strided_slice %2 {offsets = [0, 0, 0, 0], sizes = [8, 1, 8, 4], strides = [1, 1, 1, 1]} : vector<8x2x8x4xf32> to vector<8x1x8x4xf32>
    %12 = vector.shape_cast %11 : vector<8x1x8x4xf32> to vector<8x8x4xf32>
    %13 = arith.truncf %12 : vector<8x8x4xf32> to vector<8x8x4xbf16>
    "tpu.trace_start"() <{level = 10 : i32, message = "bqc,blc->bql"}> : () -> ()
    %cst_11 = arith.constant dense<0.000000e+00> : vector<8x64x8xf32>
    %14 = tpu.matmul %7, %10, %cst_11 {dimension_numbers = #tpu.dot_dimension_numbers<[2], [2], [1], [1], [0, 0, 0, 1, 1, 1], [0], [0]>} : vector<8x64x4xbf16>, vector<8x8x4xbf16>, vector<8x64x8xf32> -> vector<8x64x8xf32>
    "tpu.trace_stop"() : () -> ()
    %cst_12 = arith.constant dense<0xFF800000> : vector<8x64xf32>
    %15 = vector.multi_reduction <maximumf>, %14, %cst_12 [2] : vector<8x64x8xf32> to vector<8x64xf32>
    %16 = vector.shape_cast %15 : vector<8x64xf32> to vector<8x64x1xf32>
    %17 = vector.broadcast %16 : vector<8x64x1xf32> to vector<8x64x8xf32>
    %18 = arith.subf %14, %17 : vector<8x64x8xf32>
    %19 = math.exp %18 : vector<8x64x8xf32>
    %cst_13 = arith.constant dense<0.000000e+00> : vector<8x64xf32>
    %20 = vector.multi_reduction <add>, %19, %cst_13 [2] : vector<8x64x8xf32> to vector<8x64xf32>
    %21 = vector.shape_cast %20 : vector<8x64xf32> to vector<8x64x1xf32>
    %22 = tpu.reciprocal %21 {approx = true} : vector<8x64x1xf32> -> vector<8x64x1xf32>
    %23 = vector.broadcast %22 : vector<8x64x1xf32> to vector<8x64x8xf32>
    %24 = arith.mulf %19, %23 : vector<8x64x8xf32>
    %25 = arith.truncf %24 : vector<8x64x8xf32> to vector<8x64x8xbf16>
    "tpu.trace_start"() <{level = 10 : i32, message = "bql,blc->bqc"}> : () -> ()
    %cst_14 = arith.constant dense<0.000000e+00> : vector<8x64x4xf32>
    %26 = tpu.matmul %25, %13, %cst_14 {dimension_numbers = #tpu.dot_dimension_numbers<[2], [1], [1], [2], [0, 0, 0, 1, 1, 2], [0], [0]>} : vector<8x64x8xbf16>, vector<8x8x4xbf16>, vector<8x64x4xf32> -> vector<8x64x4xf32>
    "tpu.trace_stop"() : () -> ()
    %27 = vector.extract_strided_slice %0 {offsets = [0, 1, 0, 0], sizes = [8, 1, 64, 4], strides = [1, 1, 1, 1]} : vector<8x2x64x4xf32> to vector<8x1x64x4xf32>
    %28 = vector.shape_cast %27 : vector<8x1x64x4xf32> to vector<8x64x4xf32>
    %cst_15 = arith.constant 0.353553385 : f32
    %29 = vector.broadcast %cst_15 : f32 to vector<8x64x4xf32>
    %30 = arith.mulf %28, %29 : vector<8x64x4xf32>
    %31 = arith.truncf %30 : vector<8x64x4xf32> to vector<8x64x4xbf16>
    %32 = vector.extract_strided_slice %1 {offsets = [0, 1, 0, 0], sizes = [8, 1, 8, 4], strides = [1, 1, 1, 1]} : vector<8x2x8x4xf32> to vector<8x1x8x4xf32>
    %33 = vector.shape_cast %32 : vector<8x1x8x4xf32> to vector<8x8x4xf32>
    %34 = arith.truncf %33 : vector<8x8x4xf32> to vector<8x8x4xbf16>
    %35 = vector.extract_strided_slice %2 {offsets = [0, 1, 0, 0], sizes = [8, 1, 8, 4], strides = [1, 1, 1, 1]} : vector<8x2x8x4xf32> to vector<8x1x8x4xf32>
    %36 = vector.shape_cast %35 : vector<8x1x8x4xf32> to vector<8x8x4xf32>
    %37 = arith.truncf %36 : vector<8x8x4xf32> to vector<8x8x4xbf16>
    "tpu.trace_start"() <{level = 10 : i32, message = "bqc,blc->bql"}> : () -> ()
    %cst_16 = arith.constant dense<0.000000e+00> : vector<8x64x8xf32>
    %38 = tpu.matmul %31, %34, %cst_16 {dimension_numbers = #tpu.dot_dimension_numbers<[2], [2], [1], [1], [0, 0, 0, 1, 1, 1], [0], [0]>} : vector<8x64x4xbf16>, vector<8x8x4xbf16>, vector<8x64x8xf32> -> vector<8x64x8xf32>
    "tpu.trace_stop"() : () -> ()
    %cst_17 = arith.constant dense<0xFF800000> : vector<8x64xf32>
    %39 = vector.multi_reduction <maximumf>, %38, %cst_17 [2] : vector<8x64x8xf32> to vector<8x64xf32>
    %40 = vector.shape_cast %39 : vector<8x64xf32> to vector<8x64x1xf32>
    %41 = vector.broadcast %40 : vector<8x64x1xf32> to vector<8x64x8xf32>
    %42 = arith.subf %38, %41 : vector<8x64x8xf32>
    %43 = math.exp %42 : vector<8x64x8xf32>
    %cst_18 = arith.constant dense<0.000000e+00> : vector<8x64xf32>
    %44 = vector.multi_reduction <add>, %43, %cst_18 [2] : vector<8x64x8xf32> to vector<8x64xf32>
    %45 = vector.shape_cast %44 : vector<8x64xf32> to vector<8x64x1xf32>
    %46 = tpu.reciprocal %45 {approx = true} : vector<8x64x1xf32> -> vector<8x64x1xf32>
    %47 = vector.broadcast %46 : vector<8x64x1xf32> to vector<8x64x8xf32>
    %48 = arith.mulf %43, %47 : vector<8x64x8xf32>
    %49 = arith.truncf %48 : vector<8x64x8xf32> to vector<8x64x8xbf16>
    "tpu.trace_start"() <{level = 10 : i32, message = "bql,blc->bqc"}> : () -> ()
    %cst_19 = arith.constant dense<0.000000e+00> : vector<8x64x4xf32>
    %50 = tpu.matmul %49, %37, %cst_19 {dimension_numbers = #tpu.dot_dimension_numbers<[2], [1], [1], [2], [0, 0, 0, 1, 1, 2], [0], [0]>} : vector<8x64x8xbf16>, vector<8x8x4xbf16>, vector<8x64x4xf32> -> vector<8x64x4xf32>
    "tpu.trace_stop"() : () -> ()
    %51 = tpu.concatenate %26, %50 in 2 : vector<8x64x4xf32>, vector<8x64x4xf32> -> vector<8x64x8xf32>
    %c0_20 = arith.constant 0 : index
    %c0_21 = arith.constant 0 : index
    %c0_22 = arith.constant 0 : index
    %52 = vector.load %arg4[%c0_20, %c0_21, %c0_22] : memref<8x64x8xf32, #tpu.memory_space<vmem>>, vector<8x64x8xf32>
    tpu.vector_store %arg4[%c0_20, %c0_21, %c0_22], %51 {strides = array<i32>} : memref<8x64x8xf32, #tpu.memory_space<vmem>>, vector<8x64x8xf32>,
    return
  }
  func.func @transform_0(%arg0: i32) -> (i32, i32, i32, i32) {
    %c0_i32 = arith.constant 0 : i32
    %c0_i32_0 = arith.constant 0 : i32
    %c0_i32_1 = arith.constant 0 : i32
    %c0_i32_2 = arith.constant 0 : i32
    return %arg0, %c0_i32, %c0_i32_0, %c0_i32_1 : i32, i32, i32, i32
  }
  func.func @transform_1(%arg0: i32) -> (i32, i32, i32, i32) {
    %c0_i32 = arith.constant 0 : i32
    %c0_i32_0 = arith.constant 0 : i32
    %c0_i32_1 = arith.constant 0 : i32
    %c0_i32_2 = arith.constant 0 : i32
    return %arg0, %c0_i32, %c0_i32_0, %c0_i32_1 : i32, i32, i32, i32
  }
  func.func @transform_2(%arg0: i32) -> (i32, i32, i32, i32) {
    %c0_i32 = arith.constant 0 : i32
    %c0_i32_0 = arith.constant 0 : i32
    %c0_i32_1 = arith.constant 0 : i32
    %c0_i32_2 = arith.constant 0 : i32
    return %arg0, %c0_i32, %c0_i32_0, %c0_i32_1 : i32, i32, i32, i32
  }
  func.func @transform_3(%arg0: i32) -> (i32, i32, i32) {
    %c0_i32 = arith.constant 0 : i32
    %c0_i32_0 = arith.constant 0 : i32
    %c0_i32_1 = arith.constant 0 : i32
    return %arg0, %c0_i32, %c0_i32_0 : i32, i32, i32
  }
}

</mosaic_0001>

<bundles_post_ra>
// kernel: bilevel_routing_deformable_attention.7
= control target key start
LH: loop header
LB: loop body
LE: loop exit
PB: predicated region body
PF: predicated region fallthrough
CT: control target
= control target key end

     0   :  { %vm212_vm0 = vcmask 1043456   ;;  %vm115_vm1 = vcmask 64512   ;;  %s2540_s1 = inlined_call_operand.vmem [shape: bf16[8,8], index: 1, kind: input, shape index: {}]   ;;  %s2541_s0 = inlined_call_operand.vmem [shape: f32[512,8], index: 0, kind: input, shape index: {}]   ;;  %s2542_s2 = inlined_call_operand.vmem [shape: f32[1,8], index: 2, kind: input, shape index: {}]   ;;  %s2543_s3 = inlined_call_operand.vmem [shape: f32[1,8], index: 3, kind: input, shape index: {}]   ;;  %s2544_s4 = inlined_call_operand.vmem [shape: f32[512,8], index: 4, kind: output, shape index: {}]  }
   0x1   :  { %v114_v0 = vld [vmem:[%s2540_s1] sm:$0xf]  ;;  %v19_v2 = vld [vmem:[%s2541_s0 + $0x8] sm:$0xff]  ;;  %v20_v7 = vld [vmem:[%s2541_s0 + $0x10] sm:$0xff] }
   0x2   :  { %v18_v1 = vld [vmem:[%s2541_s0] sm:$0xff]  ;;  %1362 = vmatprep.subr.msk.bf16.mxu0 %vm212_vm0, %v114_v0  ;;  %1363 = vmatprep.subr.msk.bf16.mxu1 %vm212_vm0, %v114_v0  ;;  %v214_v3 = vsel %vm212_vm0, %v114_v0, 0  ;;  %v51_v6 = vld [vmem:[%s2541_s0 + $0x108] sm:$0xff]  ;;  %v21_v9 = vld [vmem:[%s2541_s0 + $0x18] sm:$0xff] }
   0x3   :  { %v82_v4 = vpack.c.bf16 %v19_v2, %v18_v1  ;;  %v50_v5 = vld [vmem:[%s2541_s0 + $0x100] sm:$0xff]  ;;  %1295 = vmatpush3.bf16.msra.mxu0 %v214_v3  ;;  %1361 = vmatpush3.bf16.msra.mxu1 %v214_v3  ;;  %v52_v10 = vld [vmem:[%s2541_s0 + $0x110] sm:$0xff]  ;;  %v53_v11 = vld [vmem:[%s2541_s0 + $0x118] sm:$0xff]  ;;  %v83_v12 = vpack.c.bf16 %v21_v9, %v20_v7 }
   0x4   :  { %v98_v8 = vpack.c.bf16 %v51_v6, %v50_v5  ;;  %v99_v13 = vpack.c.bf16 %v53_v11, %v52_v10  ;;  %v22_v14 = vld [vmem:[%s2541_s0 + $0x20] sm:$0xff]  ;;  %v23_v15 = vld [vmem:[%s2541_s0 + $0x28] sm:$0xff]  ;;  %v24_v20 = vld [vmem:[%s2541_s0 + $0x30] sm:$0xff] }
   0x5   :  { %1296 = vmatprep.mubr.msk.bf16.mxu0 %vm115_vm1, %v82_v4  ;;  %v54_v16 = vld [vmem:[%s2541_s0 + $0x120] sm:$0xff]  ;;  %v84_v17 = vpack.c.bf16 %v23_v15, %v22_v14  ;;  %v55_v18 = vld [vmem:[%s2541_s0 + $0x128] sm:$0xff]  ;;  %v25_v21 = vld [vmem:[%s2541_s0 + $0x38] sm:$0xff] }
   0x6   :  { %1328 = vmatprep.mubr.msk.bf16.mxu1 %vm115_vm1, %v98_v8  ;;  %1297 = vmatmul.mubr.msk.bf16.vlgmr.msra.gmra.mxu0 %vm115_vm1, %v83_v12  ;;  %v100_v19 = vpack.c.bf16 %v55_v18, %v54_v16  ;;  %v56_v22 = vld [vmem:[%s2541_s0 + $0x130] sm:$0xff]  ;;  %v57_v23 = vld [vmem:[%s2541_s0 + $0x138] sm:$0xff]  ;;  %v26_v24 = vld [vmem:[%s2541_s0 + $0x40] sm:$0xff]  ;;  %v85_v28 = vpack.c.bf16 %v25_v21, %v24_v20 }
   0x7   :  { %1329 = vmatmul.mubr.msk.bf16.vlgmr.msra.gmra.mxu1 %vm115_vm1, %v99_v13  ;;  %1300 = vmatprep.mubr.msk.bf16.mxu0 %vm115_vm1, %v84_v17  ;;  %v27_v25 = vld [vmem:[%s2541_s0 + $0x48] sm:$0xff]  ;;  %v58_v26 = vld [vmem:[%s2541_s0 + $0x140] sm:$0xff]  ;;  %v101_v29 = vpack.c.bf16 %v57_v23, %v56_v22  ;;  %v28_v32 = vld [vmem:[%s2541_s0 + $0x50] sm:$0xff] }
   0x8   :  { %1332 = vmatprep.mubr.msk.bf16.mxu1 %vm115_vm1, %v100_v19  ;;  %v59_v27 = vld [vmem:[%s2541_s0 + $0x148] sm:$0xff]  ;;  %v86_v30 = vpack.c.bf16 %v27_v25, %v26_v24  ;;  %v29_v33 = vld [vmem:[%s2541_s0 + $0x58] sm:$0xff]  ;;  %v60_v34 = vld [vmem:[%s2541_s0 + $0x150] sm:$0xff] }
   0x9   :  { %v102_v31 = vpack.c.bf16 %v59_v27, %v58_v26  ;;  %v61_v35 = vld [vmem:[%s2541_s0 + $0x158] sm:$0xff]  ;;  %v30_v36 = vld [vmem:[%s2541_s0 + $0x60] sm:$0xff]  ;;  %v31_v37 = vld [vmem:[%s2541_s0 + $0x68] sm:$0xff]  ;;  %v87_v40 = vpack.c.bf16 %v29_v33, %v28_v32 }
   0xa   :  { %v62_v38 = vld [vmem:[%s2541_s0 + $0x160] sm:$0xff]  ;;  %v63_v39 = vld [vmem:[%s2541_s0 + $0x168] sm:$0xff]  ;;  %v103_v41 = vpack.c.bf16 %v61_v35, %v60_v34  ;;  %v88_v42 = vpack.c.bf16 %v31_v37, %v30_v36  ;;  %v32_v44 = vld [vmem:[%s2541_s0 + $0x70] sm:$0xff] }
   0xb   :  { %v104_v43 = vpack.c.bf16 %v63_v39, %v62_v38  ;;  %v33_v45 = vld [vmem:[%s2541_s0 + $0x78] sm:$0xff]  ;;  %v64_v46 = vld [vmem:[%s2541_s0 + $0x170] sm:$0xff]  ;;  %v34_v48 = vld [vmem:[%s2541_s0 + $0x80] sm:$0xff] }
   0xc   :  { %v65_v47 = vld [vmem:[%s2541_s0 + $0x178] sm:$0xff]  ;;  %v35_v49 = vld [vmem:[%s2541_s0 + $0x88] sm:$0xff]  ;;  %v66_v50 = vld [vmem:[%s2541_s0 + $0x180] sm:$0xff]  ;;  %v89_v52 = vpack.c.bf16 %v33_v45, %v32_v44 }
   0xd   :  { %v67_v51 = vld [vmem:[%s2541_s0 + $0x188] sm:$0xff]  ;;  %v105_v53 = vpack.c.bf16 %v65_v47, %v64_v46  ;;  %v90_v54 = vpack.c.bf16 %v35_v49, %v34_v48  ;;  %v36_v56 = vld [vmem:[%s2541_s0 + $0x90] sm:$0xff]  ;;  %v37_v57 = vld [vmem:[%s2541_s0 + $0x98] sm:$0xff] }
   0xe   :  { %1301 = vmatmul.mubr.msk.bf16.gmra.mxu0 %vm115_vm1, %v85_v28  ;;  %v106_v55 = vpack.c.bf16 %v67_v51, %v66_v50  ;;  %v68_v58 = vld [vmem:[%s2541_s0 + $0x190] sm:$0xff]  ;;  %v69_v59 = vld [vmem:[%s2541_s0 + $0x198] sm:$0xff]  ;;  %v38_v60 = vld [vmem:[%s2541_s0 + $0xa0] sm:$0xff]  ;;  %v91_v0 = vpack.c.bf16 %v37_v57, %v36_v56 }
   0xf   :  { %1333 = vmatmul.mubr.msk.bf16.gmra.mxu1 %vm115_vm1, %v101_v29  ;;  %1304 = vmatprep.mubr.msk.bf16.mxu0 %vm115_vm1, %v86_v30  ;;  %v39_v61 = vld [vmem:[%s2541_s0 + $0xa8] sm:$0xff]  ;;  %v70_v62 = vld [vmem:[%s2541_s0 + $0x1a0] sm:$0xff]  ;;  %v107_v1 = vpack.c.bf16 %v69_v59, %v68_v58  ;;  %v40_v4 = vld [vmem:[%s2541_s0 + $0xb0] sm:$0xff] }
  0x10   :  { %1336 = vmatprep.mubr.msk.bf16.mxu1 %vm115_vm1, %v102_v31  ;;  %v71_v63 = vld [vmem:[%s2541_s0 + $0x1a8] sm:$0xff]  ;;  %v92_v2 = vpack.c.bf16 %v39_v61, %v38_v60  ;;  %v41_v5 = vld [vmem:[%s2541_s0 + $0xb8] sm:$0xff]  ;;  %v72_v6 = vld [vmem:[%s2541_s0 + $0x1b0] sm:$0xff] }
  0x11   :  { %v108_v3 = vpack.c.bf16 %v71_v63, %v70_v62  ;;  %v73_v7 = vld [vmem:[%s2541_s0 + $0x1b8] sm:$0xff]  ;;  %v42_v8 = vld [vmem:[%s2541_s0 + $0xc0] sm:$0xff]  ;;  %v43_v9 = vld [vmem:[%s2541_s0 + $0xc8] sm:$0xff]  ;;  %v93_v12 = vpack.c.bf16 %v41_v5, %v40_v4 }
  0x12   :  { %v74_v10 = vld [vmem:[%s2541_s0 + $0x1c0] sm:$0xff]  ;;  %v75_v11 = vld [vmem:[%s2541_s0 + $0x1c8] sm:$0xff]  ;;  %v109_v13 = vpack.c.bf16 %v73_v7, %v72_v6  ;;  %v94_v14 = vpack.c.bf16 %v43_v9, %v42_v8  ;;  %v44_v16 = vld [vmem:[%s2541_s0 + $0xd0] sm:$0xff] }
  0x13   :  { %v110_v15 = vpack.c.bf16 %v75_v11, %v74_v10  ;;  %v45_v17 = vld [vmem:[%s2541_s0 + $0xd8] sm:$0xff]  ;;  %v76_v18 = vld [vmem:[%s2541_s0 + $0x1d0] sm:$0xff]  ;;  %v46_v20 = vld [vmem:[%s2541_s0 + $0xe0] sm:$0xff] }
  0x14   :  { %v77_v19 = vld [vmem:[%s2541_s0 + $0x1d8] sm:$0xff]  ;;  %v47_v21 = vld [vmem:[%s2541_s0 + $0xe8] sm:$0xff]  ;;  %v78_v22 = vld [vmem:[%s2541_s0 + $0x1e0] sm:$0xff]  ;;  %v95_v24 = vpack.c.bf16 %v45_v17, %v44_v16 }
  0x15   :  { %v79_v23 = vld [vmem:[%s2541_s0 + $0x1e8] sm:$0xff]  ;;  %v111_v25 = vpack.c.bf16 %v77_v19, %v76_v18  ;;  %v96_v26 = vpack.c.bf16 %v47_v21, %v46_v20  ;;  %v48_v28 = vld [vmem:[%s2541_s0 + $0xf0] sm:$0xff]  ;;  %v49_v29 = vld [vmem:[%s2541_s0 + $0xf8] sm:$0xff] }
  0x16   :  { %1305 = vmatmul.mubr.msk.bf16.gmra.mxu0 %vm115_vm1, %v87_v40  ;;  %v112_v27 = vpack.c.bf16 %v79_v23, %v78_v22  ;;  %v80_v30 = vld [vmem:[%s2541_s0 + $0x1f0] sm:$0xff]  ;;  %v81_v31 = vld [vmem:[%s2541_s0 + $0x1f8] sm:$0xff]  ;;  %v97_v32 = vpack.c.bf16 %v49_v29, %v48_v28  ;;  %v1877_v34 = vld [vmem:[%s2542_s2] ss:$0 sm:$0xff] }
  0x17   :  { %1337 = vmatmul.mubr.msk.bf16.gmra.mxu1 %vm115_vm1, %v103_v41  ;;  %1308 = vmatprep.mubr.msk.bf16.mxu0 %vm115_vm1, %v88_v42  ;;  %v113_v33 = vpack.c.bf16 %v81_v31, %v80_v30  ;;  %v1882_v36 = vld [vmem:[%s2543_s3] ss:$0 sm:$0xff] }
  0x18   :  { %1340 = vmatprep.mubr.msk.bf16.mxu1 %vm115_vm1, %v104_v43 }
  0x1e   :  { %1309 = vmatmul.mubr.msk.bf16.gmra.mxu0 %vm115_vm1, %v89_v52 }
  0x1f   :  { %1341 = vmatmul.mubr.msk.bf16.gmra.mxu1 %vm115_vm1, %v105_v53  ;;  %1312 = vmatprep.mubr.msk.bf16.mxu0 %vm115_vm1, %v90_v54 }
  0x20   :  { %1344 = vmatprep.mubr.msk.bf16.mxu1 %vm115_vm1, %v106_v55 }
  0x26   :  { %1313 = vmatmul.mubr.msk.bf16.gmra.mxu0 %vm115_vm1, %v91_v0 }
  0x27   :  { %1345 = vmatmul.mubr.msk.bf16.gmra.mxu1 %vm115_vm1, %v107_v1  ;;  %1316 = vmatprep.mubr.msk.bf16.mxu0 %vm115_vm1, %v92_v2 }
  0x28   :  { %1348 = vmatprep.mubr.msk.bf16.mxu1 %vm115_vm1, %v108_v3 }
  0x2e   :  { %1317 = vmatmul.mubr.msk.bf16.gmra.mxu0 %vm115_vm1, %v93_v12 }
  0x2f   :  { %1349 = vmatmul.mubr.msk.bf16.gmra.mxu1 %vm115_vm1, %v109_v13  ;;  %1320 = vmatprep.mubr.msk.bf16.mxu0 %vm115_vm1, %v94_v14 }
  0x30   :  { %1352 = vmatprep.mubr.msk.bf16.mxu1 %vm115_vm1, %v110_v15 }
  0x36   :  { %1321 = vmatmul.mubr.msk.bf16.gmra.mxu0 %vm115_vm1, %v95_v24 }
  0x37   :  { %1353 = vmatmul.mubr.msk.bf16.gmra.mxu1 %vm115_vm1, %v111_v25  ;;  %1324 = vmatprep.mubr.msk.bf16.mxu0 %vm115_vm1, %v96_v26 }
  0x38   :  { %1356 = vmatprep.mubr.msk.bf16.mxu1 %vm115_vm1, %v112_v27 }
  0x3e   :  { %1325 = vmatmul.mubr.msk.bf16.gmra.mxu0 %vm115_vm1, %v97_v32 }
  0x3f   :  { %1357 = vmatmul.mubr.msk.bf16.gmra.mxu1 %vm115_vm1, %v113_v33 }
  0xc6   :  { %v1298_v35 = vpop.f32.mrf.mxu0 }
  0xc7   :  { %v1330_v37 = vpop.f32.mrf.mxu1  ;;  %v514_v38 = vmul.f32 %v1298_v35, %v1877_v34 }
  0xc8   :  { %v546_v39 = vmul.f32 %v1330_v37, %v1877_v34  ;;  %v250_v40 = vpop.f32.mrf.mxu0 }
  0xc9   :  { %v378_v41 = vpop.f32.mrf.mxu1  ;;  %v1887_v42 = vadd.f32 %v1882_v36, %v514_v38  ;;  %v512_v44 = vmul.f32 %v1877_v34, %v250_v40 }
  0xca   :  { %v1890_v43 = vadd.f32 %v1882_v36, %v546_v39  ;;  %v544_v45 = vmul.f32 %v1877_v34, %v378_v41  ;;  %v1299_v46 = vpop.f32.mrf.mxu0 }
  0xcb   :  { %v1331_v47 = vpop.f32.mrf.mxu1  ;;  %v1199_v48 = vmul.f32 -1.442695, %v1887_v42  ;;  %v1897_v50 = vadd.f32 %v1882_v36, %v512_v44  ;;  %v515_v52 = vmul.f32 %v1299_v46, %v1877_v34 }
  0xcc   :  { %v1231_v49 = vmul.f32 -1.442695, %v1890_v43  ;;  %v1900_v51 = vadd.f32 %v1882_v36, %v544_v45  ;;  %v547_v53 = vmul.f32 %v1331_v47, %v1877_v34  ;;  %v253_v54 = vpop.f32.mrf.mxu0 }
  0xcd   :  { %v381_v55 = vpop.f32.mrf.mxu1  ;;  %1364 = vpow2.f32 %v1199_v48  ;;  %v1197_v56 = vmul.f32 -1.442695, %v1897_v50  ;;  %v513_v58 = vmul.f32 %v1877_v34, %v253_v54  ;;  %v1908_v59 = vadd.f32 %v1882_v36, %v515_v52 }
  0xce   :  { %v1229_v57 = vmul.f32 -1.442695, %v1900_v51  ;;  %1366 = vpow2.f32 %v1231_v49  ;;  %v1911_v60 = vadd.f32 %v1882_v36, %v547_v53  ;;  %v545_v61 = vmul.f32 %v1877_v34, %v381_v55  ;;  %v1302_v62 = vpop.f32.mrf.mxu0 }
  0xcf   :  { %v1334_v63 = vpop.f32.mrf.mxu1  ;;  %1368 = vpow2.f32 %v1197_v56  ;;  %v1915_v0 = vadd.f32 %v1882_v36, %v513_v58  ;;  %v518_v1 = vmul.f32 %v1302_v62, %v1877_v34  ;;  %v1200_v3 = vmul.f32 -1.442695, %v1908_v59 }
  0xd0   :  { %v550_v2 = vmul.f32 %v1334_v63, %v1877_v34  ;;  %1370 = vpow2.f32 %v1229_v57  ;;  %v1232_v4 = vmul.f32 -1.442695, %v1911_v60  ;;  %v1922_v5 = vadd.f32 %v1882_v36, %v545_v61  ;;  %v266_v6 = vpop.f32.mrf.mxu0 }
  0xd1   :  { %v394_v7 = vpop.f32.mrf.mxu1  ;;  %v1198_v8 = vmul.f32 -1.442695, %v1915_v0  ;;  %v1926_v9 = vadd.f32 %v1882_v36, %v518_v1  ;;  %v516_v11 = vmul.f32 %v1877_v34, %v266_v6  ;;  %1372 = vpow2.f32 %v1200_v3 }
  0xd2   :  { %v1929_v10 = vadd.f32 %v1882_v36, %v550_v2  ;;  %v1230_v12 = vmul.f32 -1.442695, %v1922_v5  ;;  %v548_v13 = vmul.f32 %v1877_v34, %v394_v7  ;;  %v1303_v14 = vpop.f32.mrf.mxu0  ;;  %1374 = vpow2.f32 %v1232_v4 }
  0xd3   :  { %v1335_v15 = vpop.f32.mrf.mxu1  ;;  %v1203_v16 = vmul.f32 -1.442695, %v1926_v9  ;;  %v1937_v18 = vadd.f32 %v1882_v36, %v516_v11  ;;  %1376 = vpow2.f32 %v1198_v8  ;;  %v519_v20 = vmul.f32 %v1303_v14, %v1877_v34 }
  0xd4   :  { %v1235_v17 = vmul.f32 -1.442695, %v1929_v10  ;;  %v1940_v19 = vadd.f32 %v1882_v36, %v548_v13  ;;  %v551_v21 = vmul.f32 %v1335_v15, %v1877_v34  ;;  %v269_v22 = vpop.f32.mrf.mxu0  ;;  %1378 = vpow2.f32 %v1230_v12 }
  0xd5   :  { %v397_v23 = vpop.f32.mrf.mxu1  ;;  %v1201_v24 = vmul.f32 -1.442695, %v1937_v18  ;;  %v517_v25 = vmul.f32 %v1877_v34, %v269_v22  ;;  %1380 = vpow2.f32 %v1203_v16  ;;  %v1949_v28 = vadd.f32 %v1882_v36, %v519_v20 }
  0xd6   :  { %v549_v26 = vmul.f32 %v1877_v34, %v397_v23  ;;  %v1233_v27 = vmul.f32 -1.442695, %v1940_v19  ;;  %v1952_v29 = vadd.f32 %v1882_v36, %v551_v21  ;;  %v1306_v30 = vpop.f32.mrf.mxu0  ;;  %1382 = vpow2.f32 %v1235_v17 }
  0xd7   :  { %v1338_v31 = vpop.f32.mrf.mxu1  ;;  %v1955_v32 = vadd.f32 %v1882_v36, %v517_v25  ;;  %1384 = vpow2.f32 %v1201_v24  ;;  %v1204_v33 = vmul.f32 -1.442695, %v1949_v28  ;;  %v522_v57 = vmul.f32 %v1306_v30, %v1877_v34 }
  0xd8   :  { %v1236_v35 = vmul.f32 -1.442695, %v1952_v29  ;;  %v282_v37 = vpop.f32.mrf.mxu0  ;;  %1386 = vpow2.f32 %v1233_v27  ;;  %v1961_v40 = vadd.f32 %v1882_v36, %v549_v26  ;;  %v554_v61 = vmul.f32 %v1338_v31, %v1877_v34 }
  0xd9   :  { %v410_v38 = vpop.f32.mrf.mxu1  ;;  %v1202_v39 = vmul.f32 -1.442695, %v1955_v32  ;;  %1388 = vpow2.f32 %v1204_v33  ;;  %v520_v1 = vmul.f32 %v1877_v34, %v282_v37  ;;  %v1969_v12 = vadd.f32 %v1882_v36, %v522_v57 }
  0xda   :  { %v1365_v41 = vpop.eup %1364  ;;  %v1307_v44 = vpop.f32.mrf.mxu0  ;;  %1390 = vpow2.f32 %v1236_v35  ;;  %v1234_v54 = vmul.f32 -1.442695, %v1961_v40  ;;  %v552_v6 = vmul.f32 %v1877_v34, %v410_v38  ;;  %v1973_v16 = vadd.f32 %v1882_v36, %v554_v61 }
  0xdb   :  { %v1367_v45 = vpop.eup %1366  ;;  %v841_v46 = vadd.f32 1.0, %v1365_v41  ;;  %1392 = vpow2.f32 %v1202_v39  ;;  %v1339_v49 = vpop.f32.mrf.mxu1  ;;  %v523_v13 = vmul.f32 %v1307_v44, %v1877_v34  ;;  %v1977_v22 = vadd.f32 %v1882_v36, %v520_v1 }
  0xdc   :  { %v1369_v47 = vpop.eup %1368  ;;  %v873_v48 = vadd.f32 1.0, %v1367_v45  ;;  %v285_v55 = vpop.f32.mrf.mxu0  ;;  %v555_v17 = vmul.f32 %v1339_v49, %v1877_v34  ;;  %v1980_v26 = vadd.f32 %v1882_v36, %v552_v6  ;;  %v1207_v35 = vmul.f32 -1.442695, %v1969_v12 }
  0xdd   :  { %v1371_v52 = vpop.eup %1370  ;;  %1394 = vrcp.f32 %v841_v46  ;;  %v839_v53 = vadd.f32 1.0, %v1369_v47  ;;  %v413_v2 = vpop.f32.mrf.mxu1  ;;  %v521_v27 = vmul.f32 %v1877_v34, %v285_v55  ;;  %v1985_v37 = vadd.f32 %v1882_v36, %v523_v13 }
  0xde   :  { %1396 = vrcp.f32 %v873_v48  ;;  %v871_v56 = vadd.f32 1.0, %v1371_v52  ;;  %v1373_v58 = vpop.eup %1372  ;;  %v1310_v7 = vpop.f32.mrf.mxu0  ;;  %v1239_v41 = vmul.f32 -1.442695, %v1973_v16  ;;  %v1989_v44 = vadd.f32 %v1882_v36, %v555_v17 }
  0xdf   :  { %1398 = vrcp.f32 %v839_v53  ;;  %v1375_v62 = vpop.eup %1374  ;;  %v842_v63 = vadd.f32 1.0, %v1373_v58  ;;  %v1342_v23 = vpop.f32.mrf.mxu1  ;;  %v1205_v47 = vmul.f32 -1.442695, %v1977_v22  ;;  %v553_v48 = vmul.f32 %v1877_v34, %v413_v2 }
  0xe0   :  { %1400 = vrcp.f32 %v871_v56  ;;  %v1377_v3 = vpop.eup %1376  ;;  %v874_v4 = vadd.f32 1.0, %v1375_v62  ;;  %v298_v30 = vpop.f32.mrf.mxu0  ;;  %v1995_v55 = vadd.f32 %v1882_v36, %v521_v27  ;;  %v1208_v61 = vmul.f32 -1.442695, %v1985_v37 }
  0xe1   :  { %1402 = vpow2.f32 %v1234_v54  ;;  %v1379_v8 = vpop.eup %1378  ;;  %v840_v11 = vadd.f32 1.0, %v1377_v3  ;;  %v426_v49 = vpop.f32.mrf.mxu1  ;;  %v1237_v54 = vmul.f32 -1.442695, %v1980_v26  ;;  %v526_v62 = vmul.f32 %v1310_v7, %v1877_v34 }
  0xe2   :  { %1404 = vrcp.f32 %v842_v63  ;;  %v1381_v14 = vpop.eup %1380  ;;  %v872_v15 = vadd.f32 1.0, %v1379_v8  ;;  %v1311_v56 = vpop.f32.mrf.mxu0  ;;  %v1240_v2 = vmul.f32 -1.442695, %v1989_v44  ;;  %v558_v3 = vmul.f32 %v1342_v23, %v1877_v34 }
  0xe3   :  { %1406 = vrcp.f32 %v874_v4  ;;  %v1383_v20 = vpop.eup %1382  ;;  %v845_v21 = vadd.f32 1.0, %v1381_v14  ;;  %v2004_v8 = vadd.f32 %v1882_v36, %v553_v48  ;;  %v1343_v13 = vpop.f32.mrf.mxu1  ;;  %v1206_v7 = vmul.f32 -1.442695, %v1995_v55 }
  0xe4   :  { %1408 = vrcp.f32 %v840_v11  ;;  %v1385_v24 = vpop.eup %1384  ;;  %v877_v25 = vadd.f32 1.0, %v1383_v20  ;;  %v524_v11 = vmul.f32 %v1877_v34, %v298_v30  ;;  %v559_v27 = vmul.f32 %v1343_v13, %v1877_v34 }
  0xe5   :  { %1410 = vrcp.f32 %v872_v15  ;;  %v1387_v31 = vpop.eup %1386  ;;  %v843_v33 = vadd.f32 1.0, %v1385_v24  ;;  %v301_v15 = vpop.f32.mrf.mxu0 }
  0xe6   :  { %1412 = vrcp.f32 %v845_v21  ;;  %v1389_v38 = vpop.eup %1388  ;;  %v875_v39 = vadd.f32 1.0, %v1387_v31  ;;  %v2020_v21 = vadd.f32 %v1882_v36, %v526_v62  ;;  %v2037_v31 = vadd.f32 %v1882_v36, %v524_v11 }
  0xe7   :  { %1414 = vrcp.f32 %v877_v25  ;;  %v1391_v45 = vpop.eup %1390  ;;  %v846_v46 = vadd.f32 1.0, %v1389_v38  ;;  %v2028_v25 = vadd.f32 %v1882_v36, %v558_v3 }
  0xe8   :  { %1416 = vrcp.f32 %v843_v33  ;;  %v1393_v52 = vpop.eup %1392  ;;  %v878_v53 = vadd.f32 1.0, %v1391_v45  ;;  %v525_v33 = vmul.f32 %v1877_v34, %v301_v15  ;;  %v1211_v48 = vmul.f32 -1.442695, %v2020_v21 }
  0xe9   :  { %1418 = vrcp.f32 %v875_v39  ;;  %v844_v58 = vadd.f32 1.0, %v1393_v52 }
  0xea   :  { %v1395_v57 = vpop.eup %1394  ;;  %1420 = vrcp.f32 %v846_v46  ;;  %v2045_v46 = vpop.f32.mrf.mxu0 }
  0xeb   :  { %v1397_v63 = vpop.eup %1396  ;;  %v1033_v1 = vmul.f32 %v1395_v57, %v1887_v42  ;;  %1422 = vrcp.f32 %v878_v53  ;;  %v1243_v53 = vmul.f32 -1.442695, %v2028_v25  ;;  %v1209_v57 = vmul.f32 -1.442695, %v2037_v31 }
  0xec   :  { %v1399_v4 = vpop.eup %1398  ;;  %v1065_v6 = vmul.f32 %v1397_v63, %v1890_v43  ;;  %1424 = vrcp.f32 %v844_v58  ;;  %v556_v43 = vmul.f32 %v1877_v34, %v426_v49  ;;  %v2072_v58 = vadd.f32 %v1882_v36, %v525_v33 }
  0xed   :  { %v1401_v14 = vpop.eup %1400  ;;  %1097 = vst.msk [vmem:[%s2544_s4 + $0x10] sm:$0xff] %vm115_vm1, %v1033_v1  ;;  %v1031_v42 = vmul.f32 %v1399_v4, %v1897_v50  ;;  %1426 = vpow2.f32 %v1207_v35  ;;  %v527_v50 = vmul.f32 %v1311_v56, %v1877_v34  ;;  %v429_v35 = vpop.f32.mrf.mxu1 }
  0xee   :  { %v1403_v17 = vpop.eup %1402  ;;  %1129 = vst.msk [vmem:[%s2544_s4 + $0x110] sm:$0xff] %vm115_vm1, %v1065_v6  ;;  %v1063_v20 = vmul.f32 %v1401_v14, %v1900_v51  ;;  %1428 = vpow2.f32 %v1239_v41  ;;  %v1238_v41 = vmul.f32 -1.442695, %v2004_v8  ;;  %v2043_v45 = vadd.f32 %v1882_v36, %v556_v43  ;;  %v314_v1 = vpop.f32.mrf.mxu0 }
  0xef   :  { %v1405_v23 = vpop.eup %1404  ;;  %1095 = vst.msk [vmem:[%s2544_s4] sm:$0xff] %vm115_vm1, %v1031_v42  ;;  %v876_v24 = vadd.f32 1.0, %v1403_v17  ;;  %1430 = vpow2.f32 %v1205_v47  ;;  %v1210_v14 = vmul.f32 -1.442695, %v2072_v58 }
  0xf0   :  { %v1407_v51 = vpop.eup %1406  ;;  %1127 = vst.msk [vmem:[%s2544_s4 + $0x100] sm:$0xff] %vm115_vm1, %v1063_v20  ;;  %v1034_v30 = vmul.f32 %v1405_v23, %v1908_v59  ;;  %1432 = vpow2.f32 %v1237_v54  ;;  %v2063_v54 = vadd.f32 %v1882_v36, %v559_v27  ;;  %v1241_v63 = vmul.f32 -1.442695, %v2043_v45  ;;  %v1315_v15 = vpop.f32.mrf.mxu0 }
  0xf1   :  { %v1409_v38 = vpop.eup %1408  ;;  %v1066_v39 = vmul.f32 %v1407_v51, %v1911_v60  ;;  %1434 = vrcp.f32 %v876_v24  ;;  %v2054_v60 = vadd.f32 %v1882_v36, %v527_v50 }
  0xf2   :  { %v1411_v47 = vpop.eup %1410  ;;  %1098 = vst.msk [vmem:[%s2544_s4 + $0x18] sm:$0xff] %vm115_vm1, %v1034_v30  ;;  %v1032_v59 = vmul.f32 %v1409_v38, %v1915_v0  ;;  %1436 = vpow2.f32 %v1208_v61  ;;  %v1244_v11 = vmul.f32 -1.442695, %v2063_v54  ;;  %v317_v30 = vpop.f32.mrf.mxu0  ;;  %v530_v38 = vmul.f32 %v2045_v46, %v1877_v34 }
  0xf3   :  { %v1413_v49 = vpop.eup %1412  ;;  %1130 = vst.msk [vmem:[%s2544_s4 + $0x118] sm:$0xff] %vm115_vm1, %v1066_v39  ;;  %v1064_v52 = vmul.f32 %v1411_v47, %v1922_v5  ;;  %1438 = vpow2.f32 %v1240_v2  ;;  %v1346_v5 = vpop.f32.mrf.mxu1  ;;  %v1212_v4 = vmul.f32 -1.442695, %v2054_v60 }
  0xf4   :  { %v1415_v0 = vpop.eup %1414  ;;  %1096 = vst.msk [vmem:[%s2544_s4 + $0x8] sm:$0xff] %vm115_vm1, %v1032_v59  ;;  %v1037_v56 = vmul.f32 %v1413_v49, %v1926_v9  ;;  %1440 = vpow2.f32 %v1206_v7  ;;  %v557_v9 = vmul.f32 %v1877_v34, %v429_v35  ;;  %v562_v47 = vmul.f32 %v1346_v5, %v1877_v34 }
  0xf5   :  { %v1417_v61 = vpop.eup %1416  ;;  %1128 = vst.msk [vmem:[%s2544_s4 + $0x108] sm:$0xff] %vm115_vm1, %v1064_v52  ;;  %v1069_v62 = vmul.f32 %v1415_v0, %v1929_v10  ;;  %1442 = vpow2.f32 %v1238_v41  ;;  %v442_v42 = vpop.f32.mrf.mxu1  ;;  %v528_v49 = vmul.f32 %v1877_v34, %v314_v1  ;;  %v2132_v5 = vadd.f32 %v1882_v36, %v530_v38 }
  0xf6   :  { %v1419_v2 = vpop.eup %1418  ;;  %1101 = vst.msk [vmem:[%s2544_s4 + $0x30] sm:$0xff] %vm115_vm1, %v1037_v56  ;;  %v1035_v3 = vmul.f32 %v1417_v61, %v1937_v18  ;;  %1444 = vpow2.f32 %v1211_v48  ;;  %v2105_v43 = vadd.f32 %v1882_v36, %v557_v9  ;;  %v560_v46 = vmul.f32 %v1877_v34, %v442_v42 }
  0xf7   :  { %v1421_v6 = vpop.eup %1420  ;;  %1133 = vst.msk [vmem:[%s2544_s4 + $0x130] sm:$0xff] %vm115_vm1, %v1069_v62  ;;  %v1067_v10 = vmul.f32 %v1419_v2, %v1940_v19  ;;  %1446 = vpow2.f32 %v1243_v53  ;;  %v1347_v24 = vpop.f32.mrf.mxu1  ;;  %v531_v61 = vmul.f32 %v1315_v15, %v1877_v34  ;;  %v2136_v9 = vadd.f32 %v1882_v36, %v562_v47 }
  0xf8   :  { %v1423_v13 = vpop.eup %1422  ;;  %1099 = vst.msk [vmem:[%s2544_s4 + $0x20] sm:$0xff] %vm115_vm1, %v1035_v3  ;;  %v1038_v18 = vmul.f32 %v1421_v6, %v1949_v28  ;;  %1448 = vpow2.f32 %v1209_v57  ;;  %v1242_v51 = vmul.f32 -1.442695, %v2105_v43  ;;  %v563_v1 = vmul.f32 %v1347_v24, %v1877_v34 }
  0xf9   :  { %v1425_v7 = vpop.eup %1424  ;;  %1131 = vst.msk [vmem:[%s2544_s4 + $0x120] sm:$0xff] %vm115_vm1, %v1067_v10  ;;  %v1070_v19 = vmul.f32 %v1423_v13, %v1952_v29  ;;  %1450 = vpow2.f32 %v1241_v63  ;;  %v445_v52 = vpop.f32.mrf.mxu1  ;;  %v2143_v13 = vadd.f32 %v1882_v36, %v560_v46  ;;  %v2148_v15 = vadd.f32 %v1882_v36, %v531_v61 }
  0xfa   :  { %v1427_v17 = vpop.eup %1426  ;;  %1102 = vst.msk [vmem:[%s2544_s4 + $0x38] sm:$0xff] %vm115_vm1, %v1038_v18  ;;  %v1036_v28 = vmul.f32 %v1425_v7, %v1955_v32  ;;  %1452 = vpow2.f32 %v1212_v4  ;;  %v2140_v4 = vadd.f32 %v1882_v36, %v528_v49  ;;  %v529_v18 = vmul.f32 %v1877_v34, %v317_v30 }
  0xfb   :  { %v1429_v20 = vpop.eup %1428  ;;  %1134 = vst.msk [vmem:[%s2544_s4 + $0x138] sm:$0xff] %vm115_vm1, %v1070_v19  ;;  %v849_v29 = vadd.f32 1.0, %v1427_v17  ;;  %1454 = vpow2.f32 %v1244_v11  ;;  %v1350_v6 = vpop.f32.mrf.mxu1  ;;  %v1215_v19 = vmul.f32 -1.442695, %v2132_v5  ;;  %v1216_v47 = vmul.f32 -1.442695, %v2148_v15 }
  0xfc   :  { %v1431_v50 = vpop.eup %1430  ;;  %1100 = vst.msk [vmem:[%s2544_s4 + $0x28] sm:$0xff] %vm115_vm1, %v1036_v28  ;;  %v881_v23 = vadd.f32 1.0, %v1429_v20  ;;  %1456 = vpow2.f32 %v1210_v14  ;;  %v1247_v20 = vmul.f32 -1.442695, %v2136_v9  ;;  %v1213_v24 = vmul.f32 -1.442695, %v2140_v4 }
  0xfd   :  { %v1433_v27 = vpop.eup %1432  ;;  %1458 = vrcp.f32 %v849_v29  ;;  %v847_v32 = vadd.f32 1.0, %v1431_v50  ;;  %v2152_v29 = vadd.f32 %v1882_v36, %v563_v1 }
  0xfe   :  { %v1435_v33 = vpop.eup %1434  ;;  %1460 = vrcp.f32 %v881_v23  ;;  %v879_v35 = vadd.f32 1.0, %v1433_v27  ;;  %v561_v27 = vmul.f32 %v1877_v34, %v445_v52 }
  0xff   :  { %v1437_v39 = vpop.eup %1436  ;;  %v1068_v41 = vmul.f32 %v1435_v33, %v1961_v40  ;;  %1462 = vrcp.f32 %v847_v32  ;;  %v1318_v40 = vpop.f32.mrf.mxu0  ;;  %v1245_v33 = vmul.f32 -1.442695, %v2143_v13  ;;  %v1248_v52 = vmul.f32 -1.442695, %v2152_v29 }
 0x100   :  { %v1439_v59 = vpop.eup %1438  ;;  %1464 = vrcp.f32 %v879_v35  ;;  %v850_v48 = vadd.f32 1.0, %v1437_v39  ;;  %v458_v32 = vpop.f32.mrf.mxu1  ;;  %v2158_v35 = vadd.f32 %v1882_v36, %v529_v18 }
 0x101   :  { %v1441_v53 = vpop.eup %1440  ;;  %1132 = vst.msk [vmem:[%s2544_s4 + $0x128] sm:$0xff] %vm115_vm1, %v1068_v41  ;;  %v882_v0 = vadd.f32 1.0, %v1439_v59  ;;  %1466 = vpow2.f32 %v1242_v51  ;;  %v330_v14 = vpop.f32.mrf.mxu0  ;;  %v534_v59 = vmul.f32 %v1318_v40, %v1877_v34 }
 0x102   :  { %v1443_v56 = vpop.eup %1442  ;;  %1468 = vrcp.f32 %v850_v48  ;;  %v848_v57 = vadd.f32 1.0, %v1441_v53  ;;  %v566_v53 = vmul.f32 %v1350_v6, %v1877_v34  ;;  %v1351_v61 = vpop.f32.mrf.mxu1  ;;  %v1214_v40 = vmul.f32 -1.442695, %v2158_v35 }
 0x103   :  { %v1445_v62 = vpop.eup %1444  ;;  %1470 = vrcp.f32 %v882_v0  ;;  %v880_v63 = vadd.f32 1.0, %v1443_v56  ;;  %v1319_v38 = vpop.f32.mrf.mxu0  ;;  %v2167_v56 = vadd.f32 %v1882_v36, %v561_v27  ;;  %v567_v18 = vmul.f32 %v1351_v61, %v1877_v34 }
 0x104   :  { %v1447_v2 = vpop.eup %1446  ;;  %1472 = vrcp.f32 %v848_v57  ;;  %v853_v3 = vadd.f32 1.0, %v1445_v62  ;;  %v532_v57 = vmul.f32 %v1877_v34, %v330_v14 }
 0x105   :  { %v1449_v10 = vpop.eup %1448  ;;  %1474 = vrcp.f32 %v880_v63  ;;  %v885_v11 = vadd.f32 1.0, %v1447_v2  ;;  %v333_v63 = vpop.f32.mrf.mxu0 }
 0x106   :  { %v1451_v42 = vpop.eup %1450  ;;  %1476 = vrcp.f32 %v853_v3  ;;  %v851_v7 = vadd.f32 1.0, %v1449_v10  ;;  %v2183_v3 = vadd.f32 %v1882_v36, %v534_v59 }
 0x107   :  { %v1453_v17 = vpop.eup %1452  ;;  %1478 = vrcp.f32 %v885_v11  ;;  %v883_v28 = vadd.f32 1.0, %v1451_v42  ;;  %v2191_v11 = vadd.f32 %v1882_v36, %v566_v53  ;;  %v2200_v42 = vadd.f32 %v1882_v36, %v532_v57 }
 0x108   :  { %v1455_v50 = vpop.eup %1454  ;;  %1480 = vrcp.f32 %v851_v7  ;;  %v854_v23 = vadd.f32 1.0, %v1453_v17  ;;  %v533_v7 = vmul.f32 %v1877_v34, %v333_v63  ;;  %v1219_v27 = vmul.f32 -1.442695, %v2183_v3 }
 0x109   :  { %v1457_v51 = vpop.eup %1456  ;;  %1482 = vrcp.f32 %v883_v28  ;;  %v886_v30 = vadd.f32 1.0, %v1455_v50 }
 0x10a   :  { %v1459_v39 = vpop.eup %1458  ;;  %1484 = vrcp.f32 %v854_v23  ;;  %v852_v41 = vadd.f32 1.0, %v1457_v51  ;;  %v2208_v23 = vpop.f32.mrf.mxu0 }
 0x10b   :  { %v1461_v48 = vpop.eup %1460  ;;  %v1041_v49 = vmul.f32 %v1459_v39, %v1969_v12  ;;  %1486 = vrcp.f32 %v886_v30  ;;  %v1251_v30 = vmul.f32 -1.442695, %v2191_v11  ;;  %v1217_v39 = vmul.f32 -1.442695, %v2200_v42 }
 0x10c   :  { %v1463_v0 = vpop.eup %1462  ;;  %v1073_v46 = vmul.f32 %v1461_v48, %v1973_v16  ;;  %1488 = vrcp.f32 %v852_v41  ;;  %v564_v16 = vmul.f32 %v1877_v34, %v458_v32  ;;  %v2235_v41 = vadd.f32 %v1882_v36, %v533_v7 }
 0x10d   :  { %v1465_v62 = vpop.eup %1464  ;;  %1105 = vst.msk [vmem:[%s2544_s4 + $0x50] sm:$0xff] %vm115_vm1, %v1041_v49  ;;  %v1039_v12 = vmul.f32 %v1463_v0, %v1977_v22  ;;  %1490 = vpow2.f32 %v1215_v19  ;;  %v535_v22 = vmul.f32 %v1319_v38, %v1877_v34  ;;  %v461_v19 = vpop.f32.mrf.mxu1 }
 0x10e   :  { %v1467_v1 = vpop.eup %1466  ;;  %1137 = vst.msk [vmem:[%s2544_s4 + $0x150] sm:$0xff] %vm115_vm1, %v1073_v46  ;;  %v1071_v2 = vmul.f32 %v1465_v62, %v1980_v26  ;;  %1492 = vpow2.f32 %v1247_v20  ;;  %v1246_v20 = vmul.f32 -1.442695, %v2167_v56  ;;  %v2206_v50 = vadd.f32 %v1882_v36, %v564_v16  ;;  %v346_v49 = vpop.f32.mrf.mxu0 }
 0x10f   :  { %v1469_v6 = vpop.eup %1468  ;;  %1103 = vst.msk [vmem:[%s2544_s4 + $0x40] sm:$0xff] %vm115_vm1, %v1039_v12  ;;  %v884_v10 = vadd.f32 1.0, %v1467_v1  ;;  %1494 = vpow2.f32 %v1213_v24  ;;  %v1218_v62 = vmul.f32 -1.442695, %v2235_v41 }
 0x110   :  { %v1471_v26 = vpop.eup %1470  ;;  %1135 = vst.msk [vmem:[%s2544_s4 + $0x140] sm:$0xff] %vm115_vm1, %v1071_v2  ;;  %v1042_v14 = vmul.f32 %v1469_v6, %v1985_v37  ;;  %1496 = vpow2.f32 %v1245_v33  ;;  %v2226_v33 = vadd.f32 %v1882_v36, %v567_v18  ;;  %v1249_v48 = vmul.f32 -1.442695, %v2206_v50  ;;  %v1323_v63 = vpop.f32.mrf.mxu0 }
 0x111   :  { %v1473_v17 = vpop.eup %1472  ;;  %v1074_v28 = vmul.f32 %v1471_v26, %v1989_v44  ;;  %1498 = vrcp.f32 %v884_v10  ;;  %v2217_v44 = vadd.f32 %v1882_v36, %v535_v22 }
 0x112   :  { %v1475_v24 = vpop.eup %1474  ;;  %1106 = vst.msk [vmem:[%s2544_s4 + $0x58] sm:$0xff] %vm115_vm1, %v1042_v14  ;;  %v1040_v37 = vmul.f32 %v1473_v17, %v1995_v55  ;;  %1500 = vpow2.f32 %v1216_v47  ;;  %v1252_v57 = vmul.f32 -1.442695, %v2226_v33  ;;  %v349_v14 = vpop.f32.mrf.mxu0  ;;  %v538_v17 = vmul.f32 %v2208_v23, %v1877_v34 }
 0x113   :  { %v1477_v32 = vpop.eup %1476  ;;  %1138 = vst.msk [vmem:[%s2544_s4 + $0x158] sm:$0xff] %vm115_vm1, %v1074_v28  ;;  %v1072_v51 = vmul.f32 %v1475_v24, %v2004_v8  ;;  %1502 = vpow2.f32 %v1248_v52  ;;  %v1354_v8 = vpop.f32.mrf.mxu1  ;;  %v1220_v0 = vmul.f32 -1.442695, %v2217_v44 }
 0x114   :  { %v1479_v55 = vpop.eup %1478  ;;  %1104 = vst.msk [vmem:[%s2544_s4 + $0x48] sm:$0xff] %vm115_vm1, %v1040_v37  ;;  %v1045_v38 = vmul.f32 %v1477_v32, %v2020_v21  ;;  %1504 = vpow2.f32 %v1214_v40  ;;  %v565_v21 = vmul.f32 %v1877_v34, %v461_v19  ;;  %v570_v24 = vmul.f32 %v1354_v8, %v1877_v34 }
 0x115   :  { %v1481_v47 = vpop.eup %1480  ;;  %1136 = vst.msk [vmem:[%s2544_s4 + $0x148] sm:$0xff] %vm115_vm1, %v1072_v51  ;;  %v1077_v59 = vmul.f32 %v1479_v55, %v2028_v25  ;;  %1506 = vpow2.f32 %v1246_v20  ;;  %v474_v12 = vpop.f32.mrf.mxu1  ;;  %v536_v32 = vmul.f32 %v1877_v34, %v346_v49  ;;  %v2295_v8 = vadd.f32 %v1882_v36, %v538_v17 }
 0x116   :  { %v1483_v52 = vpop.eup %1482  ;;  %1109 = vst.msk [vmem:[%s2544_s4 + $0x70] sm:$0xff] %vm115_vm1, %v1045_v38  ;;  %v1043_v53 = vmul.f32 %v1481_v47, %v2037_v31  ;;  %1508 = vpow2.f32 %v1219_v27  ;;  %v2268_v16 = vadd.f32 %v1882_v36, %v565_v21  ;;  %v568_v23 = vmul.f32 %v1877_v34, %v474_v12 }
 0x117   :  { %v1485_v46 = vpop.eup %1484  ;;  %1141 = vst.msk [vmem:[%s2544_s4 + $0x170] sm:$0xff] %vm115_vm1, %v1077_v59  ;;  %v1075_v25 = vmul.f32 %v1483_v52, %v2043_v45  ;;  %1510 = vpow2.f32 %v1251_v30  ;;  %v1355_v10 = vpop.f32.mrf.mxu1  ;;  %v539_v47 = vmul.f32 %v1323_v63, %v1877_v34  ;;  %v2299_v21 = vadd.f32 %v1882_v36, %v570_v24 }
 0x118   :  { %v1487_v61 = vpop.eup %1486  ;;  %1107 = vst.msk [vmem:[%s2544_s4 + $0x60] sm:$0xff] %vm115_vm1, %v1043_v53  ;;  %v1046_v31 = vmul.f32 %v1485_v46, %v2054_v60  ;;  %1512 = vpow2.f32 %v1217_v39  ;;  %v1250_v26 = vmul.f32 -1.442695, %v2268_v16  ;;  %v571_v49 = vmul.f32 %v1355_v10, %v1877_v34 }
 0x119   :  { %v1489_v40 = vpop.eup %1488  ;;  %1139 = vst.msk [vmem:[%s2544_s4 + $0x160] sm:$0xff] %vm115_vm1, %v1075_v25  ;;  %v1078_v45 = vmul.f32 %v1487_v61, %v2063_v54  ;;  %1514 = vpow2.f32 %v1249_v48  ;;  %v477_v51 = vpop.f32.mrf.mxu1  ;;  %v2306_v61 = vadd.f32 %v1882_v36, %v568_v23  ;;  %v2311_v63 = vadd.f32 %v1882_v36, %v539_v47  ;;  %v2337_v23 = vld [vmem:[%s2543_s3] ss:$0 sm:$0xff] }
 0x11a   :  { %v1491_v1 = vpop.eup %1490  ;;  %1110 = vst.msk [vmem:[%s2544_s4 + $0x78] sm:$0xff] %vm115_vm1, %v1046_v31  ;;  %v1044_v60 = vmul.f32 %v1489_v40, %v2072_v58  ;;  %1516 = vpow2.f32 %v1220_v0  ;;  %v2303_v0 = vadd.f32 %v1882_v36, %v536_v32  ;;  %v537_v31 = vmul.f32 %v1877_v34, %v349_v14 }
 0x11b   :  { %v1493_v2 = vpop.eup %1492  ;;  %1142 = vst.msk [vmem:[%s2544_s4 + $0x178] sm:$0xff] %vm115_vm1, %v1078_v45  ;;  %v857_v54 = vadd.f32 1.0, %v1491_v1  ;;  %1518 = vpow2.f32 %v1252_v57  ;;  %v1358_v46 = vpop.f32.mrf.mxu1  ;;  %v1223_v45 = vmul.f32 -1.442695, %v2295_v8  ;;  %v1224_v24 = vmul.f32 -1.442695, %v2311_v63 }
 0x11c   :  { %v1495_v22 = vpop.eup %1494  ;;  %1108 = vst.msk [vmem:[%s2544_s4 + $0x68] sm:$0xff] %vm115_vm1, %v1044_v60  ;;  %v889_v6 = vadd.f32 1.0, %v1493_v2  ;;  %1520 = vpow2.f32 %v1218_v62  ;;  %v1255_v2 = vmul.f32 -1.442695, %v2299_v21  ;;  %v1221_v10 = vmul.f32 -1.442695, %v2303_v0 }
 0x11d   :  { %v1497_v18 = vpop.eup %1496  ;;  %1522 = vrcp.f32 %v857_v54  ;;  %v855_v58 = vadd.f32 1.0, %v1495_v22  ;;  %v2315_v54 = vadd.f32 %v1882_v36, %v571_v49 }
 0x11e   :  { %v1499_v7 = vpop.eup %1498  ;;  %1524 = vrcp.f32 %v889_v6  ;;  %v887_v19 = vadd.f32 1.0, %v1497_v18  ;;  %v569_v18 = vmul.f32 %v1877_v34, %v477_v51 }
 0x11f   :  { %v1501_v28 = vpop.eup %1500  ;;  %v1076_v20 = vmul.f32 %v1499_v7, %v2105_v43  ;;  %1526 = vrcp.f32 %v855_v58  ;;  %v1326_v43 = vpop.f32.mrf.mxu0  ;;  %v1253_v7 = vmul.f32 -1.442695, %v2306_v61 }
 0x120   :  { %v1503_v37 = vpop.eup %1502  ;;  %1528 = vrcp.f32 %v887_v19  ;;  %v858_v27 = vadd.f32 1.0, %v1501_v28  ;;  %v490_v58 = vpop.f32.mrf.mxu1  ;;  %v2321_v19 = vadd.f32 %v1882_v36, %v537_v31  ;;  %v1256_v36 = vmul.f32 -1.442695, %v2315_v54 }
 0x121   :  { %v1505_v30 = vpop.eup %1504  ;;  %1140 = vst.msk [vmem:[%s2544_s4 + $0x168] sm:$0xff] %vm115_vm1, %v1076_v20  ;;  %v890_v55 = vadd.f32 1.0, %v1503_v37  ;;  %1530 = vpow2.f32 %v1250_v26  ;;  %v362_v62 = vpop.f32.mrf.mxu0  ;;  %v2327_v37 = vld [vmem:[%s2542_s2] ss:$0 sm:$0xff] }
 0x122   :  { %v1507_v38 = vpop.eup %1506  ;;  %1532 = vrcp.f32 %v858_v27  ;;  %v856_v39 = vadd.f32 1.0, %v1505_v30  ;;  %v542_v34 = vmul.f32 %v2327_v37, %v1326_v43  ;;  %v574_v51 = vmul.f32 %v2327_v37, %v1358_v46 }
 0x123   :  { %v1509_v59 = vpop.eup %1508  ;;  %1534 = vrcp.f32 %v890_v55  ;;  %v888_v48 = vadd.f32 1.0, %v1507_v38  ;;  %v1327_v17 = vpop.f32.mrf.mxu0  ;;  %v2340_v38 = vadd.f32 %v2337_v23, %v569_v18  ;;  %v540_v43 = vmul.f32 %v2327_v37, %v362_v62 }
 0x124   :  { %v1511_v52 = vpop.eup %1510  ;;  %1536 = vrcp.f32 %v856_v39  ;;  %v861_v53 = vadd.f32 1.0, %v1509_v59  ;;  %v1222_v47 = vmul.f32 -1.442695, %v2321_v19  ;;  %v572_v59 = vmul.f32 %v2327_v37, %v490_v58 }
 0x125   :  { %v1513_v25 = vpop.eup %1512  ;;  %1538 = vrcp.f32 %v888_v48  ;;  %v893_v57 = vadd.f32 1.0, %v1511_v52  ;;  %v365_v48 = vpop.f32.mrf.mxu0 }
 0x126   :  { %v1515_v12 = vpop.eup %1514  ;;  %1540 = vrcp.f32 %v861_v53  ;;  %v859_v40 = vadd.f32 1.0, %v1513_v25  ;;  %v2356_v53 = vadd.f32 %v2337_v23, %v542_v34 }
 0x127   :  { %v1517_v1 = vpop.eup %1516  ;;  %1542 = vrcp.f32 %v893_v57  ;;  %v891_v60 = vadd.f32 1.0, %v1515_v12  ;;  %v2364_v57 = vadd.f32 %v2337_v23, %v574_v51  ;;  %v2373_v12 = vadd.f32 %v2337_v23, %v540_v43 }
 0x128   :  { %v1519_v22 = vpop.eup %1518  ;;  %1544 = vrcp.f32 %v859_v40  ;;  %v862_v6 = vadd.f32 1.0, %v1517_v1  ;;  %v541_v40 = vmul.f32 %v2327_v37, %v365_v48 }
 0x129   :  { %v1521_v26 = vpop.eup %1520  ;;  %1546 = vrcp.f32 %v891_v60  ;;  %v894_v14 = vadd.f32 1.0, %v1519_v22  ;;  %v1254_v60 = vmul.f32 -1.442695, %v2340_v38 }
 0x12a   :  { %v1523_v28 = vpop.eup %1522  ;;  %1548 = vrcp.f32 %v862_v6  ;;  %v860_v20 = vadd.f32 1.0, %v1521_v26  ;;  %v1227_v6 = vmul.f32 -1.442695, %v2356_v53  ;;  %v1259_v26 = vmul.f32 -1.442695, %v2364_v57 }
 0x12b   :  { %v1525_v27 = vpop.eup %1524  ;;  %v1049_v32 = vmul.f32 %v1523_v28, %v2132_v5  ;;  %1550 = vrcp.f32 %v894_v14  ;;  %v1359_v5 = vpop.f32.mrf.mxu1  ;;  %v2406_v28 = vadd.f32 %v2337_v23, %v541_v40 }
 0x12c   :  { %v1527_v30 = vpop.eup %1526  ;;  %v1081_v55 = vmul.f32 %v1525_v27, %v2136_v9  ;;  %1552 = vrcp.f32 %v860_v20  ;;  %v575_v31 = vmul.f32 %v2327_v37, %v1359_v5 }
 0x12d   :  { %v1529_v39 = vpop.eup %1528  ;;  %1113 = vst.msk [vmem:[%s2544_s4 + $0x90] sm:$0xff] %vm115_vm1, %v1049_v32  ;;  %v1047_v9 = vmul.f32 %v1527_v30, %v2140_v4  ;;  %1554 = vpow2.f32 %v1223_v45  ;;  %v543_v4 = vmul.f32 %v2327_v37, %v1327_v17  ;;  %v1225_v17 = vmul.f32 -1.442695, %v2373_v12 }
 0x12e   :  { %v1531_v49 = vpop.eup %1530  ;;  %1145 = vst.msk [vmem:[%s2544_s4 + $0x190] sm:$0xff] %vm115_vm1, %v1081_v55  ;;  %v1079_v52 = vmul.f32 %v1529_v39, %v2143_v13  ;;  %1556 = vpow2.f32 %v1255_v2  ;;  %v2379_v2 = vadd.f32 %v2337_v23, %v572_v59  ;;  %v1226_v30 = vmul.f32 -1.442695, %v2406_v28 }
 0x12f   :  { %v1533_v46 = vpop.eup %1532  ;;  %1111 = vst.msk [vmem:[%s2544_s4 + $0x80] sm:$0xff] %vm115_vm1, %v1047_v9  ;;  %v892_v25 = vadd.f32 1.0, %v1531_v49  ;;  %1558 = vpow2.f32 %v1221_v10  ;;  %v2388_v10 = vadd.f32 %v2337_v23, %v543_v4 }
 0x130   :  { %v1535_v13 = vpop.eup %1534  ;;  %1143 = vst.msk [vmem:[%s2544_s4 + $0x180] sm:$0xff] %vm115_vm1, %v1079_v52  ;;  %v1050_v62 = vmul.f32 %v1533_v46, %v2148_v15  ;;  %1560 = vpow2.f32 %v1253_v7 }
 0x131   :  { %v1537_v45 = vpop.eup %1536  ;;  %v1082_v1 = vmul.f32 %v1535_v13, %v2152_v29  ;;  %1562 = vrcp.f32 %v892_v25  ;;  %v493_v29 = vpop.f32.mrf.mxu1  ;;  %v1228_v32 = vmul.f32 -1.442695, %v2388_v10 }
 0x132   :  { %v1539_v22 = vpop.eup %1538  ;;  %1114 = vst.msk [vmem:[%s2544_s4 + $0x98] sm:$0xff] %vm115_vm1, %v1050_v62  ;;  %v1048_v15 = vmul.f32 %v1537_v45, %v2158_v35  ;;  %1564 = vpow2.f32 %v1224_v24  ;;  %v2397_v35 = vadd.f32 %v2337_v23, %v575_v31  ;;  %v1257_v24 = vmul.f32 -1.442695, %v2379_v2 }
 0x133   :  { %v1541_v18 = vpop.eup %1540  ;;  %1146 = vst.msk [vmem:[%s2544_s4 + $0x198] sm:$0xff] %vm115_vm1, %v1082_v1  ;;  %v1080_v58 = vmul.f32 %v1539_v22, %v2167_v56  ;;  %1566 = vpow2.f32 %v1256_v36  ;;  %v573_v34 = vmul.f32 %v2327_v37, %v493_v29 }
 0x134   :  { %v1543_v14 = vpop.eup %1542  ;;  %1112 = vst.msk [vmem:[%s2544_s4 + $0x88] sm:$0xff] %vm115_vm1, %v1048_v15  ;;  %v1053_v7 = vmul.f32 %v1541_v18, %v2183_v3  ;;  %1568 = vpow2.f32 %v1222_v47  ;;  %v1260_v37 = vmul.f32 -1.442695, %v2397_v35 }
 0x135   :  { %v1545_v56 = vpop.eup %1544  ;;  %1144 = vst.msk [vmem:[%s2544_s4 + $0x188] sm:$0xff] %vm115_vm1, %v1080_v58  ;;  %v1085_v20 = vmul.f32 %v1543_v14, %v2191_v11  ;;  %1570 = vpow2.f32 %v1254_v60  ;;  %v2439_v43 = vadd.f32 %v2337_v23, %v573_v34 }
 0x136   :  { %v1547_v3 = vpop.eup %1546  ;;  %1117 = vst.msk [vmem:[%s2544_s4 + $0xb0] sm:$0xff] %vm115_vm1, %v1053_v7  ;;  %v1051_v27 = vmul.f32 %v1545_v56, %v2200_v42  ;;  %1572 = vpow2.f32 %v1227_v6 }
 0x137   :  { %v1549_v36 = vpop.eup %1548  ;;  %1149 = vst.msk [vmem:[%s2544_s4 + $0x1b0] sm:$0xff] %vm115_vm1, %v1085_v20  ;;  %v1083_v11 = vmul.f32 %v1547_v3, %v2206_v50  ;;  %1574 = vpow2.f32 %v1259_v26  ;;  %v1258_v59 = vmul.f32 -1.442695, %v2439_v43 }
 0x138   :  { %v1551_v51 = vpop.eup %1550  ;;  %1115 = vst.msk [vmem:[%s2544_s4 + $0xa0] sm:$0xff] %vm115_vm1, %v1051_v27  ;;  %v1054_v42 = vmul.f32 %v1549_v36, %v2217_v44  ;;  %1576 = vpow2.f32 %v1225_v17 }
 0x139   :  { %v1553_v55 = vpop.eup %1552  ;;  %1147 = vst.msk [vmem:[%s2544_s4 + $0x1a0] sm:$0xff] %vm115_vm1, %v1083_v11  ;;  %v1086_v50 = vmul.f32 %v1551_v51, %v2226_v33  ;;  %1578 = vpow2.f32 %v1257_v24 }
 0x13a   :  { %v1555_v5 = vpop.eup %1554  ;;  %1118 = vst.msk [vmem:[%s2544_s4 + $0xb8] sm:$0xff] %vm115_vm1, %v1054_v42  ;;  %v1052_v44 = vmul.f32 %v1553_v55, %v2235_v41  ;;  %1580 = vpow2.f32 %v1228_v32 }
 0x13b   :  { %v1557_v39 = vpop.eup %1556  ;;  %1150 = vst.msk [vmem:[%s2544_s4 + $0x1b8] sm:$0xff] %vm115_vm1, %v1086_v50  ;;  %v865_v33 = vadd.f32 1.0, %v1555_v5  ;;  %1582 = vpow2.f32 %v1260_v37 }
 0x13c   :  { %v1559_v9 = vpop.eup %1558  ;;  %1116 = vst.msk [vmem:[%s2544_s4 + $0xa8] sm:$0xff] %vm115_vm1, %v1052_v44  ;;  %v897_v23 = vadd.f32 1.0, %v1557_v39  ;;  %1584 = vpow2.f32 %v1226_v30 }
 0x13d   :  { %v1561_v47 = vpop.eup %1560  ;;  %1586 = vrcp.f32 %v865_v33  ;;  %v863_v41 = vadd.f32 1.0, %v1559_v9 }
 0x13e   :  { %v1563_v48 = vpop.eup %1562  ;;  %1588 = vrcp.f32 %v897_v23  ;;  %v895_v49 = vadd.f32 1.0, %v1561_v47 }
 0x13f   :  { %v1565_v52 = vpop.eup %1564  ;;  %v1084_v4 = vmul.f32 %v1563_v48, %v2268_v16  ;;  %1590 = vrcp.f32 %v863_v41 }
 0x140   :  { %v1567_v46 = vpop.eup %1566  ;;  %1592 = vrcp.f32 %v895_v49  ;;  %v866_v25 = vadd.f32 1.0, %v1565_v52 }
 0x141   :  { %v1569_v31 = vpop.eup %1568  ;;  %1148 = vst.msk [vmem:[%s2544_s4 + $0x1a8] sm:$0xff] %vm115_vm1, %v1084_v4  ;;  %v898_v13 = vadd.f32 1.0, %v1567_v46  ;;  %1594 = vpow2.f32 %v1258_v59 }
 0x142   :  { %v1571_v62 = vpop.eup %1570  ;;  %1596 = vrcp.f32 %v866_v25  ;;  %v864_v40 = vadd.f32 1.0, %v1569_v31 }
 0x143   :  { %v1573_v45 = vpop.eup %1572  ;;  %1598 = vrcp.f32 %v898_v13  ;;  %v896_v1 = vadd.f32 1.0, %v1571_v62 }
 0x144   :  { %v1575_v60 = vpop.eup %1574  ;;  %1600 = vrcp.f32 %v864_v40  ;;  %v869_v16 = vadd.f32 1.0, %v1573_v45 }
 0x145   :  { %v1577_v22 = vpop.eup %1576  ;;  %1602 = vrcp.f32 %v896_v1  ;;  %v901_v15 = vadd.f32 1.0, %v1575_v60 }
 0x146   :  { %v1579_v6 = vpop.eup %1578  ;;  %1604 = vrcp.f32 %v869_v16  ;;  %v867_v29 = vadd.f32 1.0, %v1577_v22 }
 0x147   :  { %v1581_v18 = vpop.eup %1580  ;;  %1606 = vrcp.f32 %v901_v15  ;;  %v899_v58 = vadd.f32 1.0, %v1579_v6 }
 0x148   :  { %v1583_v26 = vpop.eup %1582  ;;  %1608 = vrcp.f32 %v867_v29  ;;  %v870_v14 = vadd.f32 1.0, %v1581_v18 }
 0x149   :  { %v1585_v7 = vpop.eup %1584  ;;  %1610 = vrcp.f32 %v899_v58  ;;  %v902_v17 = vadd.f32 1.0, %v1583_v26 }
 0x14a   :  { %v1587_v56 = vpop.eup %1586  ;;  %1612 = vrcp.f32 %v870_v14  ;;  %v868_v20 = vadd.f32 1.0, %v1585_v7 }
 0x14b   :  { %v1589_v24 = vpop.eup %1588  ;;  %v1057_v34 = vmul.f32 %v1587_v56, %v2295_v8  ;;  %1614 = vrcp.f32 %v902_v17 }
 0x14c   :  { %v1591_v3 = vpop.eup %1590  ;;  %v1089_v27 = vmul.f32 %v1589_v24, %v2299_v21  ;;  %1616 = vrcp.f32 %v868_v20 }
 0x14d   :  { %v1593_v32 = vpop.eup %1592  ;;  %1121 = vst.msk [vmem:[%s2544_s4 + $0xd0] sm:$0xff] %vm115_vm1, %v1057_v34  ;;  %v1055_v36 = vmul.f32 %v1591_v3, %v2303_v0 }
 0x14e   :  { %v1595_v11 = vpop.eup %1594  ;;  %1153 = vst.msk [vmem:[%s2544_s4 + $0x1d0] sm:$0xff] %vm115_vm1, %v1089_v27  ;;  %v1087_v8 = vmul.f32 %v1593_v32, %v2306_v61 }
 0x14f   :  { %v1597_v37 = vpop.eup %1596  ;;  %1119 = vst.msk [vmem:[%s2544_s4 + $0xc0] sm:$0xff] %vm115_vm1, %v1055_v36  ;;  %v900_v21 = vadd.f32 1.0, %v1595_v11 }
 0x150   :  { %v1599_v51 = vpop.eup %1598  ;;  %1151 = vst.msk [vmem:[%s2544_s4 + $0x1c0] sm:$0xff] %vm115_vm1, %v1087_v8  ;;  %v1058_v0 = vmul.f32 %v1597_v37, %v2311_v63 }
 0x151   :  { %v1601_v42 = vpop.eup %1600  ;;  %v1090_v30 = vmul.f32 %v1599_v51, %v2315_v54  ;;  %1618 = vrcp.f32 %v900_v21 }
 0x152   :  { %v1603_v61 = vpop.eup %1602  ;;  %1122 = vst.msk [vmem:[%s2544_s4 + $0xd8] sm:$0xff] %vm115_vm1, %v1058_v0  ;;  %v1056_v55 = vmul.f32 %v1601_v42, %v2321_v19 }
 0x153   :  { %v1605_v50 = vpop.eup %1604  ;;  %1154 = vst.msk [vmem:[%s2544_s4 + $0x1d8] sm:$0xff] %vm115_vm1, %v1090_v30  ;;  %v1088_v63 = vmul.f32 %v1603_v61, %v2340_v38 }
 0x154   :  { %v1607_v5 = vpop.eup %1606  ;;  %1120 = vst.msk [vmem:[%s2544_s4 + $0xc8] sm:$0xff] %vm115_vm1, %v1056_v55  ;;  %v1061_v54 = vmul.f32 %v1605_v50, %v2356_v53 }
 0x155   :  { %v1609_v44 = vpop.eup %1608  ;;  %1152 = vst.msk [vmem:[%s2544_s4 + $0x1c8] sm:$0xff] %vm115_vm1, %v1088_v63  ;;  %v1093_v19 = vmul.f32 %v1607_v5, %v2364_v57 }
 0x156   :  { %v1611_v39 = vpop.eup %1610  ;;  %1125 = vst.msk [vmem:[%s2544_s4 + $0xf0] sm:$0xff] %vm115_vm1, %v1061_v54  ;;  %v1059_v38 = vmul.f32 %v1609_v44, %v2373_v12 }
 0x157   :  { %v1613_v33 = vpop.eup %1612  ;;  %1157 = vst.msk [vmem:[%s2544_s4 + $0x1f0] sm:$0xff] %vm115_vm1, %v1093_v19  ;;  %v1091_v53 = vmul.f32 %v1611_v39, %v2379_v2 }
 0x158   :  { %v1615_v9 = vpop.eup %1614  ;;  %1123 = vst.msk [vmem:[%s2544_s4 + $0xe0] sm:$0xff] %vm115_vm1, %v1059_v38  ;;  %v1062_v57 = vmul.f32 %v1613_v33, %v2388_v10 }
 0x159   :  { %v1617_v23 = vpop.eup %1616  ;;  %1155 = vst.msk [vmem:[%s2544_s4 + $0x1e0] sm:$0xff] %vm115_vm1, %v1091_v53  ;;  %v1094_v12 = vmul.f32 %v1615_v9, %v2397_v35 }
 0x15a   :  { %1126 = vst.msk [vmem:[%s2544_s4 + $0xf8] sm:$0xff] %vm115_vm1, %v1062_v57  ;;  %v1060_v2 = vmul.f32 %v1617_v23, %v2406_v28 }
 0x15b   :  { %1158 = vst.msk [vmem:[%s2544_s4 + $0x1f8] sm:$0xff] %vm115_vm1, %v1094_v12 }
 0x15c   :  { %1124 = vst.msk [vmem:[%s2544_s4 + $0xe8] sm:$0xff] %vm115_vm1, %v1060_v2 }
 0x15e   :  { %v1619_v10 = vpop.eup %1618 }
 0x15f   :  { %v1092_v35 = vmul.f32 %v1619_v10, %v2439_v43 }
 0x161   :  { %1156 = vst.msk [vmem:[%s2544_s4 + $0x1e8] sm:$0xff] %vm115_vm1, %v1092_v35 }

// kernel: bilevel_routing_deformable_attention.9
= control target key start
LH: loop header
LB: loop body
LE: loop exit
PB: predicated region body
PF: predicated region fallthrough
CT: control target
= control target key end

     0   :  { %vm212_vm0 = vcmask 1043456   ;;  %vm115_vm1 = vcmask 64512   ;;  %vm647_vm2 = vcmask 15360   ;;  %s1499_s1 = inlined_call_operand.vmem [shape: bf16[8,2], index: 1, kind: input, shape index: {}]   ;;  %s1500_s0 = inlined_call_operand.vmem [shape: f32[512,8], index: 0, kind: input, shape index: {}]   ;;  %s1501_s2 = inlined_call_operand.vmem [shape: f32[1,2], index: 2, kind: input, shape index: {}]   ;;  %s1502_s3 = inlined_call_operand.vmem [shape: f32[1,2], index: 3, kind: input, shape index: {}]   ;;  %s1503_s4 = inlined_call_operand.vmem [shape: f32[512,2], index: 4, kind: output, shape index: {}]  }
   0x1   :  { %v114_v0 = vld [vmem:[%s1499_s1] sm:$0xf]  ;;  %v19_v2 = vld [vmem:[%s1500_s0 + $0x8] sm:$0xff]  ;;  %v20_v7 = vld [vmem:[%s1500_s0 + $0x10] sm:$0xff] }
   0x2   :  { %v18_v1 = vld [vmem:[%s1500_s0] sm:$0xff]  ;;  %851 = vmatprep.subr.msk.bf16.mxu0 %vm212_vm0, %v114_v0  ;;  %852 = vmatprep.subr.msk.bf16.mxu1 %vm212_vm0, %v114_v0  ;;  %v214_v3 = vsel %vm212_vm0, %v114_v0, 0  ;;  %v51_v6 = vld [vmem:[%s1500_s0 + $0x108] sm:$0xff]  ;;  %v21_v9 = vld [vmem:[%s1500_s0 + $0x18] sm:$0xff] }
   0x3   :  { %v82_v4 = vpack.c.bf16 %v19_v2, %v18_v1  ;;  %v50_v5 = vld [vmem:[%s1500_s0 + $0x100] sm:$0xff]  ;;  %784 = vmatpush3.bf16.msra.mxu0 %v214_v3  ;;  %850 = vmatpush3.bf16.msra.mxu1 %v214_v3  ;;  %v52_v10 = vld [vmem:[%s1500_s0 + $0x110] sm:$0xff]  ;;  %v53_v11 = vld [vmem:[%s1500_s0 + $0x118] sm:$0xff]  ;;  %v83_v12 = vpack.c.bf16 %v21_v9, %v20_v7 }
   0x4   :  { %v98_v8 = vpack.c.bf16 %v51_v6, %v50_v5  ;;  %v99_v13 = vpack.c.bf16 %v53_v11, %v52_v10  ;;  %v22_v14 = vld [vmem:[%s1500_s0 + $0x20] sm:$0xff]  ;;  %v23_v15 = vld [vmem:[%s1500_s0 + $0x28] sm:$0xff]  ;;  %v24_v20 = vld [vmem:[%s1500_s0 + $0x30] sm:$0xff] }
   0x5   :  { %785 = vmatprep.mubr.msk.bf16.mxu0 %vm115_vm1, %v82_v4  ;;  %v54_v16 = vld [vmem:[%s1500_s0 + $0x120] sm:$0xff]  ;;  %v84_v17 = vpack.c.bf16 %v23_v15, %v22_v14  ;;  %v55_v18 = vld [vmem:[%s1500_s0 + $0x128] sm:$0xff]  ;;  %v25_v21 = vld [vmem:[%s1500_s0 + $0x38] sm:$0xff] }
   0x6   :  { %817 = vmatprep.mubr.msk.bf16.mxu1 %vm115_vm1, %v98_v8  ;;  %786 = vmatmul.mubr.msk.bf16.vlgmr.msra.gmra.mxu0 %vm115_vm1, %v83_v12  ;;  %v100_v19 = vpack.c.bf16 %v55_v18, %v54_v16  ;;  %v56_v22 = vld [vmem:[%s1500_s0 + $0x130] sm:$0xff]  ;;  %v57_v23 = vld [vmem:[%s1500_s0 + $0x138] sm:$0xff]  ;;  %v26_v24 = vld [vmem:[%s1500_s0 + $0x40] sm:$0xff]  ;;  %v85_v28 = vpack.c.bf16 %v25_v21, %v24_v20 }
   0x7   :  { %818 = vmatmul.mubr.msk.bf16.vlgmr.msra.gmra.mxu1 %vm115_vm1, %v99_v13  ;;  %789 = vmatprep.mubr.msk.bf16.mxu0 %vm115_vm1, %v84_v17  ;;  %v27_v25 = vld [vmem:[%s1500_s0 + $0x48] sm:$0xff]  ;;  %v58_v26 = vld [vmem:[%s1500_s0 + $0x140] sm:$0xff]  ;;  %v101_v29 = vpack.c.bf16 %v57_v23, %v56_v22  ;;  %v28_v32 = vld [vmem:[%s1500_s0 + $0x50] sm:$0xff] }
   0x8   :  { %821 = vmatprep.mubr.msk.bf16.mxu1 %vm115_vm1, %v100_v19  ;;  %v59_v27 = vld [vmem:[%s1500_s0 + $0x148] sm:$0xff]  ;;  %v86_v30 = vpack.c.bf16 %v27_v25, %v26_v24  ;;  %v29_v33 = vld [vmem:[%s1500_s0 + $0x58] sm:$0xff]  ;;  %v60_v34 = vld [vmem:[%s1500_s0 + $0x150] sm:$0xff] }
   0x9   :  { %v102_v31 = vpack.c.bf16 %v59_v27, %v58_v26  ;;  %v61_v35 = vld [vmem:[%s1500_s0 + $0x158] sm:$0xff]  ;;  %v30_v36 = vld [vmem:[%s1500_s0 + $0x60] sm:$0xff]  ;;  %v31_v37 = vld [vmem:[%s1500_s0 + $0x68] sm:$0xff]  ;;  %v87_v40 = vpack.c.bf16 %v29_v33, %v28_v32 }
   0xa   :  { %v62_v38 = vld [vmem:[%s1500_s0 + $0x160] sm:$0xff]  ;;  %v63_v39 = vld [vmem:[%s1500_s0 + $0x168] sm:$0xff]  ;;  %v103_v41 = vpack.c.bf16 %v61_v35, %v60_v34  ;;  %v88_v42 = vpack.c.bf16 %v31_v37, %v30_v36  ;;  %v32_v44 = vld [vmem:[%s1500_s0 + $0x70] sm:$0xff] }
   0xb   :  { %v104_v43 = vpack.c.bf16 %v63_v39, %v62_v38  ;;  %v33_v45 = vld [vmem:[%s1500_s0 + $0x78] sm:$0xff]  ;;  %v64_v46 = vld [vmem:[%s1500_s0 + $0x170] sm:$0xff]  ;;  %v34_v48 = vld [vmem:[%s1500_s0 + $0x80] sm:$0xff] }
   0xc   :  { %v65_v47 = vld [vmem:[%s1500_s0 + $0x178] sm:$0xff]  ;;  %v35_v49 = vld [vmem:[%s1500_s0 + $0x88] sm:$0xff]  ;;  %v66_v50 = vld [vmem:[%s1500_s0 + $0x180] sm:$0xff]  ;;  %v89_v52 = vpack.c.bf16 %v33_v45, %v32_v44 }
   0xd   :  { %v67_v51 = vld [vmem:[%s1500_s0 + $0x188] sm:$0xff]  ;;  %v105_v53 = vpack.c.bf16 %v65_v47, %v64_v46  ;;  %v90_v54 = vpack.c.bf16 %v35_v49, %v34_v48  ;;  %v36_v56 = vld [vmem:[%s1500_s0 + $0x90] sm:$0xff]  ;;  %v37_v57 = vld [vmem:[%s1500_s0 + $0x98] sm:$0xff] }
   0xe   :  { %790 = vmatmul.mubr.msk.bf16.gmra.mxu0 %vm115_vm1, %v85_v28  ;;  %v106_v55 = vpack.c.bf16 %v67_v51, %v66_v50  ;;  %v68_v58 = vld [vmem:[%s1500_s0 + $0x190] sm:$0xff]  ;;  %v69_v59 = vld [vmem:[%s1500_s0 + $0x198] sm:$0xff]  ;;  %v38_v60 = vld [vmem:[%s1500_s0 + $0xa0] sm:$0xff]  ;;  %v91_v0 = vpack.c.bf16 %v37_v57, %v36_v56 }
   0xf   :  { %822 = vmatmul.mubr.msk.bf16.gmra.mxu1 %vm115_vm1, %v101_v29  ;;  %793 = vmatprep.mubr.msk.bf16.mxu0 %vm115_vm1, %v86_v30  ;;  %v39_v61 = vld [vmem:[%s1500_s0 + $0xa8] sm:$0xff]  ;;  %v70_v62 = vld [vmem:[%s1500_s0 + $0x1a0] sm:$0xff]  ;;  %v107_v1 = vpack.c.bf16 %v69_v59, %v68_v58  ;;  %v40_v4 = vld [vmem:[%s1500_s0 + $0xb0] sm:$0xff] }
  0x10   :  { %825 = vmatprep.mubr.msk.bf16.mxu1 %vm115_vm1, %v102_v31  ;;  %v71_v63 = vld [vmem:[%s1500_s0 + $0x1a8] sm:$0xff]  ;;  %v92_v2 = vpack.c.bf16 %v39_v61, %v38_v60  ;;  %v41_v5 = vld [vmem:[%s1500_s0 + $0xb8] sm:$0xff]  ;;  %v72_v6 = vld [vmem:[%s1500_s0 + $0x1b0] sm:$0xff] }
  0x11   :  { %v108_v3 = vpack.c.bf16 %v71_v63, %v70_v62  ;;  %v73_v7 = vld [vmem:[%s1500_s0 + $0x1b8] sm:$0xff]  ;;  %v42_v8 = vld [vmem:[%s1500_s0 + $0xc0] sm:$0xff]  ;;  %v43_v9 = vld [vmem:[%s1500_s0 + $0xc8] sm:$0xff]  ;;  %v93_v12 = vpack.c.bf16 %v41_v5, %v40_v4 }
  0x12   :  { %v74_v10 = vld [vmem:[%s1500_s0 + $0x1c0] sm:$0xff]  ;;  %v75_v11 = vld [vmem:[%s1500_s0 + $0x1c8] sm:$0xff]  ;;  %v109_v13 = vpack.c.bf16 %v73_v7, %v72_v6  ;;  %v94_v14 = vpack.c.bf16 %v43_v9, %v42_v8  ;;  %v44_v16 = vld [vmem:[%s1500_s0 + $0xd0] sm:$0xff] }
  0x13   :  { %v110_v15 = vpack.c.bf16 %v75_v11, %v74_v10  ;;  %v45_v17 = vld [vmem:[%s1500_s0 + $0xd8] sm:$0xff]  ;;  %v76_v18 = vld [vmem:[%s1500_s0 + $0x1d0] sm:$0xff]  ;;  %v46_v20 = vld [vmem:[%s1500_s0 + $0xe0] sm:$0xff] }
  0x14   :  { %v77_v19 = vld [vmem:[%s1500_s0 + $0x1d8] sm:$0xff]  ;;  %v47_v21 = vld [vmem:[%s1500_s0 + $0xe8] sm:$0xff]  ;;  %v78_v22 = vld [vmem:[%s1500_s0 + $0x1e0] sm:$0xff]  ;;  %v95_v24 = vpack.c.bf16 %v45_v17, %v44_v16 }
  0x15   :  { %v79_v23 = vld [vmem:[%s1500_s0 + $0x1e8] sm:$0xff]  ;;  %v111_v25 = vpack.c.bf16 %v77_v19, %v76_v18  ;;  %v96_v26 = vpack.c.bf16 %v47_v21, %v46_v20  ;;  %v48_v28 = vld [vmem:[%s1500_s0 + $0xf0] sm:$0xff]  ;;  %v49_v29 = vld [vmem:[%s1500_s0 + $0xf8] sm:$0xff] }
  0x16   :  { %794 = vmatmul.mubr.msk.bf16.gmra.mxu0 %vm115_vm1, %v87_v40  ;;  %v112_v27 = vpack.c.bf16 %v79_v23, %v78_v22  ;;  %v80_v30 = vld [vmem:[%s1500_s0 + $0x1f0] sm:$0xff]  ;;  %v81_v31 = vld [vmem:[%s1500_s0 + $0x1f8] sm:$0xff]  ;;  %v97_v32 = vpack.c.bf16 %v49_v29, %v48_v28  ;;  %v1108_v34 = vld [vmem:[%s1501_s2] ss:$0 sm:$0xff] }
  0x17   :  { %826 = vmatmul.mubr.msk.bf16.gmra.mxu1 %vm115_vm1, %v103_v41  ;;  %797 = vmatprep.mubr.msk.bf16.mxu0 %vm115_vm1, %v88_v42  ;;  %v113_v33 = vpack.c.bf16 %v81_v31, %v80_v30  ;;  %v1113_v36 = vld [vmem:[%s1502_s3] ss:$0 sm:$0xff] }
  0x18   :  { %829 = vmatprep.mubr.msk.bf16.mxu1 %vm115_vm1, %v104_v43 }
  0x1e   :  { %798 = vmatmul.mubr.msk.bf16.gmra.mxu0 %vm115_vm1, %v89_v52 }
  0x1f   :  { %830 = vmatmul.mubr.msk.bf16.gmra.mxu1 %vm115_vm1, %v105_v53  ;;  %801 = vmatprep.mubr.msk.bf16.mxu0 %vm115_vm1, %v90_v54 }
  0x20   :  { %833 = vmatprep.mubr.msk.bf16.mxu1 %vm115_vm1, %v106_v55 }
  0x26   :  { %802 = vmatmul.mubr.msk.bf16.gmra.mxu0 %vm115_vm1, %v91_v0 }
  0x27   :  { %834 = vmatmul.mubr.msk.bf16.gmra.mxu1 %vm115_vm1, %v107_v1  ;;  %805 = vmatprep.mubr.msk.bf16.mxu0 %vm115_vm1, %v92_v2 }
  0x28   :  { %837 = vmatprep.mubr.msk.bf16.mxu1 %vm115_vm1, %v108_v3 }
  0x2e   :  { %806 = vmatmul.mubr.msk.bf16.gmra.mxu0 %vm115_vm1, %v93_v12 }
  0x2f   :  { %838 = vmatmul.mubr.msk.bf16.gmra.mxu1 %vm115_vm1, %v109_v13  ;;  %809 = vmatprep.mubr.msk.bf16.mxu0 %vm115_vm1, %v94_v14 }
  0x30   :  { %841 = vmatprep.mubr.msk.bf16.mxu1 %vm115_vm1, %v110_v15 }
  0x36   :  { %810 = vmatmul.mubr.msk.bf16.gmra.mxu0 %vm115_vm1, %v95_v24 }
  0x37   :  { %842 = vmatmul.mubr.msk.bf16.gmra.mxu1 %vm115_vm1, %v111_v25  ;;  %813 = vmatprep.mubr.msk.bf16.mxu0 %vm115_vm1, %v96_v26 }
  0x38   :  { %845 = vmatprep.mubr.msk.bf16.mxu1 %vm115_vm1, %v112_v27 }
  0x3e   :  { %814 = vmatmul.mubr.msk.bf16.gmra.mxu0 %vm115_vm1, %v97_v32 }
  0x3f   :  { %846 = vmatmul.mubr.msk.bf16.gmra.mxu1 %vm115_vm1, %v113_v33 }
  0xc6   :  { %v787_v35 = vpop.f32.mrf.mxu0 }
  0xc7   :  { %v819_v37 = vpop.f32.mrf.mxu1  ;;  %v514_v38 = vmul.f32 %v787_v35, %v1108_v34 }
  0xc8   :  { %v546_v39 = vmul.f32 %v819_v37, %v1108_v34  ;;  %v250_v40 = vpop.f32.mrf.mxu0 }
  0xc9   :  { %v378_v41 = vpop.f32.mrf.mxu1  ;;  %v585_v42 = vadd.f32 %v1113_v36, %v514_v38  ;;  %v512_v44 = vmul.f32 %v1108_v34, %v250_v40 }
  0xca   :  { %v617_v43 = vadd.f32 %v1113_v36, %v546_v39  ;;  %v544_v45 = vmul.f32 %v1108_v34, %v378_v41  ;;  %v788_v46 = vpop.f32.mrf.mxu0 }
  0xcb   :  { %v820_v47 = vpop.f32.mrf.mxu1  ;;  %650 = vst.msk [vmem:[%s1503_s4 + $0x10] sm:$0xff] %vm647_vm2, %v585_v42  ;;  %v583_v48 = vadd.f32 %v1113_v36, %v512_v44  ;;  %v515_v50 = vmul.f32 %v788_v46, %v1108_v34 }
  0xcc   :  { %682 = vst.msk [vmem:[%s1503_s4 + $0x110] sm:$0xff] %vm647_vm2, %v617_v43  ;;  %v615_v49 = vadd.f32 %v1113_v36, %v544_v45  ;;  %v547_v51 = vmul.f32 %v820_v47, %v1108_v34  ;;  %v253_v52 = vpop.f32.mrf.mxu0 }
  0xcd   :  { %v381_v53 = vpop.f32.mrf.mxu1  ;;  %648 = vst.msk [vmem:[%s1503_s4] sm:$0xff] %vm647_vm2, %v583_v48  ;;  %v586_v54 = vadd.f32 %v1113_v36, %v515_v50  ;;  %v513_v56 = vmul.f32 %v1108_v34, %v253_v52 }
  0xce   :  { %680 = vst.msk [vmem:[%s1503_s4 + $0x100] sm:$0xff] %vm647_vm2, %v615_v49  ;;  %v618_v55 = vadd.f32 %v1113_v36, %v547_v51  ;;  %v545_v57 = vmul.f32 %v1108_v34, %v381_v53  ;;  %v791_v58 = vpop.f32.mrf.mxu0 }
  0xcf   :  { %v823_v59 = vpop.f32.mrf.mxu1  ;;  %651 = vst.msk [vmem:[%s1503_s4 + $0x18] sm:$0xff] %vm647_vm2, %v586_v54  ;;  %v584_v60 = vadd.f32 %v1113_v36, %v513_v56  ;;  %v518_v62 = vmul.f32 %v791_v58, %v1108_v34 }
  0xd0   :  { %683 = vst.msk [vmem:[%s1503_s4 + $0x118] sm:$0xff] %vm647_vm2, %v618_v55  ;;  %v616_v61 = vadd.f32 %v1113_v36, %v545_v57  ;;  %v550_v63 = vmul.f32 %v823_v59, %v1108_v34  ;;  %v266_v0 = vpop.f32.mrf.mxu0 }
  0xd1   :  { %v394_v1 = vpop.f32.mrf.mxu1  ;;  %649 = vst.msk [vmem:[%s1503_s4 + $0x8] sm:$0xff] %vm647_vm2, %v584_v60  ;;  %v589_v2 = vadd.f32 %v1113_v36, %v518_v62  ;;  %v516_v4 = vmul.f32 %v1108_v34, %v266_v0 }
  0xd2   :  { %681 = vst.msk [vmem:[%s1503_s4 + $0x108] sm:$0xff] %vm647_vm2, %v616_v61  ;;  %v621_v3 = vadd.f32 %v1113_v36, %v550_v63  ;;  %v548_v5 = vmul.f32 %v1108_v34, %v394_v1  ;;  %v792_v6 = vpop.f32.mrf.mxu0 }
  0xd3   :  { %v824_v7 = vpop.f32.mrf.mxu1  ;;  %654 = vst.msk [vmem:[%s1503_s4 + $0x30] sm:$0xff] %vm647_vm2, %v589_v2  ;;  %v587_v8 = vadd.f32 %v1113_v36, %v516_v4  ;;  %v519_v10 = vmul.f32 %v792_v6, %v1108_v34 }
  0xd4   :  { %686 = vst.msk [vmem:[%s1503_s4 + $0x130] sm:$0xff] %vm647_vm2, %v621_v3  ;;  %v619_v9 = vadd.f32 %v1113_v36, %v548_v5  ;;  %v551_v11 = vmul.f32 %v824_v7, %v1108_v34  ;;  %v269_v12 = vpop.f32.mrf.mxu0 }
  0xd5   :  { %v397_v13 = vpop.f32.mrf.mxu1  ;;  %652 = vst.msk [vmem:[%s1503_s4 + $0x20] sm:$0xff] %vm647_vm2, %v587_v8  ;;  %v590_v14 = vadd.f32 %v1113_v36, %v519_v10  ;;  %v517_v16 = vmul.f32 %v1108_v34, %v269_v12 }
  0xd6   :  { %684 = vst.msk [vmem:[%s1503_s4 + $0x120] sm:$0xff] %vm647_vm2, %v619_v9  ;;  %v622_v15 = vadd.f32 %v1113_v36, %v551_v11  ;;  %v549_v17 = vmul.f32 %v1108_v34, %v397_v13  ;;  %v795_v18 = vpop.f32.mrf.mxu0 }
  0xd7   :  { %v827_v19 = vpop.f32.mrf.mxu1  ;;  %655 = vst.msk [vmem:[%s1503_s4 + $0x38] sm:$0xff] %vm647_vm2, %v590_v14  ;;  %v588_v20 = vadd.f32 %v1113_v36, %v517_v16  ;;  %v522_v22 = vmul.f32 %v795_v18, %v1108_v34 }
  0xd8   :  { %687 = vst.msk [vmem:[%s1503_s4 + $0x138] sm:$0xff] %vm647_vm2, %v622_v15  ;;  %v620_v21 = vadd.f32 %v1113_v36, %v549_v17  ;;  %v554_v23 = vmul.f32 %v827_v19, %v1108_v34  ;;  %v282_v24 = vpop.f32.mrf.mxu0 }
  0xd9   :  { %v410_v25 = vpop.f32.mrf.mxu1  ;;  %653 = vst.msk [vmem:[%s1503_s4 + $0x28] sm:$0xff] %vm647_vm2, %v588_v20  ;;  %v593_v26 = vadd.f32 %v1113_v36, %v522_v22  ;;  %v520_v28 = vmul.f32 %v1108_v34, %v282_v24 }
  0xda   :  { %685 = vst.msk [vmem:[%s1503_s4 + $0x128] sm:$0xff] %vm647_vm2, %v620_v21  ;;  %v625_v27 = vadd.f32 %v1113_v36, %v554_v23  ;;  %v552_v29 = vmul.f32 %v1108_v34, %v410_v25  ;;  %v796_v30 = vpop.f32.mrf.mxu0 }
  0xdb   :  { %v828_v31 = vpop.f32.mrf.mxu1  ;;  %658 = vst.msk [vmem:[%s1503_s4 + $0x50] sm:$0xff] %vm647_vm2, %v593_v26  ;;  %v591_v32 = vadd.f32 %v1113_v36, %v520_v28  ;;  %v523_v35 = vmul.f32 %v796_v30, %v1108_v34 }
  0xdc   :  { %690 = vst.msk [vmem:[%s1503_s4 + $0x150] sm:$0xff] %vm647_vm2, %v625_v27  ;;  %v623_v33 = vadd.f32 %v1113_v36, %v552_v29  ;;  %v555_v37 = vmul.f32 %v828_v31, %v1108_v34  ;;  %v285_v38 = vpop.f32.mrf.mxu0 }
  0xdd   :  { %v413_v39 = vpop.f32.mrf.mxu1  ;;  %656 = vst.msk [vmem:[%s1503_s4 + $0x40] sm:$0xff] %vm647_vm2, %v591_v32  ;;  %v594_v40 = vadd.f32 %v1113_v36, %v523_v35  ;;  %v521_v42 = vmul.f32 %v1108_v34, %v285_v38 }
  0xde   :  { %688 = vst.msk [vmem:[%s1503_s4 + $0x140] sm:$0xff] %vm647_vm2, %v623_v33  ;;  %v626_v41 = vadd.f32 %v1113_v36, %v555_v37  ;;  %v553_v43 = vmul.f32 %v1108_v34, %v413_v39  ;;  %v799_v44 = vpop.f32.mrf.mxu0 }
  0xdf   :  { %v831_v45 = vpop.f32.mrf.mxu1  ;;  %659 = vst.msk [vmem:[%s1503_s4 + $0x58] sm:$0xff] %vm647_vm2, %v594_v40  ;;  %v592_v46 = vadd.f32 %v1113_v36, %v521_v42  ;;  %v526_v48 = vmul.f32 %v799_v44, %v1108_v34 }
  0xe0   :  { %691 = vst.msk [vmem:[%s1503_s4 + $0x158] sm:$0xff] %vm647_vm2, %v626_v41  ;;  %v624_v47 = vadd.f32 %v1113_v36, %v553_v43  ;;  %v558_v49 = vmul.f32 %v831_v45, %v1108_v34  ;;  %v298_v50 = vpop.f32.mrf.mxu0 }
  0xe1   :  { %v426_v51 = vpop.f32.mrf.mxu1  ;;  %657 = vst.msk [vmem:[%s1503_s4 + $0x48] sm:$0xff] %vm647_vm2, %v592_v46  ;;  %v597_v52 = vadd.f32 %v1113_v36, %v526_v48  ;;  %v524_v54 = vmul.f32 %v1108_v34, %v298_v50 }
  0xe2   :  { %689 = vst.msk [vmem:[%s1503_s4 + $0x148] sm:$0xff] %vm647_vm2, %v624_v47  ;;  %v629_v53 = vadd.f32 %v1113_v36, %v558_v49  ;;  %v556_v55 = vmul.f32 %v1108_v34, %v426_v51  ;;  %v800_v56 = vpop.f32.mrf.mxu0 }
  0xe3   :  { %v832_v57 = vpop.f32.mrf.mxu1  ;;  %662 = vst.msk [vmem:[%s1503_s4 + $0x70] sm:$0xff] %vm647_vm2, %v597_v52  ;;  %v595_v58 = vadd.f32 %v1113_v36, %v524_v54  ;;  %v527_v60 = vmul.f32 %v800_v56, %v1108_v34 }
  0xe4   :  { %694 = vst.msk [vmem:[%s1503_s4 + $0x170] sm:$0xff] %vm647_vm2, %v629_v53  ;;  %v627_v59 = vadd.f32 %v1113_v36, %v556_v55  ;;  %v559_v61 = vmul.f32 %v832_v57, %v1108_v34  ;;  %v301_v62 = vpop.f32.mrf.mxu0 }
  0xe5   :  { %v429_v63 = vpop.f32.mrf.mxu1  ;;  %660 = vst.msk [vmem:[%s1503_s4 + $0x60] sm:$0xff] %vm647_vm2, %v595_v58  ;;  %v598_v0 = vadd.f32 %v1113_v36, %v527_v60  ;;  %v525_v2 = vmul.f32 %v1108_v34, %v301_v62 }
  0xe6   :  { %692 = vst.msk [vmem:[%s1503_s4 + $0x160] sm:$0xff] %vm647_vm2, %v627_v59  ;;  %v630_v1 = vadd.f32 %v1113_v36, %v559_v61  ;;  %v557_v3 = vmul.f32 %v1108_v34, %v429_v63  ;;  %v803_v4 = vpop.f32.mrf.mxu0 }
  0xe7   :  { %v835_v5 = vpop.f32.mrf.mxu1  ;;  %663 = vst.msk [vmem:[%s1503_s4 + $0x78] sm:$0xff] %vm647_vm2, %v598_v0  ;;  %v596_v6 = vadd.f32 %v1113_v36, %v525_v2  ;;  %v530_v8 = vmul.f32 %v803_v4, %v1108_v34 }
  0xe8   :  { %695 = vst.msk [vmem:[%s1503_s4 + $0x178] sm:$0xff] %vm647_vm2, %v630_v1  ;;  %v628_v7 = vadd.f32 %v1113_v36, %v557_v3  ;;  %v562_v9 = vmul.f32 %v835_v5, %v1108_v34  ;;  %v314_v10 = vpop.f32.mrf.mxu0 }
  0xe9   :  { %v442_v11 = vpop.f32.mrf.mxu1  ;;  %661 = vst.msk [vmem:[%s1503_s4 + $0x68] sm:$0xff] %vm647_vm2, %v596_v6  ;;  %v601_v12 = vadd.f32 %v1113_v36, %v530_v8  ;;  %v528_v14 = vmul.f32 %v1108_v34, %v314_v10 }
  0xea   :  { %693 = vst.msk [vmem:[%s1503_s4 + $0x168] sm:$0xff] %vm647_vm2, %v628_v7  ;;  %v633_v13 = vadd.f32 %v1113_v36, %v562_v9  ;;  %v560_v15 = vmul.f32 %v1108_v34, %v442_v11  ;;  %v804_v16 = vpop.f32.mrf.mxu0 }
  0xeb   :  { %v836_v17 = vpop.f32.mrf.mxu1  ;;  %666 = vst.msk [vmem:[%s1503_s4 + $0x90] sm:$0xff] %vm647_vm2, %v601_v12  ;;  %v599_v18 = vadd.f32 %v1113_v36, %v528_v14  ;;  %v531_v20 = vmul.f32 %v804_v16, %v1108_v34 }
  0xec   :  { %698 = vst.msk [vmem:[%s1503_s4 + $0x190] sm:$0xff] %vm647_vm2, %v633_v13  ;;  %v631_v19 = vadd.f32 %v1113_v36, %v560_v15  ;;  %v563_v21 = vmul.f32 %v836_v17, %v1108_v34  ;;  %v317_v22 = vpop.f32.mrf.mxu0 }
  0xed   :  { %v445_v23 = vpop.f32.mrf.mxu1  ;;  %664 = vst.msk [vmem:[%s1503_s4 + $0x80] sm:$0xff] %vm647_vm2, %v599_v18  ;;  %v602_v24 = vadd.f32 %v1113_v36, %v531_v20  ;;  %v529_v26 = vmul.f32 %v1108_v34, %v317_v22 }
  0xee   :  { %696 = vst.msk [vmem:[%s1503_s4 + $0x180] sm:$0xff] %vm647_vm2, %v631_v19  ;;  %v634_v25 = vadd.f32 %v1113_v36, %v563_v21  ;;  %v561_v27 = vmul.f32 %v1108_v34, %v445_v23  ;;  %v807_v28 = vpop.f32.mrf.mxu0 }
  0xef   :  { %v839_v29 = vpop.f32.mrf.mxu1  ;;  %667 = vst.msk [vmem:[%s1503_s4 + $0x98] sm:$0xff] %vm647_vm2, %v602_v24  ;;  %v600_v30 = vadd.f32 %v1113_v36, %v529_v26  ;;  %v534_v32 = vmul.f32 %v807_v28, %v1108_v34 }
  0xf0   :  { %699 = vst.msk [vmem:[%s1503_s4 + $0x198] sm:$0xff] %vm647_vm2, %v634_v25  ;;  %v632_v31 = vadd.f32 %v1113_v36, %v561_v27  ;;  %v566_v33 = vmul.f32 %v839_v29, %v1108_v34  ;;  %v330_v35 = vpop.f32.mrf.mxu0 }
  0xf1   :  { %v458_v37 = vpop.f32.mrf.mxu1  ;;  %665 = vst.msk [vmem:[%s1503_s4 + $0x88] sm:$0xff] %vm647_vm2, %v600_v30  ;;  %v605_v38 = vadd.f32 %v1113_v36, %v534_v32  ;;  %v532_v40 = vmul.f32 %v1108_v34, %v330_v35 }
  0xf2   :  { %697 = vst.msk [vmem:[%s1503_s4 + $0x188] sm:$0xff] %vm647_vm2, %v632_v31  ;;  %v637_v39 = vadd.f32 %v1113_v36, %v566_v33  ;;  %v564_v41 = vmul.f32 %v1108_v34, %v458_v37  ;;  %v808_v42 = vpop.f32.mrf.mxu0 }
  0xf3   :  { %v840_v43 = vpop.f32.mrf.mxu1  ;;  %670 = vst.msk [vmem:[%s1503_s4 + $0xb0] sm:$0xff] %vm647_vm2, %v605_v38  ;;  %v603_v44 = vadd.f32 %v1113_v36, %v532_v40  ;;  %v535_v46 = vmul.f32 %v808_v42, %v1108_v34 }
  0xf4   :  { %702 = vst.msk [vmem:[%s1503_s4 + $0x1b0] sm:$0xff] %vm647_vm2, %v637_v39  ;;  %v635_v45 = vadd.f32 %v1113_v36, %v564_v41  ;;  %v567_v47 = vmul.f32 %v840_v43, %v1108_v34  ;;  %v333_v48 = vpop.f32.mrf.mxu0 }
  0xf5   :  { %v461_v49 = vpop.f32.mrf.mxu1  ;;  %668 = vst.msk [vmem:[%s1503_s4 + $0xa0] sm:$0xff] %vm647_vm2, %v603_v44  ;;  %v606_v50 = vadd.f32 %v1113_v36, %v535_v46  ;;  %v533_v52 = vmul.f32 %v1108_v34, %v333_v48 }
  0xf6   :  { %700 = vst.msk [vmem:[%s1503_s4 + $0x1a0] sm:$0xff] %vm647_vm2, %v635_v45  ;;  %v638_v51 = vadd.f32 %v1113_v36, %v567_v47  ;;  %v565_v53 = vmul.f32 %v1108_v34, %v461_v49  ;;  %v811_v54 = vpop.f32.mrf.mxu0 }
  0xf7   :  { %v843_v55 = vpop.f32.mrf.mxu1  ;;  %671 = vst.msk [vmem:[%s1503_s4 + $0xb8] sm:$0xff] %vm647_vm2, %v606_v50  ;;  %v604_v56 = vadd.f32 %v1113_v36, %v533_v52  ;;  %v538_v58 = vmul.f32 %v811_v54, %v1108_v34 }
  0xf8   :  { %703 = vst.msk [vmem:[%s1503_s4 + $0x1b8] sm:$0xff] %vm647_vm2, %v638_v51  ;;  %v636_v57 = vadd.f32 %v1113_v36, %v565_v53  ;;  %v570_v59 = vmul.f32 %v843_v55, %v1108_v34  ;;  %v346_v60 = vpop.f32.mrf.mxu0 }
  0xf9   :  { %v474_v61 = vpop.f32.mrf.mxu1  ;;  %669 = vst.msk [vmem:[%s1503_s4 + $0xa8] sm:$0xff] %vm647_vm2, %v604_v56  ;;  %v609_v62 = vadd.f32 %v1113_v36, %v538_v58  ;;  %v536_v0 = vmul.f32 %v1108_v34, %v346_v60 }
  0xfa   :  { %701 = vst.msk [vmem:[%s1503_s4 + $0x1a8] sm:$0xff] %vm647_vm2, %v636_v57  ;;  %v641_v63 = vadd.f32 %v1113_v36, %v570_v59  ;;  %v568_v1 = vmul.f32 %v1108_v34, %v474_v61  ;;  %v812_v2 = vpop.f32.mrf.mxu0 }
  0xfb   :  { %v844_v3 = vpop.f32.mrf.mxu1  ;;  %674 = vst.msk [vmem:[%s1503_s4 + $0xd0] sm:$0xff] %vm647_vm2, %v609_v62  ;;  %v607_v4 = vadd.f32 %v1113_v36, %v536_v0  ;;  %v539_v6 = vmul.f32 %v812_v2, %v1108_v34 }
  0xfc   :  { %706 = vst.msk [vmem:[%s1503_s4 + $0x1d0] sm:$0xff] %vm647_vm2, %v641_v63  ;;  %v639_v5 = vadd.f32 %v1113_v36, %v568_v1  ;;  %v571_v7 = vmul.f32 %v844_v3, %v1108_v34  ;;  %v349_v8 = vpop.f32.mrf.mxu0 }
  0xfd   :  { %v477_v9 = vpop.f32.mrf.mxu1  ;;  %672 = vst.msk [vmem:[%s1503_s4 + $0xc0] sm:$0xff] %vm647_vm2, %v607_v4  ;;  %v610_v10 = vadd.f32 %v1113_v36, %v539_v6  ;;  %v537_v12 = vmul.f32 %v1108_v34, %v349_v8 }
  0xfe   :  { %704 = vst.msk [vmem:[%s1503_s4 + $0x1c0] sm:$0xff] %vm647_vm2, %v639_v5  ;;  %v642_v11 = vadd.f32 %v1113_v36, %v571_v7  ;;  %v569_v13 = vmul.f32 %v1108_v34, %v477_v9  ;;  %v815_v14 = vpop.f32.mrf.mxu0 }
  0xff   :  { %v847_v15 = vpop.f32.mrf.mxu1  ;;  %675 = vst.msk [vmem:[%s1503_s4 + $0xd8] sm:$0xff] %vm647_vm2, %v610_v10  ;;  %v608_v16 = vadd.f32 %v1113_v36, %v537_v12  ;;  %v542_v18 = vmul.f32 %v815_v14, %v1108_v34 }
 0x100   :  { %707 = vst.msk [vmem:[%s1503_s4 + $0x1d8] sm:$0xff] %vm647_vm2, %v642_v11  ;;  %v640_v17 = vadd.f32 %v1113_v36, %v569_v13  ;;  %v574_v19 = vmul.f32 %v847_v15, %v1108_v34  ;;  %v362_v20 = vpop.f32.mrf.mxu0 }
 0x101   :  { %v490_v21 = vpop.f32.mrf.mxu1  ;;  %673 = vst.msk [vmem:[%s1503_s4 + $0xc8] sm:$0xff] %vm647_vm2, %v608_v16  ;;  %v613_v22 = vadd.f32 %v1113_v36, %v542_v18  ;;  %v540_v24 = vmul.f32 %v1108_v34, %v362_v20 }
 0x102   :  { %705 = vst.msk [vmem:[%s1503_s4 + $0x1c8] sm:$0xff] %vm647_vm2, %v640_v17  ;;  %v645_v23 = vadd.f32 %v1113_v36, %v574_v19  ;;  %v572_v25 = vmul.f32 %v1108_v34, %v490_v21  ;;  %v816_v26 = vpop.f32.mrf.mxu0 }
 0x103   :  { %v848_v27 = vpop.f32.mrf.mxu1  ;;  %678 = vst.msk [vmem:[%s1503_s4 + $0xf0] sm:$0xff] %vm647_vm2, %v613_v22  ;;  %v611_v28 = vadd.f32 %v1113_v36, %v540_v24  ;;  %v543_v30 = vmul.f32 %v816_v26, %v1108_v34 }
 0x104   :  { %710 = vst.msk [vmem:[%s1503_s4 + $0x1f0] sm:$0xff] %vm647_vm2, %v645_v23  ;;  %v643_v29 = vadd.f32 %v1113_v36, %v572_v25  ;;  %v575_v31 = vmul.f32 %v848_v27, %v1108_v34  ;;  %v365_v32 = vpop.f32.mrf.mxu0 }
 0x105   :  { %v493_v33 = vpop.f32.mrf.mxu1  ;;  %676 = vst.msk [vmem:[%s1503_s4 + $0xe0] sm:$0xff] %vm647_vm2, %v611_v28  ;;  %v614_v35 = vadd.f32 %v1113_v36, %v543_v30  ;;  %v541_v38 = vmul.f32 %v1108_v34, %v365_v32 }
 0x106   :  { %708 = vst.msk [vmem:[%s1503_s4 + $0x1e0] sm:$0xff] %vm647_vm2, %v643_v29  ;;  %v646_v37 = vadd.f32 %v1113_v36, %v575_v31  ;;  %v573_v39 = vmul.f32 %v1108_v34, %v493_v33 }
 0x107   :  { %679 = vst.msk [vmem:[%s1503_s4 + $0xf8] sm:$0xff] %vm647_vm2, %v614_v35  ;;  %v612_v40 = vadd.f32 %v1113_v36, %v541_v38 }
 0x108   :  { %711 = vst.msk [vmem:[%s1503_s4 + $0x1f8] sm:$0xff] %vm647_vm2, %v646_v37  ;;  %v644_v41 = vadd.f32 %v1113_v36, %v573_v39 }
 0x109   :  { %677 = vst.msk [vmem:[%s1503_s4 + $0xe8] sm:$0xff] %vm647_vm2, %v612_v40 }
 0x10a   :  { %709 = vst.msk [vmem:[%s1503_s4 + $0x1e8] sm:$0xff] %vm647_vm2, %v644_v41 }

// kernel: bilevel_routing_deformable_attention.8
= control target key start
LH: loop header
LB: loop body
LE: loop exit
PB: predicated region body
PF: predicated region fallthrough
CT: control target
= control target key end

     0   :  { %s1598_s12 = smov 0   ;;  %s1600_s13 = smov 0   ;;  %s2205_s0 = inlined_call_operand.vmem [shape: f32[2,18,18,8], index: 0, kind: input, shape index: {}]   ;;  %s2206_s1 = inlined_call_operand.vmem [shape: f32[9,8], index: 1, kind: input, shape index: {}]   ;;  %s2207_s2 = inlined_call_operand.vmem [shape: f32[1,8], index: 2, kind: input, shape index: {}]   ;;  %s2208_s3 = inlined_call_operand.vmem [shape: f32[2,16,16,8], index: 3, kind: output, shape index: {}]  }
   0x1   :  { %s1602_s14 = smov 0  }
   0x2 LB: > { %s25_s15 = sadd.s32 1, %s1572_s13  ;;  %p1326_p0 = scmp.ge.s32.totalorder %s1576_s14, 1  ;;  %s1576_s14 = sphi %s1602_s14, %s13_s14   ;;  %s1572_s13 = sphi %s1600_s13, %s2210_s13   ;;  %s1568_s12 = sphi %s1598_s12, %s2209_s12  }
   0x3   : > { %p27_p1 = scmp.ge.s32.totalorder %s25_s15, 2  ;;  %p173_p2 = scmp.lt.s32.totalorder %s1576_s14, 3 }
   0x5   : > { %s2212_s15 = smov (%p27_p1, %s25_s15), 0  ;;  %p174_p3 = pnand %p1326_p0, %p173_p2 }
   0x6   : > { %p210_p4 = scmp.lt.s32.totalorder (!%p174_p3), %s1568_s12, 1 }
   0x7   : > { %177 = sbr.rel (%p174_p3) target bundleno = 175 (0xaf), region = 32 }
   0xc   : > { %v267_v0 = vlaneseq  ;;  %s2214_s12 = smov (!%p210_p4, %s1568_s12), 1  ;;  %v233_v2 = vld [vmem:[%s2206_s1] sm:$0xff]  ;;  %v1654_v27 = vld [vmem:[%s2206_s1 + $0x8] ss:$0 sm:$0xff]  ;;  %vm1176_vm0 = vcmask 64512  }
   0xd   : > { %s1527_s18 = smul.u32 432, %s2214_s12  ;;  %s1526_s24 = sshll.u32 %s2214_s12, 8 }
   0xe   : > { %v268_v1 = vshrl.u32 %v267_v0, 7  ;;  %s1746_s29 = scalar_lea.vmem %s2208_s3, %s1526_s24 }
   0xf   : > { %s1625_s21 = scalar_lea.vmem %s2205_s0, %s1527_s18 }
  0x10   : > { %v269_v3 = vsub.s32 0, %v268_v1  ;;  %v369_v4 = vsub.s32 1, %v268_v1  ;;  %v469_v5 = vsub.s32 2, %v268_v1  ;;  %v570_v6 = vsub.s32 3, %v268_v1  ;;  %v235_v15 = vld [vmem:[%s1625_s21] sm:$0xff]  ;;  %v1330_v24 = vld [vmem:[%s1625_s21 + $0x18] sm:$0xff] }
  0x11   : > { %v670_v7 = vsub.s32 4, %v268_v1  ;;  %v770_v8 = vsub.s32 5, %v268_v1  ;;  %v871_v9 = vsub.s32 6, %v268_v1  ;;  %v971_v10 = vsub.s32 7, %v268_v1  ;;  %v335_v16 = vld [vmem:[%s1625_s21 + $0x1] sm:$0xff]  ;;  %v1362_v25 = vld [vmem:[%s1625_s21 + $0x19] sm:$0xff] }
  0x12   : > { %v1627_v11 = vrot.slane %v233_v2, %v269_v3  ;;  %v1629_v12 = vrot.slane %v233_v2, %v369_v4  ;;  %v1631_v13 = vrot.slane %v233_v2, %v469_v5  ;;  %v1633_v14 = vrot.slane %v233_v2, %v570_v6  ;;  %v435_v17 = vld [vmem:[%s1625_s21 + $0x2] sm:$0xff]  ;;  %v1394_v29 = vld [vmem:[%s1625_s21 + $0x1a] sm:$0xff]  ;;  %v436_v35 = vld [vmem:[%s1625_s21 + $0xa] sm:$0xff] }
  0x13   : > { %v1638_v18 = vrot.slane %v233_v2, %v670_v7  ;;  %v1640_v19 = vrot.slane %v233_v2, %v770_v8  ;;  %v1642_v20 = vrot.slane %v233_v2, %v871_v9  ;;  %v1649_v26 = vrot.slane %v233_v2, %v971_v10  ;;  %v236_v33 = vld [vmem:[%s1625_s21 + $0x8] sm:$0xff]  ;;  %v1426_v37 = vld [vmem:[%s1625_s21 + $0x30] sm:$0xff]  ;;  %v1331_v48 = vld [vmem:[%s1625_s21 + $0x20] sm:$0xff] }
  0x14   : > { %v271_v21 = vmul.f32 %v1627_v11, %v235_v15  ;;  %v371_v22 = vmul.f32 %v1629_v12, %v335_v16  ;;  %v471_v23 = vmul.f32 %v1631_v13, %v435_v17  ;;  %v572_v28 = vmul.f32 %v1330_v24, %v1633_v14  ;;  %v336_v34 = vld [vmem:[%s1625_s21 + $0x9] sm:$0xff]  ;;  %v1458_v38 = vld [vmem:[%s1625_s21 + $0x31] sm:$0xff]  ;;  %v1363_v49 = vld [vmem:[%s1625_s21 + $0x21] sm:$0xff] }
  0x15   : > { %v672_v31 = vmul.f32 %v1362_v25, %v1638_v18  ;;  %v772_v32 = vmul.f32 %v1394_v29, %v1640_v19  ;;  %v273_v36 = vmul.f32 %v1330_v24, %v1627_v11  ;;  %v1490_v39 = vld [vmem:[%s1625_s21 + $0x32] sm:$0xff]  ;;  %v272_v40 = vmul.f32 %v1627_v11, %v236_v33  ;;  %v1395_v50 = vld [vmem:[%s1625_s21 + $0x22] sm:$0xff]  ;;  %v1687_v58 = vld [vmem:[%s1625_s21 + $0x3a] sm:$0xff] }
  0x16   : > { %v403_v30 = vadd.f32 %v371_v22, %v271_v21  ;;  %v372_v41 = vmul.f32 %v1629_v12, %v336_v34  ;;  %v472_v42 = vmul.f32 %v1631_v13, %v436_v35  ;;  %v373_v43 = vmul.f32 %v1362_v25, %v1629_v12  ;;  %v1681_v56 = vld [vmem:[%s1625_s21 + $0x38] sm:$0xff]  ;;  %v1700_v7 = vld [vmem:[%s1625_s21 + $0x48] sm:$0xff] }
  0x17   : > { %v873_v45 = vmul.f32 %v1426_v37, %v1642_v20  ;;  %v973_v46 = vmul.f32 %v1458_v38, %v1649_v26  ;;  %v1073_v47 = vmul.f32 %v1654_v27, %v1490_v39  ;;  %v573_v52 = vmul.f32 %v1331_v48, %v1633_v14  ;;  %v1684_v57 = vld [vmem:[%s1625_s21 + $0x39] sm:$0xff]  ;;  %v1703_v8 = vld [vmem:[%s1625_s21 + $0x49] sm:$0xff] }
  0x18   : > { %v503_v44 = vadd.f32 %v471_v23, %v403_v30  ;;  %v404_v51 = vadd.f32 %v372_v41, %v272_v40  ;;  %v673_v53 = vmul.f32 %v1363_v49, %v1638_v18  ;;  %v773_v54 = vmul.f32 %v1395_v50, %v1640_v19  ;;  %v1713_v23 = vld [vmem:[%s1625_s21 + $0x4a] sm:$0xff] }
  0x19   : > { %v405_v59 = vadd.f32 %v373_v43, %v273_v36  ;;  %v473_v60 = vmul.f32 %v1394_v29, %v1631_v13  ;;  %v574_v61 = vmul.f32 %v1426_v37, %v1633_v14  ;;  %v874_v63 = vmul.f32 %v1681_v56, %v1642_v20  ;;  %v1724_v36 = vld [vmem:[%s1625_s21 + $0x50] sm:$0xff] }
  0x1a   : > { %v604_v55 = vadd.f32 %v572_v28, %v503_v44  ;;  %v504_v62 = vadd.f32 %v472_v42, %v404_v51  ;;  %v974_v0 = vmul.f32 %v1684_v57, %v1649_v26  ;;  %v1074_v1 = vmul.f32 %v1654_v27, %v1687_v58  ;;  %v1461_v51 = vld [vmem:[%s1625_s21 + $0x51] sm:$0xff] }
  0x1b   : > { %v505_v3 = vadd.f32 %v473_v60, %v405_v59  ;;  %v674_v4 = vmul.f32 %v1458_v38, %v1638_v18  ;;  %v774_v5 = vmul.f32 %v1490_v39, %v1640_v19  ;;  %v274_v9 = vmul.f32 %v1331_v48, %v1627_v11  ;;  %v1735_v48 = vld [vmem:[%s2207_s2] ss:$0 sm:$0xff] }
  0x1c   : > { %v704_v2 = vadd.f32 %v672_v31, %v604_v55  ;;  %v605_v6 = vadd.f32 %v573_v52, %v504_v62  ;;  %v374_v10 = vmul.f32 %v1363_v49, %v1629_v12  ;;  %v474_v15 = vmul.f32 %v1395_v50, %v1631_v13  ;;  %v1493_v52 = vld [vmem:[%s1625_s21 + $0x52] sm:$0xff] }
  0x1d   : > { %v606_v17 = vadd.f32 %v574_v61, %v505_v3  ;;  %v875_v21 = vmul.f32 %v1700_v7, %v1642_v20  ;;  %v975_v22 = vmul.f32 %v1703_v8, %v1649_v26  ;;  %v1075_v25 = vmul.f32 %v1654_v27, %v1713_v23 }
  0x1e   : > { %v804_v16 = vadd.f32 %v772_v32, %v704_v2  ;;  %v705_v24 = vadd.f32 %v673_v53, %v605_v6  ;;  %v406_v28 = vadd.f32 %v374_v10, %v274_v9  ;;  %v575_v29 = vmul.f32 %v1681_v56, %v1633_v14 }
  0x1f   : > { %v706_v31 = vadd.f32 %v674_v4, %v606_v17  ;;  %v675_v32 = vmul.f32 %v1684_v57, %v1638_v18  ;;  %v775_v33 = vmul.f32 %v1687_v58, %v1640_v19  ;;  %v275_v40 = vmul.f32 %v1426_v37, %v1627_v11 }
  0x20   : > { %v905_v30 = vadd.f32 %v873_v45, %v804_v16  ;;  %v805_v34 = vadd.f32 %v773_v54, %v705_v24  ;;  %v506_v35 = vadd.f32 %v474_v15, %v406_v28  ;;  %v375_v41 = vmul.f32 %v1458_v38, %v1629_v12 }
  0x21   : > { %v806_v43 = vadd.f32 %v774_v5, %v706_v31  ;;  %v876_v44 = vmul.f32 %v1724_v36, %v1642_v20  ;;  %v475_v45 = vmul.f32 %v1490_v39, %v1631_v13  ;;  %v576_v38 = vmul.f32 %v1700_v7, %v1633_v14 }
  0x22   : > { %v1005_v42 = vadd.f32 %v973_v46, %v905_v30  ;;  %v906_v49 = vadd.f32 %v874_v63, %v805_v34  ;;  %v607_v50 = vadd.f32 %v575_v29, %v506_v35  ;;  %v407_v37 = vadd.f32 %v375_v41, %v275_v40  ;;  %v1494_v29 = vld [vmem:[%s1625_s21 + $0x62] sm:$0xff] }
  0x23   : > { %v907_v53 = vadd.f32 %v875_v21, %v806_v43  ;;  %v976_v54 = vmul.f32 %v1461_v51, %v1649_v26  ;;  %v1076_v39 = vmul.f32 %v1654_v27, %v1493_v52  ;;  %v676_v61 = vmul.f32 %v1703_v8, %v1638_v18  ;;  %v1462_v21 = vld [vmem:[%s1625_s21 + $0x61] sm:$0xff] }
  0x24   : > { %v1105_v46 = vadd.f32 %v1073_v47, %v1005_v42  ;;  %v1006_v55 = vadd.f32 %v974_v0, %v906_v49  ;;  %v707_v59 = vadd.f32 %v675_v32, %v607_v50  ;;  %v507_v60 = vadd.f32 %v475_v45, %v407_v37  ;;  %v1430_v0 = vld [vmem:[%s1625_s21 + $0x60] sm:$0xff]  ;;  %v1431_v43 = vld [vmem:[%s1625_s21 + $0x68] sm:$0xff] }
  0x25   : > { %v1007_v62 = vadd.f32 %v975_v22, %v907_v53  ;;  %v776_v63 = vmul.f32 %v1713_v23, %v1640_v19  ;;  %v276_v2 = vmul.f32 %v1681_v56, %v1627_v11  ;;  %v376_v6 = vmul.f32 %v1684_v57, %v1629_v12 }
  0x26   : > { %v1144_v47 = vadd.f32 %v1735_v48, %v1105_v46  ;;  %v1106_v3 = vadd.f32 %v1074_v1, %v1006_v55  ;;  %v807_v4 = vadd.f32 %v775_v33, %v707_v59  ;;  %v608_v5 = vadd.f32 %v576_v38, %v507_v60  ;;  %v1495_v38 = vld [vmem:[%s1625_s21 + $0x6a] sm:$0xff] }
  0x27   : > { %v1107_v9 = vadd.f32 %v1075_v25, %v1007_v62  ;;  %v877_v10 = vmul.f32 %v1430_v0, %v1642_v20  ;;  %v476_v15 = vmul.f32 %v1687_v58, %v1631_v13  ;;  %v577_v56 = vmul.f32 %v1724_v36, %v1633_v14 }
  0x28   : > { %1177 = vst.msk [vmem:[%s1746_s29] sm:$0xff] %vm1176_vm0, %v1144_v47  ;;  %v1145_v1 = vadd.f32 %v1735_v48, %v1106_v3  ;;  %v908_v16 = vadd.f32 %v876_v44, %v807_v4  ;;  %v708_v17 = vadd.f32 %v676_v61, %v608_v5  ;;  %v408_v22 = vadd.f32 %v376_v6, %v276_v2  ;;  %v1464_v6 = vld [vmem:[%s1625_s21 + $0x79] sm:$0xff] }
  0x29   : > { %v1146_v57 = vadd.f32 %v1735_v48, %v1107_v9  ;;  %v977_v24 = vmul.f32 %v1462_v21, %v1649_v26  ;;  %v677_v30 = vmul.f32 %v1461_v51, %v1638_v18  ;;  %v1077_v31 = vmul.f32 %v1654_v27, %v1494_v29 }
  0x2a   : > { %1178 = vst.msk [vmem:[%s1746_s29 + $0x8] sm:$0xff] %vm1176_vm0, %v1145_v1  ;;  %v1008_v25 = vadd.f32 %v976_v54, %v908_v16  ;;  %v808_v28 = vadd.f32 %v776_v63, %v708_v17  ;;  %v508_v58 = vadd.f32 %v476_v15, %v408_v22  ;;  %v277_v32 = vmul.f32 %v1700_v7, %v1627_v11  ;;  %v1432_v63 = vld [vmem:[%s1625_s21 + $0x78] sm:$0xff] }
  0x2b   : > { %1179 = vst.msk [vmem:[%s1746_s29 + $0x10] sm:$0xff] %vm1176_vm0, %v1146_v57  ;;  %v377_v33 = vmul.f32 %v1703_v8, %v1629_v12  ;;  %v477_v34 = vmul.f32 %v1713_v23, %v1631_v13  ;;  %v777_v42 = vmul.f32 %v1493_v52, %v1640_v19  ;;  %v878_v44 = vmul.f32 %v1431_v43, %v1642_v20  ;;  %v1463_v23 = vld [vmem:[%s1625_s21 + $0x69] sm:$0xff]  ;;  %v1496_v57 = vld [vmem:[%s1625_s21 + $0x7a] sm:$0xff] }
  0x2c   : > { %v1108_v35 = vadd.f32 %v1076_v39, %v1008_v25  ;;  %v909_v40 = vadd.f32 %v877_v10, %v808_v28  ;;  %v609_v41 = vadd.f32 %v577_v56, %v508_v58  ;;  %v578_v49 = vmul.f32 %v1430_v0, %v1633_v14  ;;  %v1433_v25 = vld [vmem:[%s1625_s21 + $0x80] sm:$0xff] }
  0x2d   : > { %v409_v45 = vadd.f32 %v377_v33, %v277_v32  ;;  %v678_v37 = vmul.f32 %v1462_v21, %v1638_v18  ;;  %v278_v53 = vmul.f32 %v1724_v36, %v1627_v11  ;;  %v378_v54 = vmul.f32 %v1461_v51, %v1629_v12 }
  0x2e   : > { %v1147_v7 = vadd.f32 %v1735_v48, %v1108_v35  ;;  %v1009_v50 = vadd.f32 %v977_v24, %v909_v40  ;;  %v709_v8 = vadd.f32 %v677_v30, %v609_v41  ;;  %v478_v39 = vmul.f32 %v1493_v52, %v1631_v13 }
  0x2f   : > { %v509_v46 = vadd.f32 %v477_v34, %v409_v45  ;;  %v978_v60 = vmul.f32 %v1463_v23, %v1649_v26  ;;  %v1078_v61 = vmul.f32 %v1654_v27, %v1495_v38  ;;  %v778_v62 = vmul.f32 %v1494_v29, %v1640_v19 }
  0x30   : > { %1180 = vst.msk [vmem:[%s1746_s29 + $0x18] sm:$0xff] %vm1176_vm0, %v1147_v7  ;;  %v1109_v55 = vadd.f32 %v1077_v31, %v1009_v50  ;;  %v809_v59 = vadd.f32 %v777_v42, %v709_v8  ;;  %v410_v2 = vadd.f32 %v378_v54, %v278_v53  ;;  %v579_v36 = vmul.f32 %v1431_v43, %v1633_v14  ;;  %v1497_v7 = vld [vmem:[%s1625_s21 + $0x82] sm:$0xff] }
  0x31   : > { %v610_v47 = vadd.f32 %v578_v49, %v509_v46  ;;  %v879_v3 = vmul.f32 %v1432_v63, %v1642_v20  ;;  %v679_v4 = vmul.f32 %v1463_v23, %v1638_v18  ;;  %v279_v10 = vmul.f32 %v1430_v0, %v1627_v11 }
  0x32   : > { %v1148_v51 = vadd.f32 %v1735_v48, %v1109_v55  ;;  %v910_v52 = vadd.f32 %v878_v44, %v809_v59  ;;  %v510_v9 = vadd.f32 %v478_v39, %v410_v2  ;;  %v379_v15 = vmul.f32 %v1462_v21, %v1629_v12  ;;  %v1466_v59 = vld [vmem:[%s1625_s21 + $0x91] sm:$0xff] }
  0x33   : > { %v710_v5 = vadd.f32 %v678_v37, %v610_v47  ;;  %v979_v1 = vmul.f32 %v1464_v6, %v1649_v26  ;;  %v779_v16 = vmul.f32 %v1495_v38, %v1640_v19  ;;  %v479_v17 = vmul.f32 %v1494_v29, %v1631_v13  ;;  %v1465_v29 = vld [vmem:[%s1625_s21 + $0x81] sm:$0xff]  ;;  %v1434_v37 = vld [vmem:[%s1625_s21 + $0x90] sm:$0xff] }
  0x34   : > { %1181 = vst.msk [vmem:[%s1746_s29 + $0x20] sm:$0xff] %vm1176_vm0, %v1148_v51  ;;  %v1010_v56 = vadd.f32 %v978_v60, %v910_v52  ;;  %v611_v24 = vadd.f32 %v579_v36, %v510_v9  ;;  %v411_v28 = vadd.f32 %v379_v15, %v279_v10  ;;  %v580_v58 = vmul.f32 %v1432_v63, %v1633_v14  ;;  %v1435_v9 = vld [vmem:[%s1625_s21 + $0x98] sm:$0xff] }
  0x35   : > { %v810_v22 = vadd.f32 %v778_v62, %v710_v5  ;;  %v1079_v21 = vmul.f32 %v1654_v27, %v1496_v57  ;;  %v880_v30 = vmul.f32 %v1433_v25, %v1642_v20  ;;  %v680_v31 = vmul.f32 %v1464_v6, %v1638_v18 }
  0x36   : > { %v1110_v0 = vadd.f32 %v1078_v61, %v1010_v56  ;;  %v711_v33 = vadd.f32 %v679_v4, %v611_v24  ;;  %v511_v34 = vadd.f32 %v479_v17, %v411_v28  ;;  %v280_v35 = vmul.f32 %v1431_v43, %v1627_v11 }
  0x37   : > { %v911_v32 = vadd.f32 %v879_v3, %v810_v22  ;;  %v980_v41 = vmul.f32 %v1465_v29, %v1649_v26  ;;  %v380_v42 = vmul.f32 %v1463_v23, %v1629_v12  ;;  %v480_v44 = vmul.f32 %v1495_v38, %v1631_v13  ;;  %v1498_v3 = vld [vmem:[%s1625_s21 + $0x92] sm:$0xff] }
  0x38   : > { %v1149_v40 = vadd.f32 %v1735_v48, %v1110_v0  ;;  %v811_v49 = vadd.f32 %v779_v16, %v711_v33  ;;  %v612_v50 = vadd.f32 %v580_v58, %v511_v34  ;;  %v780_v8 = vmul.f32 %v1496_v57, %v1640_v19  ;;  %v1467_v58 = vld [vmem:[%s1625_s21 + $0x99] sm:$0xff] }
  0x39   : > { %v1011_v45 = vadd.f32 %v979_v1, %v911_v32  ;;  %v1080_v43 = vmul.f32 %v1654_v27, %v1497_v7  ;;  %v881_v46 = vmul.f32 %v1434_v37, %v1642_v20  ;;  %v412_v53 = vadd.f32 %v380_v42, %v280_v35  ;;  %v1499_v32 = vld [vmem:[%s1625_s21 + $0x9a] sm:$0xff] }
  0x3a   : > { %1182 = vst.msk [vmem:[%s1746_s29 + $0x28] sm:$0xff] %vm1176_vm0, %v1149_v40  ;;  %v581_v23 = vmul.f32 %v1433_v25, %v1633_v14  ;;  %v912_v38 = vadd.f32 %v880_v30, %v811_v49  ;;  %v712_v39 = vadd.f32 %v680_v31, %v612_v50  ;;  %v681_v55 = vmul.f32 %v1465_v29, %v1638_v18  ;;  %v1436_v40 = vld [vmem:[%s1625_s21 + $0xa8] sm:$0xff] }
  0x3b   : > { %v1111_v54 = vadd.f32 %v1079_v21, %v1011_v45  ;;  %v512_v60 = vadd.f32 %v480_v44, %v412_v53  ;;  %v281_v61 = vmul.f32 %v1432_v63, %v1627_v11  ;;  %v381_v47 = vmul.f32 %v1464_v6, %v1629_v12  ;;  %v1468_v50 = vld [vmem:[%s1625_s21 + $0xa9] sm:$0xff] }
  0x3c   : > { %v481_v62 = vmul.f32 %v1496_v57, %v1631_v13  ;;  %v1012_v36 = vadd.f32 %v980_v41, %v912_v38  ;;  %v812_v51 = vadd.f32 %v780_v8, %v712_v39  ;;  %v981_v52 = vmul.f32 %v1466_v59, %v1649_v26  ;;  %v1500_v39 = vld [vmem:[%s1625_s21 + $0xaa] sm:$0xff] }
  0x3d   : > { %v1150_v2 = vadd.f32 %v1735_v48, %v1111_v54  ;;  %v613_v4 = vadd.f32 %v581_v23, %v512_v60  ;;  %v781_v5 = vmul.f32 %v1497_v7, %v1640_v19  ;;  %v413_v10 = vadd.f32 %v381_v47, %v281_v61  ;;  %v1437_v61 = vld [vmem:[%s1625_s21 + $0xb0] sm:$0xff] }
  0x3e   : > { %v582_v15 = vmul.f32 %v1434_v37, %v1633_v14  ;;  %v1112_v63 = vadd.f32 %v1080_v43, %v1012_v36  ;;  %v913_v6 = vadd.f32 %v881_v46, %v812_v51  ;;  %v1081_v56 = vmul.f32 %v1654_v27, %v1498_v3 }
  0x3f   : > { %1183 = vst.msk [vmem:[%s1746_s29 + $0x30] sm:$0xff] %vm1176_vm0, %v1150_v2  ;;  %v882_v1 = vmul.f32 %v1435_v9, %v1642_v20  ;;  %v713_v16 = vadd.f32 %v681_v55, %v613_v4  ;;  %v513_v17 = vadd.f32 %v481_v62, %v413_v10  ;;  %v682_v22 = vmul.f32 %v1466_v59, %v1638_v18 }
  0x40   : > { %v282_v57 = vmul.f32 %v1433_v25, %v1627_v11  ;;  %v1151_v24 = vadd.f32 %v1735_v48, %v1112_v63  ;;  %v1013_v28 = vadd.f32 %v981_v52, %v913_v6  ;;  %v382_v0 = vmul.f32 %v1465_v29, %v1629_v12 }
  0x41   : > { %v482_v21 = vmul.f32 %v1497_v7, %v1631_v13  ;;  %v813_v30 = vadd.f32 %v781_v5, %v713_v16  ;;  %v982_v31 = vmul.f32 %v1467_v58, %v1649_v26  ;;  %v614_v33 = vadd.f32 %v582_v15, %v513_v17  ;;  %v1469_v15 = vld [vmem:[%s1625_s21 + $0xb1] sm:$0xff] }
  0x42   : > { %v782_v34 = vmul.f32 %v1498_v3, %v1640_v19  ;;  %1184 = vst.msk [vmem:[%s1746_s29 + $0x38] sm:$0xff] %vm1176_vm0, %v1151_v24  ;;  %v1113_v35 = vadd.f32 %v1081_v56, %v1013_v28  ;;  %v1082_v25 = vmul.f32 %v1654_v27, %v1499_v32  ;;  %v414_v41 = vadd.f32 %v382_v0, %v282_v57  ;;  %v1501_v16 = vld [vmem:[%s1625_s21 + $0xb2] sm:$0xff]  ;;  %v1438_v24 = vld [vmem:[%s1625_s21 + $0xc0] sm:$0xff] }
  0x43   : > { %v583_v29 = vmul.f32 %v1435_v9, %v1633_v14  ;;  %v914_v42 = vadd.f32 %v882_v1, %v813_v30  ;;  %v714_v44 = vadd.f32 %v682_v22, %v614_v33  ;;  %v883_v45 = vmul.f32 %v1436_v40, %v1642_v20  ;;  %v1470_v33 = vld [vmem:[%s1625_s21 + $0xc1] sm:$0xff] }
  0x44   : > { %v683_v49 = vmul.f32 %v1467_v58, %v1638_v18  ;;  %v1152_v7 = vadd.f32 %v1735_v48, %v1113_v35  ;;  %v514_v8 = vadd.f32 %v482_v21, %v414_v41  ;;  %v283_v43 = vmul.f32 %v1434_v37, %v1627_v11 }
  0x45   : > { %v383_v46 = vmul.f32 %v1466_v59, %v1629_v12  ;;  %v1014_v53 = vadd.f32 %v982_v31, %v914_v42  ;;  %v814_v23 = vadd.f32 %v782_v34, %v714_v44  ;;  %v983_v54 = vmul.f32 %v1468_v50, %v1649_v26 }
  0x46   : > { %v483_v38 = vmul.f32 %v1498_v3, %v1631_v13  ;;  %1185 = vst.msk [vmem:[%s1746_s29 + $0x40] sm:$0xff] %vm1176_vm0, %v1152_v7  ;;  %v615_v55 = vadd.f32 %v583_v29, %v514_v8  ;;  %v783_v60 = vmul.f32 %v1499_v32, %v1640_v19  ;;  %v584_v62 = vmul.f32 %v1436_v40, %v1633_v14  ;;  %v1439_v8 = vld [vmem:[%s1625_s21 + $0xc8] sm:$0xff] }
  0x47   : > { %v415_v47 = vadd.f32 %v383_v46, %v283_v43  ;;  %v1114_v37 = vadd.f32 %v1082_v25, %v1014_v53  ;;  %v915_v59 = vadd.f32 %v883_v45, %v814_v23  ;;  %v1083_v2 = vmul.f32 %v1654_v27, %v1500_v39  ;;  %v1502_v45 = vld [vmem:[%s1625_s21 + $0xc2] sm:$0xff] }
  0x48   : > { %v884_v36 = vmul.f32 %v1437_v61, %v1642_v20  ;;  %v715_v51 = vadd.f32 %v683_v49, %v615_v55  ;;  %v684_v3 = vmul.f32 %v1468_v50, %v1638_v18  ;;  %v284_v4 = vmul.f32 %v1435_v9, %v1627_v11 }
  0x49   : > { %v515_v52 = vadd.f32 %v483_v38, %v415_v47  ;;  %v1153_v5 = vadd.f32 %v1735_v48, %v1114_v37  ;;  %v1015_v10 = vadd.f32 %v983_v54, %v915_v59  ;;  %v384_v63 = vmul.f32 %v1467_v58, %v1629_v12 }
  0x4a   : > { %v484_v6 = vmul.f32 %v1499_v32, %v1631_v13  ;;  %v815_v56 = vadd.f32 %v783_v60, %v715_v51  ;;  %v984_v1 = vmul.f32 %v1469_v15, %v1649_v26  ;;  %v784_v22 = vmul.f32 %v1500_v39, %v1640_v19  ;;  %v1503_v51 = vld [vmem:[%s1625_s21 + $0xca] sm:$0xff] }
  0x4b   : > { %v616_v17 = vadd.f32 %v584_v62, %v515_v52  ;;  %1186 = vst.msk [vmem:[%s1746_s29 + $0x48] sm:$0xff] %vm1176_vm0, %v1153_v5  ;;  %v1115_v57 = vadd.f32 %v1083_v2, %v1015_v10  ;;  %v1084_v9 = vmul.f32 %v1654_v27, %v1501_v16  ;;  %v416_v28 = vadd.f32 %v384_v63, %v284_v4  ;;  %v1471_v62 = vld [vmem:[%s1625_s21 + $0xc9] sm:$0xff]  ;;  %v1440_v5 = vld [vmem:[%s1625_s21 + $0xd8] sm:$0xff] }
  0x4c   : > { %v585_v58 = vmul.f32 %v1437_v61, %v1633_v14  ;;  %v916_v0 = vadd.f32 %v884_v36, %v815_v56  ;;  %v885_v30 = vmul.f32 %v1438_v24, %v1642_v20  ;;  %v685_v31 = vmul.f32 %v1469_v15, %v1638_v18 }
  0x4d   : > { %v716_v21 = vadd.f32 %v684_v3, %v616_v17  ;;  %v1154_v32 = vadd.f32 %v1735_v48, %v1115_v57  ;;  %v516_v34 = vadd.f32 %v484_v6, %v416_v28  ;;  %v285_v35 = vmul.f32 %v1436_v40, %v1627_v11  ;;  %v1472_v17 = vld [vmem:[%s1625_s21 + $0xd9] sm:$0xff] }
  0x4e   : > { %v385_v25 = vmul.f32 %v1468_v50, %v1629_v12  ;;  %v1016_v41 = vadd.f32 %v984_v1, %v916_v0  ;;  %v985_v42 = vmul.f32 %v1470_v33, %v1649_v26  ;;  %v485_v44 = vmul.f32 %v1500_v39, %v1631_v13 }
  0x4f   : > { %v816_v29 = vadd.f32 %v784_v22, %v716_v21  ;;  %1187 = vst.msk [vmem:[%s1746_s29 + $0x50] sm:$0xff] %vm1176_vm0, %v1154_v32  ;;  %v617_v49 = vadd.f32 %v585_v58, %v516_v34  ;;  %v785_v7 = vmul.f32 %v1501_v16, %v1640_v19  ;;  %v586_v46 = vmul.f32 %v1438_v24, %v1633_v14  ;;  %v1441_v34 = vld [vmem:[%s1625_s21 + $0xe0] sm:$0xff] }
  0x50   : > { %v417_v43 = vadd.f32 %v385_v25, %v285_v35  ;;  %v1116_v40 = vadd.f32 %v1084_v9, %v1016_v41  ;;  %v1085_v53 = vmul.f32 %v1654_v27, %v1502_v45  ;;  %v886_v23 = vmul.f32 %v1439_v8, %v1642_v20 }
  0x51   : > { %v917_v50 = vadd.f32 %v885_v30, %v816_v29  ;;  %v717_v54 = vadd.f32 %v685_v31, %v617_v49  ;;  %v686_v39 = vmul.f32 %v1470_v33, %v1638_v18  ;;  %v286_v55 = vmul.f32 %v1437_v61, %v1627_v11  ;;  %v1504_v30 = vld [vmem:[%s1625_s21 + $0xda] sm:$0xff] }
  0x52   : > { %v517_v38 = vadd.f32 %v485_v44, %v417_v43  ;;  %v1155_v60 = vadd.f32 %v1735_v48, %v1116_v40  ;;  %v386_v37 = vmul.f32 %v1469_v15, %v1629_v12  ;;  %v486_v59 = vmul.f32 %v1501_v16, %v1631_v13 }
  0x53   : > { %v1017_v47 = vadd.f32 %v985_v42, %v917_v50  ;;  %v817_v2 = vadd.f32 %v785_v7, %v717_v54  ;;  %v986_v36 = vmul.f32 %v1471_v62, %v1649_v26  ;;  %v786_v3 = vmul.f32 %v1502_v45, %v1640_v19  ;;  %v1505_v54 = vld [vmem:[%s1625_s21 + $0xe2] sm:$0xff] }
  0x54   : > { %v618_v52 = vadd.f32 %v586_v46, %v517_v38  ;;  %1188 = vst.msk [vmem:[%s1746_s29 + $0x58] sm:$0xff] %vm1176_vm0, %v1155_v60  ;;  %v1086_v61 = vmul.f32 %v1654_v27, %v1503_v51  ;;  %v418_v10 = vadd.f32 %v386_v37, %v286_v55  ;;  %v587_v15 = vmul.f32 %v1439_v8, %v1633_v14  ;;  %v1473_v46 = vld [vmem:[%s1625_s21 + $0xe1] sm:$0xff]  ;;  %v1442_v60 = vld [vmem:[%s1625_s21 + $0xf0] sm:$0xff] }
  0x55   : > { %v1117_v4 = vadd.f32 %v1085_v53, %v1017_v47  ;;  %v918_v63 = vadd.f32 %v886_v23, %v817_v2  ;;  %v887_v56 = vmul.f32 %v1440_v5, %v1642_v20  ;;  %v687_v1 = vmul.f32 %v1471_v62, %v1638_v18 }
  0x56   : > { %v718_v6 = vadd.f32 %v686_v39, %v618_v52  ;;  %v518_v22 = vadd.f32 %v486_v59, %v418_v10  ;;  %v287_v57 = vmul.f32 %v1438_v24, %v1627_v11  ;;  %v387_v9 = vmul.f32 %v1470_v33, %v1629_v12  ;;  %v1474_v52 = vld [vmem:[%s1625_s21 + $0xf1] sm:$0xff] }
  0x57   : > { %v1156_v16 = vadd.f32 %v1735_v48, %v1117_v4  ;;  %v1018_v28 = vadd.f32 %v986_v36, %v918_v63  ;;  %v987_v0 = vmul.f32 %v1472_v17, %v1649_v26  ;;  %v487_v21 = vmul.f32 %v1502_v45, %v1631_v13 }
  0x58   : > { %v818_v58 = vadd.f32 %v786_v3, %v718_v6  ;;  %v619_v31 = vadd.f32 %v587_v15, %v518_v22  ;;  %v787_v32 = vmul.f32 %v1503_v51, %v1640_v19  ;;  %v419_v35 = vadd.f32 %v387_v9, %v287_v57  ;;  %v1443_v22 = vld [vmem:[%s1625_s21 + $0xf8] sm:$0xff] }
  0x59   : > { %1189 = vst.msk [vmem:[%s1746_s29 + $0x60] sm:$0xff] %vm1176_vm0, %v1156_v16  ;;  %v588_v25 = vmul.f32 %v1440_v5, %v1633_v14  ;;  %v1118_v24 = vadd.f32 %v1086_v61, %v1018_v28  ;;  %v1087_v41 = vmul.f32 %v1654_v27, %v1504_v30  ;;  %v888_v29 = vmul.f32 %v1441_v34, %v1642_v20 }
  0x5a   : > { %v919_v33 = vadd.f32 %v887_v56, %v818_v58  ;;  %v719_v42 = vadd.f32 %v687_v1, %v619_v31  ;;  %v519_v44 = vadd.f32 %v487_v21, %v419_v35  ;;  %v688_v45 = vmul.f32 %v1472_v17, %v1638_v18  ;;  %v1506_v56 = vld [vmem:[%s1625_s21 + $0xf2] sm:$0xff] }
  0x5b   : > { %v288_v49 = vmul.f32 %v1439_v8, %v1627_v11  ;;  %v1157_v7 = vadd.f32 %v1735_v48, %v1118_v24  ;;  %v388_v40 = vmul.f32 %v1471_v62, %v1629_v12  ;;  %v488_v50 = vmul.f32 %v1503_v51, %v1631_v13 }
  0x5c   : > { %v1019_v43 = vadd.f32 %v987_v0, %v919_v33  ;;  %v819_v53 = vadd.f32 %v787_v32, %v719_v42  ;;  %v988_v23 = vmul.f32 %v1473_v46, %v1649_v26  ;;  %v620_v38 = vadd.f32 %v588_v25, %v519_v44  ;;  %v1475_v25 = vld [vmem:[%s1625_s21 + $0xf9] sm:$0xff] }
  0x5d   : > { %v788_v39 = vmul.f32 %v1504_v30, %v1640_v19  ;;  %1190 = vst.msk [vmem:[%s1746_s29 + $0x68] sm:$0xff] %vm1176_vm0, %v1157_v7  ;;  %v1088_v8 = vmul.f32 %v1654_v27, %v1505_v54  ;;  %v420_v47 = vadd.f32 %v388_v40, %v288_v49  ;;  %v589_v62 = vmul.f32 %v1441_v34, %v1633_v14  ;;  %v1507_v42 = vld [vmem:[%s1625_s21 + $0xfa] sm:$0xff]  ;;  %v1444_v7 = vld [vmem:[%s1625_s21 + $0x108] sm:$0xff] }
  0x5e   : > { %v1119_v55 = vadd.f32 %v1087_v41, %v1019_v43  ;;  %v920_v37 = vadd.f32 %v888_v29, %v819_v53  ;;  %v720_v59 = vadd.f32 %v688_v45, %v620_v38  ;;  %v889_v2 = vmul.f32 %v1442_v60, %v1642_v20  ;;  %v1476_v38 = vld [vmem:[%s1625_s21 + $0x109] sm:$0xff] }
  0x5f   : > { %v689_v36 = vmul.f32 %v1473_v46, %v1638_v18  ;;  %v520_v3 = vadd.f32 %v488_v50, %v420_v47  ;;  %v289_v4 = vmul.f32 %v1440_v5, %v1627_v11  ;;  %v389_v61 = vmul.f32 %v1472_v17, %v1629_v12 }
  0x60   : > { %v1158_v51 = vadd.f32 %v1735_v48, %v1119_v55  ;;  %v1020_v10 = vadd.f32 %v988_v23, %v920_v37  ;;  %v820_v15 = vadd.f32 %v788_v39, %v720_v59  ;;  %v989_v63 = vmul.f32 %v1474_v52, %v1649_v26 }
  0x61   : > { %v489_v6 = vmul.f32 %v1504_v30, %v1631_v13  ;;  %v621_v1 = vadd.f32 %v589_v62, %v520_v3  ;;  %v789_v16 = vmul.f32 %v1505_v54, %v1640_v19  ;;  %v421_v57 = vadd.f32 %v389_v61, %v289_v4  ;;  %v1445_v3 = vld [vmem:[%s1625_s21 + $0x110] sm:$0xff] }
  0x62   : > { %1191 = vst.msk [vmem:[%s1746_s29 + $0x70] sm:$0xff] %vm1176_vm0, %v1158_v51  ;;  %v590_v9 = vmul.f32 %v1442_v60, %v1633_v14  ;;  %v1120_v5 = vadd.f32 %v1088_v8, %v1020_v10  ;;  %v921_v17 = vadd.f32 %v889_v2, %v820_v15  ;;  %v1089_v28 = vmul.f32 %v1654_v27, %v1506_v56  ;;  %v1508_v2 = vld [vmem:[%s1625_s21 + $0x10a] sm:$0xff] }
  0x63   : > { %v890_v58 = vmul.f32 %v1443_v22, %v1642_v20  ;;  %v721_v0 = vadd.f32 %v689_v36, %v621_v1  ;;  %v521_v21 = vadd.f32 %v489_v6, %v421_v57  ;;  %v690_v30 = vmul.f32 %v1474_v52, %v1638_v18 }
  0x64   : > { %v290_v31 = vmul.f32 %v1441_v34, %v1627_v11  ;;  %v1159_v32 = vadd.f32 %v1735_v48, %v1120_v5  ;;  %v1021_v35 = vadd.f32 %v989_v63, %v921_v17  ;;  %v390_v24 = vmul.f32 %v1473_v46, %v1629_v12 }
  0x65   : > { %v490_v33 = vmul.f32 %v1505_v54, %v1631_v13  ;;  %v821_v41 = vadd.f32 %v789_v16, %v721_v0  ;;  %v990_v29 = vmul.f32 %v1475_v25, %v1649_v26  ;;  %v622_v44 = vadd.f32 %v590_v9, %v521_v21  ;;  %v1477_v9 = vld [vmem:[%s1625_s21 + $0x111] sm:$0xff] }
  0x66   : > { %v790_v45 = vmul.f32 %v1506_v56, %v1640_v19  ;;  %1192 = vst.msk [vmem:[%s1746_s29 + $0x78] sm:$0xff] %vm1176_vm0, %v1159_v32  ;;  %v1121_v49 = vadd.f32 %v1089_v28, %v1021_v35  ;;  %v1090_v34 = vmul.f32 %v1654_v27, %v1507_v42  ;;  %v422_v43 = vadd.f32 %v390_v24, %v290_v31  ;;  %v1509_v0 = vld [vmem:[%s1625_s21 + $0x112] sm:$0xff]  ;;  %v1446_v32 = vld [vmem:[%s1625_s21 + $0x120] sm:$0xff] }
  0x67   : > { %v591_v46 = vmul.f32 %v1443_v22, %v1633_v14  ;;  %v922_v40 = vadd.f32 %v890_v58, %v821_v41  ;;  %v722_v50 = vadd.f32 %v690_v30, %v622_v44  ;;  %v891_v53 = vmul.f32 %v1444_v7, %v1642_v20  ;;  %v1478_v44 = vld [vmem:[%s1625_s21 + $0x121] sm:$0xff] }
  0x68   : > { %v691_v23 = vmul.f32 %v1475_v25, %v1638_v18  ;;  %v1160_v54 = vadd.f32 %v1735_v48, %v1121_v49  ;;  %v522_v39 = vadd.f32 %v490_v33, %v422_v43  ;;  %v291_v55 = vmul.f32 %v1442_v60, %v1627_v11 }
  0x69   : > { %v391_v8 = vmul.f32 %v1474_v52, %v1629_v12  ;;  %v1022_v47 = vadd.f32 %v990_v29, %v922_v40  ;;  %v822_v62 = vadd.f32 %v790_v45, %v722_v50  ;;  %v991_v37 = vmul.f32 %v1476_v38, %v1649_v26 }
  0x6a   : > { %v491_v59 = vmul.f32 %v1506_v56, %v1631_v13  ;;  %1193 = vst.msk [vmem:[%s1746_s29 + $0x80] sm:$0xff] %vm1176_vm0, %v1160_v54  ;;  %v623_v36 = vadd.f32 %v591_v46, %v522_v39  ;;  %v791_v51 = vmul.f32 %v1507_v42, %v1640_v19  ;;  %v592_v61 = vmul.f32 %v1444_v7, %v1633_v14  ;;  %v1447_v39 = vld [vmem:[%s1625_s21 + $0x128] sm:$0xff] }
  0x6b   : > { %v423_v4 = vadd.f32 %v391_v8, %v291_v55  ;;  %v1122_v60 = vadd.f32 %v1090_v34, %v1022_v47  ;;  %v923_v52 = vadd.f32 %v891_v53, %v822_v62  ;;  %v1091_v10 = vmul.f32 %v1654_v27, %v1508_v2  ;;  %v1510_v53 = vld [vmem:[%s1625_s21 + $0x122] sm:$0xff] }
  0x6c   : > { %v892_v15 = vmul.f32 %v1445_v3, %v1642_v20  ;;  %v723_v63 = vadd.f32 %v691_v23, %v623_v36  ;;  %v692_v56 = vmul.f32 %v1476_v38, %v1638_v18  ;;  %v292_v1 = vmul.f32 %v1443_v22, %v1627_v11 }
  0x6d   : > { %v523_v6 = vadd.f32 %v491_v59, %v423_v4  ;;  %v1161_v16 = vadd.f32 %v1735_v48, %v1122_v60  ;;  %v1023_v57 = vadd.f32 %v991_v37, %v923_v52  ;;  %v392_v5 = vmul.f32 %v1475_v25, %v1629_v12 }
  0x6e   : > { %v492_v17 = vmul.f32 %v1507_v42, %v1631_v13  ;;  %v823_v28 = vadd.f32 %v791_v51, %v723_v63  ;;  %v992_v58 = vmul.f32 %v1477_v9, %v1649_v26  ;;  %v792_v30 = vmul.f32 %v1508_v2, %v1640_v19  ;;  %v1511_v63 = vld [vmem:[%s1625_s21 + $0x12a] sm:$0xff] }
  0x6f   : > { %v624_v21 = vadd.f32 %v592_v61, %v523_v6  ;;  %1194 = vst.msk [vmem:[%s1746_s29 + $0x88] sm:$0xff] %vm1176_vm0, %v1161_v16  ;;  %v1123_v31 = vadd.f32 %v1091_v10, %v1023_v57  ;;  %v1092_v22 = vmul.f32 %v1654_v27, %v1509_v0  ;;  %v424_v35 = vadd.f32 %v392_v5, %v292_v1  ;;  %v1479_v61 = vld [vmem:[%s1625_s21 + $0x129] sm:$0xff]  ;;  %v1448_v16 = vld [vmem:[%s1625_s21 + $0x138] sm:$0xff] }
  0x70   : > { %v593_v25 = vmul.f32 %v1445_v3, %v1633_v14  ;;  %v924_v24 = vadd.f32 %v892_v15, %v823_v28  ;;  %v893_v41 = vmul.f32 %v1446_v32, %v1642_v20  ;;  %v693_v29 = vmul.f32 %v1477_v9, %v1638_v18 }
  0x71   : > { %v724_v33 = vadd.f32 %v692_v56, %v624_v21  ;;  %v1162_v42 = vadd.f32 %v1735_v48, %v1123_v31  ;;  %v524_v45 = vadd.f32 %v492_v17, %v424_v35  ;;  %v293_v49 = vmul.f32 %v1444_v7, %v1627_v11  ;;  %v1480_v21 = vld [vmem:[%s1625_s21 + $0x139] sm:$0xff] }
  0x72   : > { %v393_v34 = vmul.f32 %v1476_v38, %v1629_v12  ;;  %v1024_v43 = vadd.f32 %v992_v58, %v924_v24  ;;  %v993_v40 = vmul.f32 %v1478_v44, %v1649_v26  ;;  %v493_v50 = vmul.f32 %v1508_v2, %v1631_v13 }
  0x73   : > { %v824_v46 = vadd.f32 %v792_v30, %v724_v33  ;;  %1195 = vst.msk [vmem:[%s1746_s29 + $0x90] sm:$0xff] %vm1176_vm0, %v1162_v42  ;;  %v625_v23 = vadd.f32 %v593_v25, %v524_v45  ;;  %v793_v54 = vmul.f32 %v1509_v0, %v1640_v19  ;;  %v594_v8 = vmul.f32 %v1446_v32, %v1633_v14  ;;  %v1512_v33 = vld [vmem:[%s1625_s21 + $0x13a] sm:$0xff] }
  0x74   : > { %v425_v55 = vadd.f32 %v393_v34, %v293_v49  ;;  %v1124_v7 = vadd.f32 %v1092_v22, %v1024_v43  ;;  %v1093_v47 = vmul.f32 %v1654_v27, %v1510_v53  ;;  %v894_v62 = vmul.f32 %v1447_v39, %v1642_v20  ;;  %v1449_v42 = vld [vmem:[%s1625_s21 + $0x140] sm:$0xff]  ;;  %v2058_v34 = vld [vmem:[%s2206_s1 + $0x8] ss:$0 sm:$0xff] }
  0x75   : > { %v925_v38 = vadd.f32 %v893_v41, %v824_v46  ;;  %v725_v37 = vadd.f32 %v693_v29, %v625_v23  ;;  %v694_v2 = vmul.f32 %v1478_v44, %v1638_v18  ;;  %v294_v36 = vmul.f32 %v1445_v3, %v1627_v11 }
  0x76   : > { %v525_v59 = vadd.f32 %v493_v50, %v425_v55  ;;  %v1163_v51 = vadd.f32 %v1735_v48, %v1124_v7  ;;  %v394_v60 = vmul.f32 %v1477_v9, %v1629_v12  ;;  %v494_v52 = vmul.f32 %v1509_v0, %v1631_v13 }
  0x77   : > { %v1025_v4 = vadd.f32 %v993_v40, %v925_v38  ;;  %v825_v10 = vadd.f32 %v793_v54, %v725_v37  ;;  %v994_v15 = vmul.f32 %v1479_v61, %v1649_v26  ;;  %v794_v56 = vmul.f32 %v1510_v53, %v1640_v19  ;;  %v1513_v37 = vld [vmem:[%s1625_s21 + $0x142] sm:$0xff] }
  0x78   : > { %v626_v6 = vadd.f32 %v594_v8, %v525_v59  ;;  %1196 = vst.msk [vmem:[%s1746_s29 + $0x98] sm:$0xff] %vm1176_vm0, %v1163_v51  ;;  %v1094_v3 = vmul.f32 %v1654_v27, %v1511_v63  ;;  %v426_v57 = vadd.f32 %v394_v60, %v294_v36  ;;  %v595_v9 = vmul.f32 %v1447_v39, %v1633_v14  ;;  %v1481_v8 = vld [vmem:[%s1625_s21 + $0x141] sm:$0xff]  ;;  %v1450_v51 = vld [vmem:[%s1625_s21 + $0x150] sm:$0xff] }
  0x79   : > { %v1125_v1 = vadd.f32 %v1093_v47, %v1025_v4  ;;  %v926_v5 = vadd.f32 %v894_v62, %v825_v10  ;;  %v895_v28 = vmul.f32 %v1448_v16, %v1642_v20  ;;  %v695_v58 = vmul.f32 %v1479_v61, %v1638_v18 }
  0x7a   : > { %v726_v17 = vadd.f32 %v694_v2, %v626_v6  ;;  %v526_v30 = vadd.f32 %v494_v52, %v426_v57  ;;  %v295_v31 = vmul.f32 %v1446_v32, %v1627_v11  ;;  %v395_v27 = vmul.f32 %v1478_v44, %v1629_v12  ;;  %v1482_v6 = vld [vmem:[%s1625_s21 + $0x151] sm:$0xff] }
  0x7b   : > { %v1164_v0 = vadd.f32 %v1735_v48, %v1125_v1  ;;  %v1026_v22 = vadd.f32 %v994_v15, %v926_v5  ;;  %v995_v25 = vmul.f32 %v1480_v21, %v1649_v26  ;;  %v495_v24 = vmul.f32 %v1510_v53, %v1631_v13 }
  0x7c   : > { %v826_v35 = vadd.f32 %v794_v56, %v726_v17  ;;  %v627_v41 = vadd.f32 %v595_v9, %v526_v30  ;;  %v795_v29 = vmul.f32 %v1511_v63, %v1640_v19  ;;  %v427_v45 = vadd.f32 %v395_v27, %v295_v31  ;;  %v1451_v30 = vld [vmem:[%s1625_s21 + $0x158] sm:$0xff] }
  0x7d   : > { %1197 = vst.msk [vmem:[%s1746_s29 + $0xa0] sm:$0xff] %vm1176_vm0, %v1164_v0  ;;  %v596_v49 = vmul.f32 %v1448_v16, %v1633_v14  ;;  %v1126_v32 = vadd.f32 %v1094_v3, %v1026_v22  ;;  %v1095_v43 = vmul.f32 %v2058_v34, %v1512_v33  ;;  %v896_v46 = vmul.f32 %v1449_v42, %v1642_v20 }
  0x7e   : > { %v927_v44 = vadd.f32 %v895_v28, %v826_v35  ;;  %v727_v40 = vadd.f32 %v695_v58, %v627_v41  ;;  %v527_v50 = vadd.f32 %v495_v24, %v427_v45  ;;  %v696_v53 = vmul.f32 %v1480_v21, %v1638_v18  ;;  %v1514_v28 = vld [vmem:[%s1625_s21 + $0x152] sm:$0xff] }
  0x7f   : > { %v296_v23 = vmul.f32 %v1447_v39, %v1627_v11  ;;  %v1165_v54 = vadd.f32 %v1735_v48, %v1126_v32  ;;  %v396_v7 = vmul.f32 %v1479_v61, %v1629_v12  ;;  %v496_v38 = vmul.f32 %v1511_v63, %v1631_v13 }
  0x80   : > { %v1027_v55 = vadd.f32 %v995_v25, %v927_v44  ;;  %v827_v47 = vadd.f32 %v795_v29, %v727_v40  ;;  %v996_v62 = vmul.f32 %v1481_v8, %v1649_v26  ;;  %v628_v59 = vadd.f32 %v596_v49, %v527_v50  ;;  %v1483_v49 = vld [vmem:[%s1625_s21 + $0x159] sm:$0xff] }
  0x81   : > { %v796_v2 = vmul.f32 %v1512_v33, %v1640_v19  ;;  %1198 = vst.msk [vmem:[%s1746_s29 + $0xa8] sm:$0xff] %vm1176_vm0, %v1165_v54  ;;  %v1096_v39 = vmul.f32 %v2058_v34, %v1513_v37  ;;  %v428_v4 = vadd.f32 %v396_v7, %v296_v23  ;;  %v597_v61 = vmul.f32 %v1449_v42, %v1633_v14  ;;  %v1515_v40 = vld [vmem:[%s1625_s21 + $0x15a] sm:$0xff] }
  0x82   : > { %v1127_v36 = vadd.f32 %v1095_v43, %v1027_v55  ;;  %v928_v60 = vadd.f32 %v896_v46, %v827_v47  ;;  %v728_v52 = vadd.f32 %v696_v53, %v628_v59  ;;  %v897_v10 = vmul.f32 %v1450_v51, %v1642_v20  ;;  %v1484_v59 = vld [vmem:[%s1625_s21 + $0x169] sm:$0xff] }
  0x83   : > { %v697_v15 = vmul.f32 %v1481_v8, %v1638_v18  ;;  %v528_v56 = vadd.f32 %v496_v38, %v428_v4  ;;  %v297_v1 = vmul.f32 %v1448_v16, %v1627_v11  ;;  %v397_v3 = vmul.f32 %v1480_v21, %v1629_v12 }
  0x84   : > { %v1166_v63 = vadd.f32 %v1735_v48, %v1127_v36  ;;  %v1028_v57 = vadd.f32 %v996_v62, %v928_v60  ;;  %v828_v9 = vadd.f32 %v796_v2, %v728_v52  ;;  %v997_v5 = vmul.f32 %v1482_v6, %v1649_v26  ;;  %v2111_v62 = vld [vmem:[%s2207_s2] ss:$0 sm:$0xff] }
  0x85   : > { %v497_v17 = vmul.f32 %v1512_v33, %v1631_v13  ;;  %v629_v58 = vadd.f32 %v597_v61, %v528_v56  ;;  %v797_v0 = vmul.f32 %v1513_v37, %v1640_v19  ;;  %v429_v31 = vadd.f32 %v397_v3, %v297_v1  ;;  %v1453_v56 = vld [vmem:[%s1625_s21 + $0x170] sm:$0xff] }
  0x86   : > { %1199 = vst.msk [vmem:[%s1746_s29 + $0xb0] sm:$0xff] %vm1176_vm0, %v1166_v63  ;;  %v598_v27 = vmul.f32 %v1450_v51, %v1633_v14  ;;  %v1128_v16 = vadd.f32 %v1096_v39, %v1028_v57  ;;  %v929_v21 = vadd.f32 %v897_v10, %v828_v9  ;;  %v1097_v22 = vmul.f32 %v2058_v34, %v1514_v28  ;;  %v1516_v10 = vld [vmem:[%s1625_s21 + $0x16a] sm:$0xff] }
  0x87   : > { %v898_v35 = vmul.f32 %v1451_v30, %v1642_v20  ;;  %v729_v25 = vadd.f32 %v697_v15, %v629_v58  ;;  %v529_v24 = vadd.f32 %v497_v17, %v429_v31  ;;  %v698_v33 = vmul.f32 %v1482_v6, %v1638_v18 }
  0x88   : > { %v298_v41 = vmul.f32 %v1449_v42, %v1627_v11  ;;  %v1167_v29 = vadd.f32 %v1735_v48, %v1128_v16  ;;  %v1029_v45 = vadd.f32 %v997_v5, %v929_v21  ;;  %v398_v32 = vmul.f32 %v1481_v8, %v1629_v12  ;;  %v1452_v48 = vld [vmem:[%s1625_s21 + $0x168] sm:$0xff] }
  0x89   : > { %v498_v44 = vmul.f32 %v1513_v37, %v1631_v13  ;;  %v829_v43 = vadd.f32 %v797_v0, %v729_v25  ;;  %v998_v46 = vmul.f32 %v1483_v49, %v1649_v26  ;;  %v630_v50 = vadd.f32 %v598_v27, %v529_v24  ;;  %v1485_v27 = vld [vmem:[%s1625_s21 + $0x171] sm:$0xff] }
  0x8a   : > { %v798_v53 = vmul.f32 %v1514_v28, %v1640_v19  ;;  %1200 = vst.msk [vmem:[%s1746_s29 + $0xb8] sm:$0xff] %vm1176_vm0, %v1167_v29  ;;  %v1129_v23 = vadd.f32 %v1097_v22, %v1029_v45  ;;  %v1098_v42 = vmul.f32 %v2058_v34, %v1515_v40  ;;  %v430_v54 = vadd.f32 %v398_v32, %v298_v41  ;;  %v1517_v25 = vld [vmem:[%s1625_s21 + $0x172] sm:$0xff]  ;;  %v1454_v29 = vld [vmem:[%s1625_s21 + $0x180] sm:$0xff] }
  0x8b   : > { %v599_v55 = vmul.f32 %v1451_v30, %v1633_v14  ;;  %v930_v8 = vadd.f32 %v898_v35, %v829_v43  ;;  %v730_v7 = vadd.f32 %v698_v33, %v630_v50  ;;  %v899_v38 = vmul.f32 %v1452_v48, %v1642_v20  ;;  %v1486_v50 = vld [vmem:[%s1625_s21 + $0x181] sm:$0xff] }
  0x8c   : > { %v699_v47 = vmul.f32 %v1483_v49, %v1638_v18  ;;  %v1168_v37 = vadd.f32 %v2111_v62, %v1129_v23  ;;  %v530_v2 = vadd.f32 %v498_v44, %v430_v54  ;;  %v299_v36 = vmul.f32 %v1450_v51, %v1627_v11 }
  0x8d   : > { %v399_v39 = vmul.f32 %v1482_v6, %v1629_v12  ;;  %v1030_v4 = vadd.f32 %v998_v46, %v930_v8  ;;  %v830_v61 = vadd.f32 %v798_v53, %v730_v7  ;;  %v999_v60 = vmul.f32 %v1484_v59, %v1649_v26 }
  0x8e   : > { %v499_v52 = vmul.f32 %v1514_v28, %v1631_v13  ;;  %1201 = vst.msk [vmem:[%s1746_s29 + $0xc0] sm:$0xff] %vm1176_vm0, %v1168_v37  ;;  %v631_v15 = vadd.f32 %v599_v55, %v530_v2  ;;  %v799_v63 = vmul.f32 %v1515_v40, %v1640_v19  ;;  %v600_v3 = vmul.f32 %v1452_v48, %v1633_v14  ;;  %v1455_v2 = vld [vmem:[%s1625_s21 + $0x188] sm:$0xff] }
  0x8f   : > { %v431_v1 = vadd.f32 %v399_v39, %v299_v36  ;;  %v1130_v51 = vadd.f32 %v1098_v42, %v1030_v4  ;;  %v931_v6 = vadd.f32 %v899_v38, %v830_v61  ;;  %v1099_v57 = vmul.f32 %v2058_v34, %v1516_v10  ;;  %v1518_v38 = vld [vmem:[%s1625_s21 + $0x182] sm:$0xff] }
  0x90   : > { %v900_v9 = vmul.f32 %v1453_v56, %v1642_v20  ;;  %v731_v5 = vadd.f32 %v699_v47, %v631_v15  ;;  %v700_v28 = vmul.f32 %v1484_v59, %v1638_v18  ;;  %v300_v58 = vmul.f32 %v1451_v30, %v1627_v11 }
  0x91   : > { %v531_v17 = vadd.f32 %v499_v52, %v431_v1  ;;  %v1169_v0 = vadd.f32 %v2111_v62, %v1130_v51  ;;  %v1031_v31 = vadd.f32 %v999_v60, %v931_v6  ;;  %v400_v16 = vmul.f32 %v1483_v49, %v1629_v12  ;;  %v1456_v51 = vld [vmem:[%s1625_s21 + $0x198] sm:$0xff] }
  0x92   : > { %v500_v21 = vmul.f32 %v1515_v40, %v1631_v13  ;;  %v831_v22 = vadd.f32 %v799_v63, %v731_v5  ;;  %v1000_v35 = vmul.f32 %v1485_v27, %v1649_v26  ;;  %v800_v33 = vmul.f32 %v1516_v10, %v1640_v19 }
  0x93   : > { %v632_v24 = vadd.f32 %v600_v3, %v531_v17  ;;  %1202 = vst.msk [vmem:[%s1746_s29 + $0xc8] sm:$0xff] %vm1176_vm0, %v1169_v0  ;;  %v1131_v41 = vadd.f32 %v1099_v57, %v1031_v31  ;;  %v1100_v30 = vmul.f32 %v2058_v34, %v1517_v25  ;;  %v432_v45 = vadd.f32 %v400_v16, %v300_v58  ;;  %v1487_v3 = vld [vmem:[%s1625_s21 + $0x189] sm:$0xff] }
  0x94   : > { %v601_v49 = vmul.f32 %v1453_v56, %v1633_v14  ;;  %v932_v32 = vadd.f32 %v900_v9, %v831_v22  ;;  %v901_v43 = vmul.f32 %v1454_v29, %v1642_v20  ;;  %v701_v46 = vmul.f32 %v1485_v27, %v1638_v18  ;;  %v1520_v22 = vld [vmem:[%s1625_s21 + $0x19a] sm:$0xff] }
  0x95   : > { %v732_v44 = vadd.f32 %v700_v28, %v632_v24  ;;  %v1170_v40 = vadd.f32 %v2111_v62, %v1131_v41  ;;  %v532_v53 = vadd.f32 %v500_v21, %v432_v45  ;;  %v301_v23 = vmul.f32 %v1452_v48, %v1627_v11 }
  0x96   : > { %v401_v42 = vmul.f32 %v1484_v59, %v1629_v12  ;;  %v1032_v54 = vadd.f32 %v1000_v35, %v932_v32  ;;  %v1001_v8 = vmul.f32 %v1486_v50, %v1649_v26  ;;  %v501_v7 = vmul.f32 %v1516_v10, %v1631_v13 }
  0x97   : > { %v832_v55 = vadd.f32 %v800_v33, %v732_v44  ;;  %1203 = vst.msk [vmem:[%s1746_s29 + $0xd0] sm:$0xff] %vm1176_vm0, %v1170_v40  ;;  %v633_v47 = vadd.f32 %v601_v49, %v532_v53  ;;  %v801_v37 = vmul.f32 %v1517_v25, %v1640_v19  ;;  %v602_v48 = vmul.f32 %v1454_v29, %v1633_v14  ;;  %v1489_v44 = vld [vmem:[%s1625_s21 + $0x1a1] sm:$0xff] }
  0x98   : > { %v433_v36 = vadd.f32 %v401_v42, %v301_v23  ;;  %v1132_v39 = vadd.f32 %v1100_v30, %v1032_v54  ;;  %v1101_v4 = vmul.f32 %v2058_v34, %v1518_v38  ;;  %v902_v61 = vmul.f32 %v1455_v2, %v1642_v20 }
  0x99   : > { %v933_v59 = vadd.f32 %v901_v43, %v832_v55  ;;  %v733_v60 = vadd.f32 %v701_v46, %v633_v47  ;;  %v702_v10 = vmul.f32 %v1486_v50, %v1638_v18  ;;  %v302_v15 = vmul.f32 %v1453_v56, %v1627_v11  ;;  %v1519_v11 = vld [vmem:[%s1625_s21 + $0x18a] sm:$0xff]  ;;  %v1488_v56 = vld [vmem:[%s1625_s21 + $0x199] sm:$0xff]  ;;  %v1521_v50 = vld [vmem:[%s1625_s21 + $0x1a2] sm:$0xff] }
  0x9a   : > { %v533_v52 = vadd.f32 %v501_v7, %v433_v36  ;;  %v1171_v63 = vadd.f32 %v2111_v62, %v1132_v39  ;;  %v402_v6 = vmul.f32 %v1485_v27, %v1629_v12  ;;  %v502_v57 = vmul.f32 %v1517_v25, %v1631_v13 }
  0x9b   : > { %v1033_v1 = vadd.f32 %v1001_v8, %v933_v59  ;;  %v833_v9 = vadd.f32 %v801_v37, %v733_v60  ;;  %v1002_v5 = vmul.f32 %v1487_v3, %v1649_v26  ;;  %v802_v28 = vmul.f32 %v1518_v38, %v1640_v19 }
  0x9c   : > { %v634_v17 = vadd.f32 %v602_v48, %v533_v52  ;;  %1204 = vst.msk [vmem:[%s1746_s29 + $0xd8] sm:$0xff] %vm1176_vm0, %v1171_v63  ;;  %v434_v0 = vadd.f32 %v402_v6, %v302_v15  ;;  %v603_v31 = vmul.f32 %v1455_v2, %v1633_v14  ;;  %v1102_v13 = vmul.f32 %v2058_v34, %v1519_v11  ;;  %v1457_v14 = vld [vmem:[%s1625_s21 + $0x1a0] sm:$0xff] }
  0x9d   : > { %v1133_v58 = vadd.f32 %v1101_v4, %v1033_v1  ;;  %v934_v12 = vadd.f32 %v902_v61, %v833_v9  ;;  %v903_v16 = vmul.f32 %v1456_v51, %v1642_v20  ;;  %v703_v25 = vmul.f32 %v1487_v3, %v1638_v18 }
  0x9e   : > { %v734_v27 = vadd.f32 %v702_v10, %v634_v17  ;;  %v534_v35 = vadd.f32 %v502_v57, %v434_v0  ;;  %v1003_v41 = vmul.f32 %v1488_v56, %v1649_v26  ;;  %v803_v29 = vmul.f32 %v1519_v11, %v1640_v19 }
  0x9f   : > { %v1172_v21 = vadd.f32 %v2111_v62, %v1133_v58  ;;  %v1034_v24 = vadd.f32 %v1002_v5, %v934_v12  ;;  %v1103_v32 = vmul.f32 %v2058_v34, %v1520_v22  ;;  %v904_v18 = vmul.f32 %v1457_v14, %v1642_v20 }
  0xa0   : > { %v834_v33 = vadd.f32 %v802_v28, %v734_v27  ;;  %v635_v30 = vadd.f32 %v603_v31, %v534_v35  ;;  %v1004_v23 = vmul.f32 %v1489_v44, %v1649_v26  ;;  %v1104_v54 = vmul.f32 %v2058_v34, %v1521_v50 }
  0xa1   : > { %1205 = vst.msk [vmem:[%s1746_s29 + $0xe0] sm:$0xff] %vm1176_vm0, %v1172_v21  ;;  %v1134_v45 = vadd.f32 %v1102_v13, %v1034_v24 }
  0xa2   : > { %v935_v49 = vadd.f32 %v903_v16, %v834_v33  ;;  %v735_v43 = vadd.f32 %v703_v25, %v635_v30 }
  0xa3   : > { %v1173_v46 = vadd.f32 %v2111_v62, %v1134_v45 }
  0xa4   : > { %v1035_v40 = vadd.f32 %v1003_v41, %v935_v49  ;;  %v835_v53 = vadd.f32 %v803_v29, %v735_v43 }
  0xa5   : > { %1206 = vst.msk [vmem:[%s1746_s29 + $0xe8] sm:$0xff] %vm1176_vm0, %v1173_v46 }
  0xa6   : > { %v1135_v19 = vadd.f32 %v1103_v32, %v1035_v40  ;;  %v936_v42 = vadd.f32 %v904_v18, %v835_v53 }
  0xa8   : > { %v1174_v55 = vadd.f32 %v2111_v62, %v1135_v19  ;;  %v1036_v8 = vadd.f32 %v1004_v23, %v936_v42 }
  0xaa   : > { %1207 = vst.msk [vmem:[%s1746_s29 + $0xf0] sm:$0xff] %vm1176_vm0, %v1174_v55  ;;  %v1136_v7 = vadd.f32 %v1104_v54, %v1036_v8 }
  0xac   : > { %v1175_v20 = vadd.f32 %v2111_v62, %v1136_v7 }
  0xae   : > { %1208 = vst.msk [vmem:[%s1746_s29 + $0xf8] sm:$0xff] %vm1176_vm0, %v1175_v20 }
  0xaf PF: > { %s13_s14 = sadd.s32 1, %s1576_s14   ;;  %s2209_s12 = smov %s1572_s13 }
  0xb0   : > { %p10_p5 = scmp.ge.s32.totalorder %s13_s14, 4   ;;  %s2210_s13 = smov %s2212_s15 }
  0xb2   :  { %12 = sbr.rel (!%p10_p5) target bundleno = 2 (0x2), region = 70 }

// kernel: bilevel_routing_deformable_attention.10
= control target key start
LH: loop header
LB: loop body
LE: loop exit
PB: predicated region body
PF: predicated region fallthrough
CT: control target
= control target key end

     0   :  { %vm340_vm0 = vcmask 1043456   ;;  %vm243_vm1 = vcmask 64512   ;;  %vm1223_vm2 = vcmask 130048   ;;  %s2623_s1 = inlined_call_operand.vmem [shape: bf16[8,16], index: 1, kind: input, shape index: {}]   ;;  %s2624_s0 = inlined_call_operand.vmem [shape: bf16[512,8], index: 0, kind: input, shape index: {}]   ;;  %s2625_s2 = inlined_call_operand.vmem [shape: f32[1,16], index: 2, kind: input, shape index: {}]   ;;  %s2626_s3 = inlined_call_operand.vmem [shape: f32[1,16], index: 3, kind: input, shape index: {}]   ;;  %s2627_s4 = inlined_call_operand.vmem [shape: f32[512,16], index: 4, kind: output, shape index: {}]  }
   0x1   :  { %v82_v0 = vld [vmem:[%s2623_s1] sm:$0xf]  ;;  %v1527_v4 = vld [vmem:[%s2624_s0 + $0x8] sm:$0xff]   ;;  %v1529_v6 = vld [vmem:[%s2624_s0 + $0x10] sm:$0xff]  }
   0x2   :  { %1523 = vmatprep.subr.msk.bf16.mxu0 %vm340_vm0, %v82_v0  ;;  %1524 = vmatprep.subr.msk.bf16.mxu1 %vm340_vm0, %v82_v0  ;;  %v342_v1 = vsel %vm340_vm0, %v82_v0, 0  ;;  %v1525_v2 = vld [vmem:[%s2624_s0] sm:$0xff]   ;;  %v1528_v5 = vld [vmem:[%s2624_s0 + $0x88] sm:$0xff]   ;;  %v1530_v7 = vld [vmem:[%s2624_s0 + $0x90] sm:$0xff]  }
   0x3   :  { %1456 = vmatpush3.bf16.msra.mxu0 %v342_v1  ;;  %1522 = vmatpush3.bf16.msra.mxu1 %v342_v1  ;;  %v1526_v3 = vld [vmem:[%s2624_s0 + $0x80] sm:$0xff]   ;;  %v1531_v8 = vld [vmem:[%s2624_s0 + $0x18] sm:$0xff]   ;;  %v1535_v12 = vld [vmem:[%s2624_s0 + $0x28] sm:$0xff]  }
   0x4   :  { %1457 = vmatprep.mubr.msk.bf16.mxu0 %vm243_vm1, %v1525_v2  ;;  %1489 = vmatprep.mubr.msk.bf16.mxu1 %vm243_vm1, %v1526_v3  ;;  %v1532_v9 = vld [vmem:[%s2624_s0 + $0x98] sm:$0xff]   ;;  %v1533_v10 = vld [vmem:[%s2624_s0 + $0x20] sm:$0xff]   ;;  %v1536_v13 = vld [vmem:[%s2624_s0 + $0xa8] sm:$0xff]  }
   0x5   :  { %v1534_v11 = vld [vmem:[%s2624_s0 + $0xa0] sm:$0xff]   ;;  %v1537_v14 = vld [vmem:[%s2624_s0 + $0x30] sm:$0xff]   ;;  %v1539_v16 = vld [vmem:[%s2624_s0 + $0x38] sm:$0xff]  }
   0x6   :  { %1458 = vmatmul.mubr.msk.bf16.vlgmr.msra.gmra.mxu0 %vm243_vm1, %v1527_v4  ;;  %1490 = vmatmul.mubr.msk.bf16.vlgmr.msra.gmra.mxu1 %vm243_vm1, %v1528_v5  ;;  %v1538_v15 = vld [vmem:[%s2624_s0 + $0xb0] sm:$0xff]   ;;  %v1540_v17 = vld [vmem:[%s2624_s0 + $0xb8] sm:$0xff]   ;;  %v1541_v18 = vld [vmem:[%s2624_s0 + $0x40] sm:$0xff]  }
   0x7   :  { %1461 = vmatprep.mubr.msk.bf16.mxu0 %vm243_vm1, %v1529_v6  ;;  %1493 = vmatprep.mubr.msk.bf16.mxu1 %vm243_vm1, %v1530_v7  ;;  %v1542_v19 = vld [vmem:[%s2624_s0 + $0xc0] sm:$0xff]   ;;  %v1543_v20 = vld [vmem:[%s2624_s0 + $0x48] sm:$0xff]   ;;  %v1545_v22 = vld [vmem:[%s2624_s0 + $0x50] sm:$0xff]  }
   0x8   :  { %v1544_v21 = vld [vmem:[%s2624_s0 + $0xc8] sm:$0xff]   ;;  %v1546_v23 = vld [vmem:[%s2624_s0 + $0xd0] sm:$0xff]   ;;  %v1547_v24 = vld [vmem:[%s2624_s0 + $0x58] sm:$0xff]  }
   0x9   :  { %v1548_v25 = vld [vmem:[%s2624_s0 + $0xd8] sm:$0xff]   ;;  %v1549_v26 = vld [vmem:[%s2624_s0 + $0x60] sm:$0xff]   ;;  %v1551_v28 = vld [vmem:[%s2624_s0 + $0x68] sm:$0xff]  }
   0xa   :  { %v1550_v27 = vld [vmem:[%s2624_s0 + $0xe0] sm:$0xff]   ;;  %v1552_v29 = vld [vmem:[%s2624_s0 + $0xe8] sm:$0xff]   ;;  %v1553_v30 = vld [vmem:[%s2624_s0 + $0x70] sm:$0xff]  }
   0xb   :  { %v1554_v31 = vld [vmem:[%s2624_s0 + $0xf0] sm:$0xff]   ;;  %v1555_v32 = vld [vmem:[%s2624_s0 + $0x78] sm:$0xff]   ;;  %v1974_v34 = vld [vmem:[%s2625_s2] ss:$0 sm:$0xff] }
   0xc   :  { %v1556_v33 = vld [vmem:[%s2624_s0 + $0xf8] sm:$0xff]   ;;  %v1979_v36 = vld [vmem:[%s2626_s3] ss:$0 sm:$0xff] }
   0xe   :  { %1462 = vmatmul.mubr.msk.bf16.gmra.mxu0 %vm243_vm1, %v1531_v8  ;;  %1494 = vmatmul.mubr.msk.bf16.gmra.mxu1 %vm243_vm1, %v1532_v9 }
   0xf   :  { %1465 = vmatprep.mubr.msk.bf16.mxu0 %vm243_vm1, %v1533_v10  ;;  %1497 = vmatprep.mubr.msk.bf16.mxu1 %vm243_vm1, %v1534_v11 }
  0x16   :  { %1466 = vmatmul.mubr.msk.bf16.gmra.mxu0 %vm243_vm1, %v1535_v12  ;;  %1498 = vmatmul.mubr.msk.bf16.gmra.mxu1 %vm243_vm1, %v1536_v13 }
  0x17   :  { %1469 = vmatprep.mubr.msk.bf16.mxu0 %vm243_vm1, %v1537_v14  ;;  %1501 = vmatprep.mubr.msk.bf16.mxu1 %vm243_vm1, %v1538_v15 }
  0x1e   :  { %1470 = vmatmul.mubr.msk.bf16.gmra.mxu0 %vm243_vm1, %v1539_v16  ;;  %1502 = vmatmul.mubr.msk.bf16.gmra.mxu1 %vm243_vm1, %v1540_v17 }
  0x1f   :  { %1473 = vmatprep.mubr.msk.bf16.mxu0 %vm243_vm1, %v1541_v18  ;;  %1505 = vmatprep.mubr.msk.bf16.mxu1 %vm243_vm1, %v1542_v19 }
  0x26   :  { %1474 = vmatmul.mubr.msk.bf16.gmra.mxu0 %vm243_vm1, %v1543_v20  ;;  %1506 = vmatmul.mubr.msk.bf16.gmra.mxu1 %vm243_vm1, %v1544_v21 }
  0x27   :  { %1477 = vmatprep.mubr.msk.bf16.mxu0 %vm243_vm1, %v1545_v22  ;;  %1509 = vmatprep.mubr.msk.bf16.mxu1 %vm243_vm1, %v1546_v23 }
  0x2e   :  { %1478 = vmatmul.mubr.msk.bf16.gmra.mxu0 %vm243_vm1, %v1547_v24  ;;  %1510 = vmatmul.mubr.msk.bf16.gmra.mxu1 %vm243_vm1, %v1548_v25 }
  0x2f   :  { %1481 = vmatprep.mubr.msk.bf16.mxu0 %vm243_vm1, %v1549_v26  ;;  %1513 = vmatprep.mubr.msk.bf16.mxu1 %vm243_vm1, %v1550_v27 }
  0x36   :  { %1482 = vmatmul.mubr.msk.bf16.gmra.mxu0 %vm243_vm1, %v1551_v28  ;;  %1514 = vmatmul.mubr.msk.bf16.gmra.mxu1 %vm243_vm1, %v1552_v29 }
  0x37   :  { %1485 = vmatprep.mubr.msk.bf16.mxu0 %vm243_vm1, %v1553_v30  ;;  %1517 = vmatprep.mubr.msk.bf16.mxu1 %vm243_vm1, %v1554_v31 }
  0x3e   :  { %1486 = vmatmul.mubr.msk.bf16.gmra.mxu0 %vm243_vm1, %v1555_v32  ;;  %1518 = vmatmul.mubr.msk.bf16.gmra.mxu1 %vm243_vm1, %v1556_v33 }
  0xc6   :  { %v1459_v35 = vpop.f32.mrf.mxu0  ;;  %v1491_v38 = vpop.f32.mrf.mxu1 }
  0xc7   :  { %v642_v37 = vmul.f32 %v1459_v35, %v1974_v34  ;;  %v674_v39 = vmul.f32 %v1491_v38, %v1974_v34 }
  0xc8   :  { %v378_v40 = vpop.f32.mrf.mxu0  ;;  %v506_v43 = vpop.f32.mrf.mxu1 }
  0xc9   :  { %v1984_v41 = vadd.f32 %v1979_v36, %v642_v37  ;;  %v640_v42 = vmul.f32 %v1974_v34, %v378_v40  ;;  %v1988_v44 = vadd.f32 %v1979_v36, %v674_v39  ;;  %v672_v45 = vmul.f32 %v1974_v34, %v506_v43 }
  0xca   :  { %v1460_v46 = vpop.f32.mrf.mxu0  ;;  %v1492_v50 = vpop.f32.mrf.mxu1 }
  0xcb   :  { %v1360_v47 = vmul.f32 -1.442695, %v1984_v41  ;;  %v1993_v48 = vadd.f32 %v1979_v36, %v640_v42  ;;  %v643_v49 = vmul.f32 %v1460_v46, %v1974_v34  ;;  %v1392_v51 = vmul.f32 -1.442695, %v1988_v44 }
  0xcc   :  { %v1998_v52 = vadd.f32 %v1979_v36, %v672_v45  ;;  %v675_v53 = vmul.f32 %v1492_v50, %v1974_v34  ;;  %v381_v54 = vpop.f32.mrf.mxu0  ;;  %v509_v58 = vpop.f32.mrf.mxu1 }
  0xcd   :  { %1557 = vpow2.f32 %v1360_v47  ;;  %v1358_v55 = vmul.f32 -1.442695, %v1993_v48  ;;  %v2003_v56 = vadd.f32 %v1979_v36, %v643_v49  ;;  %v641_v57 = vmul.f32 %v1974_v34, %v381_v54 }
  0xce   :  { %1559 = vpow2.f32 %v1392_v51  ;;  %v1390_v59 = vmul.f32 -1.442695, %v1998_v52  ;;  %v2008_v60 = vadd.f32 %v1979_v36, %v675_v53  ;;  %v673_v61 = vmul.f32 %v1974_v34, %v509_v58  ;;  %v1463_v62 = vpop.f32.mrf.mxu0  ;;  %v1495_v2 = vpop.f32.mrf.mxu1 }
  0xcf   :  { %1561 = vpow2.f32 %v1358_v55  ;;  %v1361_v63 = vmul.f32 -1.442695, %v2003_v56  ;;  %v2013_v0 = vadd.f32 %v1979_v36, %v641_v57  ;;  %v646_v1 = vmul.f32 %v1463_v62, %v1974_v34 }
  0xd0   :  { %1563 = vpow2.f32 %v1390_v59  ;;  %v1393_v3 = vmul.f32 -1.442695, %v2008_v60  ;;  %v2018_v4 = vadd.f32 %v1979_v36, %v673_v61  ;;  %v678_v5 = vmul.f32 %v1495_v2, %v1974_v34  ;;  %v394_v6 = vpop.f32.mrf.mxu0  ;;  %v522_v10 = vpop.f32.mrf.mxu1 }
  0xd1   :  { %1565 = vpow2.f32 %v1361_v63  ;;  %v1359_v7 = vmul.f32 -1.442695, %v2013_v0  ;;  %v2023_v8 = vadd.f32 %v1979_v36, %v646_v1  ;;  %v644_v9 = vmul.f32 %v1974_v34, %v394_v6 }
  0xd2   :  { %1567 = vpow2.f32 %v1393_v3  ;;  %v1391_v11 = vmul.f32 -1.442695, %v2018_v4  ;;  %v2028_v12 = vadd.f32 %v1979_v36, %v678_v5  ;;  %v676_v13 = vmul.f32 %v1974_v34, %v522_v10  ;;  %v1464_v14 = vpop.f32.mrf.mxu0  ;;  %v1496_v18 = vpop.f32.mrf.mxu1 }
  0xd3   :  { %1569 = vpow2.f32 %v1359_v7  ;;  %v1364_v15 = vmul.f32 -1.442695, %v2023_v8  ;;  %v2033_v16 = vadd.f32 %v1979_v36, %v644_v9  ;;  %v647_v17 = vmul.f32 %v1464_v14, %v1974_v34 }
  0xd4   :  { %1571 = vpow2.f32 %v1391_v11  ;;  %v1396_v19 = vmul.f32 -1.442695, %v2028_v12  ;;  %v2038_v20 = vadd.f32 %v1979_v36, %v676_v13  ;;  %v679_v21 = vmul.f32 %v1496_v18, %v1974_v34  ;;  %v397_v22 = vpop.f32.mrf.mxu0  ;;  %v525_v26 = vpop.f32.mrf.mxu1 }
  0xd5   :  { %1573 = vpow2.f32 %v1364_v15  ;;  %v1362_v23 = vmul.f32 -1.442695, %v2033_v16  ;;  %v2043_v24 = vadd.f32 %v1979_v36, %v647_v17  ;;  %v645_v25 = vmul.f32 %v1974_v34, %v397_v22 }
  0xd6   :  { %1575 = vpow2.f32 %v1396_v19  ;;  %v1394_v27 = vmul.f32 -1.442695, %v2038_v20  ;;  %v2048_v28 = vadd.f32 %v1979_v36, %v679_v21  ;;  %v677_v29 = vmul.f32 %v1974_v34, %v525_v26  ;;  %v1467_v30 = vpop.f32.mrf.mxu0  ;;  %v1499_v33 = vpop.f32.mrf.mxu1 }
  0xd7   :  { %1577 = vpow2.f32 %v1362_v23  ;;  %v1365_v31 = vmul.f32 -1.442695, %v2043_v24  ;;  %v2053_v32 = vadd.f32 %v1979_v36, %v645_v25  ;;  %v650_v57 = vmul.f32 %v1467_v30, %v1974_v34 }
  0xd8   :  { %1579 = vpow2.f32 %v1394_v27  ;;  %v1397_v35 = vmul.f32 -1.442695, %v2048_v28  ;;  %v2057_v37 = vadd.f32 %v1979_v36, %v677_v29  ;;  %v410_v38 = vpop.f32.mrf.mxu0  ;;  %v538_v40 = vpop.f32.mrf.mxu1  ;;  %v682_v62 = vmul.f32 %v1499_v33, %v1974_v34 }
  0xd9   :  { %1581 = vpow2.f32 %v1365_v31  ;;  %v1363_v39 = vmul.f32 -1.442695, %v2053_v32  ;;  %v648_v2 = vmul.f32 %v1974_v34, %v410_v38  ;;  %v680_v6 = vmul.f32 %v1974_v34, %v538_v40 }
  0xda   :  { %v1558_v42 = vpop.eup %1557  ;;  %1583 = vpow2.f32 %v1397_v35  ;;  %v1395_v43 = vmul.f32 -1.442695, %v2057_v37  ;;  %v1468_v45 = vpop.f32.mrf.mxu0  ;;  %v2066_v11 = vadd.f32 %v1979_v36, %v650_v57  ;;  %v2070_v18 = vadd.f32 %v1979_v36, %v682_v62 }
  0xdb   :  { %v1560_v46 = vpop.eup %1559  ;;  %v969_v47 = vadd.f32 1.0, %v1558_v42  ;;  %1585 = vpow2.f32 %v1363_v39  ;;  %v1500_v49 = vpop.f32.mrf.mxu1  ;;  %v651_v13 = vmul.f32 %v1468_v45, %v1974_v34  ;;  %v2074_v23 = vadd.f32 %v1979_v36, %v648_v2 }
  0xdc   :  { %v1562_v50 = vpop.eup %1561  ;;  %v1001_v51 = vadd.f32 1.0, %v1560_v46  ;;  %1587 = vpow2.f32 %v1395_v43  ;;  %v413_v53 = vpop.f32.mrf.mxu0  ;;  %v683_v19 = vmul.f32 %v1500_v49, %v1974_v34  ;;  %v2078_v29 = vadd.f32 %v1979_v36, %v680_v6 }
  0xdd   :  { %v1564_v54 = vpop.eup %1563  ;;  %1589 = vrcp.f32 %v969_v47  ;;  %v967_v55 = vadd.f32 1.0, %v1562_v50  ;;  %v541_v58 = vpop.f32.mrf.mxu1  ;;  %v649_v25 = vmul.f32 %v1974_v34, %v413_v53  ;;  %v1368_v38 = vmul.f32 -1.442695, %v2066_v11 }
  0xde   :  { %v1566_v59 = vpop.eup %1565  ;;  %1591 = vrcp.f32 %v1001_v51  ;;  %v999_v61 = vadd.f32 1.0, %v1564_v54  ;;  %v1471_v7 = vpop.f32.mrf.mxu0  ;;  %v681_v30 = vmul.f32 %v1974_v34, %v541_v58  ;;  %v2083_v39 = vadd.f32 %v1979_v36, %v651_v13 }
  0xdf   :  { %v1568_v63 = vpop.eup %1567  ;;  %1593 = vrcp.f32 %v967_v55  ;;  %v970_v1 = vadd.f32 1.0, %v1566_v59  ;;  %v1503_v14 = vpop.f32.mrf.mxu1  ;;  %v1400_v45 = vmul.f32 -1.442695, %v2070_v18  ;;  %v2087_v46 = vadd.f32 %v1979_v36, %v683_v19 }
  0xe0   :  { %v1570_v3 = vpop.eup %1569  ;;  %1595 = vrcp.f32 %v999_v61  ;;  %v1002_v5 = vadd.f32 1.0, %v1568_v63  ;;  %v426_v31 = vpop.f32.mrf.mxu0  ;;  %v1366_v50 = vmul.f32 -1.442695, %v2074_v23  ;;  %v2091_v51 = vadd.f32 %v1979_v36, %v649_v25 }
  0xe1   :  { %v1572_v9 = vpop.eup %1571  ;;  %1597 = vrcp.f32 %v970_v1  ;;  %v968_v10 = vadd.f32 1.0, %v1570_v3  ;;  %v554_v40 = vpop.f32.mrf.mxu1  ;;  %v1398_v55 = vmul.f32 -1.442695, %v2078_v29  ;;  %v2095_v57 = vadd.f32 %v1979_v36, %v681_v30 }
  0xe2   :  { %v1574_v15 = vpop.eup %1573  ;;  %1599 = vrcp.f32 %v1002_v5  ;;  %v1000_v17 = vadd.f32 1.0, %v1572_v9  ;;  %v1472_v58 = vpop.f32.mrf.mxu0  ;;  %v1369_v62 = vmul.f32 -1.442695, %v2083_v39  ;;  %v654_v63 = vmul.f32 %v1471_v7, %v1974_v34 }
  0xe3   :  { %v1576_v21 = vpop.eup %1575  ;;  %1601 = vrcp.f32 %v968_v10  ;;  %v973_v22 = vadd.f32 1.0, %v1574_v15  ;;  %v1504_v1 = vpop.f32.mrf.mxu1  ;;  %v1401_v5 = vmul.f32 -1.442695, %v2087_v46  ;;  %v686_v6 = vmul.f32 %v1503_v14, %v1974_v34 }
  0xe4   :  { %v1578_v26 = vpop.eup %1577  ;;  %1603 = vrcp.f32 %v1000_v17  ;;  %v1005_v27 = vadd.f32 1.0, %v1576_v21  ;;  %v1367_v13 = vmul.f32 -1.442695, %v2091_v51  ;;  %v652_v15 = vmul.f32 %v1974_v34, %v426_v31 }
  0xe5   :  { %v1580_v33 = vpop.eup %1579  ;;  %1605 = vrcp.f32 %v973_v22  ;;  %v971_v35 = vadd.f32 1.0, %v1578_v26  ;;  %v1399_v7 = vmul.f32 -1.442695, %v2095_v57  ;;  %v684_v21 = vmul.f32 %v1974_v34, %v554_v40  ;;  %v429_v22 = vpop.f32.mrf.mxu0 }
  0xe6   :  { %v1582_v42 = vpop.eup %1581  ;;  %1607 = vrcp.f32 %v1005_v27  ;;  %v1003_v43 = vadd.f32 1.0, %v1580_v33  ;;  %v2113_v14 = vadd.f32 %v1979_v36, %v654_v63  ;;  %v557_v26 = vpop.f32.mrf.mxu1  ;;  %v2122_v31 = vadd.f32 %v1979_v36, %v686_v6 }
  0xe7   :  { %v1584_v47 = vpop.eup %1583  ;;  %1609 = vrcp.f32 %v971_v35  ;;  %v974_v49 = vadd.f32 1.0, %v1582_v42 }
  0xe8   :  { %v1586_v53 = vpop.eup %1585  ;;  %1611 = vrcp.f32 %v1003_v43  ;;  %v1006_v54 = vadd.f32 1.0, %v1584_v47  ;;  %v2140_v43 = vadd.f32 %v1979_v36, %v684_v21 }
  0xe9   :  { %v1588_v59 = vpop.eup %1587  ;;  %1613 = vrcp.f32 %v974_v49  ;;  %v972_v61 = vadd.f32 1.0, %v1586_v53  ;;  %v2154_v53 = vpop.f32.mrf.mxu1 }
  0xea   :  { %v1590_v2 = vpop.eup %1589  ;;  %1615 = vrcp.f32 %v1006_v54  ;;  %v1004_v3 = vadd.f32 1.0, %v1588_v59 }
  0xeb   :  { %v1592_v9 = vpop.eup %1591  ;;  %v1161_v10 = vmul.f32 %v1590_v2, %v1984_v41  ;;  %1617 = vrcp.f32 %v972_v61  ;;  %v1402_v2 = vmul.f32 -1.442695, %v2140_v43 }
  0xec   :  { %v1594_v17 = vpop.eup %1593  ;;  %v1193_v19 = vmul.f32 %v1592_v9, %v1988_v44  ;;  %1619 = vrcp.f32 %v1004_v3  ;;  %v655_v44 = vmul.f32 %v1472_v58, %v1974_v34  ;;  %v1404_v58 = vmul.f32 -1.442695, %v2122_v31 }
  0xed   :  { %v1596_v25 = vpop.eup %1595  ;;  %1226 = vst.msk [vmem:[%s2627_s4 + $0x10] sm:$0xff] %vm1223_vm2, %v1161_v10  ;;  %v1159_v41 = vmul.f32 %v1594_v17, %v1993_v48  ;;  %1621 = vpow2.f32 %v1368_v38  ;;  %v687_v48 = vmul.f32 %v1504_v1, %v1974_v34  ;;  %v2131_v38 = vadd.f32 %v1979_v36, %v652_v15  ;;  %v570_v10 = vpop.f32.mrf.mxu1 }
  0xee   :  { %v1598_v27 = vpop.eup %1597  ;;  %1258 = vst.msk [vmem:[%s2627_s4 + $0x110] sm:$0xff] %vm1223_vm2, %v1193_v19  ;;  %v1191_v30 = vmul.f32 %v1596_v25, %v1998_v52  ;;  %1623 = vpow2.f32 %v1400_v45  ;;  %v653_v52 = vmul.f32 %v1974_v34, %v429_v22  ;;  %v2143_v45 = vpop.f32.mrf.mxu0 }
  0xef   :  { %v1600_v33 = vpop.eup %1599  ;;  %1224 = vst.msk [vmem:[%s2627_s4] sm:$0xff] %vm1223_vm2, %v1159_v41  ;;  %v1162_v35 = vmul.f32 %v1598_v27, %v2003_v56  ;;  %1625 = vpow2.f32 %v1366_v50  ;;  %v685_v56 = vmul.f32 %v1974_v34, %v557_v26  ;;  %v1372_v50 = vmul.f32 -1.442695, %v2113_v14  ;;  %v1508_v41 = vpop.f32.mrf.mxu1 }
  0xf0   :  { %v1602_v40 = vpop.eup %1601  ;;  %1256 = vst.msk [vmem:[%s2627_s4 + $0x100] sm:$0xff] %vm1223_vm2, %v1191_v30  ;;  %v1194_v42 = vmul.f32 %v1600_v33, %v2008_v60  ;;  %1627 = vpow2.f32 %v1398_v55  ;;  %v2152_v60 = vadd.f32 %v1979_v36, %v655_v44  ;;  %v2172_v63 = vadd.f32 %v1979_v36, %v653_v52 }
  0xf1   :  { %v1604_v47 = vpop.eup %1603  ;;  %1227 = vst.msk [vmem:[%s2627_s4 + $0x18] sm:$0xff] %vm1223_vm2, %v1162_v35  ;;  %v1160_v49 = vmul.f32 %v1602_v40, %v2013_v0  ;;  %1629 = vpow2.f32 %v1369_v62  ;;  %v2163_v0 = vadd.f32 %v1979_v36, %v687_v48  ;;  %v1370_v62 = vmul.f32 -1.442695, %v2131_v38  ;;  %v573_v52 = vpop.f32.mrf.mxu1 }
  0xf2   :  { %v1606_v54 = vpop.eup %1605  ;;  %1259 = vst.msk [vmem:[%s2627_s4 + $0x118] sm:$0xff] %vm1223_vm2, %v1194_v42  ;;  %v1192_v55 = vmul.f32 %v1604_v47, %v2018_v4  ;;  %1631 = vpow2.f32 %v1401_v5  ;;  %v2181_v3 = vadd.f32 %v1979_v36, %v685_v56  ;;  %v1373_v9 = vmul.f32 -1.442695, %v2152_v60 }
  0xf3   :  { %v1608_v59 = vpop.eup %1607  ;;  %1225 = vst.msk [vmem:[%s2627_s4 + $0x8] sm:$0xff] %vm1223_vm2, %v1160_v49  ;;  %v1165_v61 = vmul.f32 %v1606_v54, %v2023_v8  ;;  %1633 = vpow2.f32 %v1367_v13  ;;  %v442_v8 = vpop.f32.mrf.mxu0  ;;  %v1405_v15 = vmul.f32 -1.442695, %v2163_v0  ;;  %v1371_v19 = vmul.f32 -1.442695, %v2172_v63 }
  0xf4   :  { %v1610_v4 = vpop.eup %1609  ;;  %1257 = vst.msk [vmem:[%s2627_s4 + $0x108] sm:$0xff] %vm1223_vm2, %v1192_v55  ;;  %v1197_v1 = vmul.f32 %v1608_v59, %v2028_v12  ;;  %1635 = vpow2.f32 %v1399_v7  ;;  %v1403_v21 = vmul.f32 -1.442695, %v2181_v3  ;;  %v658_v35 = vmul.f32 %v2143_v45, %v1974_v34 }
  0xf5   :  { %v1612_v5 = vpop.eup %1611  ;;  %1230 = vst.msk [vmem:[%s2627_s4 + $0x30] sm:$0xff] %vm1223_vm2, %v1165_v61  ;;  %v1163_v6 = vmul.f32 %v1610_v4, %v2033_v16  ;;  %1637 = vpow2.f32 %v1372_v50  ;;  %v1476_v22 = vpop.f32.mrf.mxu0  ;;  %v690_v56 = vmul.f32 %v2154_v53, %v1974_v34  ;;  %v656_v50 = vmul.f32 %v1974_v34, %v442_v8 }
  0xf6   :  { %v1614_v12 = vpop.eup %1613  ;;  %1262 = vst.msk [vmem:[%s2627_s4 + $0x130] sm:$0xff] %vm1223_vm2, %v1197_v1  ;;  %v1195_v13 = vmul.f32 %v1612_v5, %v2038_v20  ;;  %1639 = vpow2.f32 %v1404_v58  ;;  %v688_v58 = vmul.f32 %v1974_v34, %v570_v10  ;;  %v659_v4 = vmul.f32 %v1476_v22, %v1974_v34  ;;  %v1511_v53 = vpop.f32.mrf.mxu1 }
  0xf7   :  { %v1616_v17 = vpop.eup %1615  ;;  %1228 = vst.msk [vmem:[%s2627_s4 + $0x20] sm:$0xff] %vm1223_vm2, %v1163_v6  ;;  %v1166_v16 = vmul.f32 %v1614_v12, %v2043_v24  ;;  %1641 = vpow2.f32 %v1370_v62  ;;  %v445_v48 = vpop.f32.mrf.mxu0  ;;  %v2232_v62 = vadd.f32 %v1979_v36, %v658_v35  ;;  %v2236_v8 = vadd.f32 %v1979_v36, %v690_v56 }
  0xf8   :  { %v1618_v7 = vpop.eup %1617  ;;  %1260 = vst.msk [vmem:[%s2627_s4 + $0x120] sm:$0xff] %vm1223_vm2, %v1195_v13  ;;  %v1198_v20 = vmul.f32 %v1616_v17, %v2048_v28  ;;  %1643 = vpow2.f32 %v1402_v2  ;;  %v691_v5 = vmul.f32 %v1508_v41, %v1974_v34  ;;  %v2240_v10 = vadd.f32 %v1979_v36, %v656_v50 }
  0xf9   :  { %v1620_v25 = vpop.eup %1619  ;;  %1231 = vst.msk [vmem:[%s2627_s4 + $0x38] sm:$0xff] %vm1223_vm2, %v1166_v16  ;;  %v1164_v24 = vmul.f32 %v1618_v7, %v2053_v32  ;;  %1645 = vpow2.f32 %v1373_v9  ;;  %v1479_v59 = vpop.f32.mrf.mxu0  ;;  %v657_v12 = vmul.f32 %v1974_v34, %v445_v48  ;;  %v2244_v17 = vadd.f32 %v1979_v36, %v688_v58 }
  0xfa   :  { %v1622_v44 = vpop.eup %1621  ;;  %1263 = vst.msk [vmem:[%s2627_s4 + $0x138] sm:$0xff] %vm1223_vm2, %v1198_v20  ;;  %v1196_v28 = vmul.f32 %v1620_v25, %v2057_v37  ;;  %1647 = vpow2.f32 %v1405_v15  ;;  %v689_v16 = vmul.f32 %v1974_v34, %v573_v52  ;;  %v2249_v22 = vadd.f32 %v1979_v36, %v659_v4  ;;  %v586_v25 = vpop.f32.mrf.mxu1 }
  0xfb   :  { %v1624_v26 = vpop.eup %1623  ;;  %1229 = vst.msk [vmem:[%s2627_s4 + $0x28] sm:$0xff] %vm1223_vm2, %v1164_v24  ;;  %v977_v27 = vadd.f32 1.0, %v1622_v44  ;;  %1649 = vpow2.f32 %v1371_v19  ;;  %v458_v19 = vpop.f32.mrf.mxu0  ;;  %v1408_v44 = vmul.f32 -1.442695, %v2236_v8  ;;  %v694_v58 = vmul.f32 %v1511_v53, %v1974_v34 }
  0xfc   :  { %v1626_v32 = vpop.eup %1625  ;;  %1261 = vst.msk [vmem:[%s2627_s4 + $0x128] sm:$0xff] %vm1223_vm2, %v1196_v28  ;;  %v1009_v30 = vadd.f32 1.0, %v1624_v26  ;;  %1651 = vpow2.f32 %v1403_v21  ;;  %v1376_v21 = vmul.f32 -1.442695, %v2232_v62  ;;  %v2253_v28 = vadd.f32 %v1979_v36, %v691_v5 }
  0xfd   :  { %v1628_v33 = vpop.eup %1627  ;;  %1653 = vrcp.f32 %v977_v27  ;;  %v975_v37 = vadd.f32 1.0, %v1626_v32  ;;  %v1374_v32 = vmul.f32 -1.442695, %v2240_v10  ;;  %v2261_v35 = vadd.f32 %v1979_v36, %v689_v16  ;;  %v1480_v52 = vpop.f32.mrf.mxu0 }
  0xfe   :  { %v1630_v40 = vpop.eup %1629  ;;  %1655 = vrcp.f32 %v1009_v30  ;;  %v1007_v42 = vadd.f32 1.0, %v1628_v33  ;;  %v2257_v30 = vadd.f32 %v1979_v36, %v657_v12  ;;  %v1377_v56 = vmul.f32 -1.442695, %v2249_v22 }
  0xff   :  { %v1632_v47 = vpop.eup %1631  ;;  %1657 = vrcp.f32 %v975_v37  ;;  %v978_v49 = vadd.f32 1.0, %v1630_v40  ;;  %v1406_v37 = vmul.f32 -1.442695, %v2244_v17 }
 0x100   :  { %v1634_v54 = vpop.eup %1633  ;;  %1659 = vrcp.f32 %v1007_v42  ;;  %v1010_v55 = vadd.f32 1.0, %v1632_v47  ;;  %v662_v47 = vmul.f32 %v1479_v59, %v1974_v34  ;;  %v1375_v4 = vmul.f32 -1.442695, %v2257_v30 }
 0x101   :  { %v1636_v61 = vpop.eup %1635  ;;  %1661 = vrcp.f32 %v978_v49  ;;  %v976_v45 = vadd.f32 1.0, %v1634_v54  ;;  %v1512_v49 = vpop.f32.mrf.mxu1  ;;  %v1407_v59 = vmul.f32 -1.442695, %v2261_v35 }
 0x102   :  { %v1638_v1 = vpop.eup %1637  ;;  %1663 = vrcp.f32 %v1010_v55  ;;  %v1008_v2 = vadd.f32 1.0, %v1636_v61  ;;  %v1409_v55 = vmul.f32 -1.442695, %v2253_v28  ;;  %v2279_v53 = vadd.f32 %v1979_v36, %v662_v47 }
 0x103   :  { %v1640_v6 = vpop.eup %1639  ;;  %1665 = vrcp.f32 %v976_v45  ;;  %v981_v9 = vadd.f32 1.0, %v1638_v1  ;;  %v660_v1 = vmul.f32 %v1974_v34, %v458_v19  ;;  %v2288_v19 = vadd.f32 %v1979_v36, %v694_v58 }
 0x104   :  { %v1642_v13 = vpop.eup %1641  ;;  %1667 = vrcp.f32 %v1008_v2  ;;  %v1013_v15 = vadd.f32 1.0, %v1640_v6  ;;  %v692_v6 = vmul.f32 %v1974_v34, %v586_v25 }
 0x105   :  { %v1644_v7 = vpop.eup %1643  ;;  %1669 = vrcp.f32 %v981_v9  ;;  %v979_v20 = vadd.f32 1.0, %v1642_v13  ;;  %v461_v9 = vpop.f32.mrf.mxu0 }
 0x106   :  { %v1646_v24 = vpop.eup %1645  ;;  %1671 = vrcp.f32 %v1013_v15  ;;  %v1011_v41 = vadd.f32 1.0, %v1644_v7  ;;  %v589_v13 = vpop.f32.mrf.mxu1 }
 0x107   :  { %v1648_v26 = vpop.eup %1647  ;;  %1673 = vrcp.f32 %v979_v20  ;;  %v982_v27 = vadd.f32 1.0, %v1646_v24 }
 0x108   :  { %v1650_v48 = vpop.eup %1649  ;;  %1675 = vrcp.f32 %v1011_v41  ;;  %v1014_v33 = vadd.f32 1.0, %v1648_v26  ;;  %v2306_v41 = vadd.f32 %v1979_v36, %v692_v6 }
 0x109   :  { %v1652_v40 = vpop.eup %1651  ;;  %1677 = vrcp.f32 %v982_v27  ;;  %v980_v42 = vadd.f32 1.0, %v1650_v48  ;;  %v2320_v48 = vpop.f32.mrf.mxu1 }
 0x10a   :  { %v1654_v50 = vpop.eup %1653  ;;  %1679 = vrcp.f32 %v1014_v33  ;;  %v1012_v54 = vadd.f32 1.0, %v1652_v40 }
 0x10b   :  { %v1656_v61 = vpop.eup %1655  ;;  %v1169_v45 = vmul.f32 %v1654_v50, %v2066_v11  ;;  %1681 = vrcp.f32 %v980_v42  ;;  %v1410_v50 = vmul.f32 -1.442695, %v2306_v41 }
 0x10c   :  { %v1658_v2 = vpop.eup %1657  ;;  %v1201_v5 = vmul.f32 %v1656_v61, %v2070_v18  ;;  %1683 = vrcp.f32 %v1012_v54  ;;  %v663_v18 = vmul.f32 %v1480_v52, %v1974_v34  ;;  %v1412_v52 = vmul.f32 -1.442695, %v2288_v19 }
 0x10d   :  { %v1660_v12 = vpop.eup %1659  ;;  %1234 = vst.msk [vmem:[%s2627_s4 + $0x50] sm:$0xff] %vm1223_vm2, %v1169_v45  ;;  %v1167_v11 = vmul.f32 %v1658_v2, %v2074_v23  ;;  %1685 = vpow2.f32 %v1376_v21  ;;  %v695_v23 = vmul.f32 %v1512_v49, %v1974_v34  ;;  %v2297_v21 = vadd.f32 %v1979_v36, %v660_v1  ;;  %v602_v45 = vpop.f32.mrf.mxu1 }
 0x10e   :  { %v1662_v15 = vpop.eup %1661  ;;  %1266 = vst.msk [vmem:[%s2627_s4 + $0x150] sm:$0xff] %vm1223_vm2, %v1201_v5  ;;  %v1199_v16 = vmul.f32 %v1660_v12, %v2078_v29  ;;  %1687 = vpow2.f32 %v1408_v44  ;;  %v661_v29 = vmul.f32 %v1974_v34, %v461_v9  ;;  %v2309_v44 = vpop.f32.mrf.mxu0 }
 0x10f   :  { %v1664_v7 = vpop.eup %1663  ;;  %1232 = vst.msk [vmem:[%s2627_s4 + $0x40] sm:$0xff] %vm1223_vm2, %v1167_v11  ;;  %v1170_v20 = vmul.f32 %v1662_v15, %v2083_v39  ;;  %1689 = vpow2.f32 %v1374_v32  ;;  %v693_v39 = vmul.f32 %v1974_v34, %v589_v13  ;;  %v1380_v32 = vmul.f32 -1.442695, %v2279_v53  ;;  %v1516_v11 = vpop.f32.mrf.mxu1 }
 0x110   :  { %v1666_v25 = vpop.eup %1665  ;;  %1264 = vst.msk [vmem:[%s2627_s4 + $0x140] sm:$0xff] %vm1223_vm2, %v1199_v16  ;;  %v1202_v24 = vmul.f32 %v1664_v7, %v2087_v46  ;;  %1691 = vpow2.f32 %v1406_v37  ;;  %v2318_v46 = vadd.f32 %v1979_v36, %v663_v18  ;;  %v2338_v47 = vadd.f32 %v1979_v36, %v661_v29 }
 0x111   :  { %v1668_v26 = vpop.eup %1667  ;;  %1235 = vst.msk [vmem:[%s2627_s4 + $0x58] sm:$0xff] %vm1223_vm2, %v1170_v20  ;;  %v1168_v27 = vmul.f32 %v1666_v25, %v2091_v51  ;;  %1693 = vpow2.f32 %v1377_v56  ;;  %v2329_v51 = vadd.f32 %v1979_v36, %v695_v23  ;;  %v1378_v56 = vmul.f32 -1.442695, %v2297_v21  ;;  %v605_v29 = vpop.f32.mrf.mxu1 }
 0x112   :  { %v1670_v33 = vpop.eup %1669  ;;  %1267 = vst.msk [vmem:[%s2627_s4 + $0x158] sm:$0xff] %vm1223_vm2, %v1202_v24  ;;  %v1200_v37 = vmul.f32 %v1668_v26, %v2095_v57  ;;  %1695 = vpow2.f32 %v1409_v55  ;;  %v2347_v54 = vadd.f32 %v1979_v36, %v693_v39  ;;  %v1381_v61 = vmul.f32 -1.442695, %v2318_v46 }
 0x113   :  { %v1672_v40 = vpop.eup %1671  ;;  %1233 = vst.msk [vmem:[%s2627_s4 + $0x48] sm:$0xff] %vm1223_vm2, %v1168_v27  ;;  %v1173_v42 = vmul.f32 %v1670_v33, %v2113_v14  ;;  %1697 = vpow2.f32 %v1375_v4  ;;  %v474_v14 = vpop.f32.mrf.mxu0  ;;  %v1413_v1 = vmul.f32 -1.442695, %v2329_v51  ;;  %v1379_v5 = vmul.f32 -1.442695, %v2338_v47 }
 0x114   :  { %v1674_v57 = vpop.eup %1673  ;;  %1265 = vst.msk [vmem:[%s2627_s4 + $0x148] sm:$0xff] %vm1223_vm2, %v1200_v37  ;;  %v1205_v49 = vmul.f32 %v1672_v40, %v2122_v31  ;;  %1699 = vpow2.f32 %v1407_v59  ;;  %v1411_v6 = vmul.f32 -1.442695, %v2347_v54  ;;  %v666_v20 = vmul.f32 %v2309_v44, %v1974_v34 }
 0x115   :  { %v1676_v55 = vpop.eup %1675  ;;  %1238 = vst.msk [vmem:[%s2627_s4 + $0x70] sm:$0xff] %vm1223_vm2, %v1173_v42  ;;  %v1171_v58 = vmul.f32 %v1674_v57, %v2131_v38  ;;  %1701 = vpow2.f32 %v1380_v32  ;;  %v1484_v9 = vpop.f32.mrf.mxu0  ;;  %v698_v39 = vmul.f32 %v2320_v48, %v1974_v34  ;;  %v664_v32 = vmul.f32 %v1974_v34, %v474_v14 }
 0x116   :  { %v1678_v31 = vpop.eup %1677  ;;  %1270 = vst.msk [vmem:[%s2627_s4 + $0x170] sm:$0xff] %vm1223_vm2, %v1205_v49  ;;  %v1203_v4 = vmul.f32 %v1676_v55, %v2140_v43  ;;  %1703 = vpow2.f32 %v1412_v52  ;;  %v696_v52 = vmul.f32 %v1974_v34, %v602_v45  ;;  %v667_v57 = vmul.f32 %v1484_v9, %v1974_v34  ;;  %v1519_v48 = vpop.f32.mrf.mxu1 }
 0x117   :  { %v1680_v2 = vpop.eup %1679  ;;  %1236 = vst.msk [vmem:[%s2627_s4 + $0x60] sm:$0xff] %vm1223_vm2, %v1171_v58  ;;  %v1174_v38 = vmul.f32 %v1678_v31, %v2152_v60  ;;  %1705 = vpow2.f32 %v1378_v56  ;;  %v477_v23 = vpop.f32.mrf.mxu0  ;;  %v2398_v56 = vadd.f32 %v1979_v36, %v666_v20  ;;  %v2402_v14 = vadd.f32 %v1979_v36, %v698_v39  ;;  %v1813_v39 = vld [vmem:[%s2625_s2] ss:$0 sm:$0xff] }
 0x118   :  { %v1682_v59 = vpop.eup %1681  ;;  %1268 = vst.msk [vmem:[%s2627_s4 + $0x160] sm:$0xff] %vm1223_vm2, %v1203_v4  ;;  %v1206_v43 = vmul.f32 %v1680_v2, %v2163_v0  ;;  %1707 = vpow2.f32 %v1410_v50  ;;  %v699_v55 = vmul.f32 %v1516_v11, %v1974_v34  ;;  %v2406_v45 = vadd.f32 %v1979_v36, %v664_v32 }
 0x119   :  { %v1684_v12 = vpop.eup %1683  ;;  %1239 = vst.msk [vmem:[%s2627_s4 + $0x78] sm:$0xff] %vm1223_vm2, %v1174_v38  ;;  %v1172_v60 = vmul.f32 %v1682_v59, %v2172_v63  ;;  %1709 = vpow2.f32 %v1381_v61  ;;  %v1487_v40 = vpop.f32.mrf.mxu0  ;;  %v665_v31 = vmul.f32 %v1974_v34, %v477_v23  ;;  %v2410_v2 = vadd.f32 %v1979_v36, %v696_v52 }
 0x11a   :  { %v1686_v18 = vpop.eup %1685  ;;  %1271 = vst.msk [vmem:[%s2627_s4 + $0x178] sm:$0xff] %vm1223_vm2, %v1206_v43  ;;  %v1204_v0 = vmul.f32 %v1684_v12, %v2181_v3  ;;  %1711 = vpow2.f32 %v1413_v1  ;;  %v697_v38 = vmul.f32 %v1974_v34, %v605_v29  ;;  %v2415_v9 = vadd.f32 %v1979_v36, %v667_v57  ;;  %v618_v12 = vpop.f32.mrf.mxu1 }
 0x11b   :  { %v1688_v13 = vpop.eup %1687  ;;  %1237 = vst.msk [vmem:[%s2627_s4 + $0x68] sm:$0xff] %vm1223_vm2, %v1172_v60  ;;  %v985_v15 = vadd.f32 1.0, %v1686_v18  ;;  %1713 = vpow2.f32 %v1379_v5  ;;  %v490_v5 = vpop.f32.mrf.mxu0  ;;  %v1416_v18 = vmul.f32 -1.442695, %v2402_v14  ;;  %v702_v52 = vmul.f32 %v1813_v39, %v1519_v48  ;;  %v1814_v48 = vld [vmem:[%s2626_s3] ss:$0 sm:$0xff] }
 0x11c   :  { %v1690_v63 = vpop.eup %1689  ;;  %1269 = vst.msk [vmem:[%s2627_s4 + $0x168] sm:$0xff] %vm1223_vm2, %v1204_v0  ;;  %v1017_v16 = vadd.f32 1.0, %v1688_v13  ;;  %1715 = vpow2.f32 %v1411_v6  ;;  %v1384_v6 = vmul.f32 -1.442695, %v2398_v56  ;;  %v2419_v0 = vadd.f32 %v1979_v36, %v699_v55 }
 0x11d   :  { %v1692_v7 = vpop.eup %1691  ;;  %1717 = vrcp.f32 %v985_v15  ;;  %v983_v3 = vadd.f32 1.0, %v1690_v63  ;;  %v1382_v15 = vmul.f32 -1.442695, %v2406_v45  ;;  %v2423_v63 = vadd.f32 %v1979_v36, %v665_v31  ;;  %v1488_v20 = vpop.f32.mrf.mxu0 }
 0x11e   :  { %v1694_v25 = vpop.eup %1693  ;;  %1719 = vrcp.f32 %v1017_v16  ;;  %v1015_v24 = vadd.f32 1.0, %v1692_v7  ;;  %v1414_v7 = vmul.f32 -1.442695, %v2410_v2  ;;  %v668_v57 = vmul.f32 %v1813_v39, %v490_v5 }
 0x11f   :  { %v1696_v26 = vpop.eup %1695  ;;  %1721 = vrcp.f32 %v983_v3  ;;  %v986_v27 = vadd.f32 1.0, %v1694_v25  ;;  %v2427_v3 = vadd.f32 %v1979_v36, %v697_v38  ;;  %v700_v55 = vmul.f32 %v1813_v39, %v618_v12 }
 0x120   :  { %v1698_v33 = vpop.eup %1697  ;;  %1723 = vrcp.f32 %v1015_v24  ;;  %v1018_v37 = vadd.f32 1.0, %v1696_v26  ;;  %v1385_v24 = vmul.f32 -1.442695, %v2415_v9  ;;  %v670_v26 = vmul.f32 %v1813_v39, %v1487_v40 }
 0x121   :  { %v1700_v42 = vpop.eup %1699  ;;  %1725 = vrcp.f32 %v986_v27  ;;  %v984_v44 = vadd.f32 1.0, %v1698_v33  ;;  %v1520_v27 = vpop.f32.mrf.mxu1  ;;  %v1415_v40 = vmul.f32 -1.442695, %v2427_v3  ;;  %v2453_v5 = vadd.f32 %v1814_v48, %v702_v52 }
 0x122   :  { %v1702_v49 = vpop.eup %1701  ;;  %1727 = vrcp.f32 %v1018_v37  ;;  %v1016_v50 = vadd.f32 1.0, %v1700_v42  ;;  %v1417_v37 = vmul.f32 -1.442695, %v2419_v0  ;;  %v2446_v31 = vadd.f32 %v1814_v48, %v670_v26 }
 0x123   :  { %v1704_v58 = vpop.eup %1703  ;;  %1729 = vrcp.f32 %v984_v44  ;;  %v989_v61 = vadd.f32 1.0, %v1702_v49  ;;  %v1383_v44 = vmul.f32 -1.442695, %v2423_v63 }
 0x124   :  { %v1706_v4 = vpop.eup %1705  ;;  %1731 = vrcp.f32 %v1016_v50  ;;  %v1021_v1 = vadd.f32 1.0, %v1704_v58  ;;  %v493_v58 = vpop.f32.mrf.mxu0 }
 0x125   :  { %v1708_v59 = vpop.eup %1707  ;;  %1733 = vrcp.f32 %v989_v61  ;;  %v987_v43 = vadd.f32 1.0, %v1706_v4  ;;  %v621_v4 = vpop.f32.mrf.mxu1  ;;  %v669_v12 = vmul.f32 %v1813_v39, %v493_v58 }
 0x126   :  { %v1710_v60 = vpop.eup %1709  ;;  %1735 = vrcp.f32 %v1021_v1  ;;  %v1019_v11 = vadd.f32 1.0, %v1708_v59 }
 0x127   :  { %v1712_v13 = vpop.eup %1711  ;;  %1737 = vrcp.f32 %v987_v43  ;;  %v990_v34 = vadd.f32 1.0, %v1710_v60 }
 0x128   :  { %v1714_v16 = vpop.eup %1713  ;;  %1739 = vrcp.f32 %v1019_v11  ;;  %v1022_v23 = vadd.f32 1.0, %v1712_v13  ;;  %v2467_v11 = vadd.f32 %v1814_v48, %v700_v55 }
 0x129   :  { %v1716_v29 = vpop.eup %1715  ;;  %1741 = vrcp.f32 %v990_v34  ;;  %v988_v25 = vadd.f32 1.0, %v1714_v16  ;;  %v1388_v34 = vmul.f32 -1.442695, %v2446_v31 }
 0x12a   :  { %v1718_v32 = vpop.eup %1717  ;;  %1743 = vrcp.f32 %v1022_v23  ;;  %v1020_v33 = vadd.f32 1.0, %v1716_v29  ;;  %v1420_v23 = vmul.f32 -1.442695, %v2453_v5 }
 0x12b   :  { %v1720_v36 = vpop.eup %1719  ;;  %v1177_v42 = vmul.f32 %v1718_v32, %v2232_v62  ;;  %1745 = vrcp.f32 %v988_v25  ;;  %v2491_v25 = vadd.f32 %v1814_v48, %v669_v12 }
 0x12c   :  { %v1722_v49 = vpop.eup %1721  ;;  %v1209_v50 = vmul.f32 %v1720_v36, %v2236_v8  ;;  %1747 = vrcp.f32 %v1020_v33  ;;  %v671_v8 = vmul.f32 %v1813_v39, %v1488_v20 }
 0x12d   :  { %v1724_v61 = vpop.eup %1723  ;;  %1242 = vst.msk [vmem:[%s2627_s4 + $0x90] sm:$0xff] %vm1223_vm2, %v1177_v42  ;;  %v1175_v62 = vmul.f32 %v1722_v49, %v2240_v10  ;;  %1749 = vpow2.f32 %v1384_v6  ;;  %v703_v10 = vmul.f32 %v1813_v39, %v1520_v27  ;;  %v2460_v6 = vadd.f32 %v1814_v48, %v668_v57 }
 0x12e   :  { %v1726_v1 = vpop.eup %1725  ;;  %1274 = vst.msk [vmem:[%s2627_s4 + $0x190] sm:$0xff] %vm1223_vm2, %v1209_v50  ;;  %v1207_v38 = vmul.f32 %v1724_v61, %v2244_v17  ;;  %1751 = vpow2.f32 %v1416_v18  ;;  %v701_v18 = vmul.f32 %v1813_v39, %v621_v4  ;;  %v1418_v39 = vmul.f32 -1.442695, %v2467_v11 }
 0x12f   :  { %v1728_v59 = vpop.eup %1727  ;;  %1240 = vst.msk [vmem:[%s2627_s4 + $0x80] sm:$0xff] %vm1223_vm2, %v1175_v62  ;;  %v1178_v43 = vmul.f32 %v1726_v1, %v2249_v22  ;;  %1753 = vpow2.f32 %v1382_v15  ;;  %v2475_v15 = vadd.f32 %v1814_v48, %v671_v8  ;;  %v1386_v29 = vmul.f32 -1.442695, %v2460_v6 }
 0x130   :  { %v1730_v60 = vpop.eup %1729  ;;  %1272 = vst.msk [vmem:[%s2627_s4 + $0x180] sm:$0xff] %vm1223_vm2, %v1207_v38  ;;  %v1210_v17 = vmul.f32 %v1728_v59, %v2253_v28  ;;  %1755 = vpow2.f32 %v1414_v7  ;;  %v2483_v7 = vadd.f32 %v1814_v48, %v703_v10  ;;  %v2499_v26 = vadd.f32 %v1814_v48, %v701_v18 }
 0x131   :  { %v1732_v13 = vpop.eup %1731  ;;  %1243 = vst.msk [vmem:[%s2627_s4 + $0x98] sm:$0xff] %vm1223_vm2, %v1178_v43  ;;  %v1176_v22 = vmul.f32 %v1730_v60, %v2257_v30  ;;  %1757 = vpow2.f32 %v1385_v24  ;;  %v1389_v32 = vmul.f32 -1.442695, %v2475_v15  ;;  %v1387_v36 = vmul.f32 -1.442695, %v2491_v25 }
 0x132   :  { %v1734_v16 = vpop.eup %1733  ;;  %1275 = vst.msk [vmem:[%s2627_s4 + $0x198] sm:$0xff] %vm1223_vm2, %v1210_v17  ;;  %v1208_v28 = vmul.f32 %v1732_v13, %v2261_v35  ;;  %1759 = vpow2.f32 %v1417_v37  ;;  %v1421_v37 = vmul.f32 -1.442695, %v2483_v7 }
 0x133   :  { %v1736_v20 = vpop.eup %1735  ;;  %1241 = vst.msk [vmem:[%s2627_s4 + $0x88] sm:$0xff] %vm1223_vm2, %v1176_v22  ;;  %v1181_v30 = vmul.f32 %v1734_v16, %v2279_v53  ;;  %1761 = vpow2.f32 %v1383_v44  ;;  %v1419_v44 = vmul.f32 -1.442695, %v2499_v26 }
 0x134   :  { %v1738_v24 = vpop.eup %1737  ;;  %1273 = vst.msk [vmem:[%s2627_s4 + $0x188] sm:$0xff] %vm1223_vm2, %v1208_v28  ;;  %v1213_v35 = vmul.f32 %v1736_v20, %v2288_v19  ;;  %1763 = vpow2.f32 %v1415_v40 }
 0x135   :  { %v1740_v27 = vpop.eup %1739  ;;  %1246 = vst.msk [vmem:[%s2627_s4 + $0xb0] sm:$0xff] %vm1223_vm2, %v1181_v30  ;;  %v1179_v53 = vmul.f32 %v1738_v24, %v2297_v21  ;;  %1765 = vpow2.f32 %v1388_v34 }
 0x136   :  { %v1742_v33 = vpop.eup %1741  ;;  %1278 = vst.msk [vmem:[%s2627_s4 + $0x1b0] sm:$0xff] %vm1223_vm2, %v1213_v35  ;;  %v1211_v19 = vmul.f32 %v1740_v27, %v2306_v41  ;;  %1767 = vpow2.f32 %v1420_v23 }
 0x137   :  { %v1744_v52 = vpop.eup %1743  ;;  %1244 = vst.msk [vmem:[%s2627_s4 + $0xa0] sm:$0xff] %vm1223_vm2, %v1179_v53  ;;  %v1182_v21 = vmul.f32 %v1742_v33, %v2318_v46  ;;  %1769 = vpow2.f32 %v1386_v29 }
 0x138   :  { %v1746_v42 = vpop.eup %1745  ;;  %1276 = vst.msk [vmem:[%s2627_s4 + $0x1a0] sm:$0xff] %vm1223_vm2, %v1211_v19  ;;  %v1214_v41 = vmul.f32 %v1744_v52, %v2329_v51  ;;  %1771 = vpow2.f32 %v1418_v39 }
 0x139   :  { %v1748_v57 = vpop.eup %1747  ;;  %1247 = vst.msk [vmem:[%s2627_s4 + $0xb8] sm:$0xff] %vm1223_vm2, %v1182_v21  ;;  %v1180_v46 = vmul.f32 %v1746_v42, %v2338_v47  ;;  %1773 = vpow2.f32 %v1389_v32 }
 0x13a   :  { %v1750_v49 = vpop.eup %1749  ;;  %1279 = vst.msk [vmem:[%s2627_s4 + $0x1b8] sm:$0xff] %vm1223_vm2, %v1214_v41  ;;  %v1212_v51 = vmul.f32 %v1748_v57, %v2347_v54  ;;  %1775 = vpow2.f32 %v1421_v37 }
 0x13b   :  { %v1752_v50 = vpop.eup %1751  ;;  %1245 = vst.msk [vmem:[%s2627_s4 + $0xa8] sm:$0xff] %vm1223_vm2, %v1180_v46  ;;  %v993_v40 = vadd.f32 1.0, %v1750_v49  ;;  %1777 = vpow2.f32 %v1387_v36 }
 0x13c   :  { %v1754_v55 = vpop.eup %1753  ;;  %1277 = vst.msk [vmem:[%s2627_s4 + $0x1a8] sm:$0xff] %vm1223_vm2, %v1212_v51  ;;  %v1025_v47 = vadd.f32 1.0, %v1752_v50  ;;  %1779 = vpow2.f32 %v1419_v44 }
 0x13d   :  { %v1756_v58 = vpop.eup %1755  ;;  %1781 = vrcp.f32 %v993_v40  ;;  %v991_v54 = vadd.f32 1.0, %v1754_v55 }
 0x13e   :  { %v1758_v61 = vpop.eup %1757  ;;  %1783 = vrcp.f32 %v1025_v47  ;;  %v1023_v62 = vadd.f32 1.0, %v1756_v58 }
 0x13f   :  { %v1760_v48 = vpop.eup %1759  ;;  %1785 = vrcp.f32 %v991_v54  ;;  %v994_v8 = vadd.f32 1.0, %v1758_v61 }
 0x140   :  { %v1762_v4 = vpop.eup %1761  ;;  %1787 = vrcp.f32 %v1023_v62  ;;  %v1026_v1 = vadd.f32 1.0, %v1760_v48 }
 0x141   :  { %v1764_v38 = vpop.eup %1763  ;;  %1789 = vrcp.f32 %v994_v8  ;;  %v992_v10 = vadd.f32 1.0, %v1762_v4 }
 0x142   :  { %v1766_v59 = vpop.eup %1765  ;;  %1791 = vrcp.f32 %v1026_v1  ;;  %v1024_v43 = vadd.f32 1.0, %v1764_v38 }
 0x143   :  { %v1768_v12 = vpop.eup %1767  ;;  %1793 = vrcp.f32 %v992_v10  ;;  %v997_v60 = vadd.f32 1.0, %v1766_v59 }
 0x144   :  { %v1770_v17 = vpop.eup %1769  ;;  %1795 = vrcp.f32 %v1024_v43  ;;  %v1029_v18 = vadd.f32 1.0, %v1768_v12 }
 0x145   :  { %v1772_v13 = vpop.eup %1771  ;;  %1797 = vrcp.f32 %v997_v60  ;;  %v995_v22 = vadd.f32 1.0, %v1770_v17 }
 0x146   :  { %v1774_v34 = vpop.eup %1773  ;;  %1799 = vrcp.f32 %v1029_v18  ;;  %v1027_v16 = vadd.f32 1.0, %v1772_v13 }
 0x147   :  { %v1776_v28 = vpop.eup %1775  ;;  %1801 = vrcp.f32 %v995_v22  ;;  %v998_v23 = vadd.f32 1.0, %v1774_v34 }
 0x148   :  { %v1778_v20 = vpop.eup %1777  ;;  %1803 = vrcp.f32 %v1027_v16  ;;  %v1030_v30 = vadd.f32 1.0, %v1776_v28 }
 0x149   :  { %v1780_v29 = vpop.eup %1779  ;;  %1805 = vrcp.f32 %v998_v23  ;;  %v996_v24 = vadd.f32 1.0, %v1778_v20 }
 0x14a   :  { %v1782_v35 = vpop.eup %1781  ;;  %1807 = vrcp.f32 %v1030_v30  ;;  %v1028_v39 = vadd.f32 1.0, %v1780_v29 }
 0x14b   :  { %v1784_v27 = vpop.eup %1783  ;;  %v1185_v53 = vmul.f32 %v1782_v35, %v2398_v56  ;;  %1809 = vrcp.f32 %v996_v24 }
 0x14c   :  { %v1786_v32 = vpop.eup %1785  ;;  %v1217_v33 = vmul.f32 %v1784_v27, %v2402_v14  ;;  %1811 = vrcp.f32 %v1028_v39 }
 0x14d   :  { %v1788_v19 = vpop.eup %1787  ;;  %1250 = vst.msk [vmem:[%s2627_s4 + $0xd0] sm:$0xff] %vm1223_vm2, %v1185_v53  ;;  %v1183_v37 = vmul.f32 %v1786_v32, %v2406_v45 }
 0x14e   :  { %v1790_v52 = vpop.eup %1789  ;;  %1282 = vst.msk [vmem:[%s2627_s4 + $0x1d0] sm:$0xff] %vm1223_vm2, %v1217_v33  ;;  %v1215_v56 = vmul.f32 %v1788_v19, %v2410_v2 }
 0x14f   :  { %v1792_v21 = vpop.eup %1791  ;;  %1248 = vst.msk [vmem:[%s2627_s4 + $0xc0] sm:$0xff] %vm1223_vm2, %v1183_v37  ;;  %v1186_v14 = vmul.f32 %v1790_v52, %v2415_v9 }
 0x150   :  { %v1794_v36 = vpop.eup %1793  ;;  %1280 = vst.msk [vmem:[%s2627_s4 + $0x1c0] sm:$0xff] %vm1223_vm2, %v1215_v56  ;;  %v1218_v45 = vmul.f32 %v1792_v21, %v2419_v0 }
 0x151   :  { %v1796_v42 = vpop.eup %1795  ;;  %1251 = vst.msk [vmem:[%s2627_s4 + $0xd8] sm:$0xff] %vm1223_vm2, %v1186_v14  ;;  %v1184_v2 = vmul.f32 %v1794_v36, %v2423_v63 }
 0x152   :  { %v1798_v41 = vpop.eup %1797  ;;  %1283 = vst.msk [vmem:[%s2627_s4 + $0x1d8] sm:$0xff] %vm1223_vm2, %v1218_v45  ;;  %v1216_v9 = vmul.f32 %v1796_v42, %v2427_v3 }
 0x153   :  { %v1800_v44 = vpop.eup %1799  ;;  %1249 = vst.msk [vmem:[%s2627_s4 + $0xc8] sm:$0xff] %vm1223_vm2, %v1184_v2  ;;  %v1189_v0 = vmul.f32 %v1798_v41, %v2446_v31 }
 0x154   :  { %v1802_v57 = vpop.eup %1801  ;;  %1281 = vst.msk [vmem:[%s2627_s4 + $0x1c8] sm:$0xff] %vm1223_vm2, %v1216_v9  ;;  %v1221_v63 = vmul.f32 %v1800_v44, %v2453_v5 }
 0x155   :  { %v1804_v46 = vpop.eup %1803  ;;  %1254 = vst.msk [vmem:[%s2627_s4 + $0xf0] sm:$0xff] %vm1223_vm2, %v1189_v0  ;;  %v1187_v3 = vmul.f32 %v1802_v57, %v2460_v6 }
 0x156   :  { %v1806_v49 = vpop.eup %1805  ;;  %1286 = vst.msk [vmem:[%s2627_s4 + $0x1f0] sm:$0xff] %vm1223_vm2, %v1221_v63  ;;  %v1219_v31 = vmul.f32 %v1804_v46, %v2467_v11 }
 0x157   :  { %v1808_v51 = vpop.eup %1807  ;;  %1252 = vst.msk [vmem:[%s2627_s4 + $0xe0] sm:$0xff] %vm1223_vm2, %v1187_v3  ;;  %v1190_v5 = vmul.f32 %v1806_v49, %v2475_v15 }
 0x158   :  { %v1810_v50 = vpop.eup %1809  ;;  %1284 = vst.msk [vmem:[%s2627_s4 + $0x1e0] sm:$0xff] %vm1223_vm2, %v1219_v31  ;;  %v1222_v6 = vmul.f32 %v1808_v51, %v2483_v7 }
 0x159   :  { %v1812_v40 = vpop.eup %1811  ;;  %1255 = vst.msk [vmem:[%s2627_s4 + $0xf8] sm:$0xff] %vm1223_vm2, %v1190_v5  ;;  %v1188_v11 = vmul.f32 %v1810_v50, %v2491_v25 }
 0x15a   :  { %1287 = vst.msk [vmem:[%s2627_s4 + $0x1f8] sm:$0xff] %vm1223_vm2, %v1222_v6  ;;  %v1220_v15 = vmul.f32 %v1812_v40, %v2499_v26 }
 0x15b   :  { %1253 = vst.msk [vmem:[%s2627_s4 + $0xe8] sm:$0xff] %vm1223_vm2, %v1188_v11 }
 0x15c   :  { %1285 = vst.msk [vmem:[%s2627_s4 + $0x1e8] sm:$0xff] %vm1223_vm2, %v1220_v15 }

// kernel: bilevel_routing_deformable_attention.12
= control target key start
LH: loop header
LB: loop body
LE: loop exit
PB: predicated region body
PF: predicated region fallthrough
CT: control target
= control target key end

     0   :  { %vm22_vm0 = vcmask 64512   ;;  %v142_v0 = vmov 0.0   ;;  %vm143_vm1 = vmmov 0   ;;  %vm115_vm2 = vcmask 27648   ;;  %s181_s1 = inlined_call_operand.vmem [shape: f32[2,4,8], index: 1, kind: input, shape index: {}]   ;;  %s182_s0 = inlined_call_operand.vmem [shape: f32[2,4,8], index: 0, kind: input, shape index: {}]   ;;  %s183_s2 = inlined_call_operand.vmem [shape: f32[2,4,4], index: 2, kind: output, shape index: {}]  }
   0x1   :  { %128 = vmatprep.subr.bf16.mxu0 %v142_v0  ;;  %134 = vmatprep.subr.bf16.mxu1 %v142_v0  ;;  %v18_v1 = vld [vmem:[%s181_s1] sm:$0xf]  ;;  %v19_v2 = vld [vmem:[%s181_s1 + $0x4] sm:$0xf] }
   0x2   :  { %v12_v3 = vld [vmem:[%s182_s0] sm:$0xf]  ;;  %v20_v4 = vpack.c.bf16 %v18_v1, %v18_v1  ;;  %v21_v5 = vpack.c.bf16 %v19_v2, %v19_v2  ;;  %130 = vmatprep.mubr.msk.bf16.mxu0 %vm143_vm1, %v142_v0  ;;  %136 = vmatprep.mubr.msk.bf16.mxu1 %vm143_vm1, %v142_v0  ;;  %v13_v6 = vld [vmem:[%s182_s0 + $0x4] sm:$0xf] }
   0x3   :  { %v14_v9 = vmul.f32 0.35355338, %v12_v3  ;;  %v15_v10 = vmul.f32 0.35355338, %v13_v6 }
   0x4   :  { %v27_v7 = vsel %vm22_vm0, %v20_v4, 0  ;;  %v73_v8 = vsel %vm22_vm0, %v21_v5, 0 }
   0x5   :  { %129 = vmatpush3.bf16.xpose.msra.mxu0 %v27_v7  ;;  %135 = vmatpush3.bf16.xpose.msra.mxu1 %v73_v8  ;;  %v16_v11 = vpack.c.bf16 %v14_v9, %v14_v9  ;;  %v17_v12 = vpack.c.bf16 %v15_v10, %v15_v10 }
   0xc   :  { %131 = vmatmul.mubr.msk.bf16.vlgmr.msra.gmra.mxu0 %vm22_vm0, %v16_v11  ;;  %137 = vmatmul.mubr.msk.bf16.vlgmr.msra.gmra.mxu1 %vm22_vm0, %v17_v12 }
  0xcc   :  { %v63_v13 = vpop.f32.mrf.mxu0  ;;  %v109_v14 = vpop.f32.mrf.mxu1 }
  0xcd   :  { %116 = vst.msk [vmem:[%s183_s2] sm:$0xf] %vm115_vm2, %v63_v13  ;;  %117 = vst.msk [vmem:[%s183_s2 + $0x4] sm:$0xf] %vm115_vm2, %v109_v14 }
  0xce   :  { %v132_v15 = vpop.f32.mrf.mxu0  ;;  %v138_v16 = vpop.f32.mrf.mxu1 }
  0xd0   :  { %v66_v17 = vpop.f32.mrf.mxu0  ;;  %v112_v18 = vpop.f32.mrf.mxu1 }
  0xd2   :  { %v133_v19 = vpop.f32.mrf.mxu0  ;;  %v139_v20 = vpop.f32.mrf.mxu1 }

// kernel: bilevel_routing_deformable_attention.13
= control target key start
LH: loop header
LB: loop body
LE: loop exit
PB: predicated region body
PF: predicated region fallthrough
CT: control target
= control target key end

     0   :  { %vm287_vm0 = vcmask 31744   ;;  %vm928_vm1 = vcmask 64512   ;;  %vm1677_vm2 = vcmask 1043456   ;;  %s8588_s1 = inlined_call_operand.vmem [shape: f32[8,2,8,4], index: 1, kind: input, shape index: {}]   ;;  %s8589_s0 = inlined_call_operand.vmem [shape: f32[8,2,64,4], index: 0, kind: input, shape index: {}]   ;;  %s8590_s2 = inlined_call_operand.vmem [shape: f32[8,2,8,4], index: 2, kind: input, shape index: {}]   ;;  %s8591_s3 = inlined_call_operand.vmem [shape: f32[8,64,8], index: 3, kind: output, shape index: {}]  }
   0x1   :  { %v143_v0 = vld [vmem:[%s8588_s1] sm:$0xff]  ;;  %v145_v1 = vld [vmem:[%s8588_s1 + $0x10] sm:$0xff]  ;;  %v16_v5 = vld [vmem:[%s8589_s0 + $0x8] sm:$0xff] }
   0x2   :  { %v15_v2 = vld [vmem:[%s8589_s0] sm:$0xff]  ;;  %v271_v3 = vpack.c.bf16 %v143_v0, %v143_v0  ;;  %v272_v4 = vpack.c.bf16 %v145_v1, %v145_v1  ;;  %v32_v8 = vld [vmem:[%s8589_s0 + $0x88] sm:$0xff]  ;;  %v176_v9 = vmul.f32 0.35355338, %v16_v5  ;;  %v17_v14 = vld [vmem:[%s8589_s0 + $0x10] sm:$0xff] }
   0x3   :  { %v175_v6 = vmul.f32 0.35355338, %v15_v2  ;;  %v31_v7 = vld [vmem:[%s8589_s0 + $0x80] sm:$0xff]  ;;  %v184_v11 = vmul.f32 0.35355338, %v32_v8  ;;  %v18_v15 = vld [vmem:[%s8589_s0 + $0x18] sm:$0xff] }
   0x4   :  { %v183_v10 = vmul.f32 0.35355338, %v31_v7  ;;  %5430 = vmatprep.subr.msk.bf16.mxu0 %vm287_vm0, %v271_v3  ;;  %5431 = vmatprep.subr.msk.bf16.mxu1 %vm287_vm0, %v272_v4  ;;  %v301_v12 = vsel %vm287_vm0, %v271_v3, 0  ;;  %v381_v13 = vsel %vm287_vm0, %v272_v4, 0  ;;  %v33_v16 = vld [vmem:[%s8589_s0 + $0x90] sm:$0xff]  ;;  %v34_v21 = vld [vmem:[%s8589_s0 + $0x98] sm:$0xff] }
   0x5   :  { %5111 = vmatpush3.bf16.xpose.msra.mxu0 %v301_v12  ;;  %5121 = vmatpush3.bf16.xpose.msra.mxu1 %v381_v13  ;;  %v239_v17 = vpack.c.bf16 %v176_v9, %v175_v6  ;;  %v177_v19 = vmul.f32 0.35355338, %v17_v14  ;;  %v178_v20 = vmul.f32 0.35355338, %v18_v15  ;;  %v19_v22 = vld [vmem:[%s8589_s0 + $0x20] sm:$0xff]  ;;  %v20_v25 = vld [vmem:[%s8589_s0 + $0x28] sm:$0xff] }
   0x6   :  { %v243_v18 = vpack.c.bf16 %v184_v11, %v183_v10  ;;  %v185_v23 = vmul.f32 0.35355338, %v33_v16  ;;  %v186_v24 = vmul.f32 0.35355338, %v34_v21  ;;  %v179_v26 = vmul.f32 0.35355338, %v19_v22 }
   0x7   :  { %5112 = vmatprep.mubr.msk.bf16.mxu0 %vm287_vm0, %v239_v17  ;;  %v180_v27 = vmul.f32 0.35355338, %v20_v25  ;;  %v21_v28 = vld [vmem:[%s8589_s0 + $0x30] sm:$0xff]  ;;  %v35_v29 = vld [vmem:[%s8589_s0 + $0xa0] sm:$0xff]  ;;  %v240_v30 = vpack.c.bf16 %v178_v20, %v177_v19  ;;  %v22_v32 = vld [vmem:[%s8589_s0 + $0x38] sm:$0xff] }
   0x8   :  { %5122 = vmatprep.mubr.msk.bf16.mxu1 %vm287_vm0, %v243_v18  ;;  %v244_v31 = vpack.c.bf16 %v186_v24, %v185_v23  ;;  %v36_v33 = vld [vmem:[%s8589_s0 + $0xa8] sm:$0xff]  ;;  %v37_v34 = vld [vmem:[%s8589_s0 + $0xb0] sm:$0xff]  ;;  %v187_v36 = vmul.f32 0.35355338, %v35_v29  ;;  %v38_v38 = vld [vmem:[%s8589_s0 + $0xb8] sm:$0xff] }
   0x9   :  { %v241_v35 = vpack.c.bf16 %v180_v27, %v179_v26  ;;  %v188_v37 = vmul.f32 0.35355338, %v36_v33  ;;  %v147_v39 = vld [vmem:[%s8588_s1 + $0x20] sm:$0xff]  ;;  %v181_v40 = vmul.f32 0.35355338, %v21_v28  ;;  %v149_v42 = vld [vmem:[%s8588_s1 + $0x30] sm:$0xff] }
   0xa   :  { %v273_v41 = vpack.c.bf16 %v147_v39, %v147_v39  ;;  %v47_v43 = vld [vmem:[%s8589_s0 + $0x100] sm:$0xff]  ;;  %v182_v44 = vmul.f32 0.35355338, %v22_v32  ;;  %v189_v46 = vmul.f32 0.35355338, %v37_v34  ;;  %v274_v47 = vpack.c.bf16 %v149_v42, %v149_v42  ;;  %v48_v48 = vld [vmem:[%s8589_s0 + $0x108] sm:$0xff] }
   0xb   :  { %v245_v45 = vpack.c.bf16 %v188_v37, %v187_v36  ;;  %v190_v49 = vmul.f32 0.35355338, %v38_v38  ;;  %v191_v51 = vmul.f32 0.35355338, %v47_v43  ;;  %v63_v52 = vld [vmem:[%s8589_s0 + $0x180] sm:$0xff]  ;;  %v64_v55 = vld [vmem:[%s8589_s0 + $0x188] sm:$0xff] }
   0xc   :  { %5113 = vmatmul.mubr.msk.bf16.vlgmr.msra.gmra.mxu0 %vm287_vm0, %v240_v30  ;;  %5123 = vmatmul.mubr.msk.bf16.vlgmr.msra.gmra.mxu1 %vm287_vm0, %v244_v31  ;;  %v461_v50 = vsel %vm287_vm0, %v273_v41, 0  ;;  %v541_v53 = vsel %vm287_vm0, %v274_v47, 0  ;;  %v192_v54 = vmul.f32 0.35355338, %v48_v48  ;;  %v199_v56 = vmul.f32 0.35355338, %v63_v52 }
   0xd   :  { %5116 = vmatprep.mubr.msk.bf16.mxu0 %vm287_vm0, %v241_v35  ;;  %5126 = vmatprep.mubr.msk.bf16.mxu1 %vm287_vm0, %v245_v45  ;;  %v200_v57 = vmul.f32 0.35355338, %v64_v55  ;;  %v242_v58 = vpack.c.bf16 %v182_v44, %v181_v40  ;;  %v246_v59 = vpack.c.bf16 %v190_v49, %v189_v46  ;;  %v49_v60 = vld [vmem:[%s8589_s0 + $0x110] sm:$0xff]  ;;  %v50_v61 = vld [vmem:[%s8589_s0 + $0x118] sm:$0xff]  ;;  %v51_v2 = vld [vmem:[%s8589_s0 + $0x120] sm:$0xff] }
   0xe   :  { %5432 = vmatprep.subr.msk.bf16.mxu0 %vm287_vm0, %v273_v41  ;;  %5433 = vmatprep.subr.msk.bf16.mxu1 %vm287_vm0, %v274_v47  ;;  %v65_v62 = vld [vmem:[%s8589_s0 + $0x190] sm:$0xff]  ;;  %v247_v63 = vpack.c.bf16 %v192_v54, %v191_v51  ;;  %v66_v1 = vld [vmem:[%s8589_s0 + $0x198] sm:$0xff]  ;;  %v52_v3 = vld [vmem:[%s8589_s0 + $0x128] sm:$0xff]  ;;  %v193_v7 = vmul.f32 0.35355338, %v49_v60 }
   0xf   :  { %5131 = vmatpush3.bf16.xpose.msra.mxu0 %v461_v50  ;;  %5141 = vmatpush3.bf16.xpose.msra.mxu1 %v541_v53  ;;  %v251_v0 = vpack.c.bf16 %v200_v57, %v199_v56  ;;  %v67_v4 = vld [vmem:[%s8589_s0 + $0x1a0] sm:$0xff]  ;;  %v68_v5 = vld [vmem:[%s8589_s0 + $0x1a8] sm:$0xff]  ;;  %v194_v8 = vmul.f32 0.35355338, %v50_v61  ;;  %v153_v10 = vld [vmem:[%s8588_s1 + $0x50] sm:$0xff] }
  0x10   :  { %v151_v6 = vld [vmem:[%s8588_s1 + $0x40] sm:$0xff]  ;;  %v201_v11 = vmul.f32 0.35355338, %v65_v62  ;;  %v202_v12 = vmul.f32 0.35355338, %v66_v1  ;;  %v276_v14 = vpack.c.bf16 %v153_v10, %v153_v10  ;;  %v53_v18 = vld [vmem:[%s8589_s0 + $0x130] sm:$0xff] }
  0x11   :  { %v275_v9 = vpack.c.bf16 %v151_v6, %v151_v6  ;;  %v195_v13 = vmul.f32 0.35355338, %v51_v2  ;;  %v196_v15 = vmul.f32 0.35355338, %v52_v3  ;;  %v203_v16 = vmul.f32 0.35355338, %v67_v4 }
  0x12   :  { %v204_v17 = vmul.f32 0.35355338, %v68_v5  ;;  %5435 = vmatprep.subr.msk.bf16.mxu1 %vm287_vm0, %v276_v14  ;;  %v54_v19 = vld [vmem:[%s8589_s0 + $0x138] sm:$0xff]  ;;  %v248_v20 = vpack.c.bf16 %v194_v8, %v193_v7  ;;  %v252_v21 = vpack.c.bf16 %v202_v12, %v201_v11  ;;  %v69_v22 = vld [vmem:[%s8589_s0 + $0x1b0] sm:$0xff]  ;;  %v197_v24 = vmul.f32 0.35355338, %v53_v18 }
  0x13   :  { %5434 = vmatprep.subr.msk.bf16.mxu0 %vm287_vm0, %v275_v9  ;;  %v249_v23 = vpack.c.bf16 %v196_v15, %v195_v13  ;;  %v70_v26 = vld [vmem:[%s8589_s0 + $0x1b8] sm:$0xff]  ;;  %v79_v27 = vld [vmem:[%s8589_s0 + $0x200] sm:$0xff]  ;;  %v198_v28 = vmul.f32 0.35355338, %v54_v19  ;;  %v80_v29 = vld [vmem:[%s8589_s0 + $0x208] sm:$0xff]  ;;  %v621_v33 = vsel %vm287_vm0, %v275_v9, 0 }
  0x14   :  { %5117 = vmatmul.mubr.msk.bf16.gmra.mxu0 %vm287_vm0, %v242_v58  ;;  %5127 = vmatmul.mubr.msk.bf16.gmra.mxu1 %vm287_vm0, %v246_v59  ;;  %v253_v25 = vpack.c.bf16 %v204_v17, %v203_v16  ;;  %v95_v30 = vld [vmem:[%s8589_s0 + $0x280] sm:$0xff]  ;;  %v96_v31 = vld [vmem:[%s8589_s0 + $0x288] sm:$0xff]  ;;  %v205_v32 = vmul.f32 0.35355338, %v69_v22  ;;  %v701_v34 = vsel %vm287_vm0, %v276_v14, 0  ;;  %v157_v39 = vld [vmem:[%s8588_s1 + $0x70] sm:$0xff] }
  0x15   :  { %5132 = vmatprep.mubr.msk.bf16.mxu0 %vm287_vm0, %v247_v63  ;;  %5142 = vmatprep.mubr.msk.bf16.mxu1 %vm287_vm0, %v251_v0  ;;  %v155_v35 = vld [vmem:[%s8588_s1 + $0x60] sm:$0xff]  ;;  %v206_v36 = vmul.f32 0.35355338, %v70_v26  ;;  %v207_v37 = vmul.f32 0.35355338, %v79_v27  ;;  %v278_v43 = vpack.c.bf16 %v157_v39, %v157_v39  ;;  %v250_v44 = vpack.c.bf16 %v198_v28, %v197_v24  ;;  %v81_v46 = vld [vmem:[%s8589_s0 + $0x210] sm:$0xff] }
  0x16   :  { %v277_v38 = vpack.c.bf16 %v155_v35, %v155_v35  ;;  %v208_v40 = vmul.f32 0.35355338, %v80_v29  ;;  %v215_v41 = vmul.f32 0.35355338, %v95_v30  ;;  %v216_v42 = vmul.f32 0.35355338, %v96_v31 }
  0x17   :  { %v254_v45 = vpack.c.bf16 %v206_v36, %v205_v32  ;;  %v82_v47 = vld [vmem:[%s8589_s0 + $0x218] sm:$0xff]  ;;  %v97_v50 = vld [vmem:[%s8589_s0 + $0x290] sm:$0xff]  ;;  %v83_v52 = vld [vmem:[%s8589_s0 + $0x220] sm:$0xff]  ;;  %v209_v56 = vmul.f32 0.35355338, %v81_v46  ;;  %v861_v15 = vsel %vm287_vm0, %v278_v43, 0 }
  0x18   :  { %v255_v48 = vpack.c.bf16 %v208_v40, %v207_v37  ;;  %v259_v49 = vpack.c.bf16 %v216_v42, %v215_v41  ;;  %v98_v51 = vld [vmem:[%s8589_s0 + $0x298] sm:$0xff]  ;;  %v84_v53 = vld [vmem:[%s8589_s0 + $0x228] sm:$0xff]  ;;  %v99_v54 = vld [vmem:[%s8589_s0 + $0x2a0] sm:$0xff]  ;;  %v210_v57 = vmul.f32 0.35355338, %v82_v47  ;;  %v781_v14 = vsel %vm287_vm0, %v277_v38, 0 }
  0x19   :  { %v100_v55 = vld [vmem:[%s8589_s0 + $0x2a8] sm:$0xff]  ;;  %v217_v58 = vmul.f32 0.35355338, %v97_v50  ;;  %v218_v59 = vmul.f32 0.35355338, %v98_v51  ;;  %v85_v2 = vld [vmem:[%s8589_s0 + $0x230] sm:$0xff] }
  0x1a   :  { %v211_v60 = vmul.f32 0.35355338, %v83_v52  ;;  %v212_v61 = vmul.f32 0.35355338, %v84_v53  ;;  %v219_v62 = vmul.f32 0.35355338, %v99_v54  ;;  %v256_v0 = vpack.c.bf16 %v210_v57, %v209_v56 }
  0x1b   :  { %v220_v63 = vmul.f32 0.35355338, %v100_v55  ;;  %v260_v1 = vpack.c.bf16 %v218_v59, %v217_v58  ;;  %v86_v3 = vld [vmem:[%s8589_s0 + $0x238] sm:$0xff]  ;;  %v101_v6 = vld [vmem:[%s8589_s0 + $0x2b0] sm:$0xff]  ;;  %v111_v8 = vld [vmem:[%s8589_s0 + $0x300] sm:$0xff] }
  0x1c   :  { %5133 = vmatmul.mubr.msk.bf16.vlgmr.msra.gmra.mxu0 %vm287_vm0, %v248_v20  ;;  %5143 = vmatmul.mubr.msk.bf16.vlgmr.msra.gmra.mxu1 %vm287_vm0, %v252_v21  ;;  %v257_v4 = vpack.c.bf16 %v212_v61, %v211_v60  ;;  %v102_v7 = vld [vmem:[%s8589_s0 + $0x2b8] sm:$0xff]  ;;  %v112_v9 = vld [vmem:[%s8589_s0 + $0x308] sm:$0xff]  ;;  %v127_v10 = vld [vmem:[%s8589_s0 + $0x380] sm:$0xff]  ;;  %v213_v12 = vmul.f32 0.35355338, %v85_v2 }
  0x1d   :  { %5136 = vmatprep.mubr.msk.bf16.mxu0 %vm287_vm0, %v249_v23  ;;  %5146 = vmatprep.mubr.msk.bf16.mxu1 %vm287_vm0, %v253_v25  ;;  %v261_v5 = vpack.c.bf16 %v220_v63, %v219_v62  ;;  %v128_v11 = vld [vmem:[%s8589_s0 + $0x388] sm:$0xff]  ;;  %v214_v13 = vmul.f32 0.35355338, %v86_v3  ;;  %v221_v16 = vmul.f32 0.35355338, %v101_v6  ;;  %v113_v24 = vld [vmem:[%s8589_s0 + $0x310] sm:$0xff] }
  0x1e   :  { %5151 = vmatpush3.bf16.xpose.msra.mxu0 %v621_v33  ;;  %5161 = vmatpush3.bf16.xpose.msra.mxu1 %v701_v34  ;;  %v222_v17 = vmul.f32 0.35355338, %v102_v7  ;;  %v223_v18 = vmul.f32 0.35355338, %v111_v8  ;;  %v224_v19 = vmul.f32 0.35355338, %v112_v9 }
  0x1f   :  { %5436 = vmatprep.subr.msk.bf16.mxu0 %vm287_vm0, %v277_v38  ;;  %5437 = vmatprep.subr.msk.bf16.mxu1 %vm287_vm0, %v278_v43  ;;  %v231_v20 = vmul.f32 0.35355338, %v127_v10  ;;  %v232_v21 = vmul.f32 0.35355338, %v128_v11  ;;  %v258_v22 = vpack.c.bf16 %v214_v13, %v213_v12  ;;  %v114_v25 = vld [vmem:[%s8589_s0 + $0x318] sm:$0xff]  ;;  %v129_v28 = vld [vmem:[%s8589_s0 + $0x390] sm:$0xff] }
  0x20   :  { %v262_v23 = vpack.c.bf16 %v222_v17, %v221_v16  ;;  %v263_v26 = vpack.c.bf16 %v224_v19, %v223_v18  ;;  %v130_v29 = vld [vmem:[%s8589_s0 + $0x398] sm:$0xff]  ;;  %v115_v30 = vld [vmem:[%s8589_s0 + $0x320] sm:$0xff]  ;;  %v116_v31 = vld [vmem:[%s8589_s0 + $0x328] sm:$0xff]  ;;  %v225_v34 = vmul.f32 0.35355338, %v113_v24 }
  0x21   :  { %v267_v27 = vpack.c.bf16 %v232_v21, %v231_v20  ;;  %v131_v32 = vld [vmem:[%s8589_s0 + $0x3a0] sm:$0xff]  ;;  %v132_v33 = vld [vmem:[%s8589_s0 + $0x3a8] sm:$0xff]  ;;  %v226_v35 = vmul.f32 0.35355338, %v114_v25  ;;  %v233_v36 = vmul.f32 0.35355338, %v129_v28 }
  0x22   :  { %v234_v37 = vmul.f32 0.35355338, %v130_v29  ;;  %v227_v38 = vmul.f32 0.35355338, %v115_v30  ;;  %v228_v39 = vmul.f32 0.35355338, %v116_v31 }
  0x23   :  { %v235_v40 = vmul.f32 0.35355338, %v131_v32  ;;  %v236_v41 = vmul.f32 0.35355338, %v132_v33  ;;  %v264_v42 = vpack.c.bf16 %v226_v35, %v225_v34  ;;  %v118_v46 = vld [vmem:[%s8589_s0 + $0x338] sm:$0xff] }
  0x24   :  { %5137 = vmatmul.mubr.msk.bf16.gmra.mxu0 %vm287_vm0, %v250_v44  ;;  %5147 = vmatmul.mubr.msk.bf16.gmra.mxu1 %vm287_vm0, %v254_v45  ;;  %v268_v43 = vpack.c.bf16 %v234_v37, %v233_v36  ;;  %v117_v44 = vld [vmem:[%s8589_s0 + $0x330] sm:$0xff]  ;;  %v265_v45 = vpack.c.bf16 %v228_v39, %v227_v38  ;;  %v230_v51 = vmul.f32 0.35355338, %v118_v46 }
  0x25   :  { %5152 = vmatprep.mubr.msk.bf16.mxu0 %vm287_vm0, %v255_v48  ;;  %5162 = vmatprep.mubr.msk.bf16.mxu1 %vm287_vm0, %v259_v49  ;;  %v269_v47 = vpack.c.bf16 %v236_v41, %v235_v40  ;;  %v133_v48 = vld [vmem:[%s8589_s0 + $0x3b0] sm:$0xff]  ;;  %v134_v49 = vld [vmem:[%s8589_s0 + $0x3b8] sm:$0xff]  ;;  %v229_v50 = vmul.f32 0.35355338, %v117_v44 }
  0x26   :  { %v237_v52 = vmul.f32 0.35355338, %v133_v48  ;;  %v238_v53 = vmul.f32 0.35355338, %v134_v49 }
  0x27   :  { %v266_v54 = vpack.c.bf16 %v230_v51, %v229_v50 }
  0x28   :  { %v270_v55 = vpack.c.bf16 %v238_v53, %v237_v52 }
  0x2c   :  { %5153 = vmatmul.mubr.msk.bf16.vlgmr.msra.gmra.mxu0 %vm287_vm0, %v256_v0  ;;  %5163 = vmatmul.mubr.msk.bf16.vlgmr.msra.gmra.mxu1 %vm287_vm0, %v260_v1 }
  0x2d   :  { %5156 = vmatprep.mubr.msk.bf16.mxu0 %vm287_vm0, %v257_v4  ;;  %5166 = vmatprep.mubr.msk.bf16.mxu1 %vm287_vm0, %v261_v5 }
  0x2e   :  { %5171 = vmatpush3.bf16.xpose.msra.mxu0 %v781_v14  ;;  %5181 = vmatpush3.bf16.xpose.msra.mxu1 %v861_v15 }
  0x34   :  { %5157 = vmatmul.mubr.msk.bf16.gmra.mxu0 %vm287_vm0, %v258_v22  ;;  %5167 = vmatmul.mubr.msk.bf16.gmra.mxu1 %vm287_vm0, %v262_v23 }
  0x35   :  { %5172 = vmatprep.mubr.msk.bf16.mxu0 %vm287_vm0, %v263_v26  ;;  %5182 = vmatprep.mubr.msk.bf16.mxu1 %vm287_vm0, %v267_v27 }
  0x3c   :  { %5173 = vmatmul.mubr.msk.bf16.vlgmr.msra.gmra.mxu0 %vm287_vm0, %v264_v42  ;;  %5183 = vmatmul.mubr.msk.bf16.vlgmr.msra.gmra.mxu1 %vm287_vm0, %v268_v43 }
  0x3d   :  { %5176 = vmatprep.mubr.msk.bf16.mxu0 %vm287_vm0, %v265_v45  ;;  %5186 = vmatprep.mubr.msk.bf16.mxu1 %vm287_vm0, %v269_v47 }
  0x44   :  { %5177 = vmatmul.mubr.msk.bf16.gmra.mxu0 %vm287_vm0, %v266_v54  ;;  %5187 = vmatmul.mubr.msk.bf16.gmra.mxu1 %vm287_vm0, %v270_v55 }
  0xcc   :  { %v6260_v56 = vpop.f32.mrf.mxu0  ;;  %v6262_v57 = vpop.f32.mrf.mxu1 }
  0xcd   :  { %v935_v58 = vsel %vm928_vm1, %v6260_v56, -inf  ;;  %v959_v63 = vsel %vm928_vm1, %v6262_v57, -inf }
  0xce   :  { %v6266_v59 = vpop.f32.mrf.mxu1  ;;  %936 = vmax.xlane.f32.xlu0 %v935_v58  ;;  %v6268_v60 = vpop.f32.mrf.mxu0 }
  0xcf   :  { %v953_v61 = vsel %vm928_vm1, %v6266_v59, -inf  ;;  %v929_v3 = vsel %vm928_vm1, %v6268_v60, -inf }
  0xd0   :  { %954 = vmax.xlane.f32.xlu1 %v953_v61  ;;  %v6272_v62 = vpop.f32.mrf.mxu0  ;;  %v6280_v2 = vpop.f32.mrf.mxu1 }
  0xd1   :  { %v938_v1 = vsel %vm928_vm1, %v6272_v62, -inf  ;;  %v962_v5 = vsel %vm928_vm1, %v6280_v2, -inf }
  0xd2   :  { %960 = vmax.xlane.f32.xlu0 %v959_v63  ;;  %v6276_v0 = vpop.f32.mrf.mxu0  ;;  %v6288_v6 = vpop.f32.mrf.mxu1 }
  0xd3   :  { %v932_v7 = vsel %vm928_vm1, %v6276_v0, -inf  ;;  %v956_v10 = vsel %vm928_vm1, %v6288_v6, -inf }
  0xd4   :  { %939 = vmax.xlane.f32.xlu1 %v938_v1  ;;  %v6284_v4 = vpop.f32.mrf.mxu0  ;;  %v6294_v9 = vpop.f32.mrf.mxu1 }
  0xd5   :  { %v947_v11 = vsel %vm928_vm1, %v6284_v4, -inf  ;;  %v971_v15 = vsel %vm928_vm1, %v6294_v9, -inf }
  0xd6   :  { %930 = vmax.xlane.f32.xlu0 %v929_v3  ;;  %v6292_v8 = vpop.f32.mrf.mxu0  ;;  %v6302_v13 = vpop.f32.mrf.mxu1 }
  0xd7   :  { %v941_v19 = vsel %vm928_vm1, %v6292_v8, -inf  ;;  %v965_v23 = vsel %vm928_vm1, %v6302_v13, -inf }
  0xd8   :  { %963 = vmax.xlane.f32.xlu1 %v962_v5  ;;  %v6300_v12 = vpop.f32.mrf.mxu0  ;;  %v6308_v16 = vpop.f32.mrf.mxu1 }
  0xd9   :  { %v950_v14 = vsel %vm928_vm1, %v6300_v12, -inf  ;;  %v974_v17 = vsel %vm928_vm1, %v6308_v16, -inf }
  0xda   :  { %933 = vmax.xlane.f32.xlu0 %v932_v7  ;;  %v6312_v18 = vpop.f32.mrf.mxu0  ;;  %v6320_v22 = vpop.f32.mrf.mxu1 }
  0xdb   :  { %v944_v21 = vsel %vm928_vm1, %v6312_v18, -inf  ;;  %v968_v26 = vsel %vm928_vm1, %v6320_v22, -inf }
  0xdc   :  { %957 = vmax.xlane.f32.xlu1 %v956_v10  ;;  %v6316_v20 = vpop.f32.mrf.mxu0  ;;  %v6326_v25 = vpop.f32.mrf.mxu1 }
  0xdd   :  { %v983_v27 = vsel %vm928_vm1, %v6316_v20, -inf  ;;  %v1007_v31 = vsel %vm928_vm1, %v6326_v25, -inf }
  0xde   :  { %948 = vmax.xlane.f32.xlu0 %v947_v11  ;;  %v6324_v24 = vpop.f32.mrf.mxu0  ;;  %v6334_v29 = vpop.f32.mrf.mxu1 }
  0xdf   :  { %v977_v35 = vsel %vm928_vm1, %v6324_v24, -inf  ;;  %v1001_v39 = vsel %vm928_vm1, %v6334_v29, -inf }
  0xe0   :  { %951 = vmax.xlane.f32.xlu1 %v950_v14  ;;  %v6332_v28 = vpop.f32.mrf.mxu0  ;;  %v6340_v32 = vpop.f32.mrf.mxu1 }
  0xe1   :  { %v986_v30 = vsel %vm928_vm1, %v6332_v28, -inf  ;;  %v1010_v33 = vsel %vm928_vm1, %v6340_v32, -inf }
  0xe2   :  { %972 = vmax.xlane.f32.xlu0 %v971_v15  ;;  %v6344_v34 = vpop.f32.mrf.mxu0  ;;  %v6352_v38 = vpop.f32.mrf.mxu1 }
  0xe3   :  { %v980_v37 = vsel %vm928_vm1, %v6344_v34, -inf  ;;  %v1004_v42 = vsel %vm928_vm1, %v6352_v38, -inf }
  0xe4   :  { %975 = vmax.xlane.f32.xlu1 %v974_v17  ;;  %v6348_v36 = vpop.f32.mrf.mxu0  ;;  %v6358_v41 = vpop.f32.mrf.mxu1 }
  0xe5   :  { %v995_v43 = vsel %vm928_vm1, %v6348_v36, -inf  ;;  %v1019_v47 = vsel %vm928_vm1, %v6358_v41, -inf }
  0xe6   :  { %942 = vmax.xlane.f32.xlu0 %v941_v19  ;;  %v6356_v40 = vpop.f32.mrf.mxu0  ;;  %v6366_v45 = vpop.f32.mrf.mxu1 }
  0xe7   :  { %v989_v51 = vsel %vm928_vm1, %v6356_v40, -inf  ;;  %v1013_v55 = vsel %vm928_vm1, %v6366_v45, -inf }
  0xe8   :  { %945 = vmax.xlane.f32.xlu1 %v944_v21  ;;  %v6364_v44 = vpop.f32.mrf.mxu0  ;;  %v6372_v48 = vpop.f32.mrf.mxu1 }
  0xe9   :  { %v998_v46 = vsel %vm928_vm1, %v6364_v44, -inf  ;;  %v1022_v49 = vsel %vm928_vm1, %v6372_v48, -inf }
  0xea   :  { %966 = vmax.xlane.f32.xlu0 %v965_v23  ;;  %v6376_v50 = vpop.f32.mrf.mxu0  ;;  %v6384_v54 = vpop.f32.mrf.mxu1 }
  0xeb   :  { %v992_v53 = vsel %vm928_vm1, %v6376_v50, -inf  ;;  %v1016_v63 = vsel %vm928_vm1, %v6384_v54, -inf }
  0xec   :  { %969 = vmax.xlane.f32.xlu1 %v968_v26  ;;  %v6380_v52 = vpop.f32.mrf.mxu0  ;;  %v6390_v61 = vpop.f32.mrf.mxu1 }
  0xed   :  { %v1031_v1 = vsel %vm928_vm1, %v6380_v52, -inf  ;;  %v1055_v10 = vsel %vm928_vm1, %v6390_v61, -inf }
  0xee   :  { %984 = vmax.xlane.f32.xlu0 %v983_v27  ;;  %v6388_v58 = vpop.f32.mrf.mxu0  ;;  %v6398_v5 = vpop.f32.mrf.mxu1 }
  0xef   :  { %v1025_v17 = vsel %vm928_vm1, %v6388_v58, -inf  ;;  %v1049_v26 = vsel %vm928_vm1, %v6398_v5, -inf }
  0xf0   :  { %987 = vmax.xlane.f32.xlu1 %v986_v30  ;;  %v6396_v3 = vpop.f32.mrf.mxu0  ;;  %v6404_v11 = vpop.f32.mrf.mxu1 }
  0xf1   :  { %v1034_v7 = vsel %vm928_vm1, %v6396_v3, -inf  ;;  %v1058_v14 = vsel %vm928_vm1, %v6404_v11, -inf }
  0xf2   :  { %1008 = vmax.xlane.f32.xlu0 %v1007_v31  ;;  %v6408_v15 = vpop.f32.mrf.mxu0  ;;  %v6416_v23 = vpop.f32.mrf.mxu1 }
  0xf3   :  { %v1028_v21 = vsel %vm928_vm1, %v6408_v15, -inf  ;;  %v1052_v31 = vsel %vm928_vm1, %v6416_v23, -inf }
  0xf4   :  { %1011 = vmax.xlane.f32.xlu1 %v1010_v33  ;;  %v6412_v19 = vpop.f32.mrf.mxu0  ;;  %v6422_v30 = vpop.f32.mrf.mxu1 }
  0xf5   :  { %v1043_v33 = vsel %vm928_vm1, %v6412_v19, -inf }
  0xf6   :  { %978 = vmax.xlane.f32.xlu0 %v977_v35  ;;  %v6420_v27 = vpop.f32.mrf.mxu0 }
  0xf8   :  { %981 = vmax.xlane.f32.xlu1 %v980_v37  ;;  %v6428_v35 = vpop.f32.mrf.mxu0  ;;  %v6430_v37 = vpop.f32.mrf.mxu1 }
  0xfa   :  { %1002 = vmax.xlane.f32.xlu0 %v1001_v39  ;;  %v1046_v39 = vsel %vm928_vm1, %v6428_v35, -inf }
  0xfc   :  { %1005 = vmax.xlane.f32.xlu1 %v1004_v42  ;;  %v1067_v42 = vsel %vm928_vm1, %v6422_v30, -inf }
  0xfe   :  { %996 = vmax.xlane.f32.xlu0 %v995_v43  ;;  %v6436_v43 = vpop.f32.mrf.mxu1 }
 0x100   :  { %999 = vmax.xlane.f32.xlu1 %v998_v46  ;;  %v1070_v46 = vsel %vm928_vm1, %v6436_v43, -inf }
 0x102   :  { %1020 = vmax.xlane.f32.xlu0 %v1019_v47  ;;  %v6440_v47 = vpop.f32.mrf.mxu0 }
 0x104   :  { %1023 = vmax.xlane.f32.xlu1 %v1022_v49  ;;  %v1037_v49 = vsel %vm928_vm1, %v6420_v27, -inf }
 0x106   :  { %990 = vmax.xlane.f32.xlu0 %v989_v51  ;;  %v6444_v51 = vpop.f32.mrf.mxu0 }
 0x108   :  { %993 = vmax.xlane.f32.xlu1 %v992_v53  ;;  %v1040_v53 = vsel %vm928_vm1, %v6440_v47, -inf }
 0x10a   :  { %1014 = vmax.xlane.f32.xlu0 %v1013_v55  ;;  %v6448_v55 = vpop.f32.mrf.mxu1 }
 0x10c   :  { %1017 = vmax.xlane.f32.xlu1 %v1016_v63  ;;  %v1061_v63 = vsel %vm928_vm1, %v6430_v37, -inf }
 0x10e   :  { %1032 = vmax.xlane.f32.xlu0 %v1031_v1  ;;  %v6452_v1 = vpop.f32.mrf.mxu0 }
 0x10f   :  { %8663 = vst [vmem:[#allocation2_spill] sm:$0xff] %v6452_v1 }
 0x110   :  { %1035 = vmax.xlane.f32.xlu1 %v1034_v7  ;;  %v6454_v7 = vpop.f32.mrf.mxu1 }
 0x111   :  { %8664 = vst [vmem:[#allocation3_spill] sm:$0xff] %v6454_v7 }
 0x112   :  { %1056 = vmax.xlane.f32.xlu0 %v1055_v10  ;;  %v1064_v10 = vsel %vm928_vm1, %v6448_v55, -inf }
 0x114   :  { %1059 = vmax.xlane.f32.xlu1 %v1058_v14  ;;  %v1079_v14 = vsel %vm928_vm1, %v6444_v51, -inf }
 0x116   :  { %1026 = vmax.xlane.f32.xlu0 %v1025_v17  ;;  %v6460_v17 = vpop.f32.mrf.mxu0 }
 0x117   :  { %8665 = vst [vmem:[#allocation4_spill] sm:$0xff] %v6460_v17 }
 0x118   :  { %1029 = vmax.xlane.f32.xlu1 %v1028_v21  ;;  %v6462_v21 = vpop.f32.mrf.mxu1 }
 0x119   :  { %8666 = vst [vmem:[#allocation5_spill] sm:$0xff] %v6462_v21 }
 0x11a   :  { %1050 = vmax.xlane.f32.xlu0 %v1049_v26  ;;  %v1082_v26 = vsel %vm928_vm1, %v6460_v17, -inf }
 0x11c   :  { %1053 = vmax.xlane.f32.xlu1 %v1052_v31  ;;  %v1103_v31 = vsel %vm928_vm1, %v6454_v7, -inf }
 0x11e   :  { %1044 = vmax.xlane.f32.xlu0 %v1043_v33  ;;  %v6468_v33 = vpop.f32.mrf.mxu1 }
 0x11f   :  { %8667 = vst [vmem:[#allocation6_spill] sm:$0xff] %v6468_v33 }
 0x120   :  { %1047 = vmax.xlane.f32.xlu1 %v1046_v39  ;;  %v1106_v39 = vsel %vm928_vm1, %v6468_v33, -inf }
 0x122   :  { %1068 = vmax.xlane.f32.xlu0 %v1067_v42  ;;  %v6472_v42 = vpop.f32.mrf.mxu0 }
 0x123   :  { %8668 = vst [vmem:[#allocation7_spill] sm:$0xff] %v6472_v42 }
 0x124   :  { %1071 = vmax.xlane.f32.xlu1 %v1070_v46  ;;  %v1073_v46 = vsel %vm928_vm1, %v6452_v1, -inf }
 0x126   :  { %1038 = vmax.xlane.f32.xlu0 %v1037_v49  ;;  %v6476_v49 = vpop.f32.mrf.mxu0 }
 0x127   :  { %8669 = vst [vmem:[#allocation8_spill] sm:$0xff] %v6476_v49 }
 0x128   :  { %1041 = vmax.xlane.f32.xlu1 %v1040_v53  ;;  %v1076_v53 = vsel %vm928_vm1, %v6472_v42, -inf }
 0x12a   :  { %1062 = vmax.xlane.f32.xlu0 %v1061_v63  ;;  %v6480_v63 = vpop.f32.mrf.mxu1 }
 0x12b   :  { %8670 = vst [vmem:[#allocation9_spill] sm:$0xff] %v6480_v63 }
 0x12c   :  { %1065 = vmax.xlane.f32.xlu1 %v1064_v10  ;;  %v1097_v10 = vsel %vm928_vm1, %v6462_v21, -inf }
 0x12e   :  { %1080 = vmax.xlane.f32.xlu0 %v1079_v14  ;;  %v6484_v14 = vpop.f32.mrf.mxu0 }
 0x12f   :  { %8671 = vst [vmem:[#allocation10_spill] sm:$0xff] %v6484_v14 }
 0x130   :  { %1083 = vmax.xlane.f32.xlu1 %v1082_v26  ;;  %v6486_v26 = vpop.f32.mrf.mxu1 }
 0x131   :  { %8672 = vst [vmem:[#allocation11_spill] sm:$0xff] %v6486_v26  ;;  %v1115_v21 = vsel %vm928_vm1, %v6486_v26, -inf }
 0x132   :  { %1104 = vmax.xlane.f32.xlu0 %v1103_v31  ;;  %v1100_v31 = vsel %vm928_vm1, %v6480_v63, -inf  ;;  %v6494_v42 = vpop.f32.mrf.mxu1 }
 0x133   :  { %8674 = vst [vmem:[#allocation13_spill] sm:$0xff] %v6494_v42  ;;  %v1109_v26 = vsel %vm928_vm1, %v6494_v42, -inf }
 0x134   :  { %1107 = vmax.xlane.f32.xlu1 %v1106_v39  ;;  %v1091_v39 = vsel %vm928_vm1, %v6476_v49, -inf  ;;  %v1085_v49 = vsel %vm928_vm1, %v6484_v14, -inf }
 0x136   :  { %1074 = vmax.xlane.f32.xlu0 %v1073_v46  ;;  %v6492_v46 = vpop.f32.mrf.mxu0 }
 0x137   :  { %8673 = vst [vmem:[#allocation12_spill] sm:$0xff] %v6492_v46 }
 0x138   :  { %1077 = vmax.xlane.f32.xlu1 %v1076_v53  ;;  %v1094_v53 = vsel %vm928_vm1, %v6492_v46, -inf  ;;  %v6504_v63 = vpop.f32.mrf.mxu0 }
 0x139   :  { %8676 = vst [vmem:[#allocation15_spill] sm:$0xff] %v6504_v63 }
 0x13a   :  { %1098 = vmax.xlane.f32.xlu0 %v1097_v10  ;;  %v6500_v10 = vpop.f32.mrf.mxu1 }
 0x13b   :  { %8675 = vst [vmem:[#allocation14_spill] sm:$0xff] %v6500_v10 }
 0x13c   :  { %1101 = vmax.xlane.f32.xlu1 %v1100_v31  ;;  %v1118_v31 = vsel %vm928_vm1, %v6500_v10, -inf }
 0x13e   :  { %1092 = vmax.xlane.f32.xlu0 %v1091_v39  ;;  %v1088_v39 = vsel %vm928_vm1, %v6504_v63, -inf }
 0x140   :  { %1095 = vmax.xlane.f32.xlu1 %v1094_v53  ;;  %v6510_v53 = vpop.f32.mrf.mxu1 }
 0x141   :  { %8677 = vst [vmem:[#allocation16_spill] sm:$0xff] %v6510_v53 }
 0x142   :  { %1116 = vmax.xlane.f32.xlu0 %v1115_v21  ;;  %v1112_v21 = vsel %vm928_vm1, %v6510_v53, -inf }
 0x144   :  { %1119 = vmax.xlane.f32.xlu1 %v1118_v31 }
 0x146   :  { %1086 = vmax.xlane.f32.xlu0 %v1085_v49 }
 0x148   :  { %1089 = vmax.xlane.f32.xlu1 %v1088_v39 }
 0x14a   :  { %1110 = vmax.xlane.f32.xlu0 %v1109_v26 }
 0x14c   :  { %1113 = vmax.xlane.f32.xlu1 %v1112_v21 }
 0x157   :  { %v937_v10 = vpop.xlane.xlu0 %936 }
 0x158   :  { %v1123_v31 = vsub.f32 %v6260_v56, %v937_v10 }
 0x159   :  { %v955_v46 = vpop.xlane.xlu1 %954 }
 0x15a   :  { %v1189_v14 = vmul.f32 1.442695, %v1123_v31  ;;  %v1129_v1 = vsub.f32 %v6266_v59, %v955_v46 }
 0x15b   :  { %v961_v49 = vpop.xlane.xlu0 %960 }
 0x15c   :  { %5463 = vpow2.f32 %v1189_v14  ;;  %v1131_v63 = vsub.f32 %v6262_v57, %v961_v49  ;;  %v1201_v53 = vmul.f32 1.442695, %v1129_v1 }
 0x15d   :  { %v940_v39 = vpop.xlane.xlu1 %939 }
 0x15e   :  { %v1205_v33 = vmul.f32 1.442695, %v1131_v63  ;;  %v1124_v42 = vsub.f32 %v6272_v62, %v940_v39 }
 0x15f   :  { %v931_v26 = vpop.xlane.xlu0 %930 }
 0x160   :  { %5465 = vpow2.f32 %v1205_v33  ;;  %v1191_v7 = vmul.f32 1.442695, %v1124_v42  ;;  %v1121_v21 = vsub.f32 %v6268_v60, %v931_v26 }
 0x161   :  { %v964_v17 = vpop.xlane.xlu1 %963 }
 0x162   :  { %5467 = vpow2.f32 %v1191_v7  ;;  %v1185_v56 = vmul.f32 1.442695, %v1121_v21  ;;  %v1132_v10 = vsub.f32 %v6280_v2, %v964_v17 }
 0x163   :  { %v934_v14 = vpop.xlane.xlu0 %933 }
 0x164   :  { %5469 = vpow2.f32 %v1185_v56  ;;  %v1207_v57 = vmul.f32 1.442695, %v1132_v10  ;;  %v1122_v59 = vsub.f32 %v6276_v0, %v934_v14 }
 0x165   :  { %5471 = vpow2.f32 %v1201_v53  ;;  %v958_v63 = vpop.xlane.xlu1 %957 }
 0x166   :  { %5473 = vpow2.f32 %v1207_v57  ;;  %v1187_v62 = vmul.f32 1.442695, %v1122_v59  ;;  %v1130_v33 = vsub.f32 %v6288_v6, %v958_v63 }
 0x167   :  { %v949_v42 = vpop.xlane.xlu0 %948 }
 0x168   :  { %5475 = vpow2.f32 %v1187_v62  ;;  %v1203_v60 = vmul.f32 1.442695, %v1130_v33  ;;  %v1127_v1 = vsub.f32 %v6284_v4, %v949_v42 }
 0x169   :  { %v6525_v7 = vpop.eup %5463  ;;  %v952_v46 = vpop.xlane.xlu1 %951 }
 0x16a   :  { %v1197_v2 = vmul.f32 1.442695, %v1127_v1  ;;  %v1128_v17 = vsub.f32 %v6300_v12, %v952_v46  ;;  %v1319_v0 = vsel %vm928_vm1, %v6525_v7, 0.0  ;;  %5477 = vpow2.f32 %v1203_v60 }
 0x16b   :  { %v973_v53 = vpop.xlane.xlu0 %972  ;;  %1320 = vadd.xlane.f32.xlu0 %v1319_v0 }
 0x16c   :  { %5479 = vpow2.f32 %v1197_v2  ;;  %v1199_v31 = vmul.f32 1.442695, %v1128_v17  ;;  %v1135_v6 = vsub.f32 %v6294_v9, %v973_v53 }
 0x16d   :  { %v6531_v49 = vpop.eup %5465  ;;  %v976_v39 = vpop.xlane.xlu1 %975 }
 0x16e   :  { %v1213_v4 = vmul.f32 1.442695, %v1135_v6  ;;  %v1136_v26 = vsub.f32 %v6308_v16, %v976_v39  ;;  %v1343_v21 = vsel %vm928_vm1, %v6531_v49, 0.0  ;;  %5481 = vpow2.f32 %v1199_v31 }
 0x16f   :  { %v6536_v12 = vpop.eup %5467  ;;  %v943_v56 = vpop.xlane.xlu0 %942  ;;  %1344 = vadd.xlane.f32.xlu0 %v1343_v21 }
 0x170   :  { %5483 = vpow2.f32 %v1213_v4  ;;  %v1215_v10 = vmul.f32 1.442695, %v1136_v26  ;;  %v1125_v14 = vsub.f32 %v6292_v8, %v943_v56  ;;  %v1322_v9 = vsel %vm928_vm1, %v6536_v12, 0.0 }
 0x171   :  { %v6541_v57 = vpop.eup %5469  ;;  %v946_v59 = vpop.xlane.xlu1 %945  ;;  %1323 = vadd.xlane.f32.xlu1 %v1322_v9 }
 0x172   :  { %v6543_v16 = vpop.eup %5471  ;;  %v1193_v63 = vmul.f32 1.442695, %v1125_v14  ;;  %v1126_v62 = vsub.f32 %v6312_v18, %v946_v59  ;;  %v1313_v33 = vsel %vm928_vm1, %v6541_v57, 0.0  ;;  %5485 = vpow2.f32 %v1215_v10 }
 0x173   :  { %v6548_v42 = vpop.eup %5473  ;;  %v967_v60 = vpop.xlane.xlu0 %966  ;;  %1314 = vadd.xlane.f32.xlu0 %v1313_v33  ;;  %v1337_v53 = vsel %vm928_vm1, %v6543_v16, 0.0 }
 0x174   :  { %5487 = vpow2.f32 %v1193_v63  ;;  %v1195_v8 = vmul.f32 1.442695, %v1126_v62  ;;  %v1133_v1 = vsub.f32 %v6302_v13, %v967_v60  ;;  %v1346_v46 = vsel %vm928_vm1, %v6548_v42, 0.0 }
 0x175   :  { %v6553_v2 = vpop.eup %5475  ;;  %v970_v17 = vpop.xlane.xlu1 %969  ;;  %1347 = vadd.xlane.f32.xlu1 %v1346_v46 }
 0x176   :  { %v1209_v18 = vmul.f32 1.442695, %v1133_v1  ;;  %v1134_v0 = vsub.f32 %v6320_v22, %v970_v17  ;;  %5489 = vpow2.f32 %v1195_v8  ;;  %v1316_v4 = vsel %vm928_vm1, %v6553_v2, 0.0 }
 0x177   :  { %v985_v31 = vpop.xlane.xlu0 %984  ;;  %1338 = vadd.xlane.f32.xlu0 %v1337_v53  ;;  %v6558_v6 = vpop.eup %5477 }
 0x178   :  { %5491 = vpow2.f32 %v1209_v18  ;;  %v1211_v13 = vmul.f32 1.442695, %v1134_v0  ;;  %v1139_v39 = vsub.f32 %v6316_v20, %v985_v31  ;;  %v1340_v63 = vsel %vm928_vm1, %v6558_v6, 0.0 }
 0x179   :  { %v6563_v26 = vpop.eup %5479  ;;  %v988_v21 = vpop.xlane.xlu1 %987  ;;  %1317 = vadd.xlane.f32.xlu1 %v1316_v4 }
 0x17a   :  { %v1221_v22 = vmul.f32 1.442695, %v1139_v39  ;;  %v1140_v56 = vsub.f32 %v6332_v28, %v988_v21  ;;  %v1331_v10 = vsel %vm928_vm1, %v6563_v26, 0.0  ;;  %5493 = vpow2.f32 %v1211_v13 }
 0x17b   :  { %v1009_v14 = vpop.xlane.xlu0 %1008  ;;  %1332 = vadd.xlane.f32.xlu0 %v1331_v10  ;;  %v6568_v9 = vpop.eup %5481 }
 0x17c   :  { %5495 = vpow2.f32 %v1221_v22  ;;  %v1223_v20 = vmul.f32 1.442695, %v1140_v56  ;;  %v1147_v59 = vsub.f32 %v6326_v25, %v1009_v14  ;;  %v1334_v18 = vsel %vm928_vm1, %v6568_v9, 0.0 }
 0x17d   :  { %v6573_v62 = vpop.eup %5483  ;;  %v1012_v33 = vpop.xlane.xlu1 %1011  ;;  %1341 = vadd.xlane.f32.xlu1 %v1340_v63 }
 0x17e   :  { %v1237_v28 = vmul.f32 1.442695, %v1147_v59  ;;  %v1148_v60 = vsub.f32 %v6340_v32, %v1012_v33  ;;  %v1355_v8 = vsel %vm928_vm1, %v6573_v62, 0.0  ;;  %5497 = vpow2.f32 %v1223_v20 }
 0x17f   :  { %v979_v1 = vpop.xlane.xlu0 %978  ;;  %1356 = vadd.xlane.f32.xlu0 %v1355_v8  ;;  %v6578_v46 = vpop.eup %5485 }
 0x180   :  { %5499 = vpow2.f32 %v1237_v28  ;;  %v1239_v25 = vmul.f32 1.442695, %v1148_v60  ;;  %v1137_v17 = vsub.f32 %v6324_v24, %v979_v1  ;;  %v1358_v22 = vsel %vm928_vm1, %v6578_v46, 0.0 }
 0x181   :  { %v6583_v0 = vpop.eup %5487  ;;  %v982_v53 = vpop.xlane.xlu1 %981  ;;  %1335 = vadd.xlane.f32.xlu1 %v1334_v18 }
 0x182   :  { %v1217_v32 = vmul.f32 1.442695, %v1137_v17  ;;  %v1138_v31 = vsub.f32 %v6344_v34, %v982_v53  ;;  %v1325_v13 = vsel %vm928_vm1, %v6583_v0, 0.0  ;;  %5501 = vpow2.f32 %v1239_v25 }
 0x183   :  { %v1003_v39 = vpop.xlane.xlu0 %1002  ;;  %1326 = vadd.xlane.f32.xlu0 %v1325_v13  ;;  %v6588_v4 = vpop.eup %5489 }
 0x184   :  { %5503 = vpow2.f32 %v1217_v32  ;;  %v1219_v24 = vmul.f32 1.442695, %v1138_v31  ;;  %v1145_v21 = vsub.f32 %v6334_v29, %v1003_v39  ;;  %v1328_v28 = vsel %vm928_vm1, %v6588_v4, 0.0 }
 0x185   :  { %v6593_v56 = vpop.eup %5491  ;;  %v1006_v10 = vpop.xlane.xlu1 %1005  ;;  %1359 = vadd.xlane.f32.xlu1 %v1358_v22 }
 0x186   :  { %v1233_v34 = vmul.f32 1.442695, %v1145_v21  ;;  %v1146_v14 = vsub.f32 %v6352_v38, %v1006_v10  ;;  %v1349_v20 = vsel %vm928_vm1, %v6593_v56, 0.0  ;;  %5505 = vpow2.f32 %v1219_v24 }
 0x187   :  { %v997_v59 = vpop.xlane.xlu0 %996  ;;  %1350 = vadd.xlane.f32.xlu0 %v1349_v20  ;;  %v6598_v63 = vpop.eup %5493 }
 0x188   :  { %5507 = vpow2.f32 %v1233_v34  ;;  %v1235_v29 = vmul.f32 1.442695, %v1146_v14  ;;  %v1143_v33 = vsub.f32 %v6348_v36, %v997_v59  ;;  %v1352_v32 = vsel %vm928_vm1, %v6598_v63, 0.0 }
 0x189   :  { %v6603_v60 = vpop.eup %5495  ;;  %v1000_v8 = vpop.xlane.xlu1 %999  ;;  %1329 = vadd.xlane.f32.xlu1 %v1328_v28 }
 0x18a   :  { %v1229_v38 = vmul.f32 1.442695, %v1143_v33  ;;  %v1144_v1 = vsub.f32 %v6364_v44, %v1000_v8  ;;  %v1367_v25 = vsel %vm928_vm1, %v6603_v60, 0.0  ;;  %5509 = vpow2.f32 %v1235_v29 }
 0x18b   :  { %v1021_v17 = vpop.xlane.xlu0 %1020  ;;  %1368 = vadd.xlane.f32.xlu0 %v1367_v25  ;;  %v6608_v18 = vpop.eup %5497 }
 0x18c   :  { %5511 = vpow2.f32 %v1229_v38  ;;  %v1231_v36 = vmul.f32 1.442695, %v1144_v1  ;;  %v1151_v53 = vsub.f32 %v6358_v41, %v1021_v17  ;;  %v159_v41 = vld [vmem:[%s8590_s2] sm:$0xff]  ;;  %v1370_v14 = vsel %vm928_vm1, %v6608_v18, 0.0  ;;  %v161_v38 = vld [vmem:[%s8590_s2 + $0x10] sm:$0xff] }
 0x18d   :  { %v6613_v31 = vpop.eup %5499  ;;  %v1024_v13 = vpop.xlane.xlu1 %1023  ;;  %1353 = vadd.xlane.f32.xlu1 %v1352_v32  ;;  %v279_v59 = vpack.c.bf16 %v159_v41, %v159_v41  ;;  %v280_v32 = vpack.c.bf16 %v161_v38, %v161_v38 }
 0x18e   :  { %v1245_v44 = vmul.f32 1.442695, %v1151_v53  ;;  %v1152_v39 = vsub.f32 %v6372_v48, %v1024_v13  ;;  %v1391_v24 = vsel %vm928_vm1, %v6613_v31, 0.0  ;;  %5513 = vpow2.f32 %v1231_v36 }
 0x18f   :  { %v991_v21 = vpop.xlane.xlu0 %990  ;;  %1392 = vadd.xlane.f32.xlu0 %v1391_v24  ;;  %v6621_v22 = vpop.eup %5501  ;;  %5438 = vmatprep.subr.msk.bf16.mxu0 %vm1677_vm2, %v279_v59 }
 0x190   :  { %5515 = vpow2.f32 %v1245_v44  ;;  %v1247_v10 = vmul.f32 1.442695, %v1152_v39  ;;  %v1141_v34 = vsub.f32 %v6356_v40, %v991_v21  ;;  %v1679_v40 = vsel %vm1677_vm2, %v279_v59, 0  ;;  %5439 = vmatprep.subr.msk.bf16.mxu1 %vm1677_vm2, %v280_v32 }
 0x191   :  { %v6626_v48 = vpop.eup %5503  ;;  %v994_v20 = vpop.xlane.xlu1 %993  ;;  %1371 = vadd.xlane.f32.xlu1 %v1370_v14  ;;  %v1394_v17 = vsel %vm928_vm1, %v6621_v22, 0.0  ;;  %5191 = vmatpush3.bf16.msra.mxu0 %v1679_v40 }
 0x192   :  { %v1225_v29 = vmul.f32 1.442695, %v1141_v34  ;;  %v1142_v33 = vsub.f32 %v6376_v50, %v994_v20  ;;  %v1361_v28 = vsel %vm928_vm1, %v6626_v48, 0.0  ;;  %5517 = vpow2.f32 %v1247_v10 }
 0x193   :  { %v1015_v8 = vpop.xlane.xlu0 %1014  ;;  %1362 = vadd.xlane.f32.xlu0 %v1361_v28  ;;  %v6636_v1 = vpop.eup %5505 }
 0x194   :  { %5519 = vpow2.f32 %v1225_v29  ;;  %v1227_v25 = vmul.f32 1.442695, %v1142_v33  ;;  %v1149_v50 = vsub.f32 %v6366_v45, %v1015_v8  ;;  %v1759_v45 = vsel %vm1677_vm2, %v280_v32, 0 }
 0x195   :  { %v6641_v36 = vpop.eup %5507  ;;  %v1018_v53 = vpop.xlane.xlu1 %1017  ;;  %1395 = vadd.xlane.f32.xlu1 %v1394_v17  ;;  %v1364_v34 = vsel %vm928_vm1, %v6636_v1, 0.0  ;;  %5201 = vmatpush3.bf16.msra.mxu1 %v1759_v45 }
 0x196   :  { %v1241_v13 = vmul.f32 1.442695, %v1149_v50  ;;  %v1150_v44 = vsub.f32 %v6384_v54, %v1018_v53  ;;  %v1385_v39 = vsel %vm928_vm1, %v6641_v36, 0.0  ;;  %5521 = vpow2.f32 %v1227_v25 }
 0x197   :  { %v1033_v24 = vpop.xlane.xlu0 %1032  ;;  %1386 = vadd.xlane.f32.xlu0 %v1385_v39  ;;  %v6648_v21 = vpop.eup %5509 }
 0x198   :  { %5523 = vpow2.f32 %v1241_v13  ;;  %v1243_v41 = vmul.f32 1.442695, %v1150_v44  ;;  %v1155_v10 = vsub.f32 %v6380_v52, %v1033_v24  ;;  %v1388_v40 = vsel %vm928_vm1, %v6648_v21, 0.0 }
 0x199   :  { %v6653_v54 = vpop.eup %5511  ;;  %v1036_v14 = vpop.xlane.xlu1 %1035  ;;  %1365 = vadd.xlane.f32.xlu1 %v1364_v34 }
 0x19a   :  { %v1253_v20 = vmul.f32 1.442695, %v1155_v10  ;;  %v1156_v59 = vsub.f32 %v6396_v3, %v1036_v14  ;;  %v1379_v29 = vsel %vm928_vm1, %v6653_v54, 0.0  ;;  %5525 = vpow2.f32 %v1243_v41 }
 0x19b   :  { %v1057_v33 = vpop.xlane.xlu0 %1056  ;;  %1380 = vadd.xlane.f32.xlu0 %v1379_v29  ;;  %v6658_v28 = vpop.eup %5513 }
 0x19c   :  { %5527 = vpow2.f32 %v1253_v20  ;;  %v1255_v52 = vmul.f32 1.442695, %v1156_v59  ;;  %v1163_v8 = vsub.f32 %v6390_v61, %v1057_v33  ;;  %v1382_v44 = vsel %vm928_vm1, %v6658_v28, 0.0 }
 0x19d   :  { %v6663_v38 = vpop.eup %5515  ;;  %v1060_v25 = vpop.xlane.xlu1 %1059  ;;  %1389 = vadd.xlane.f32.xlu1 %v1388_v40 }
 0x19e   :  { %v1269_v3 = vmul.f32 1.442695, %v1163_v8  ;;  %v1164_v50 = vsub.f32 %v6404_v11, %v1060_v25  ;;  %v1403_v17 = vsel %vm928_vm1, %v6663_v38, 0.0  ;;  %5529 = vpow2.f32 %v1255_v52 }
 0x19f   :  { %v1027_v53 = vpop.xlane.xlu0 %1026  ;;  %1404 = vadd.xlane.f32.xlu0 %v1403_v17  ;;  %v6668_v32 = vpop.eup %5517 }
 0x1a0   :  { %5531 = vpow2.f32 %v1269_v3  ;;  %v1271_v61 = vmul.f32 1.442695, %v1164_v50  ;;  %v1153_v13 = vsub.f32 %v6388_v58, %v1027_v53  ;;  %v1406_v20 = vsel %vm928_vm1, %v6668_v32, 0.0 }
 0x1a1   :  { %v6673_v39 = vpop.eup %5519  ;;  %v1030_v24 = vpop.xlane.xlu1 %1029  ;;  %1383 = vadd.xlane.f32.xlu1 %v1382_v44 }
 0x1a2   :  { %v1249_v11 = vmul.f32 1.442695, %v1153_v13  ;;  %v1154_v45 = vsub.f32 %v6408_v15, %v1030_v24  ;;  %v1373_v41 = vsel %vm928_vm1, %v6673_v39, 0.0  ;;  %5533 = vpow2.f32 %v1271_v61 }
 0x1a3   :  { %v1051_v10 = vpop.xlane.xlu0 %1050  ;;  %1374 = vadd.xlane.f32.xlu0 %v1373_v41  ;;  %v6678_v34 = vpop.eup %5521 }
 0x1a4   :  { %5535 = vpow2.f32 %v1249_v11  ;;  %v1251_v58 = vmul.f32 1.442695, %v1154_v45  ;;  %v1161_v14 = vsub.f32 %v6398_v5, %v1051_v10  ;;  %v1376_v3 = vsel %vm928_vm1, %v6678_v34, 0.0 }
 0x1a5   :  { %v6683_v59 = vpop.eup %5523  ;;  %v1054_v29 = vpop.xlane.xlu1 %1053  ;;  %1407 = vadd.xlane.f32.xlu1 %v1406_v20 }
 0x1a6   :  { %v1265_v15 = vmul.f32 1.442695, %v1161_v14  ;;  %v1162_v33 = vsub.f32 %v6416_v23, %v1054_v29  ;;  %v1397_v52 = vsel %vm928_vm1, %v6683_v59, 0.0  ;;  %5537 = vpow2.f32 %v1251_v58 }
 0x1a7   :  { %v1045_v8 = vpop.xlane.xlu0 %1044  ;;  %1398 = vadd.xlane.f32.xlu0 %v1397_v52  ;;  %v6688_v40 = vpop.eup %5525 }
 0x1a8   :  { %5539 = vpow2.f32 %v1265_v15  ;;  %v1267_v5 = vmul.f32 1.442695, %v1162_v33  ;;  %v1159_v25 = vsub.f32 %v6412_v19, %v1045_v8  ;;  %v1400_v11 = vsel %vm928_vm1, %v6688_v40, 0.0 }
 0x1a9   :  { %v6693_v50 = vpop.eup %5527  ;;  %v1048_v17 = vpop.xlane.xlu1 %1047  ;;  %1377 = vadd.xlane.f32.xlu1 %v1376_v3 }
 0x1aa   :  { %v1261_v23 = vmul.f32 1.442695, %v1159_v25  ;;  %v1160_v53 = vsub.f32 %v6428_v35, %v1048_v17  ;;  %v1415_v61 = vsel %vm928_vm1, %v6693_v50, 0.0  ;;  %5541 = vpow2.f32 %v1267_v5 }
 0x1ab   :  { %v1069_v13 = vpop.xlane.xlu0 %1068  ;;  %1416 = vadd.xlane.f32.xlu0 %v1415_v61  ;;  %v6698_v44 = vpop.eup %5529 }
 0x1ac   :  { %5543 = vpow2.f32 %v1261_v23  ;;  %v1263_v19 = vmul.f32 1.442695, %v1160_v53  ;;  %v1167_v24 = vsub.f32 %v6422_v30, %v1069_v13  ;;  %v163_v30 = vld [vmem:[%s8590_s2 + $0x20] sm:$0xff]  ;;  %v1418_v33 = vsel %vm928_vm1, %v6698_v44, 0.0 }
 0x1ad   :  { %v6703_v45 = vpop.eup %5531  ;;  %v1072_v41 = vpop.xlane.xlu1 %1071  ;;  %1401 = vadd.xlane.f32.xlu1 %v1400_v11  ;;  %v6718_v8 = vpack.c.bf16 %v163_v30, %v163_v30 }
 0x1ae   :  { %v1277_v35 = vmul.f32 1.442695, %v1167_v24  ;;  %v1168_v10 = vsub.f32 %v6436_v43, %v1072_v41  ;;  %v1439_v58 = vsel %vm928_vm1, %v6703_v45, 0.0  ;;  %5545 = vpow2.f32 %v1263_v19 }
 0x1af   :  { %v1039_v14 = vpop.xlane.xlu0 %1038  ;;  %1440 = vadd.xlane.f32.xlu0 %v1439_v58  ;;  %v6711_v20 = vpop.eup %5533  ;;  %5440 = vmatprep.subr.msk.bf16.mxu0 %vm1677_vm2, %v6718_v8 }
 0x1b0   :  { %5547 = vpow2.f32 %v1277_v35  ;;  %v1279_v29 = vmul.f32 1.442695, %v1168_v10  ;;  %v1157_v15 = vsub.f32 %v6420_v27, %v1039_v14  ;;  %v165_v27 = vld [vmem:[%s8590_s2 + $0x30] sm:$0xff] }
 0x1b1   :  { %v6716_v43 = vpop.eup %5535  ;;  %v1042_v52 = vpop.xlane.xlu1 %1041  ;;  %1419 = vadd.xlane.f32.xlu1 %v1418_v33  ;;  %v6735_v24 = vpack.c.bf16 %v165_v27, %v165_v27  ;;  %v8679_v33 = vld [vmem:[#allocation4_spill] sm:$0xff] }
 0x1b2   :  { %v1257_v5 = vmul.f32 1.442695, %v1157_v15  ;;  %v1158_v25 = vsub.f32 %v6440_v47, %v1042_v52  ;;  %v1409_v3 = vsel %vm928_vm1, %v6716_v43, 0.0  ;;  %5549 = vpow2.f32 %v1279_v29 }
 0x1b3   :  { %v1063_v17 = vpop.xlane.xlu0 %1062  ;;  %1410 = vadd.xlane.f32.xlu0 %v1409_v3  ;;  %v6728_v23 = vpop.eup %5537  ;;  %v1442_v47 = vsel %vm928_vm1, %v6711_v20, 0.0  ;;  %5441 = vmatprep.subr.msk.bf16.mxu1 %vm1677_vm2, %v6735_v24 }
 0x1b4   :  { %5551 = vpow2.f32 %v1257_v5  ;;  %v1259_v53 = vmul.f32 1.442695, %v1158_v25  ;;  %v1165_v61 = vsub.f32 %v6430_v37, %v1063_v17  ;;  %v1412_v30 = vsel %vm928_vm1, %v6728_v23, 0.0  ;;  %v8680_v17 = vld [vmem:[#allocation3_spill] sm:$0xff] }
 0x1b5   :  { %v6733_v13 = vpop.eup %5539  ;;  %v1066_v19 = vpop.xlane.xlu1 %1065  ;;  %1443 = vadd.xlane.f32.xlu1 %v1442_v47 }
 0x1b6   :  { %v1273_v11 = vmul.f32 1.442695, %v1165_v61  ;;  %v1166_v41 = vsub.f32 %v6448_v55, %v1066_v19  ;;  %v1433_v35 = vsel %vm928_vm1, %v6733_v13, 0.0  ;;  %5553 = vpow2.f32 %v1259_v53 }
 0x1b7   :  { %v1081_v10 = vpop.xlane.xlu0 %1080  ;;  %1434 = vadd.xlane.f32.xlu0 %v1433_v35  ;;  %v6742_v37 = vpop.eup %5541 }
 0x1b8   :  { %5555 = vpow2.f32 %v1273_v11  ;;  %v1275_v58 = vmul.f32 1.442695, %v1166_v41  ;;  %v1171_v14 = vsub.f32 %v6444_v51, %v1081_v10  ;;  %v1436_v53 = vsel %vm928_vm1, %v6742_v37, 0.0  ;;  %v8682_v11 = vld [vmem:[#allocation6_spill] sm:$0xff] }
 0x1b9   :  { %v6747_v29 = vpop.eup %5543  ;;  %v1084_v55 = vpop.xlane.xlu1 %1083  ;;  %1413 = vadd.xlane.f32.xlu1 %v1412_v30  ;;  %v8684_v30 = vld [vmem:[#allocation2_spill] sm:$0xff] }
 0x1ba   :  { %8678 = vst [vmem:[#allocation17_spill] sm:$0xff] %v6747_v29  ;;  %v1285_v15 = vmul.f32 1.442695, %v1171_v14  ;;  %v1172_v52 = vsub.f32 %v8679_v33, %v1084_v55  ;;  %v1427_v5 = vsel %vm928_vm1, %v6747_v29, 0.0  ;;  %5557 = vpow2.f32 %v1275_v58 }
 0x1bb   :  { %v1105_v25 = vpop.xlane.xlu0 %1104  ;;  %1428 = vadd.xlane.f32.xlu0 %v1427_v5  ;;  %v6752_v3 = vpop.eup %5545 }
 0x1bc   :  { %5559 = vpow2.f32 %v1285_v15  ;;  %v1287_v51 = vmul.f32 1.442695, %v1172_v52  ;;  %v1179_v27 = vsub.f32 %v8680_v17, %v1105_v25  ;;  %v1430_v15 = vsel %vm928_vm1, %v6752_v3, 0.0  ;;  %v8685_v25 = vld [vmem:[#allocation7_spill] sm:$0xff] }
 0x1bd   :  { %v6757_v61 = vpop.eup %5547  ;;  %v1108_v47 = vpop.xlane.xlu1 %1107  ;;  %1437 = vadd.xlane.f32.xlu1 %v1436_v53 }
 0x1be   :  { %8681 = vst [vmem:[#allocation4_spill] sm:$0xff] %v6757_v61  ;;  %v1301_v19 = vmul.f32 1.442695, %v1179_v27  ;;  %v1180_v41 = vsub.f32 %v8682_v11, %v1108_v47  ;;  %v1451_v35 = vsel %vm928_vm1, %v6757_v61, 0.0  ;;  %5561 = vpow2.f32 %v1287_v51 }
 0x1bf   :  { %v1075_v10 = vpop.xlane.xlu0 %1074  ;;  %1452 = vadd.xlane.f32.xlu0 %v1451_v35  ;;  %v6762_v58 = vpop.eup %5549 }
 0x1c0   :  { %8683 = vst [vmem:[#allocation3_spill] sm:$0xff] %v6762_v58  ;;  %5563 = vpow2.f32 %v1301_v19  ;;  %v1303_v14 = vmul.f32 1.442695, %v1180_v41  ;;  %v1169_v55 = vsub.f32 %v8684_v30, %v1075_v10  ;;  %v8687_v19 = vld [vmem:[#allocation5_spill] sm:$0xff]  ;;  %v1454_v41 = vsel %vm928_vm1, %v6762_v58, 0.0 }
 0x1c1   :  { %v6767_v33 = vpop.eup %5551  ;;  %v1078_v52 = vpop.xlane.xlu1 %1077  ;;  %1431 = vadd.xlane.f32.xlu1 %v1430_v15 }
 0x1c2   :  { %v1281_v5 = vmul.f32 1.442695, %v1169_v55  ;;  %v1170_v17 = vsub.f32 %v8685_v25, %v1078_v52  ;;  %v1421_v51 = vsel %vm928_vm1, %v6767_v33, 0.0  ;;  %5565 = vpow2.f32 %v1303_v14  ;;  %v8689_v55 = vld [vmem:[#allocation9_spill] sm:$0xff] }
 0x1c3   :  { %v1099_v27 = vpop.xlane.xlu0 %1098  ;;  %1422 = vadd.xlane.f32.xlu0 %v1421_v51  ;;  %v6772_v53 = vpop.eup %5553 }
 0x1c4   :  { %8686 = vst [vmem:[#allocation6_spill] sm:$0xff] %v6772_v53  ;;  %5567 = vpow2.f32 %v1281_v5  ;;  %v1283_v47 = vmul.f32 1.442695, %v1170_v17  ;;  %v1177_v11 = vsub.f32 %v8687_v19, %v1099_v27  ;;  %v8691_v17 = vld [vmem:[#allocation8_spill] sm:$0xff]  ;;  %v1424_v27 = vsel %vm928_vm1, %v6772_v53, 0.0 }
 0x1c5   :  { %v6777_v35 = vpop.eup %5555  ;;  %v1102_v10 = vpop.xlane.xlu1 %1101  ;;  %1455 = vadd.xlane.f32.xlu1 %v1454_v41 }
 0x1c6   :  { %8688 = vst [vmem:[#allocation2_spill] sm:$0xff] %v6777_v35  ;;  %v1297_v30 = vmul.f32 1.442695, %v1177_v11  ;;  %v1178_v15 = vsub.f32 %v8689_v55, %v1102_v10  ;;  %v1445_v14 = vsel %vm928_vm1, %v6777_v35, 0.0  ;;  %5569 = vpow2.f32 %v1283_v47  ;;  %v8693_v10 = vld [vmem:[#allocation12_spill] sm:$0xff]  ;;  %v8699_v35 = vld [vmem:[#allocation15_spill] sm:$0xff] }
 0x1c7   :  { %v1093_v52 = vpop.xlane.xlu0 %1092  ;;  %1446 = vadd.xlane.f32.xlu0 %v1445_v14  ;;  %v6782_v5 = vpop.eup %5557 }
 0x1c8   :  { %8690 = vst [vmem:[#allocation7_spill] sm:$0xff] %v6782_v5  ;;  %5571 = vpow2.f32 %v1297_v30  ;;  %v1299_v25 = vmul.f32 1.442695, %v1178_v15  ;;  %v1175_v51 = vsub.f32 %v8691_v17, %v1093_v52  ;;  %v1448_v52 = vsel %vm928_vm1, %v6782_v5, 0.0 }
 0x1c9   :  { %v6787_v19 = vpop.eup %5559  ;;  %v1096_v11 = vpop.xlane.xlu1 %1095  ;;  %1425 = vadd.xlane.f32.xlu1 %v1424_v27 }
 0x1ca   :  { %8692 = vst [vmem:[#allocation5_spill] sm:$0xff] %v6787_v19  ;;  %v1293_v41 = vmul.f32 1.442695, %v1175_v51  ;;  %v1176_v55 = vsub.f32 %v8693_v10, %v1096_v11  ;;  %v1463_v47 = vsel %vm928_vm1, %v6787_v19, 0.0  ;;  %5573 = vpow2.f32 %v1299_v25  ;;  %v8697_v25 = vld [vmem:[#allocation10_spill] sm:$0xff] }
 0x1cb   :  { %v1117_v14 = vpop.xlane.xlu0 %1116  ;;  %1464 = vadd.xlane.f32.xlu0 %v1463_v47  ;;  %v6792_v30 = vpop.eup %5561  ;;  %v8698_v47 = vld [vmem:[#allocation11_spill] sm:$0xff] }
 0x1cc   :  { %8694 = vst [vmem:[#allocation9_spill] sm:$0xff] %v6792_v30  ;;  %5575 = vpow2.f32 %v1293_v41  ;;  %v1295_v15 = vmul.f32 1.442695, %v1176_v55  ;;  %v1466_v41 = vsel %vm928_vm1, %v6792_v30, 0.0  ;;  %v1183_v19 = vsub.f32 %v8698_v47, %v1117_v14  ;;  %v8702_v30 = vld [vmem:[#allocation13_spill] sm:$0xff]  ;;  %v8704_v47 = vld [vmem:[#allocation16_spill] sm:$0xff] }
 0x1cd   :  { %v6796_v17 = vpop.eup %5563  ;;  %v1120_v61 = vpop.xlane.xlu1 %1119  ;;  %1449 = vadd.xlane.f32.xlu1 %v1448_v52 }
 0x1ce   :  { %8695 = vst [vmem:[#allocation8_spill] sm:$0xff] %v6796_v17  ;;  %v1487_v51 = vsel %vm928_vm1, %v6796_v17, 0.0  ;;  %5577 = vpow2.f32 %v1295_v15  ;;  %v8700_v17 = vld [vmem:[#allocation14_spill] sm:$0xff] }
 0x1cf   :  { %1488 = vadd.xlane.f32.xlu0 %v1487_v51  ;;  %v1087_v27 = vpop.xlane.xlu0 %1086  ;;  %v6800_v11 = vpop.eup %5565  ;;  %v1184_v29 = vsub.f32 %v8700_v17, %v1120_v61 }
 0x1d0   :  { %8696 = vst [vmem:[#allocation12_spill] sm:$0xff] %v6800_v11  ;;  %v1173_v10 = vsub.f32 %v8697_v25, %v1087_v27  ;;  %v1490_v14 = vsel %vm928_vm1, %v6800_v11, 0.0 }
 0x1d1   :  { %v6805_v55 = vpop.eup %5567  ;;  %1467 = vadd.xlane.f32.xlu1 %v1466_v41  ;;  %v1090_v5 = vpop.xlane.xlu1 %1089 }
 0x1d2   :  { %v1289_v52 = vmul.f32 1.442695, %v1173_v10  ;;  %v1174_v58 = vsub.f32 %v8699_v35, %v1090_v5  ;;  %v1457_v51 = vsel %vm928_vm1, %v6805_v55, 0.0  ;;  %v1309_v10 = vmul.f32 1.442695, %v1183_v19 }
 0x1d3   :  { %1458 = vadd.xlane.f32.xlu0 %v1457_v51  ;;  %v1111_v15 = vpop.xlane.xlu0 %1110  ;;  %v6812_v27 = vpop.eup %5569 }
 0x1d4   :  { %8701 = vst [vmem:[#allocation10_spill] sm:$0xff] %v6812_v27  ;;  %5579 = vpow2.f32 %v1289_v52  ;;  %v1291_v25 = vmul.f32 1.442695, %v1174_v58  ;;  %v1181_v53 = vsub.f32 %v8702_v30, %v1111_v15  ;;  %v1311_v58 = vmul.f32 1.442695, %v1184_v29 }
 0x1d5   :  { %v6817_v41 = vpop.eup %5571  ;;  %1491 = vadd.xlane.f32.xlu1 %v1490_v14  ;;  %v1114_v35 = vpop.xlane.xlu1 %1113  ;;  %v1460_v51 = vsel %vm928_vm1, %v6812_v27, 0.0 }
 0x1d6   :  { %8703 = vst [vmem:[#allocation11_spill] sm:$0xff] %v6817_v41  ;;  %5581 = vpow2.f32 %v1291_v25  ;;  %v1305_v5 = vmul.f32 1.442695, %v1181_v53  ;;  %v1182_v61 = vsub.f32 %v8704_v47, %v1114_v35  ;;  %v1481_v17 = vsel %vm928_vm1, %v6817_v41, 0.0 }
 0x1d7   :  { %1482 = vadd.xlane.f32.xlu0 %v1481_v17  ;;  %v6822_v52 = vpop.eup %5573 }
 0x1d8   :  { %8705 = vst [vmem:[#allocation15_spill] sm:$0xff] %v6822_v52  ;;  %5583 = vpow2.f32 %v1305_v5  ;;  %v1307_v30 = vmul.f32 1.442695, %v1182_v61  ;;  %v1484_v19 = vsel %vm928_vm1, %v6822_v52, 0.0 }
 0x1d9   :  { %v6826_v15 = vpop.eup %5575  ;;  %5585 = vpow2.f32 %v1309_v10  ;;  %1461 = vadd.xlane.f32.xlu1 %v1460_v51 }
 0x1da   :  { %8706 = vst [vmem:[#allocation14_spill] sm:$0xff] %v6826_v15  ;;  %5587 = vpow2.f32 %v1307_v30  ;;  %v1475_v53 = vsel %vm928_vm1, %v6826_v15, 0.0 }
 0x1db   :  { %1476 = vadd.xlane.f32.xlu0 %v1475_v53  ;;  %5589 = vpow2.f32 %v1311_v58  ;;  %v6832_v25 = vpop.eup %5577 }
 0x1dc   :  { %8707 = vst [vmem:[#allocation13_spill] sm:$0xff] %v6832_v25  ;;  %v1478_v29 = vsel %vm928_vm1, %v6832_v25, 0.0 }
 0x1dd   :  { %1485 = vadd.xlane.f32.xlu1 %v1484_v19 }
 0x1e1   :  { %v6836_v14 = vpop.eup %5579  ;;  %1479 = vadd.xlane.f32.xlu1 %v1478_v29 }
 0x1e2   :  { %8708 = vst [vmem:[#allocation16_spill] sm:$0xff] %v6836_v14  ;;  %v1469_v10 = vsel %vm928_vm1, %v6836_v14, 0.0 }
 0x1e3   :  { %v6840_v35 = vpop.eup %5581  ;;  %1470 = vadd.xlane.f32.xlu0 %v1469_v10 }
 0x1e4   :  { %8709 = vst [vmem:[#allocation18_spill] sm:$0xff] %v6840_v35  ;;  %v1472_v5 = vsel %vm928_vm1, %v6840_v35, 0.0 }
 0x1e5   :  { %v6844_v47 = vpop.eup %5583  ;;  %1473 = vadd.xlane.f32.xlu1 %v1472_v5 }
 0x1e6   :  { %8710 = vst [vmem:[#allocation19_spill] sm:$0xff] %v6844_v47  ;;  %v6846_v61 = vpop.eup %5585  ;;  %v1493_v17 = vsel %vm928_vm1, %v6844_v47, 0.0 }
 0x1e7   :  { %8711 = vst [vmem:[#allocation20_spill] sm:$0xff] %v6846_v61  ;;  %v6850_v58 = vpop.eup %5587  ;;  %1494 = vadd.xlane.f32.xlu0 %v1493_v17  ;;  %v1499_v53 = vsel %vm928_vm1, %v6846_v61, 0.0 }
 0x1e8   :  { %8712 = vst [vmem:[#allocation21_spill] sm:$0xff] %v6850_v58  ;;  %v1496_v30 = vsel %vm928_vm1, %v6850_v58, 0.0  ;;  %v6854_v51 = vpop.eup %5589 }
 0x1e9   :  { %8713 = vst [vmem:[#allocation22_spill] sm:$0xff] %v6854_v51  ;;  %1497 = vadd.xlane.f32.xlu1 %v1496_v30  ;;  %v1502_v19 = vsel %vm928_vm1, %v6854_v51, 0.0 }
 0x1eb   :  { %1500 = vadd.xlane.f32.xlu0 %v1499_v53 }
 0x1ed   :  { %1503 = vadd.xlane.f32.xlu1 %v1502_v19 }
 0x1f4   :  { %v1321_v29 = vpop.xlane.xlu0 %1320 }
 0x1f8   :  { %v1345_v10 = vpop.xlane.xlu0 %1344 }
 0x1fa   :  { %v1324_v5 = vpop.xlane.xlu1 %1323 }
 0x1fb   :  { %5591 = vrcp.f32 %v1324_v5 }
 0x1fc   :  { %v1315_v47 = vpop.xlane.xlu0 %1314 }
 0x1fd   :  { %5593 = vrcp.f32 %v1315_v47 }
 0x1fe   :  { %v1348_v15 = vpop.xlane.xlu1 %1347  ;;  %5595 = vrcp.f32 %v1321_v29 }
 0x200   :  { %v1339_v17 = vpop.xlane.xlu0 %1338 }
 0x202   :  { %v1318_v58 = vpop.xlane.xlu1 %1317 }
 0x203   :  { %5597 = vrcp.f32 %v1318_v58 }
 0x204   :  { %5599 = vrcp.f32 %v1348_v15  ;;  %v1333_v30 = vpop.xlane.xlu0 %1332 }
 0x205   :  { %5601 = vrcp.f32 %v1339_v17 }
 0x206   :  { %5603 = vrcp.f32 %v1345_v10  ;;  %v1342_v53 = vpop.xlane.xlu1 %1341  ;;  %v167_v10 = vld [vmem:[%s8590_s2 + $0x40] sm:$0xff] }
 0x207   :  { %5605 = vrcp.f32 %v1342_v53 }
 0x208   :  { %v1357_v61 = vpop.xlane.xlu0 %1356  ;;  %v5592_v35 = vpop.eup %5591 }
 0x209   :  { %v1572_v5 = vmul.f32 %v5592_v35, %v6536_v12  ;;  %v1839_v35 = vsel %vm1677_vm2, %v6718_v8, 0 }
 0x20a   :  { %v1336_v51 = vpop.xlane.xlu1 %1335  ;;  %v5594_v14 = vpop.eup %5593 }
 0x20b   :  { %v5596_v52 = vpop.eup %5595  ;;  %5607 = vrcp.f32 %v1336_v51  ;;  %v1569_v15 = vmul.f32 %v5594_v14, %v6541_v57  ;;  %v6870_v14 = vpack.c.bf16 %v167_v10, %v167_v10 }
 0x20c   :  { %v1327_v19 = vpop.xlane.xlu0 %1326  ;;  %v1571_v53 = vmul.f32 %v5596_v52, %v6525_v7 }
 0x20d   :  { %5609 = vrcp.f32 %v1327_v19 }
 0x20e   :  { %v1360_v25 = vpop.xlane.xlu1 %1359  ;;  %5611 = vrcp.f32 %v1333_v30 }
 0x210   :  { %v5598_v41 = vpop.eup %5597  ;;  %v1351_v47 = vpop.xlane.xlu0 %1350 }
 0x211   :  { %v5600_v29 = vpop.eup %5599  ;;  %v1570_v58 = vmul.f32 %v5598_v41, %v6553_v2  ;;  %v1634_v41 = vpack.c.bf16 %v1572_v5, %v1571_v53 }
 0x212   :  { %v5602_v17 = vpop.eup %5601  ;;  %v1330_v11 = vpop.xlane.xlu1 %1329  ;;  %v1580_v57 = vmul.f32 %v5600_v29, %v6548_v42 }
 0x213   :  { %v5604_v27 = vpop.eup %5603  ;;  %5613 = vrcp.f32 %v1330_v11  ;;  %v1633_v12 = vpack.c.bf16 %v1570_v58, %v1569_v15  ;;  %v1577_v7 = vmul.f32 %v5602_v17, %v6543_v16  ;;  %v169_v11 = vld [vmem:[%s8590_s2 + $0x50] sm:$0xff]  ;;  %v1919_v16 = vsel %vm1677_vm2, %v6735_v24, 0 }
 0x214   :  { %v5606_v51 = vpop.eup %5605  ;;  %5615 = vrcp.f32 %v1360_v25  ;;  %v1369_v2 = vpop.xlane.xlu0 %1368  ;;  %v1579_v8 = vmul.f32 %v5604_v27, %v6531_v49 }
 0x215   :  { %5617 = vrcp.f32 %v1351_v47  ;;  %5192 = vmatprep.mubr.msk.bf16.mxu0 %vm928_vm1, %v1633_v12  ;;  %v1578_v52 = vmul.f32 %v5606_v51, %v6558_v6  ;;  %v6884_v6 = vpack.c.bf16 %v169_v11, %v169_v11 }
 0x216   :  { %5619 = vrcp.f32 %v1357_v61  ;;  %5193 = vmatmul.mubr.msk.bf16.vlgmr.msra.gmra.mxu0 %vm928_vm1, %v1634_v41  ;;  %v1354_v42 = vpop.xlane.xlu1 %1353  ;;  %v1638_v19 = vpack.c.bf16 %v1580_v57, %v1579_v8 }
 0x217   :  { %5621 = vrcp.f32 %v1354_v42  ;;  %v1637_v25 = vpack.c.bf16 %v1578_v52, %v1577_v7  ;;  %5211 = vmatpush3.bf16.msra.mxu0 %v1839_v35 }
 0x218   :  { %v1393_v30 = vpop.xlane.xlu0 %1392  ;;  %5442 = vmatprep.subr.msk.bf16.mxu0 %vm1677_vm2, %v6870_v14  ;;  %v5608_v61 = vpop.eup %5607 }
 0x219   :  { %5202 = vmatprep.mubr.msk.bf16.mxu1 %vm928_vm1, %v1637_v25  ;;  %v1576_v58 = vmul.f32 %v5608_v61, %v6568_v9 }
 0x21a   :  { %5203 = vmatmul.mubr.msk.bf16.vlgmr.msra.gmra.mxu1 %vm928_vm1, %v1638_v19  ;;  %v1372_v49 = vpop.xlane.xlu1 %1371  ;;  %v5610_v5 = vpop.eup %5609 }
 0x21b   :  { %5221 = vmatpush3.bf16.msra.mxu1 %v1919_v16  ;;  %v5612_v29 = vpop.eup %5611  ;;  %5623 = vrcp.f32 %v1372_v49  ;;  %v1573_v17 = vmul.f32 %v5610_v5, %v6583_v0 }
 0x21c   :  { %v1363_v27 = vpop.xlane.xlu0 %1362  ;;  %5443 = vmatprep.subr.msk.bf16.mxu1 %vm1677_vm2, %v6884_v6  ;;  %v1575_v51 = vmul.f32 %v5612_v29, %v6563_v26  ;;  %v171_v29 = vld [vmem:[%s8590_s2 + $0x60] sm:$0xff] }
 0x21d   :  { %5625 = vrcp.f32 %v1363_v27 }
 0x21e   :  { %v1396_v47 = vpop.xlane.xlu1 %1395  ;;  %5627 = vrcp.f32 %v1369_v2  ;;  %v1636_v11 = vpack.c.bf16 %v1576_v58, %v1575_v51 }
 0x220   :  { %v5614_v24 = vpop.eup %5613  ;;  %v1387_v15 = vpop.xlane.xlu0 %1386 }
 0x221   :  { %v5616_v10 = vpop.eup %5615  ;;  %v1574_v53 = vmul.f32 %v5614_v24, %v6588_v4 }
 0x222   :  { %v5618_v12 = vpop.eup %5617  ;;  %v1366_v35 = vpop.xlane.xlu1 %1365  ;;  %v1584_v9 = vmul.f32 %v5616_v10, %v6578_v46 }
 0x223   :  { %v5620_v57 = vpop.eup %5619  ;;  %5629 = vrcp.f32 %v1366_v35  ;;  %v1635_v41 = vpack.c.bf16 %v1574_v53, %v1573_v17  ;;  %v1581_v0 = vmul.f32 %v5618_v12, %v6593_v56  ;;  %v1999_v17 = vsel %vm1677_vm2, %v6870_v14, 0 }
 0x224   :  { %v5622_v7 = vpop.eup %5621  ;;  %5631 = vrcp.f32 %v1396_v47  ;;  %v1381_v52 = vpop.xlane.xlu0 %1380  ;;  %v1583_v2 = vmul.f32 %v5620_v57, %v6573_v62  ;;  %v6912_v35 = vpack.c.bf16 %v171_v29, %v171_v29  ;;  %v173_v57 = vld [vmem:[%s8590_s2 + $0x70] sm:$0xff] }
 0x225   :  { %5633 = vrcp.f32 %v1387_v15  ;;  %5196 = vmatprep.mubr.msk.bf16.mxu0 %vm928_vm1, %v1635_v41  ;;  %v1582_v4 = vmul.f32 %v5622_v7, %v6598_v63 }
 0x226   :  { %5635 = vrcp.f32 %v1393_v30  ;;  %5197 = vmatmul.mubr.msk.bf16.gmra.mxu0 %vm928_vm1, %v1636_v11  ;;  %v1390_v26 = vpop.xlane.xlu1 %1389  ;;  %v1640_v25 = vpack.c.bf16 %v1584_v9, %v1583_v2 }
 0x227   :  { %5637 = vrcp.f32 %v1390_v26  ;;  %v1639_v8 = vpack.c.bf16 %v1582_v4, %v1581_v0 }
 0x228   :  { %v1405_v42 = vpop.xlane.xlu0 %1404  ;;  %v5624_v16 = vpop.eup %5623 }
 0x229   :  { %5206 = vmatprep.mubr.msk.bf16.mxu1 %vm928_vm1, %v1639_v8  ;;  %v1588_v27 = vmul.f32 %v5624_v16, %v6608_v18 }
 0x22a   :  { %5207 = vmatmul.mubr.msk.bf16.gmra.mxu1 %vm928_vm1, %v1640_v25  ;;  %v1384_v46 = vpop.xlane.xlu1 %1383  ;;  %v5626_v56 = vpop.eup %5625 }
 0x22b   :  { %v5628_v63 = vpop.eup %5627  ;;  %5639 = vrcp.f32 %v1384_v46  ;;  %v1585_v5 = vmul.f32 %v5626_v56, %v6626_v48 }
 0x22c   :  { %v1375_v19 = vpop.xlane.xlu0 %1374  ;;  %v1587_v15 = vmul.f32 %v5628_v63, %v6603_v60 }
 0x22d   :  { %5641 = vrcp.f32 %v1375_v19 }
 0x22e   :  { %v1408_v49 = vpop.xlane.xlu1 %1407  ;;  %5643 = vrcp.f32 %v1381_v52  ;;  %v1642_v12 = vpack.c.bf16 %v1588_v27, %v1587_v15 }
 0x230   :  { %v5630_v30 = vpop.eup %5629  ;;  %v1399_v61 = vpop.xlane.xlu0 %1398 }
 0x231   :  { %v5632_v62 = vpop.eup %5631  ;;  %v1586_v47 = vmul.f32 %v5630_v30, %v6636_v1 }
 0x232   :  { %v5634_v24 = vpop.eup %5633  ;;  %v1378_v58 = vpop.xlane.xlu1 %1377  ;;  %v1596_v48 = vmul.f32 %v5632_v62, %v6621_v22 }
 0x233   :  { %v5636_v10 = vpop.eup %5635  ;;  %5645 = vrcp.f32 %v1378_v58  ;;  %v1641_v18 = vpack.c.bf16 %v1586_v47, %v1585_v5  ;;  %v1593_v60 = vmul.f32 %v5634_v24, %v6641_v36  ;;  %v2079_v36 = vsel %vm1677_vm2, %v6884_v6, 0 }
 0x234   :  { %v5638_v53 = vpop.eup %5637  ;;  %5647 = vrcp.f32 %v1408_v49  ;;  %v1417_v1 = vpop.xlane.xlu0 %1416  ;;  %v1595_v14 = vmul.f32 %v5636_v10, %v6613_v31 }
 0x235   :  { %5649 = vrcp.f32 %v1399_v61  ;;  %5212 = vmatprep.mubr.msk.bf16.mxu0 %vm928_vm1, %v1641_v18  ;;  %v1594_v51 = vmul.f32 %v5638_v53, %v6648_v21  ;;  %v6926_v21 = vpack.c.bf16 %v173_v57, %v173_v57 }
 0x236   :  { %5651 = vrcp.f32 %v1405_v42  ;;  %5213 = vmatmul.mubr.msk.bf16.vlgmr.msra.gmra.mxu0 %vm928_vm1, %v1642_v12  ;;  %v1402_v22 = vpop.xlane.xlu1 %1401  ;;  %v1646_v52 = vpack.c.bf16 %v1596_v48, %v1595_v14  ;;  %v2159_v14 = vsel %vm1677_vm2, %v6912_v35, 0 }
 0x237   :  { %5653 = vrcp.f32 %v1402_v22  ;;  %v1645_v41 = vpack.c.bf16 %v1594_v51, %v1593_v60  ;;  %5231 = vmatpush3.bf16.msra.mxu0 %v1999_v17 }
 0x238   :  { %v1441_v7 = vpop.xlane.xlu0 %1440  ;;  %5444 = vmatprep.subr.msk.bf16.mxu0 %vm1677_vm2, %v6912_v35  ;;  %v5640_v9 = vpop.eup %5639 }
 0x239   :  { %5222 = vmatprep.mubr.msk.bf16.mxu1 %vm928_vm1, %v1645_v41  ;;  %v1592_v8 = vmul.f32 %v5640_v9, %v6658_v28 }
 0x23a   :  { %5223 = vmatmul.mubr.msk.bf16.vlgmr.msra.gmra.mxu1 %vm928_vm1, %v1646_v52  ;;  %v1420_v31 = vpop.xlane.xlu1 %1419  ;;  %v5642_v0 = vpop.eup %5641 }
 0x23b   :  { %5241 = vmatpush3.bf16.msra.mxu1 %v2079_v36  ;;  %v5644_v26 = vpop.eup %5643  ;;  %5655 = vrcp.f32 %v1420_v31  ;;  %v1589_v25 = vmul.f32 %v5642_v0, %v6673_v39  ;;  %v146_v36 = vld [vmem:[%s8588_s1 + $0x18] sm:$0xff] }
 0x23c   :  { %v1411_v11 = vpop.xlane.xlu0 %1410  ;;  %5445 = vmatprep.subr.msk.bf16.mxu1 %vm1677_vm2, %v6926_v21  ;;  %v1591_v56 = vmul.f32 %v5644_v26, %v6653_v54 }
 0x23d   :  { %5657 = vrcp.f32 %v1411_v11 }
 0x23e   :  { %v1444_v4 = vpop.xlane.xlu1 %1443  ;;  %5659 = vrcp.f32 %v1417_v1  ;;  %v1644_v61 = vpack.c.bf16 %v1592_v8, %v1591_v56  ;;  %v144_v1 = vld [vmem:[%s8588_s1 + $0x8] sm:$0xff] }
 0x240   :  { %v5646_v6 = vpop.eup %5645  ;;  %v1435_v2 = vpop.xlane.xlu0 %1434 }
 0x241   :  { %v5648_v42 = vpop.eup %5647  ;;  %v1590_v46 = vmul.f32 %v5646_v6, %v6678_v34 }
 0x242   :  { %v5650_v19 = vpop.eup %5649  ;;  %v1414_v16 = vpop.xlane.xlu1 %1413  ;;  %v1600_v28 = vmul.f32 %v5648_v42, %v6668_v32 }
 0x243   :  { %v5652_v49 = vpop.eup %5651  ;;  %5661 = vrcp.f32 %v1414_v16  ;;  %v1643_v63 = vpack.c.bf16 %v1590_v46, %v1589_v25  ;;  %v1597_v39 = vmul.f32 %v5650_v19, %v6683_v59  ;;  %v8714_v46 = vld [vmem:[#allocation6_spill] sm:$0xff] }
 0x244   :  { %v5654_v30 = vpop.eup %5653  ;;  %5663 = vrcp.f32 %v1444_v4  ;;  %v1429_v27 = vpop.xlane.xlu0 %1428  ;;  %v1599_v62 = vmul.f32 %v5652_v49, %v6663_v38 }
 0x245   :  { %5665 = vrcp.f32 %v1435_v2  ;;  %5216 = vmatprep.mubr.msk.bf16.mxu0 %vm928_vm1, %v1643_v63  ;;  %v1598_v34 = vmul.f32 %v5654_v30, %v6688_v40  ;;  %v8715_v63 = vld [vmem:[#allocation17_spill] sm:$0xff] }
 0x246   :  { %5667 = vrcp.f32 %v1441_v7  ;;  %5217 = vmatmul.mubr.msk.bf16.gmra.mxu0 %vm928_vm1, %v1644_v61  ;;  %v1438_v54 = vpop.xlane.xlu1 %1437  ;;  %v1648_v29 = vpack.c.bf16 %v1600_v28, %v1599_v62  ;;  %v6954_v7 = vpack.c.bf16 %v144_v1, %v144_v1  ;;  %v8718_v62 = vld [vmem:[#allocation7_spill] sm:$0xff] }
 0x247   :  { %5669 = vrcp.f32 %v1438_v54  ;;  %v1647_v5 = vpack.c.bf16 %v1598_v34, %v1597_v39  ;;  %v8716_v34 = vld [vmem:[#allocation3_spill] sm:$0xff] }
 0x248   :  { %v1453_v47 = vpop.xlane.xlu0 %1452  ;;  %v5656_v15 = vpop.eup %5655 }
 0x249   :  { %5226 = vmatprep.mubr.msk.bf16.mxu1 %vm928_vm1, %v1647_v5  ;;  %v1604_v18 = vmul.f32 %v5656_v15, %v6698_v44 }
 0x24a   :  { %5227 = vmatmul.mubr.msk.bf16.gmra.mxu1 %vm928_vm1, %v1648_v29  ;;  %v1432_v32 = vpop.xlane.xlu1 %1431  ;;  %v5658_v59 = vpop.eup %5657  ;;  %v8719_v29 = vld [vmem:[#allocation4_spill] sm:$0xff] }
 0x24b   :  { %v5660_v40 = vpop.eup %5659  ;;  %5671 = vrcp.f32 %v1432_v32  ;;  %v1601_v53 = vmul.f32 %v5658_v59, %v6716_v43 }
 0x24c   :  { %v1423_v24 = vpop.xlane.xlu0 %1422  ;;  %v1603_v60 = vmul.f32 %v5660_v40, %v6693_v50 }
 0x24d   :  { %5673 = vrcp.f32 %v1423_v24 }
 0x24e   :  { %v1456_v58 = vpop.xlane.xlu1 %1455  ;;  %5675 = vrcp.f32 %v1429_v27  ;;  %v1650_v41 = vpack.c.bf16 %v1604_v18, %v1603_v60 }
 0x250   :  { %v5662_v10 = vpop.eup %5661  ;;  %v1447_v17 = vpop.xlane.xlu0 %1446 }
 0x251   :  { %v5664_v38 = vpop.eup %5663  ;;  %v1602_v48 = vmul.f32 %v5662_v10, %v6728_v23 }
 0x252   :  { %v5666_v12 = vpop.eup %5665  ;;  %v1426_v51 = vpop.xlane.xlu1 %1425  ;;  %v1612_v43 = vmul.f32 %v5664_v38, %v6711_v20 }
 0x253   :  { %v5668_v57 = vpop.eup %5667  ;;  %5677 = vrcp.f32 %v1426_v51  ;;  %v1649_v44 = vpack.c.bf16 %v1602_v48, %v1601_v53  ;;  %v1609_v50 = vmul.f32 %v5666_v12, %v6733_v13  ;;  %v2239_v13 = vsel %vm1677_vm2, %v6926_v21, 0  ;;  %v8720_v48 = vld [vmem:[#allocation9_spill] sm:$0xff] }
 0x254   :  { %v5670_v22 = vpop.eup %5669  ;;  %5679 = vrcp.f32 %v1456_v58  ;;  %v1465_v23 = vpop.xlane.xlu0 %1464  ;;  %v1611_v35 = vmul.f32 %v5668_v57, %v6703_v45  ;;  %v8721_v57 = vld [vmem:[#allocation10_spill] sm:$0xff] }
 0x255   :  { %5681 = vrcp.f32 %v1447_v17  ;;  %5232 = vmatprep.mubr.msk.bf16.mxu0 %vm928_vm1, %v1649_v44  ;;  %v1610_v52 = vmul.f32 %v5670_v22, %v6742_v37  ;;  %v6968_v37 = vpack.c.bf16 %v146_v36, %v146_v36 }
 0x256   :  { %5683 = vrcp.f32 %v1453_v47  ;;  %5233 = vmatmul.mubr.msk.bf16.vlgmr.msra.gmra.mxu0 %vm928_vm1, %v1650_v41  ;;  %v1450_v20 = vpop.xlane.xlu1 %1449  ;;  %v1654_v9 = vpack.c.bf16 %v1612_v43, %v1611_v35  ;;  %v8722_v43 = vld [vmem:[#allocation5_spill] sm:$0xff]  ;;  %v8723_v35 = vld [vmem:[#allocation12_spill] sm:$0xff] }
 0x257   :  { %5685 = vrcp.f32 %v1450_v20  ;;  %v1653_v31 = vpack.c.bf16 %v1610_v52, %v1609_v50  ;;  %5251 = vmatpush3.bf16.msra.mxu0 %v2159_v14  ;;  %v148_v14 = vld [vmem:[%s8588_s1 + $0x28] sm:$0xff] }
 0x258   :  { %v1489_v11 = vpop.xlane.xlu0 %1488  ;;  %5446 = vmatprep.subr.msk.bf16.mxu0 %vm287_vm0, %v6954_v7  ;;  %v5672_v4 = vpop.eup %5671 }
 0x259   :  { %5242 = vmatprep.mubr.msk.bf16.mxu1 %vm928_vm1, %v1653_v31  ;;  %v1608_v8 = vmul.f32 %v5672_v4, %v6752_v3 }
 0x25a   :  { %5243 = vmatmul.mubr.msk.bf16.vlgmr.msra.gmra.mxu1 %vm928_vm1, %v1654_v9  ;;  %v1468_v45 = vpop.xlane.xlu1 %1467  ;;  %v5674_v26 = vpop.eup %5673  ;;  %v6996_v9 = vpack.c.bf16 %v148_v14, %v148_v14 }
 0x25b   :  { %5261 = vmatpush3.bf16.msra.mxu1 %v2239_v13  ;;  %v5676_v2 = vpop.eup %5675  ;;  %5687 = vrcp.f32 %v1468_v45  ;;  %v1605_v25 = vmul.f32 %v5674_v26, %v6767_v33  ;;  %v8717_v33 = vld [vmem:[#allocation2_spill] sm:$0xff]  ;;  %v8724_v13 = vld [vmem:[#allocation11_spill] sm:$0xff]  ;;  %v150_v26 = vld [vmem:[%s8588_s1 + $0x38] sm:$0xff] }
 0x25c   :  { %v1459_v0 = vpop.xlane.xlu0 %1458  ;;  %5447 = vmatprep.subr.msk.bf16.mxu1 %vm287_vm0, %v6968_v37  ;;  %v1607_v30 = vmul.f32 %v5676_v2, %v8715_v63 }
 0x25d   :  { %5689 = vrcp.f32 %v1459_v0  ;;  %v8725_v0 = vld [vmem:[#allocation15_spill] sm:$0xff] }
 0x25e   :  { %v1492_v6 = vpop.xlane.xlu1 %1491  ;;  %5691 = vrcp.f32 %v1465_v23  ;;  %v1652_v39 = vpack.c.bf16 %v1608_v8, %v1607_v30 }
 0x260   :  { %v5678_v21 = vpop.eup %5677  ;;  %v1483_v56 = vpop.xlane.xlu0 %1482 }
 0x261   :  { %v5680_v42 = vpop.eup %5679  ;;  %v1606_v19 = vmul.f32 %v5678_v21, %v8714_v46  ;;  %v24_v46 = vld [vmem:[%s8589_s0 + $0x48] sm:$0xff] }
 0x262   :  { %v5682_v16 = vpop.eup %5681  ;;  %v1462_v49 = vpop.xlane.xlu1 %1461  ;;  %v1616_v3 = vmul.f32 %v5680_v42, %v8716_v34  ;;  %v2511_v42 = vsel %vm287_vm0, %v6968_v37, 0  ;;  %v2307_v63 = vmul.f32 0.35355338, %v24_v46  ;;  %v8729_v34 = vld [vmem:[#allocation18_spill] sm:$0xff] }
 0x263   :  { %v5684_v27 = vpop.eup %5683  ;;  %5693 = vrcp.f32 %v1462_v49  ;;  %v1651_v61 = vpack.c.bf16 %v1606_v19, %v1605_v25  ;;  %v1613_v54 = vmul.f32 %v5682_v16, %v8717_v33  ;;  %v23_v25 = vld [vmem:[%s8589_s0 + $0x40] sm:$0xff]  ;;  %v7016_v19 = vpack.c.bf16 %v150_v26, %v150_v26 }
 0x264   :  { %v5686_v28 = vpop.eup %5685  ;;  %5695 = vrcp.f32 %v1492_v6  ;;  %v1615_v32 = vmul.f32 %v5684_v27, %v8719_v29  ;;  %v1477_v15 = vpop.xlane.xlu0 %1476  ;;  %v8726_v6 = vld [vmem:[#allocation8_spill] sm:$0xff]  ;;  %v2306_v49 = vmul.f32 0.35355338, %v23_v25  ;;  %v8727_v27 = vld [vmem:[#allocation13_spill] sm:$0xff]  ;;  %v2591_v26 = vsel %vm287_vm0, %v6996_v9, 0 }
 0x265   :  { %5697 = vrcp.f32 %v1483_v56  ;;  %5236 = vmatprep.mubr.msk.bf16.mxu0 %vm928_vm1, %v1651_v61  ;;  %v1614_v5 = vmul.f32 %v5686_v28, %v8718_v62  ;;  %v8728_v28 = vld [vmem:[#allocation16_spill] sm:$0xff] }
 0x266   :  { %5699 = vrcp.f32 %v1489_v11  ;;  %5237 = vmatmul.mubr.msk.bf16.gmra.mxu0 %vm928_vm1, %v1652_v39  ;;  %v1486_v47 = vpop.xlane.xlu1 %1485  ;;  %v1656_v59 = vpack.c.bf16 %v1616_v3, %v1615_v32  ;;  %v2370_v29 = vpack.c.bf16 %v2307_v63, %v2306_v49  ;;  %v26_v32 = vld [vmem:[%s8589_s0 + $0x58] sm:$0xff] }
 0x267   :  { %5701 = vrcp.f32 %v1486_v47  ;;  %v1655_v24 = vpack.c.bf16 %v1614_v5, %v1613_v54  ;;  %v8730_v54 = vld [vmem:[#allocation14_spill] sm:$0xff]  ;;  %v25_v5 = vld [vmem:[%s8589_s0 + $0x50] sm:$0xff]  ;;  %v154_v49 = vld [vmem:[%s8588_s1 + $0x58] sm:$0xff] }
 0x268   :  { %v5688_v10 = vpop.eup %5687 }
 0x269   :  { %5246 = vmatprep.mubr.msk.bf16.mxu1 %vm928_vm1, %v1655_v24  ;;  %v1620_v1 = vmul.f32 %v5688_v10, %v8720_v48  ;;  %v39_v24 = vld [vmem:[%s8589_s0 + $0xc0] sm:$0xff]  ;;  %v28_v10 = vld [vmem:[%s8589_s0 + $0x68] sm:$0xff]  ;;  %v2308_v48 = vmul.f32 0.35355338, %v25_v5 }
 0x26a   :  { %5247 = vmatmul.mubr.msk.bf16.gmra.mxu1 %vm928_vm1, %v1656_v59  ;;  %v1480_v58 = vpop.xlane.xlu1 %1479  ;;  %v5690_v18 = vpop.eup %5689  ;;  %v2311_v14 = vmul.f32 0.35355338, %v28_v10  ;;  %v60_v5 = vld [vmem:[%s8589_s0 + $0x168] sm:$0xff] }
 0x26b   :  { %5703 = vrcp.f32 %v1480_v58  ;;  %v5692_v38 = vpop.eup %5691  ;;  %v1617_v51 = vmul.f32 %v5690_v18, %v6805_v55  ;;  %v2431_v55 = vsel %vm287_vm0, %v6954_v7, 0  ;;  %v8731_v18 = vld [vmem:[#allocation19_spill] sm:$0xff] }
 0x26c   :  { %v1471_v40 = vpop.xlane.xlu0 %1470  ;;  %v1619_v23 = vmul.f32 %v5692_v38, %v8722_v43  ;;  %v8732_v38 = vld [vmem:[#allocation21_spill] sm:$0xff]  ;;  %v8733_v43 = vld [vmem:[#allocation20_spill] sm:$0xff] }
 0x26d   :  { %5705 = vrcp.f32 %v1471_v40  ;;  %v27_v40 = vld [vmem:[%s8589_s0 + $0x60] sm:$0xff] }
 0x26e   :  { %5707 = vrcp.f32 %v1477_v15  ;;  %v1474_v17 = vpop.xlane.xlu1 %1473  ;;  %v1658_v11 = vpack.c.bf16 %v1620_v1, %v1619_v23  ;;  %v40_v15 = vld [vmem:[%s8589_s0 + $0xc8] sm:$0xff] }
 0x26f   :  { %5709 = vrcp.f32 %v1474_v17 }
 0x270   :  { %v5694_v53 = vpop.eup %5693  ;;  %v1495_v12 = vpop.xlane.xlu0 %1494 }
 0x271   :  { %v5696_v60 = vpop.eup %5695  ;;  %5711 = vrcp.f32 %v1495_v12  ;;  %v1618_v44 = vmul.f32 %v5694_v53, %v8721_v57  ;;  %v2309_v12 = vmul.f32 0.35355338, %v26_v32 }
 0x272   :  { %v5698_v22 = vpop.eup %5697  ;;  %v1498_v41 = vpop.xlane.xlu1 %1497  ;;  %v1628_v20 = vmul.f32 %v5696_v60, %v8723_v35  ;;  %v2314_v60 = vmul.f32 0.35355338, %v39_v24 }
 0x273   :  { %v5700_v50 = vpop.eup %5699  ;;  %5713 = vrcp.f32 %v1498_v41  ;;  %v1657_v52 = vpack.c.bf16 %v1618_v44, %v1617_v51  ;;  %v1625_v45 = vmul.f32 %v5698_v22, %v8724_v13  ;;  %v2315_v51 = vmul.f32 0.35355338, %v40_v15  ;;  %v8734_v41 = vld [vmem:[#allocation22_spill] sm:$0xff] }
 0x274   :  { %v5702_v36 = vpop.eup %5701  ;;  %v1501_v31 = vpop.xlane.xlu0 %1500  ;;  %v1627_v2 = vmul.f32 %v5700_v50, %v8726_v6  ;;  %v2310_v44 = vmul.f32 0.35355338, %v27_v40  ;;  %v55_v6 = vld [vmem:[%s8589_s0 + $0x140] sm:$0xff]  ;;  %v2327_v40 = vmul.f32 0.35355338, %v60_v5 }
 0x275   :  { %5715 = vrcp.f32 %v1501_v31  ;;  %5252 = vmatprep.mubr.msk.bf16.mxu0 %vm928_vm1, %v1657_v52  ;;  %v1626_v4 = vmul.f32 %v5702_v36, %v8725_v0  ;;  %v152_v52 = vld [vmem:[%s8588_s1 + $0x48] sm:$0xff]  ;;  %v2371_v36 = vpack.c.bf16 %v2309_v12, %v2308_v48  ;;  %v2374_v35 = vpack.c.bf16 %v2315_v51, %v2314_v60  ;;  %v42_v31 = vld [vmem:[%s8589_s0 + $0xd8] sm:$0xff]  ;;  %v43_v0 = vld [vmem:[%s8589_s0 + $0xe0] sm:$0xff] }
 0x276   :  { %5253 = vmatmul.mubr.msk.bf16.vlgmr.msra.gmra.mxu0 %vm928_vm1, %v1658_v11  ;;  %v1504_v21 = vpop.xlane.xlu1 %1503  ;;  %v1662_v8 = vpack.c.bf16 %v1628_v20, %v1627_v2  ;;  %v41_v20 = vld [vmem:[%s8589_s0 + $0xd0] sm:$0xff]  ;;  %v2372_v13 = vpack.c.bf16 %v2311_v14, %v2310_v44  ;;  %v56_v2 = vld [vmem:[%s8589_s0 + $0x148] sm:$0xff]  ;;  %v74_v48 = vld [vmem:[%s8589_s0 + $0x1d8] sm:$0xff] }
 0x277   :  { %5717 = vrcp.f32 %v1504_v21  ;;  %v1661_v7 = vpack.c.bf16 %v1626_v4, %v1625_v45  ;;  %5271 = vmatpush3.bf16.xpose.msra.mxu0 %v2431_v55  ;;  %v29_v11 = vld [vmem:[%s8589_s0 + $0x70] sm:$0xff]  ;;  %v30_v45 = vld [vmem:[%s8589_s0 + $0x78] sm:$0xff]  ;;  %v44_v4 = vld [vmem:[%s8589_s0 + $0xe8] sm:$0xff]  ;;  %v2406_v21 = vpack.c.bf16 %v152_v52, %v152_v52 }
 0x278   :  { %5448 = vmatprep.subr.msk.bf16.mxu0 %vm287_vm0, %v6996_v9  ;;  %v5704_v16 = vpop.eup %5703  ;;  %v2313_v25 = vmul.f32 0.35355338, %v30_v45  ;;  %v2318_v9 = vmul.f32 0.35355338, %v43_v0  ;;  %v2319_v46 = vmul.f32 0.35355338, %v44_v4 }
 0x279   :  { %5262 = vmatprep.mubr.msk.bf16.mxu1 %vm928_vm1, %v1661_v7  ;;  %v1624_v61 = vmul.f32 %v5704_v16, %v8727_v27  ;;  %v2316_v7 = vmul.f32 0.35355338, %v41_v20  ;;  %v2322_v16 = vmul.f32 0.35355338, %v55_v6  ;;  %v45_v27 = vld [vmem:[%s8589_s0 + $0xf0] sm:$0xff]  ;;  %v62_v60 = vld [vmem:[%s8589_s0 + $0x178] sm:$0xff] }
 0x27a   :  { %v5706_v56 = vpop.eup %5705  ;;  %5263 = vmatmul.mubr.msk.bf16.vlgmr.msra.gmra.mxu1 %vm928_vm1, %v1662_v8  ;;  %v2317_v8 = vmul.f32 0.35355338, %v42_v31  ;;  %v75_v51 = vld [vmem:[%s8589_s0 + $0x1e0] sm:$0xff]  ;;  %v2751_v44 = vsel %vm287_vm0, %v2406_v21, 0  ;;  %v2329_v52 = vmul.f32 0.35355338, %v62_v60 }
 0x27b   :  { %v5708_v37 = vpop.eup %5707  ;;  %5281 = vmatpush3.bf16.xpose.msra.mxu1 %v2511_v42  ;;  %v1621_v39 = vmul.f32 %v5706_v56, %v8728_v28  ;;  %v2312_v42 = vmul.f32 0.35355338, %v29_v11  ;;  %v2323_v56 = vmul.f32 0.35355338, %v56_v2  ;;  %v57_v28 = vld [vmem:[%s8589_s0 + $0x150] sm:$0xff]  ;;  %v87_v14 = vld [vmem:[%s8589_s0 + $0x240] sm:$0xff] }
 0x27c   :  { %v5710_v30 = vpop.eup %5709  ;;  %5449 = vmatprep.subr.msk.bf16.mxu1 %vm287_vm0, %v7016_v19  ;;  %v1623_v62 = vmul.f32 %v5708_v37, %v8730_v54  ;;  %v2375_v37 = vpack.c.bf16 %v2317_v8, %v2316_v7  ;;  %v2671_v54 = vsel %vm287_vm0, %v7016_v19, 0  ;;  %v2324_v24 = vmul.f32 0.35355338, %v57_v28  ;;  %v77_v0 = vld [vmem:[%s8589_s0 + $0x1f0] sm:$0xff]  ;;  %v78_v4 = vld [vmem:[%s8589_s0 + $0x1f8] sm:$0xff]  ;;  %v104_v7 = vld [vmem:[%s8589_s0 + $0x2c8] sm:$0xff] }
 0x27d   :  { %v1622_v3 = vmul.f32 %v5710_v30, %v8729_v34  ;;  %v2373_v63 = vpack.c.bf16 %v2313_v25, %v2312_v42  ;;  %v2376_v30 = vpack.c.bf16 %v2319_v46, %v2318_v9  ;;  %v58_v34 = vld [vmem:[%s8589_s0 + $0x158] sm:$0xff]  ;;  %v2338_v20 = vmul.f32 0.35355338, %v87_v14  ;;  %v91_v42 = vld [vmem:[%s8589_s0 + $0x260] sm:$0xff]  ;;  %v92_v25 = vld [vmem:[%s8589_s0 + $0x268] sm:$0xff] }
 0x27e   :  { %v5712_v33 = vpop.eup %5711  ;;  %v1660_v58 = vpack.c.bf16 %v1624_v61, %v1623_v62  ;;  %v46_v61 = vld [vmem:[%s8589_s0 + $0xf8] sm:$0xff]  ;;  %v59_v62 = vld [vmem:[%s8589_s0 + $0x160] sm:$0xff]  ;;  %v2325_v15 = vmul.f32 0.35355338, %v58_v34  ;;  %v2336_v46 = vmul.f32 0.35355338, %v77_v0 }
 0x27f   :  { %v1659_v47 = vpack.c.bf16 %v1622_v3, %v1621_v39  ;;  %v1629_v17 = vmul.f32 %v5712_v33, %v8731_v18  ;;  %v2378_v39 = vpack.c.bf16 %v2323_v56, %v2322_v16  ;;  %v71_v3 = vld [vmem:[%s8589_s0 + $0x1c0] sm:$0xff]  ;;  %v72_v33 = vld [vmem:[%s8589_s0 + $0x1c8] sm:$0xff]  ;;  %v2321_v32 = vmul.f32 0.35355338, %v46_v61  ;;  %v90_v2 = vld [vmem:[%s8589_s0 + $0x258] sm:$0xff] }
 0x280   :  { %v5714_v59 = vpop.eup %5713  ;;  %v2330_v19 = vmul.f32 0.35355338, %v71_v3  ;;  %v156_v18 = vld [vmem:[%s8588_s1 + $0x68] sm:$0xff]  ;;  %v2337_v16 = vmul.f32 0.35355338, %v78_v4  ;;  %v105_v34 = vld [vmem:[%s8589_s0 + $0x2d0] sm:$0xff] }
 0x281   :  { %5256 = vmatprep.mubr.msk.bf16.mxu0 %vm928_vm1, %v1659_v47  ;;  %v1630_v53 = vmul.f32 %v5714_v59, %v8732_v38  ;;  %v2407_v47 = vpack.c.bf16 %v154_v49, %v154_v49  ;;  %v2331_v59 = vmul.f32 0.35355338, %v72_v33  ;;  %v106_v3 = vld [vmem:[%s8589_s0 + $0x2d8] sm:$0xff]  ;;  %v93_v33 = vld [vmem:[%s8589_s0 + $0x270] sm:$0xff]  ;;  %v107_v5 = vld [vmem:[%s8589_s0 + $0x2e0] sm:$0xff] }
 0x282   :  { %v5716_v1 = vpop.eup %5715  ;;  %5257 = vmatmul.mubr.msk.bf16.gmra.mxu0 %vm928_vm1, %v1660_v58  ;;  %v2326_v58 = vmul.f32 0.35355338, %v59_v62  ;;  %v2385_v61 = vpack.c.bf16 %v2337_v16, %v2336_v46  ;;  %v94_v62 = vld [vmem:[%s8589_s0 + $0x278] sm:$0xff]  ;;  %v121_v60 = vld [vmem:[%s8589_s0 + $0x350] sm:$0xff]  ;;  %v136_v14 = vld [vmem:[%s8589_s0 + $0x3c8] sm:$0xff] }
 0x283   :  { %v1663_v57 = vpack.c.bf16 %v1630_v53, %v1629_v17  ;;  %5272 = vmatprep.mubr.msk.bf16.mxu0 %vm287_vm0, %v2370_v29  ;;  %v1631_v23 = vmul.f32 %v5716_v1, %v8733_v43  ;;  %v2320_v29 = vmul.f32 0.35355338, %v45_v27  ;;  %v2379_v17 = vpack.c.bf16 %v2325_v15, %v2324_v24  ;;  %v73_v53 = vld [vmem:[%s8589_s0 + $0x1d0] sm:$0xff]  ;;  %v120_v24 = vld [vmem:[%s8589_s0 + $0x348] sm:$0xff]  ;;  %v138_v4 = vld [vmem:[%s8589_s0 + $0x3d8] sm:$0xff] }
 0x284   :  { %v5718_v22 = vpop.eup %5717  ;;  %v2382_v38 = vpack.c.bf16 %v2331_v59, %v2330_v19  ;;  %v61_v1 = vld [vmem:[%s8589_s0 + $0x170] sm:$0xff]  ;;  %v2380_v12 = vpack.c.bf16 %v2327_v40, %v2326_v58  ;;  %v2408_v43 = vpack.c.bf16 %v156_v18, %v156_v18  ;;  %v2831_v8 = vsel %vm287_vm0, %v2407_v47, 0 }
 0x285   :  { %5266 = vmatprep.mubr.msk.bf16.mxu1 %vm928_vm1, %v1663_v57  ;;  %v1632_v50 = vmul.f32 %v5718_v22, %v8734_v41  ;;  %v2377_v10 = vpack.c.bf16 %v2321_v32, %v2320_v29  ;;  %v76_v57 = vld [vmem:[%s8589_s0 + $0x1e8] sm:$0xff]  ;;  %v2333_v41 = vmul.f32 0.35355338, %v74_v48  ;;  %v2343_v27 = vmul.f32 0.35355338, %v92_v25  ;;  %v119_v32 = vld [vmem:[%s8589_s0 + $0x340] sm:$0xff] }
 0x286   :  { %v88_v22 = vld [vmem:[%s8589_s0 + $0x248] sm:$0xff]  ;;  %v2911_v29 = vsel %vm287_vm0, %v2408_v43, 0  ;;  %v2348_v15 = vmul.f32 0.35355338, %v105_v34  ;;  %v2349_v19 = vmul.f32 0.35355338, %v106_v3 }
 0x287   :  { %v1664_v55 = vpack.c.bf16 %v1632_v50, %v1631_v23  ;;  %v2332_v23 = vmul.f32 0.35355338, %v73_v53  ;;  %v2328_v50 = vmul.f32 0.35355338, %v61_v1  ;;  %v2339_v31 = vmul.f32 0.35355338, %v88_v22 }
 0x288   :  { %v2344_v59 = vmul.f32 0.35355338, %v93_v33  ;;  %v2345_v58 = vmul.f32 0.35355338, %v94_v62  ;;  %v2350_v40 = vmul.f32 0.35355338, %v107_v5 }
 0x289   :  { %5267 = vmatmul.mubr.msk.bf16.gmra.mxu1 %vm928_vm1, %v1664_v55  ;;  %v2383_v11 = vpack.c.bf16 %v2333_v41, %v2332_v23  ;;  %v158_v55 = vld [vmem:[%s8588_s1 + $0x78] sm:$0xff]  ;;  %v2386_v6 = vpack.c.bf16 %v2339_v31, %v2338_v20  ;;  %v2354_v18 = vmul.f32 0.35355338, %v119_v32  ;;  %v109_v1 = vld [vmem:[%s8589_s0 + $0x2f0] sm:$0xff]  ;;  %v124_v23 = vld [vmem:[%s8589_s0 + $0x368] sm:$0xff] }
 0x28a   :  { %5273 = vmatmul.mubr.msk.bf16.vlgmr.msra.gmra.mxu0 %vm287_vm0, %v2371_v36  ;;  %5282 = vmatprep.mubr.msk.bf16.mxu1 %vm287_vm0, %v2374_v35  ;;  %v2334_v36 = vmul.f32 0.35355338, %v75_v51  ;;  %v2335_v35 = vmul.f32 0.35355338, %v76_v57  ;;  %v2409_v9 = vpack.c.bf16 %v158_v55, %v158_v55  ;;  %v2389_v53 = vpack.c.bf16 %v2345_v58, %v2344_v59  ;;  %v122_v57 = vld [vmem:[%s8589_s0 + $0x358] sm:$0xff]  ;;  %v137_v0 = vld [vmem:[%s8589_s0 + $0x3d0] sm:$0xff] }
 0x28b   :  { %5276 = vmatprep.mubr.msk.bf16.mxu0 %vm287_vm0, %v2372_v13  ;;  %5291 = vmatpush3.bf16.xpose.msra.mxu0 %v2591_v26  ;;  %v2381_v13 = vpack.c.bf16 %v2329_v52, %v2328_v50  ;;  %v89_v26 = vld [vmem:[%s8589_s0 + $0x250] sm:$0xff]  ;;  %v2352_v41 = vmul.f32 0.35355338, %v109_v1  ;;  %v2356_v52 = vmul.f32 0.35355338, %v121_v60 }
 0x28c   :  { %5450 = vmatprep.subr.msk.bf16.mxu0 %vm287_vm0, %v2406_v21  ;;  %v2384_v45 = vpack.c.bf16 %v2335_v35, %v2334_v36  ;;  %v103_v21 = vld [vmem:[%s8589_s0 + $0x2c0] sm:$0xff]  ;;  %v2340_v56 = vmul.f32 0.35355338, %v89_v26  ;;  %v2991_v22 = vsel %vm287_vm0, %v2409_v9, 0  ;;  %v2357_v36 = vmul.f32 0.35355338, %v122_v57 }
 0x28d   :  { %v2346_v49 = vmul.f32 0.35355338, %v103_v21  ;;  %v2363_v20 = vmul.f32 0.35355338, %v136_v14  ;;  %v125_v26 = vld [vmem:[%s8589_s0 + $0x370] sm:$0xff]  ;;  %v139_v21 = vld [vmem:[%s8589_s0 + $0x3e0] sm:$0xff] }
 0x28e   :  { %v2360_v25 = vmul.f32 0.35355338, %v125_v26  ;;  %v2366_v46 = vmul.f32 0.35355338, %v139_v21 }
 0x291   :  { %5283 = vmatmul.mubr.msk.bf16.vlgmr.msra.gmra.mxu1 %vm287_vm0, %v2375_v37  ;;  %v2341_v37 = vmul.f32 0.35355338, %v90_v2  ;;  %v126_v2 = vld [vmem:[%s8589_s0 + $0x378] sm:$0xff] }
 0x292   :  { %5277 = vmatmul.mubr.msk.bf16.gmra.mxu0 %vm287_vm0, %v2373_v63  ;;  %5286 = vmatprep.mubr.msk.bf16.mxu1 %vm287_vm0, %v2376_v30  ;;  %v2347_v63 = vmul.f32 0.35355338, %v104_v7  ;;  %v2342_v30 = vmul.f32 0.35355338, %v91_v42  ;;  %v140_v7 = vld [vmem:[%s8589_s0 + $0x3e8] sm:$0xff] }
 0x293   :  { %5301 = vmatpush3.bf16.xpose.msra.mxu1 %v2671_v54  ;;  %5292 = vmatprep.mubr.msk.bf16.mxu0 %vm287_vm0, %v2378_v39  ;;  %v2387_v28 = vpack.c.bf16 %v2341_v37, %v2340_v56  ;;  %v2365_v42 = vmul.f32 0.35355338, %v138_v4  ;;  %v2367_v16 = vmul.f32 0.35355338, %v140_v7 }
 0x294   :  { %5451 = vmatprep.subr.msk.bf16.mxu1 %vm287_vm0, %v2407_v47  ;;  %v2390_v39 = vpack.c.bf16 %v2347_v63, %v2346_v49  ;;  %v2388_v54 = vpack.c.bf16 %v2343_v27, %v2342_v30  ;;  %v108_v47 = vld [vmem:[%s8589_s0 + $0x2e8] sm:$0xff]  ;;  %v141_v63 = vld [vmem:[%s8589_s0 + $0x3f0] sm:$0xff]  ;;  %v142_v30 = vld [vmem:[%s8589_s0 + $0x3f8] sm:$0xff] }
 0x295   :  { %v2400_v49 = vpack.c.bf16 %v2367_v16, %v2366_v46  ;;  %v2368_v27 = vmul.f32 0.35355338, %v141_v63 }
 0x299   :  { %5287 = vmatmul.mubr.msk.bf16.gmra.mxu1 %vm287_vm0, %v2377_v10  ;;  %v2351_v10 = vmul.f32 0.35355338, %v108_v47 }
 0x29a   :  { %5293 = vmatmul.mubr.msk.bf16.vlgmr.msra.gmra.mxu0 %vm287_vm0, %v2379_v17  ;;  %5302 = vmatprep.mubr.msk.bf16.mxu1 %vm287_vm0, %v2382_v38  ;;  %v2355_v17 = vmul.f32 0.35355338, %v120_v24  ;;  %v2391_v38 = vpack.c.bf16 %v2349_v19, %v2348_v15 }
 0x29b   :  { %5296 = vmatprep.mubr.msk.bf16.mxu0 %vm287_vm0, %v2380_v12  ;;  %5311 = vmatpush3.bf16.xpose.msra.mxu0 %v2751_v44  ;;  %v2392_v48 = vpack.c.bf16 %v2351_v10, %v2350_v40  ;;  %v110_v12 = vld [vmem:[%s8589_s0 + $0x2f8] sm:$0xff]  ;;  %v135_v44 = vld [vmem:[%s8589_s0 + $0x3c0] sm:$0xff] }
 0x29c   :  { %5452 = vmatprep.subr.msk.bf16.mxu0 %vm287_vm0, %v2408_v43  ;;  %v2394_v51 = vpack.c.bf16 %v2355_v17, %v2354_v18  ;;  %v123_v43 = vld [vmem:[%s8589_s0 + $0x360] sm:$0xff]  ;;  %v2353_v50 = vmul.f32 0.35355338, %v110_v12  ;;  %v2362_v35 = vmul.f32 0.35355338, %v135_v44 }
 0x29d   :  { %v2358_v31 = vmul.f32 0.35355338, %v123_v43 }
 0x29e   :  { %v2393_v55 = vpack.c.bf16 %v2353_v50, %v2352_v41 }
 0x2a1   :  { %5303 = vmatmul.mubr.msk.bf16.vlgmr.msra.gmra.mxu1 %vm287_vm0, %v2383_v11  ;;  %v2359_v11 = vmul.f32 0.35355338, %v124_v23 }
 0x2a2   :  { %5297 = vmatmul.mubr.msk.bf16.gmra.mxu0 %vm287_vm0, %v2381_v13  ;;  %5306 = vmatprep.mubr.msk.bf16.mxu1 %vm287_vm0, %v2384_v45  ;;  %v2395_v13 = vpack.c.bf16 %v2357_v36, %v2356_v52  ;;  %v2398_v45 = vpack.c.bf16 %v2363_v20, %v2362_v35 }
 0x2a3   :  { %5321 = vmatpush3.bf16.xpose.msra.mxu1 %v2831_v8  ;;  %5312 = vmatprep.mubr.msk.bf16.mxu0 %vm287_vm0, %v2386_v6  ;;  %v2396_v6 = vpack.c.bf16 %v2359_v11, %v2358_v31  ;;  %v2364_v8 = vmul.f32 0.35355338, %v137_v0 }
 0x2a4   :  { %5453 = vmatprep.subr.msk.bf16.mxu1 %vm287_vm0, %v2409_v9  ;;  %v2361_v9 = vmul.f32 0.35355338, %v126_v2 }
 0x2a5   :  { %v2399_v56 = vpack.c.bf16 %v2365_v42, %v2364_v8 }
 0x2a6   :  { %v2397_v37 = vpack.c.bf16 %v2361_v9, %v2360_v25 }
 0x2a9   :  { %5307 = vmatmul.mubr.msk.bf16.gmra.mxu1 %vm287_vm0, %v2385_v61  ;;  %v2369_v61 = vmul.f32 0.35355338, %v142_v30 }
 0x2aa   :  { %5313 = vmatmul.mubr.msk.bf16.vlgmr.msra.gmra.mxu0 %vm287_vm0, %v2387_v28  ;;  %5322 = vmatprep.mubr.msk.bf16.mxu1 %vm287_vm0, %v2390_v39 }
 0x2ab   :  { %5316 = vmatprep.mubr.msk.bf16.mxu0 %vm287_vm0, %v2388_v54  ;;  %5331 = vmatpush3.bf16.xpose.msra.mxu0 %v2911_v29  ;;  %v2401_v28 = vpack.c.bf16 %v2369_v61, %v2368_v27 }
 0x2b1   :  { %5323 = vmatmul.mubr.msk.bf16.vlgmr.msra.gmra.mxu1 %vm287_vm0, %v2391_v38 }
 0x2b2   :  { %5317 = vmatmul.mubr.msk.bf16.gmra.mxu0 %vm287_vm0, %v2389_v53  ;;  %5326 = vmatprep.mubr.msk.bf16.mxu1 %vm287_vm0, %v2392_v48 }
 0x2b3   :  { %5341 = vmatpush3.bf16.xpose.msra.mxu1 %v2991_v22  ;;  %5332 = vmatprep.mubr.msk.bf16.mxu0 %vm287_vm0, %v2394_v51 }
 0x2b9   :  { %5327 = vmatmul.mubr.msk.bf16.gmra.mxu1 %vm287_vm0, %v2393_v55 }
 0x2ba   :  { %5333 = vmatmul.mubr.msk.bf16.vlgmr.msra.gmra.mxu0 %vm287_vm0, %v2395_v13  ;;  %5342 = vmatprep.mubr.msk.bf16.mxu1 %vm287_vm0, %v2398_v45 }
 0x2bb   :  { %5336 = vmatprep.mubr.msk.bf16.mxu0 %vm287_vm0, %v2396_v6 }
 0x2c1   :  { %5343 = vmatmul.mubr.msk.bf16.vlgmr.msra.gmra.mxu1 %vm287_vm0, %v2399_v56 }
 0x2c2   :  { %5337 = vmatmul.mubr.msk.bf16.gmra.mxu0 %vm287_vm0, %v2397_v37  ;;  %5346 = vmatprep.mubr.msk.bf16.mxu1 %vm287_vm0, %v2400_v49 }
 0x2c9   :  { %5347 = vmatmul.mubr.msk.bf16.gmra.mxu1 %vm287_vm0, %v2401_v28 }
 0x2d6   :  { %v7276_v39 = vpop.f32.mrf.mxu0 }
 0x2d7   :  { %8735 = vst [vmem:[#allocation6_spill] sm:$0xff] %v7276_v39 }
 0x2d8   :  { %v7278_v34 = vpop.f32.mrf.mxu0 }
 0x2d9   :  { %8736 = vst [vmem:[#allocation17_spill] sm:$0xff] %v7278_v34 }
 0x2da   :  { %v7280_v3 = vpop.f32.mrf.mxu1  ;;  %v7282_v33 = vpop.f32.mrf.mxu0 }
 0x2db   :  { %8737 = vst [vmem:[#allocation3_spill] sm:$0xff] %v7280_v3  ;;  %8738 = vst [vmem:[#allocation2_spill] sm:$0xff] %v7282_v33 }
 0x2dc   :  { %v7284_v54 = vpop.f32.mrf.mxu1  ;;  %v7286_v62 = vpop.f32.mrf.mxu0 }
 0x2dd   :  { %8739 = vst [vmem:[#allocation7_spill] sm:$0xff] %v7284_v54  ;;  %8740 = vst [vmem:[#allocation4_spill] sm:$0xff] %v7286_v62 }
 0x2de   :  { %v7288_v5 = vpop.f32.mrf.mxu1 }
 0x2df   :  { %8741 = vst [vmem:[#allocation9_spill] sm:$0xff] %v7288_v5 }
 0x2e0   :  { %v7292_v29 = vpop.f32.mrf.mxu1 }
 0x2e1   :  { %8743 = vst [vmem:[#allocation5_spill] sm:$0xff] %v7292_v29 }
 0x2e6   :  { %v7290_v47 = vpop.f32.mrf.mxu0 }
 0x2e7   :  { %8742 = vst [vmem:[#allocation10_spill] sm:$0xff] %v7290_v47 }
 0x2e8   :  { %v7294_v32 = vpop.f32.mrf.mxu0 }
 0x2e9   :  { %8744 = vst [vmem:[#allocation12_spill] sm:$0xff] %v7294_v32 }
 0x2ea   :  { %v7296_v24 = vpop.f32.mrf.mxu1  ;;  %v7298_v15 = vpop.f32.mrf.mxu0 }
 0x2eb   :  { %8745 = vst [vmem:[#allocation11_spill] sm:$0xff] %v7296_v24  ;;  %8746 = vst [vmem:[#allocation15_spill] sm:$0xff] %v7298_v15 }
 0x2ec   :  { %v7300_v19 = vpop.f32.mrf.mxu1  ;;  %v7302_v59 = vpop.f32.mrf.mxu0 }
 0x2ed   :  { %8747 = vst [vmem:[#allocation8_spill] sm:$0xff] %v7300_v19  ;;  %8748 = vst [vmem:[#allocation13_spill] sm:$0xff] %v7302_v59 }
 0x2ee   :  { %v7304_v58 = vpop.f32.mrf.mxu1 }
 0x2ef   :  { %8749 = vst [vmem:[#allocation16_spill] sm:$0xff] %v7304_v58 }
 0x2f0   :  { %v7308_v10 = vpop.f32.mrf.mxu1 }
 0x2f1   :  { %8751 = vst [vmem:[#allocation14_spill] sm:$0xff] %v7308_v10 }
 0x2f6   :  { %v7306_v40 = vpop.f32.mrf.mxu0 }
 0x2f7   :  { %8750 = vst [vmem:[#allocation18_spill] sm:$0xff] %v7306_v40 }
 0x2f8   :  { %v7310_v18 = vpop.f32.mrf.mxu0 }
 0x2f9   :  { %8752 = vst [vmem:[#allocation19_spill] sm:$0xff] %v7310_v18 }
 0x2fa   :  { %v7312_v17 = vpop.f32.mrf.mxu1  ;;  %v7314_v38 = vpop.f32.mrf.mxu0 }
 0x2fb   :  { %8753 = vst [vmem:[#allocation21_spill] sm:$0xff] %v7312_v17  ;;  %8754 = vst [vmem:[#allocation20_spill] sm:$0xff] %v7314_v38 }
 0x2fc   :  { %v7316_v53 = vpop.f32.mrf.mxu1  ;;  %v7318_v48 = vpop.f32.mrf.mxu0 }
 0x2fd   :  { %8755 = vst [vmem:[#allocation22_spill] sm:$0xff] %v7316_v53  ;;  %8756 = vst [vmem:[#allocation23_spill] sm:$0xff] %v7318_v48 }
 0x2fe   :  { %v7320_v1 = vpop.f32.mrf.mxu1 }
 0x2ff   :  { %8757 = vst [vmem:[#allocation24_spill] sm:$0xff] %v7320_v1 }
 0x300   :  { %v7324_v60 = vpop.f32.mrf.mxu1 }
 0x301   :  { %8759 = vst [vmem:[#allocation26_spill] sm:$0xff] %v7324_v60 }
 0x306   :  { %v7322_v12 = vpop.f32.mrf.mxu0 }
 0x307   :  { %8758 = vst [vmem:[#allocation25_spill] sm:$0xff] %v7322_v12 }
 0x308   :  { %v7326_v51 = vpop.f32.mrf.mxu0 }
 0x309   :  { %8760 = vst [vmem:[#allocation27_spill] sm:$0xff] %v7326_v51 }
 0x30a   :  { %v7328_v57 = vpop.f32.mrf.mxu1  ;;  %v7330_v44 = vpop.f32.mrf.mxu0 }
 0x30b   :  { %8761 = vst [vmem:[#allocation28_spill] sm:$0xff] %v7328_v57  ;;  %8762 = vst [vmem:[#allocation29_spill] sm:$0xff] %v7330_v44 }
 0x30c   :  { %v7332_v14 = vpop.f32.mrf.mxu1  ;;  %v7334_v22 = vpop.f32.mrf.mxu0 }
 0x30d   :  { %8763 = vst [vmem:[#allocation30_spill] sm:$0xff] %v7332_v14  ;;  %8764 = vst [vmem:[#allocation31_spill] sm:$0xff] %v7334_v22 }
 0x30e   :  { %v7336_v43 = vpop.f32.mrf.mxu1 }
 0x30f   :  { %8765 = vst [vmem:[#allocation32_spill] sm:$0xff] %v7336_v43 }
 0x310   :  { %v7340_v41 = vpop.f32.mrf.mxu1 }
 0x311   :  { %8767 = vst [vmem:[#allocation34_spill] sm:$0xff] %v7340_v41 }
 0x316   :  { %v7338_v23 = vpop.f32.mrf.mxu0 }
 0x317   :  { %8766 = vst [vmem:[#allocation33_spill] sm:$0xff] %v7338_v23 }
 0x318   :  { %v7342_v50 = vpop.f32.mrf.mxu0 }
 0x319   :  { %8768 = vst [vmem:[#allocation35_spill] sm:$0xff] %v7342_v50 }
 0x31a   :  { %v7344_v52 = vpop.f32.mrf.mxu1  ;;  %v7346_v36 = vpop.f32.mrf.mxu0 }
 0x31b   :  { %8769 = vst [vmem:[#allocation36_spill] sm:$0xff] %v7344_v52  ;;  %8770 = vst [vmem:[#allocation37_spill] sm:$0xff] %v7346_v36 }
 0x31c   :  { %v7348_v35 = vpop.f32.mrf.mxu1  ;;  %v7350_v20 = vpop.f32.mrf.mxu0 }
 0x31d   :  { %8771 = vst [vmem:[#allocation38_spill] sm:$0xff] %v7348_v35  ;;  %8772 = vst [vmem:[#allocation39_spill] sm:$0xff] %v7350_v20 }
 0x31e   :  { %v7352_v31 = vpop.f32.mrf.mxu1 }
 0x31f   :  { %8773 = vst [vmem:[#allocation40_spill] sm:$0xff] %v7352_v31 }
 0x320   :  { %v7356_v55 = vpop.f32.mrf.mxu1 }
 0x321   :  { %8775 = vst [vmem:[#allocation42_spill] sm:$0xff] %v7356_v55 }
 0x326   :  { %v7354_v11 = vpop.f32.mrf.mxu0 }
 0x327   :  { %8774 = vst [vmem:[#allocation41_spill] sm:$0xff] %v7354_v11 }
 0x328   :  { %v7358_v13 = vpop.f32.mrf.mxu0 }
 0x329   :  { %8776 = vst [vmem:[#allocation43_spill] sm:$0xff] %v7358_v13 }
 0x32a   :  { %v7360_v45 = vpop.f32.mrf.mxu1  ;;  %v7362_v0 = vpop.f32.mrf.mxu0 }
 0x32b   :  { %8777 = vst [vmem:[#allocation44_spill] sm:$0xff] %v7360_v45  ;;  %8778 = vst [vmem:[#allocation45_spill] sm:$0xff] %v7362_v0 }
 0x32c   :  { %v7364_v4 = vpop.f32.mrf.mxu1  ;;  %v7366_v26 = vpop.f32.mrf.mxu0 }
 0x32d   :  { %8779 = vst [vmem:[#allocation46_spill] sm:$0xff] %v7364_v4  ;;  %8780 = vst [vmem:[#allocation47_spill] sm:$0xff] %v7366_v26 }
 0x32e   :  { %v7368_v6 = vpop.f32.mrf.mxu1 }
 0x32f   :  { %8781 = vst [vmem:[#allocation48_spill] sm:$0xff] %v7368_v6 }
 0x330   :  { %v7374_v7 = vpop.f32.mrf.mxu1 }
 0x331   :  { %8784 = vst [vmem:[#allocation51_spill] sm:$0xff] %v7374_v7 }
 0x336   :  { %v7370_v2 = vpop.f32.mrf.mxu0 }
 0x337   :  { %8782 = vst [vmem:[#allocation49_spill] sm:$0xff] %v7370_v2 }
 0x338   :  { %v7372_v21 = vpop.f32.mrf.mxu0 }
 0x339   :  { %8783 = vst [vmem:[#allocation50_spill] sm:$0xff] %v7372_v21 }
 0x33a   :  { %v7376_v8 = vpop.f32.mrf.mxu1  ;;  %v7378_v42 = vpop.f32.mrf.mxu0 }
 0x33b   :  { %8785 = vst [vmem:[#allocation52_spill] sm:$0xff] %v7376_v8  ;;  %8786 = vst [vmem:[#allocation53_spill] sm:$0xff] %v7378_v42 }
 0x33c   :  { %v7380_v25 = vpop.f32.mrf.mxu1  ;;  %v7382_v9 = vpop.f32.mrf.mxu0 }
 0x33d   :  { %8787 = vst [vmem:[#allocation54_spill] sm:$0xff] %v7380_v25  ;;  %8788 = vst [vmem:[#allocation55_spill] sm:$0xff] %v7382_v9 }
 0x33e   :  { %v7386_v16 = vpop.f32.mrf.mxu1 }
 0x33f   :  { %8790 = vst [vmem:[#allocation57_spill] sm:$0xff] %v7386_v16 }
 0x340   :  { %v7392_v49 = vpop.f32.mrf.mxu1 }
 0x341   :  { %8793 = vst [vmem:[#allocation60_spill] sm:$0xff] %v7392_v49 }
 0x342   :  { %v7384_v46 = vpop.f32.mrf.mxu0 }
 0x343   :  { %8789 = vst [vmem:[#allocation56_spill] sm:$0xff] %v7384_v46 }
 0x344   :  { %v7388_v56 = vpop.f32.mrf.mxu0 }
 0x345   :  { %8791 = vst [vmem:[#allocation58_spill] sm:$0xff] %v7388_v56 }
 0x346   :  { %v7390_v37 = vpop.f32.mrf.mxu0 }
 0x347   :  { %8792 = vst [vmem:[#allocation59_spill] sm:$0xff] %v7390_v37 }
 0x348   :  { %v7394_v63 = vpop.f32.mrf.mxu0 }
 0x349   :  { %8794 = vst [vmem:[#allocation61_spill] sm:$0xff] %v7394_v63  ;;  %v7396_v30 = vpop.f32.mrf.mxu1 }
 0x34a   :  { %8795 = vst [vmem:[#allocation62_spill] sm:$0xff] %v7396_v30  ;;  %v7398_v27 = vpop.f32.mrf.mxu0 }
 0x34b   :  { %v7400_v61 = vpop.f32.mrf.mxu1  ;;  %v3064_v28 = vsel %vm928_vm1, %v7398_v27, -inf }
 0x34c   :  { %8796 = vst [vmem:[#allocation63_spill] sm:$0xff] %v7400_v61  ;;  %3065 = vmax.xlane.f32.xlu0 %v3064_v28  ;;  %v7404_v46 = vpop.f32.mrf.mxu0 }
 0x34d   :  { %v7406_v9 = vpop.f32.mrf.mxu1 }
 0x34e   :  { %8797 = vst [vmem:[#allocation64_spill] sm:$0xff] %v7406_v9  ;;  %v7408_v56 = vpop.f32.mrf.mxu0  ;;  %v3058_v9 = vsel %vm928_vm1, %v7404_v46, -inf }
 0x34f   :  { %v7410_v37 = vpop.f32.mrf.mxu1  ;;  %v3067_v63 = vsel %vm928_vm1, %v7408_v56, -inf }
 0x350   :  { %8798 = vst [vmem:[#allocation65_spill] sm:$0xff] %v7410_v37  ;;  %3068 = vmax.xlane.f32.xlu1 %v3067_v63  ;;  %v7426_v25 = vpop.f32.mrf.mxu0 }
 0x351   :  { %v7414_v30 = vpop.f32.mrf.mxu1 }
 0x352   :  { %v3088_v61 = vsel %vm928_vm1, %v7414_v30, -inf  ;;  %v7428_v63 = vpop.f32.mrf.mxu0 }
 0x353   :  { %3089 = vmax.xlane.f32.xlu0 %v3088_v61  ;;  %v7418_v49 = vpop.f32.mrf.mxu1  ;;  %v3061_v61 = vsel %vm928_vm1, %v7426_v25, -inf  ;;  %v3076_v42 = vsel %vm928_vm1, %v7428_v63, -inf }
 0x354   :  { %v3082_v16 = vsel %vm928_vm1, %v7418_v49, -inf  ;;  %v7438_v8 = vpop.f32.mrf.mxu0 }
 0x355   :  { %v7420_v28 = vpop.f32.mrf.mxu1  ;;  %v3070_v4 = vsel %vm928_vm1, %v7438_v8, -inf }
 0x356   :  { %v3091_v37 = vsel %vm928_vm1, %v7420_v28, -inf  ;;  %v7446_v2 = vpop.f32.mrf.mxu0 }
 0x357   :  { %3059 = vmax.xlane.f32.xlu0 %v3058_v9  ;;  %3092 = vmax.xlane.f32.xlu1 %v3091_v37  ;;  %v7434_v21 = vpop.f32.mrf.mxu1 }
 0x358   :  { %v3085_v9 = vsel %vm928_vm1, %v7434_v21, -inf }
 0x359   :  { %v7440_v7 = vpop.f32.mrf.mxu1 }
 0x35a   :  { %v3100_v37 = vsel %vm928_vm1, %v7440_v7, -inf }
 0x35b   :  { %3083 = vmax.xlane.f32.xlu0 %v3082_v16  ;;  %3062 = vmax.xlane.f32.xlu1 %v3061_v61  ;;  %v7448_v26 = vpop.f32.mrf.mxu1  ;;  %v3079_v16 = vsel %vm928_vm1, %v7446_v2, -inf }
 0x35c   :  { %v3094_v13 = vsel %vm928_vm1, %v7448_v26, -inf }
 0x35d   :  { %v7452_v61 = vpop.f32.mrf.mxu1 }
 0x35f   :  { %3077 = vmax.xlane.f32.xlu0 %v3076_v42  ;;  %3086 = vmax.xlane.f32.xlu1 %v3085_v9  ;;  %v3103_v42 = vsel %vm928_vm1, %v7452_v61, -inf  ;;  %v7458_v9 = vpop.f32.mrf.mxu0 }
 0x361   :  { %v7460_v6 = vpop.f32.mrf.mxu0 }
 0x362   :  { %v3112_v0 = vsel %vm928_vm1, %v7460_v6, -inf }
 0x363   :  { %3080 = vmax.xlane.f32.xlu1 %v3079_v16  ;;  %3101 = vmax.xlane.f32.xlu0 %v3100_v37  ;;  %v3073_v37 = vsel %vm928_vm1, %v7458_v9, -inf  ;;  %v7466_v16 = vpop.f32.mrf.mxu1  ;;  %v7470_v45 = vpop.f32.mrf.mxu0 }
 0x364   :  { %v3106_v35 = vsel %vm928_vm1, %v7470_v45, -inf }
 0x365   :  { %v7472_v55 = vpop.f32.mrf.mxu1  ;;  %v7478_v11 = vpop.f32.mrf.mxu0 }
 0x367   :  { %3071 = vmax.xlane.f32.xlu0 %v3070_v4  ;;  %3104 = vmax.xlane.f32.xlu1 %v3103_v42  ;;  %v3097_v4 = vsel %vm928_vm1, %v7466_v16, -inf  ;;  %v3136_v42 = vsel %vm928_vm1, %v7472_v55, -inf  ;;  %v7480_v20 = vpop.f32.mrf.mxu1 }
 0x368   :  { %v3130_v50 = vsel %vm928_vm1, %v7480_v20, -inf }
 0x36b   :  { %3095 = vmax.xlane.f32.xlu0 %v3094_v13  ;;  %3074 = vmax.xlane.f32.xlu1 %v3073_v37  ;;  %v3115_v13 = vsel %vm928_vm1, %v7478_v11, -inf  ;;  %v7484_v37 = vpop.f32.mrf.mxu1 }
 0x36f   :  { %3113 = vmax.xlane.f32.xlu0 %v3112_v0  ;;  %3098 = vmax.xlane.f32.xlu1 %v3097_v4  ;;  %v3139_v0 = vsel %vm928_vm1, %v7484_v37, -inf  ;;  %v7490_v4 = vpop.f32.mrf.mxu0 }
 0x371   :  { %v7492_v31 = vpop.f32.mrf.mxu0 }
 0x372   :  { %v3124_v36 = vsel %vm928_vm1, %v7492_v31, -inf }
 0x373   :  { %3116 = vmax.xlane.f32.xlu1 %v3115_v13  ;;  %3137 = vmax.xlane.f32.xlu0 %v3136_v42  ;;  %v3109_v42 = vsel %vm928_vm1, %v7490_v4, -inf  ;;  %v7498_v13 = vpop.f32.mrf.mxu1  ;;  %v7502_v52 = vpop.f32.mrf.mxu0 }
 0x374   :  { %v3118_v14 = vsel %vm928_vm1, %v7502_v52, -inf }
 0x375   :  { %v7504_v41 = vpop.f32.mrf.mxu1  ;;  %v7510_v23 = vpop.f32.mrf.mxu0 }
 0x377   :  { %3107 = vmax.xlane.f32.xlu0 %v3106_v35  ;;  %3140 = vmax.xlane.f32.xlu1 %v3139_v0  ;;  %v3133_v35 = vsel %vm928_vm1, %v7498_v13, -inf  ;;  %v3148_v0 = vsel %vm928_vm1, %v7504_v41, -inf  ;;  %v7512_v22 = vpop.f32.mrf.mxu1 }
 0x378   :  { %v3142_v51 = vsel %vm928_vm1, %v7512_v22, -inf }
 0x37b   :  { %3131 = vmax.xlane.f32.xlu0 %v3130_v50  ;;  %3110 = vmax.xlane.f32.xlu1 %v3109_v42  ;;  %v3127_v50 = vsel %vm928_vm1, %v7510_v23, -inf  ;;  %v7516_v42 = vpop.f32.mrf.mxu1 }
 0x37f   :  { %3125 = vmax.xlane.f32.xlu0 %v3124_v36  ;;  %3134 = vmax.xlane.f32.xlu1 %v3133_v35  ;;  %v3151_v36 = vsel %vm928_vm1, %v7516_v42, -inf  ;;  %v7522_v35 = vpop.f32.mrf.mxu0 }
 0x381   :  { %v7524_v43 = vpop.f32.mrf.mxu0 }
 0x382   :  { %v3160_v44 = vsel %vm928_vm1, %v7524_v43, -inf }
 0x383   :  { %3128 = vmax.xlane.f32.xlu1 %v3127_v50  ;;  %3149 = vmax.xlane.f32.xlu0 %v3148_v0  ;;  %v3121_v0 = vsel %vm928_vm1, %v7522_v35, -inf  ;;  %v7530_v50 = vpop.f32.mrf.mxu1  ;;  %v7534_v57 = vpop.f32.mrf.mxu0 }
 0x384   :  { %v3154_v53 = vsel %vm928_vm1, %v7534_v57, -inf }
 0x385   :  { %v7536_v60 = vpop.f32.mrf.mxu1  ;;  %v7542_v12 = vpop.f32.mrf.mxu0 }
 0x387   :  { %3119 = vmax.xlane.f32.xlu0 %v3118_v14  ;;  %3152 = vmax.xlane.f32.xlu1 %v3151_v36  ;;  %v3145_v14 = vsel %vm928_vm1, %v7530_v50, -inf  ;;  %v3184_v36 = vsel %vm928_vm1, %v7536_v60, -inf  ;;  %v7544_v48 = vpop.f32.mrf.mxu1 }
 0x388   :  { %v3178_v18 = vsel %vm928_vm1, %v7544_v48, -inf }
 0x38b   :  { %3143 = vmax.xlane.f32.xlu0 %v3142_v51  ;;  %3122 = vmax.xlane.f32.xlu1 %v3121_v0  ;;  %v3163_v51 = vsel %vm928_vm1, %v7542_v12, -inf  ;;  %v7548_v0 = vpop.f32.mrf.mxu1 }
 0x38f   :  { %3161 = vmax.xlane.f32.xlu0 %v3160_v44  ;;  %3146 = vmax.xlane.f32.xlu1 %v3145_v14  ;;  %v3187_v44 = vsel %vm928_vm1, %v7548_v0, -inf  ;;  %v7554_v14 = vpop.f32.mrf.mxu0 }
 0x391   :  { %v7556_v1 = vpop.f32.mrf.mxu0 }
 0x392   :  { %v3172_v38 = vsel %vm928_vm1, %v7556_v1, -inf }
 0x393   :  { %3164 = vmax.xlane.f32.xlu1 %v3163_v51  ;;  %3185 = vmax.xlane.f32.xlu0 %v3184_v36  ;;  %v3157_v36 = vsel %vm928_vm1, %v7554_v14, -inf  ;;  %v7562_v51 = vpop.f32.mrf.mxu1  ;;  %v7566_v17 = vpop.f32.mrf.mxu0 }
 0x394   :  { %v3166_v19 = vsel %vm928_vm1, %v7566_v17, -inf }
 0x395   :  { %v7568_v10 = vpop.f32.mrf.mxu1  ;;  %v7574_v40 = vpop.f32.mrf.mxu0 }
 0x397   :  { %3155 = vmax.xlane.f32.xlu0 %v3154_v53  ;;  %3188 = vmax.xlane.f32.xlu1 %v3187_v44  ;;  %v3181_v53 = vsel %vm928_vm1, %v7562_v51, -inf  ;;  %v3196_v44 = vsel %vm928_vm1, %v7568_v10, -inf  ;;  %v7576_v59 = vpop.f32.mrf.mxu1 }
 0x398   :  { %v3190_v32 = vsel %vm928_vm1, %v7576_v59, -inf }
 0x39b   :  { %3179 = vmax.xlane.f32.xlu0 %v3178_v18  ;;  %3158 = vmax.xlane.f32.xlu1 %v3157_v36  ;;  %v3175_v18 = vsel %vm928_vm1, %v7574_v40, -inf  ;;  %v7580_v36 = vpop.f32.mrf.mxu1 }
 0x39f   :  { %3173 = vmax.xlane.f32.xlu0 %v3172_v38  ;;  %3182 = vmax.xlane.f32.xlu1 %v3181_v53  ;;  %v3199_v38 = vsel %vm928_vm1, %v7580_v36, -inf  ;;  %v7586_v53 = vpop.f32.mrf.mxu0 }
 0x3a1   :  { %v7588_v58 = vpop.f32.mrf.mxu0 }
 0x3a2   :  { %v3208_v15 = vsel %vm928_vm1, %v7588_v58, -inf }
 0x3a3   :  { %3176 = vmax.xlane.f32.xlu1 %v3175_v18  ;;  %3197 = vmax.xlane.f32.xlu0 %v3196_v44  ;;  %v3169_v44 = vsel %vm928_vm1, %v7586_v53, -inf  ;;  %v7594_v18 = vpop.f32.mrf.mxu1  ;;  %v7598_v24 = vpop.f32.mrf.mxu0 }
 0x3a4   :  { %8799 = vst [vmem:[#allocation66_spill] sm:$0xff] %v7598_v24  ;;  %v3202_v54 = vsel %vm928_vm1, %v7598_v24, -inf }
 0x3a5   :  { %v7600_v29 = vpop.f32.mrf.mxu1  ;;  %v7606_v47 = vpop.f32.mrf.mxu0 }
 0x3a6   :  { %8800 = vst [vmem:[#allocation67_spill] sm:$0xff] %v7606_v47 }
 0x3a7   :  { %3167 = vmax.xlane.f32.xlu0 %v3166_v19  ;;  %3200 = vmax.xlane.f32.xlu1 %v3199_v38  ;;  %v3193_v19 = vsel %vm928_vm1, %v7594_v18, -inf  ;;  %v3232_v38 = vsel %vm928_vm1, %v7600_v29, -inf  ;;  %v7608_v62 = vpop.f32.mrf.mxu1 }
 0x3a8   :  { %8801 = vst [vmem:[#allocation68_spill] sm:$0xff] %v7608_v62  ;;  %v3226_v34 = vsel %vm928_vm1, %v7608_v62, -inf }
 0x3ab   :  { %3191 = vmax.xlane.f32.xlu0 %v3190_v32  ;;  %3170 = vmax.xlane.f32.xlu1 %v3169_v44  ;;  %v3211_v32 = vsel %vm928_vm1, %v7606_v47, -inf  ;;  %v7612_v44 = vpop.f32.mrf.mxu1 }
 0x3ac   :  { %8802 = vst [vmem:[#allocation69_spill] sm:$0xff] %v7612_v44 }
 0x3af   :  { %3209 = vmax.xlane.f32.xlu0 %v3208_v15  ;;  %3194 = vmax.xlane.f32.xlu1 %v3193_v19  ;;  %v3235_v15 = vsel %vm928_vm1, %v7612_v44, -inf  ;;  %v7618_v19 = vpop.f32.mrf.mxu0 }
 0x3b0   :  { %8803 = vst [vmem:[#allocation70_spill] sm:$0xff] %v7618_v19 }
 0x3b1   :  { %v7620_v5 = vpop.f32.mrf.mxu0 }
 0x3b2   :  { %8804 = vst [vmem:[#allocation71_spill] sm:$0xff] %v7620_v5  ;;  %v3220_v33 = vsel %vm928_vm1, %v7620_v5, -inf }
 0x3b3   :  { %3212 = vmax.xlane.f32.xlu1 %v3211_v32  ;;  %3233 = vmax.xlane.f32.xlu0 %v3232_v38  ;;  %v3205_v38 = vsel %vm928_vm1, %v7618_v19, -inf  ;;  %v7626_v32 = vpop.f32.mrf.mxu1  ;;  %v7630_v3 = vpop.f32.mrf.mxu0 }
 0x3b4   :  { %8805 = vst [vmem:[#allocation72_spill] sm:$0xff] %v7626_v32  ;;  %8806 = vst [vmem:[#allocation73_spill] sm:$0xff] %v7630_v3  ;;  %v3214_v5 = vsel %vm928_vm1, %v7630_v3, -inf }
 0x3b5   :  { %v7632_v39 = vpop.f32.mrf.mxu1  ;;  %v7638_v19 = vpop.f32.mrf.mxu0 }
 0x3b6   :  { %8807 = vst [vmem:[#allocation74_spill] sm:$0xff] %v7632_v39  ;;  %8808 = vst [vmem:[#allocation75_spill] sm:$0xff] %v7638_v19 }
 0x3b7   :  { %3203 = vmax.xlane.f32.xlu0 %v3202_v54  ;;  %3236 = vmax.xlane.f32.xlu1 %v3235_v15  ;;  %v3229_v54 = vsel %vm928_vm1, %v7626_v32, -inf  ;;  %v3244_v15 = vsel %vm928_vm1, %v7632_v39, -inf  ;;  %v7640_v62 = vpop.f32.mrf.mxu1 }
 0x3b8   :  { %8809 = vst [vmem:[#allocation76_spill] sm:$0xff] %v7640_v62  ;;  %v3238_v39 = vsel %vm928_vm1, %v7640_v62, -inf }
 0x3bb   :  { %3227 = vmax.xlane.f32.xlu0 %v3226_v34  ;;  %3206 = vmax.xlane.f32.xlu1 %v3205_v38  ;;  %v3223_v34 = vsel %vm928_vm1, %v7638_v19, -inf  ;;  %v7644_v38 = vpop.f32.mrf.mxu1 }
 0x3bc   :  { %8810 = vst [vmem:[#allocation77_spill] sm:$0xff] %v7644_v38 }
 0x3bf   :  { %3221 = vmax.xlane.f32.xlu0 %v3220_v33  ;;  %3230 = vmax.xlane.f32.xlu1 %v3229_v54  ;;  %v3247_v33 = vsel %vm928_vm1, %v7644_v38, -inf  ;;  %v7650_v54 = vpop.f32.mrf.mxu0 }
 0x3c0   :  { %8811 = vst [vmem:[#allocation78_spill] sm:$0xff] %v7650_v54  ;;  %v3217_v19 = vsel %vm928_vm1, %v7650_v54, -inf }
 0x3c3   :  { %3224 = vmax.xlane.f32.xlu1 %v3223_v34  ;;  %3245 = vmax.xlane.f32.xlu0 %v3244_v15  ;;  %v7656_v34 = vpop.f32.mrf.mxu1 }
 0x3c4   :  { %8812 = vst [vmem:[#allocation79_spill] sm:$0xff] %v7656_v34  ;;  %v3241_v15 = vsel %vm928_vm1, %v7656_v34, -inf }
 0x3c7   :  { %3215 = vmax.xlane.f32.xlu0 %v3214_v5  ;;  %3248 = vmax.xlane.f32.xlu1 %v3247_v33 }
 0x3cb   :  { %3239 = vmax.xlane.f32.xlu0 %v3238_v39  ;;  %3218 = vmax.xlane.f32.xlu1 %v3217_v19 }
 0x3cf   :  { %3242 = vmax.xlane.f32.xlu1 %v3241_v15 }
 0x3d5   :  { %v3066_v3 = vpop.xlane.xlu0 %3065 }
 0x3d6   :  { %v3252_v38 = vsub.f32 %v7398_v27, %v3066_v3 }
 0x3d8   :  { %v3318_v32 = vmul.f32 1.442695, %v3252_v38 }
 0x3d9   :  { %v3069_v5 = vpop.xlane.xlu1 %3068 }
 0x3da   :  { %5719 = vpow2.f32 %v3318_v32  ;;  %v3253_v33 = vsub.f32 %v7408_v56, %v3069_v5 }
 0x3dc   :  { %v3320_v62 = vmul.f32 1.442695, %v3253_v33  ;;  %v3090_v44 = vpop.xlane.xlu0 %3089 }
 0x3dd   :  { %v3260_v54 = vsub.f32 %v7414_v30, %v3090_v44 }
 0x3de   :  { %5721 = vpow2.f32 %v3320_v62 }
 0x3df   :  { %v3334_v24 = vmul.f32 1.442695, %v3260_v54 }
 0x3e0   :  { %v3060_v39 = vpop.xlane.xlu0 %3059  ;;  %v3093_v19 = vpop.xlane.xlu1 %3092 }
 0x3e1   :  { %5723 = vpow2.f32 %v3334_v24  ;;  %v3250_v34 = vsub.f32 %v7404_v46, %v3060_v39  ;;  %v3261_v15 = vsub.f32 %v7420_v28, %v3093_v19 }
 0x3e3   :  { %v3314_v47 = vmul.f32 1.442695, %v3250_v34  ;;  %v3336_v3 = vmul.f32 1.442695, %v3261_v15 }
 0x3e4   :  { %v3084_v27 = vpop.xlane.xlu0 %3083  ;;  %v3063_v38 = vpop.xlane.xlu1 %3062 }
 0x3e5   :  { %5725 = vpow2.f32 %v3314_v47  ;;  %v3258_v56 = vsub.f32 %v7418_v49, %v3084_v27  ;;  %v3251_v32 = vsub.f32 %v7426_v25, %v3063_v38 }
 0x3e6   :  { %5727 = vpow2.f32 %v3336_v3 }
 0x3e7   :  { %v7667_v30 = vpop.eup %5719  ;;  %v3330_v62 = vmul.f32 1.442695, %v3258_v56  ;;  %v3316_v44 = vmul.f32 1.442695, %v3251_v32 }
 0x3e8   :  { %v3078_v54 = vpop.xlane.xlu0 %3077  ;;  %v3087_v24 = vpop.xlane.xlu1 %3086  ;;  %v3448_v46 = vsel %vm928_vm1, %v7667_v30, 0.0 }
 0x3e9   :  { %5729 = vpow2.f32 %v3330_v62  ;;  %v3256_v28 = vsub.f32 %v7428_v63, %v3078_v54  ;;  %v3259_v34 = vsub.f32 %v7434_v21, %v3087_v24  ;;  %3449 = vadd.xlane.f32.xlu0 %v3448_v46 }
 0x3ea   :  { %5731 = vpow2.f32 %v3316_v44 }
 0x3eb   :  { %v7673_v47 = vpop.eup %5721  ;;  %v3326_v25 = vmul.f32 1.442695, %v3256_v28  ;;  %v3332_v49 = vmul.f32 1.442695, %v3259_v34 }
 0x3ec   :  { %v3102_v5 = vpop.xlane.xlu0 %3101  ;;  %v3081_v33 = vpop.xlane.xlu1 %3080  ;;  %v3451_v39 = vsel %vm928_vm1, %v7673_v47, 0.0 }
 0x3ed   :  { %5733 = vpow2.f32 %v3326_v25  ;;  %v3264_v19 = vsub.f32 %v7440_v7, %v3102_v5  ;;  %v3257_v15 = vsub.f32 %v7446_v2, %v3081_v33  ;;  %3452 = vadd.xlane.f32.xlu1 %v3451_v39 }
 0x3ee   :  { %v7679_v63 = vpop.eup %5723  ;;  %5735 = vpow2.f32 %v3332_v49 }
 0x3ef   :  { %v3342_v21 = vmul.f32 1.442695, %v3264_v19  ;;  %v3328_v3 = vmul.f32 1.442695, %v3257_v15  ;;  %v3472_v27 = vsel %vm928_vm1, %v7679_v63, 0.0 }
 0x3f0   :  { %v3072_v38 = vpop.xlane.xlu0 %3071  ;;  %3473 = vadd.xlane.f32.xlu0 %v3472_v27  ;;  %v3105_v56 = vpop.xlane.xlu1 %3104 }
 0x3f1   :  { %5737 = vpow2.f32 %v3342_v21  ;;  %v3254_v32 = vsub.f32 %v7438_v8, %v3072_v38  ;;  %v3265_v62 = vsub.f32 %v7452_v61, %v3105_v56 }
 0x3f2   :  { %v7685_v7 = vpop.eup %5725  ;;  %5739 = vpow2.f32 %v3328_v3 }
 0x3f3   :  { %v7687_v2 = vpop.eup %5727  ;;  %v3322_v44 = vmul.f32 1.442695, %v3254_v32  ;;  %v3344_v54 = vmul.f32 1.442695, %v3265_v62  ;;  %v3442_v24 = vsel %vm928_vm1, %v7685_v7, 0.0 }
 0x3f4   :  { %v3096_v46 = vpop.xlane.xlu0 %3095  ;;  %3443 = vadd.xlane.f32.xlu0 %v3442_v24  ;;  %v3475_v28 = vsel %vm928_vm1, %v7687_v2, 0.0  ;;  %v3075_v34 = vpop.xlane.xlu1 %3074 }
 0x3f5   :  { %5741 = vpow2.f32 %v3322_v44  ;;  %v3262_v8 = vsub.f32 %v7448_v26, %v3096_v46  ;;  %3476 = vadd.xlane.f32.xlu1 %v3475_v28  ;;  %v3255_v61 = vsub.f32 %v7458_v9, %v3075_v34 }
 0x3f6   :  { %v7695_v25 = vpop.eup %5729  ;;  %5743 = vpow2.f32 %v3344_v54 }
 0x3f7   :  { %v7697_v49 = vpop.eup %5731  ;;  %v3338_v5 = vmul.f32 1.442695, %v3262_v8  ;;  %v3324_v33 = vmul.f32 1.442695, %v3255_v61  ;;  %v3466_v39 = vsel %vm928_vm1, %v7695_v25, 0.0 }
 0x3f8   :  { %v3114_v19 = vpop.xlane.xlu0 %3113  ;;  %3467 = vadd.xlane.f32.xlu0 %v3466_v39  ;;  %v3445_v15 = vsel %vm928_vm1, %v7697_v49, 0.0  ;;  %v3099_v21 = vpop.xlane.xlu1 %3098 }
 0x3f9   :  { %5745 = vpow2.f32 %v3338_v5  ;;  %v3268_v26 = vsub.f32 %v7460_v6, %v3114_v19  ;;  %3446 = vadd.xlane.f32.xlu1 %v3445_v15  ;;  %v3263_v9 = vsub.f32 %v7466_v16, %v3099_v21 }
 0x3fa   :  { %v7705_v3 = vpop.eup %5733  ;;  %5747 = vpow2.f32 %v3324_v33 }
 0x3fb   :  { %v7707_v27 = vpop.eup %5735  ;;  %v3350_v38 = vmul.f32 1.442695, %v3268_v26  ;;  %v3340_v56 = vmul.f32 1.442695, %v3263_v9  ;;  %v3460_v32 = vsel %vm928_vm1, %v7705_v3, 0.0 }
 0x3fc   :  { %v3138_v62 = vpop.xlane.xlu0 %3137  ;;  %3461 = vadd.xlane.f32.xlu0 %v3460_v32  ;;  %v3469_v44 = vsel %vm928_vm1, %v7707_v27, 0.0  ;;  %v3117_v54 = vpop.xlane.xlu1 %3116 }
 0x3fd   :  { %5749 = vpow2.f32 %v3350_v38  ;;  %v3276_v6 = vsub.f32 %v7472_v55, %v3138_v62  ;;  %3470 = vadd.xlane.f32.xlu1 %v3469_v44  ;;  %v3269_v16 = vsub.f32 %v7478_v11, %v3117_v54 }
 0x3fe   :  { %v7715_v24 = vpop.eup %5737  ;;  %5751 = vpow2.f32 %v3340_v56 }
 0x3ff   :  { %v7717_v46 = vpop.eup %5739  ;;  %v3366_v28 = vmul.f32 1.442695, %v3276_v6  ;;  %v3352_v34 = vmul.f32 1.442695, %v3269_v16  ;;  %v3484_v8 = vsel %vm928_vm1, %v7715_v24, 0.0 }
 0x400   :  { %v3108_v61 = vpop.xlane.xlu0 %3107  ;;  %3485 = vadd.xlane.f32.xlu0 %v3484_v8  ;;  %v3463_v5 = vsel %vm928_vm1, %v7717_v46, 0.0  ;;  %v3141_v33 = vpop.xlane.xlu1 %3140 }
 0x401   :  { %5753 = vpow2.f32 %v3366_v28  ;;  %v3266_v55 = vsub.f32 %v7470_v45, %v3108_v61  ;;  %3464 = vadd.xlane.f32.xlu1 %v3463_v5  ;;  %v3277_v11 = vsub.f32 %v7484_v37, %v3141_v33 }
 0x402   :  { %v7725_v39 = vpop.eup %5741  ;;  %5755 = vpow2.f32 %v3352_v34 }
 0x403   :  { %v7727_v19 = vpop.eup %5743  ;;  %v3346_v15 = vmul.f32 1.442695, %v3266_v55  ;;  %v3368_v21 = vmul.f32 1.442695, %v3277_v11  ;;  %v3454_v26 = vsel %vm928_vm1, %v7725_v39, 0.0 }
 0x404   :  { %v3132_v9 = vpop.xlane.xlu0 %3131  ;;  %3455 = vadd.xlane.f32.xlu0 %v3454_v26  ;;  %v3487_v38 = vsel %vm928_vm1, %v7727_v19, 0.0  ;;  %v3111_v56 = vpop.xlane.xlu1 %3110  ;;  %v160_v26 = vld [vmem:[%s8590_s2 + $0x8] sm:$0xff] }
 0x405   :  { %5757 = vpow2.f32 %v3346_v15  ;;  %v3274_v45 = vsub.f32 %v7480_v20, %v3132_v9  ;;  %3488 = vadd.xlane.f32.xlu1 %v3487_v38  ;;  %v3267_v37 = vsub.f32 %v7490_v4, %v3111_v56  ;;  %v162_v9 = vld [vmem:[%s8590_s2 + $0x18] sm:$0xff]  ;;  %v2410_v56 = vpack.c.bf16 %v160_v26, %v160_v26 }
 0x406   :  { %v7735_v32 = vpop.eup %5745  ;;  %5759 = vpow2.f32 %v3368_v21 }
 0x407   :  { %v7737_v62 = vpop.eup %5747  ;;  %v3362_v44 = vmul.f32 1.442695, %v3274_v45  ;;  %v3348_v54 = vmul.f32 1.442695, %v3267_v37  ;;  %v3478_v6 = vsel %vm928_vm1, %v7735_v32, 0.0  ;;  %v2411_v45 = vpack.c.bf16 %v162_v9, %v162_v9  ;;  %5454 = vmatprep.subr.msk.bf16.mxu0 %vm1677_vm2, %v2410_v56 }
 0x408   :  { %v3126_v16 = vpop.xlane.xlu0 %3125  ;;  %3479 = vadd.xlane.f32.xlu0 %v3478_v6  ;;  %v3457_v28 = vsel %vm928_vm1, %v7737_v62, 0.0  ;;  %v3135_v34 = vpop.xlane.xlu1 %3134 }
 0x409   :  { %5761 = vpow2.f32 %v3362_v44  ;;  %v3272_v20 = vsub.f32 %v7492_v31, %v3126_v16  ;;  %3458 = vadd.xlane.f32.xlu1 %v3457_v28  ;;  %v3275_v4 = vsub.f32 %v7498_v13, %v3135_v34  ;;  %v3807_v28 = vsel %vm1677_vm2, %v2410_v56, 0  ;;  %5455 = vmatprep.subr.msk.bf16.mxu1 %vm1677_vm2, %v2411_v45 }
 0x40a   :  { %v7745_v8 = vpop.eup %5749  ;;  %5763 = vpow2.f32 %v3348_v54  ;;  %v3887_v34 = vsel %vm1677_vm2, %v2411_v45, 0  ;;  %5351 = vmatpush3.bf16.msra.mxu0 %v3807_v28 }
 0x40b   :  { %v7747_v61 = vpop.eup %5751  ;;  %v3358_v5 = vmul.f32 1.442695, %v3272_v20  ;;  %v3364_v33 = vmul.f32 1.442695, %v3275_v4  ;;  %v3496_v55 = vsel %vm928_vm1, %v7745_v8, 0.0  ;;  %5361 = vmatpush3.bf16.msra.mxu1 %v3887_v34 }
 0x40c   :  { %v3150_v11 = vpop.xlane.xlu0 %3149  ;;  %3497 = vadd.xlane.f32.xlu0 %v3496_v55  ;;  %v3481_v15 = vsel %vm928_vm1, %v7747_v61, 0.0  ;;  %v3129_v21 = vpop.xlane.xlu1 %3128 }
 0x40d   :  { %5765 = vpow2.f32 %v3358_v5  ;;  %v3280_v31 = vsub.f32 %v7504_v41, %v3150_v11  ;;  %3482 = vadd.xlane.f32.xlu1 %v3481_v15  ;;  %v3273_v13 = vsub.f32 %v7510_v23, %v3129_v21 }
 0x40e   :  { %v7761_v38 = vpop.eup %5753  ;;  %5767 = vpow2.f32 %v3364_v33 }
 0x40f   :  { %v7763_v37 = vpop.eup %5755  ;;  %v3374_v44 = vmul.f32 1.442695, %v3280_v31  ;;  %v3360_v41 = vmul.f32 1.442695, %v3273_v13  ;;  %v3520_v23 = vsel %vm928_vm1, %v7761_v38, 0.0 }
 0x410   :  { %v3120_v54 = vpop.xlane.xlu0 %3119  ;;  %3521 = vadd.xlane.f32.xlu0 %v3520_v23  ;;  %v3499_v6 = vsel %vm928_vm1, %v7763_v37, 0.0  ;;  %v3153_v16 = vpop.xlane.xlu1 %3152 }
 0x411   :  { %5769 = vpow2.f32 %v3374_v44  ;;  %v3270_v20 = vsub.f32 %v7502_v52, %v3120_v54  ;;  %3500 = vadd.xlane.f32.xlu1 %v3499_v6  ;;  %v3281_v4 = vsub.f32 %v7516_v42, %v3153_v16 }
 0x412   :  { %v7774_v5 = vpop.eup %5757  ;;  %5771 = vpow2.f32 %v3360_v41 }
 0x413   :  { %v7777_v33 = vpop.eup %5759  ;;  %v3354_v55 = vmul.f32 1.442695, %v3270_v20  ;;  %v3376_v11 = vmul.f32 1.442695, %v3281_v4  ;;  %v3490_v15 = vsel %vm928_vm1, %v7774_v5, 0.0 }
 0x414   :  { %v3144_v21 = vpop.xlane.xlu0 %3143  ;;  %3491 = vadd.xlane.f32.xlu0 %v3490_v15  ;;  %v3523_v52 = vsel %vm928_vm1, %v7777_v33, 0.0  ;;  %v3123_v42 = vpop.xlane.xlu1 %3122 }
 0x415   :  { %5773 = vpow2.f32 %v3354_v55  ;;  %v3278_v31 = vsub.f32 %v7512_v22, %v3144_v21  ;;  %3524 = vadd.xlane.f32.xlu1 %v3523_v52  ;;  %v3271_v13 = vsub.f32 %v7522_v35, %v3123_v42 }
 0x416   :  { %v7785_v26 = vpop.eup %5761  ;;  %5775 = vpow2.f32 %v3376_v11 }
 0x417   :  { %v7787_v9 = vpop.eup %5763  ;;  %v3370_v56 = vmul.f32 1.442695, %v3278_v31  ;;  %v3356_v45 = vmul.f32 1.442695, %v3271_v13  ;;  %v3514_v44 = vsel %vm928_vm1, %v7785_v26, 0.0 }
 0x418   :  { %v3162_v41 = vpop.xlane.xlu0 %3161  ;;  %3515 = vadd.xlane.f32.xlu0 %v3514_v44  ;;  %v3493_v23 = vsel %vm928_vm1, %v7787_v9, 0.0  ;;  %v3147_v54 = vpop.xlane.xlu1 %3146 }
 0x419   :  { %5777 = vpow2.f32 %v3370_v56  ;;  %v3284_v22 = vsub.f32 %v7524_v43, %v3162_v41  ;;  %3494 = vadd.xlane.f32.xlu1 %v3493_v23  ;;  %v3279_v35 = vsub.f32 %v7530_v50, %v3147_v54 }
 0x41a   :  { %v7795_v6 = vpop.eup %5765  ;;  %5779 = vpow2.f32 %v3356_v45 }
 0x41b   :  { %v7797_v16 = vpop.eup %5767  ;;  %v3382_v28 = vmul.f32 1.442695, %v3284_v22  ;;  %v3372_v34 = vmul.f32 1.442695, %v3279_v35  ;;  %v3508_v20 = vsel %vm928_vm1, %v7795_v6, 0.0 }
 0x41c   :  { %v3186_v4 = vpop.xlane.xlu0 %3185  ;;  %3509 = vadd.xlane.f32.xlu0 %v3508_v20  ;;  %v3517_v55 = vsel %vm928_vm1, %v7797_v16, 0.0  ;;  %v3165_v11 = vpop.xlane.xlu1 %3164 }
 0x41d   :  { %5781 = vpow2.f32 %v3382_v28  ;;  %v3292_v43 = vsub.f32 %v7536_v60, %v3186_v4  ;;  %3518 = vadd.xlane.f32.xlu1 %v3517_v55  ;;  %v3285_v50 = vsub.f32 %v7542_v12, %v3165_v11 }
 0x41e   :  { %v7805_v15 = vpop.eup %5769  ;;  %5783 = vpow2.f32 %v3372_v34 }
 0x41f   :  { %v7807_v21 = vpop.eup %5771  ;;  %v3398_v52 = vmul.f32 1.442695, %v3292_v43  ;;  %v3384_v42 = vmul.f32 1.442695, %v3285_v50  ;;  %v3532_v31 = vsel %vm928_vm1, %v7805_v15, 0.0 }
 0x420   :  { %v3156_v13 = vpop.xlane.xlu0 %3155  ;;  %3533 = vadd.xlane.f32.xlu0 %v3532_v31  ;;  %v3511_v56 = vsel %vm928_vm1, %v7807_v21, 0.0  ;;  %v3189_v45 = vpop.xlane.xlu1 %3188 }
 0x421   :  { %5785 = vpow2.f32 %v3398_v52  ;;  %v3282_v60 = vsub.f32 %v7534_v57, %v3156_v13  ;;  %3512 = vadd.xlane.f32.xlu1 %v3511_v56  ;;  %v3293_v12 = vsub.f32 %v7548_v0, %v3189_v45 }
 0x422   :  { %v7815_v44 = vpop.eup %5773  ;;  %5787 = vpow2.f32 %v3384_v42 }
 0x423   :  { %v7817_v41 = vpop.eup %5775  ;;  %v3378_v23 = vmul.f32 1.442695, %v3282_v60  ;;  %v3400_v54 = vmul.f32 1.442695, %v3293_v12  ;;  %v3502_v22 = vsel %vm928_vm1, %v7815_v44, 0.0 }
 0x424   :  { %v3180_v35 = vpop.xlane.xlu0 %3179  ;;  %3503 = vadd.xlane.f32.xlu0 %v3502_v22  ;;  %v3535_v28 = vsel %vm928_vm1, %v7817_v41, 0.0  ;;  %v3159_v34 = vpop.xlane.xlu1 %3158  ;;  %v164_v22 = vld [vmem:[%s8590_s2 + $0x28] sm:$0xff] }
 0x425   :  { %5789 = vpow2.f32 %v3378_v23  ;;  %v3290_v57 = vsub.f32 %v7544_v48, %v3180_v35  ;;  %3536 = vadd.xlane.f32.xlu1 %v3535_v28  ;;  %v3283_v0 = vsub.f32 %v7554_v14, %v3159_v34  ;;  %v166_v35 = vld [vmem:[%s8590_s2 + $0x38] sm:$0xff]  ;;  %v7853_v34 = vpack.c.bf16 %v164_v22, %v164_v22 }
 0x426   :  { %v7825_v20 = vpop.eup %5777  ;;  %5791 = vpow2.f32 %v3400_v54 }
 0x427   :  { %v7827_v4 = vpop.eup %5779  ;;  %v3394_v55 = vmul.f32 1.442695, %v3290_v57  ;;  %v3380_v11 = vmul.f32 1.442695, %v3283_v0  ;;  %v3526_v43 = vsel %vm928_vm1, %v7825_v20, 0.0  ;;  %v7855_v57 = vpack.c.bf16 %v166_v35, %v166_v35  ;;  %5456 = vmatprep.subr.msk.bf16.mxu0 %vm1677_vm2, %v7853_v34 }
 0x428   :  { %v3174_v50 = vpop.xlane.xlu0 %3173  ;;  %3527 = vadd.xlane.f32.xlu0 %v3526_v43  ;;  %v3505_v52 = vsel %vm928_vm1, %v7827_v4, 0.0  ;;  %v3183_v42 = vpop.xlane.xlu1 %3182 }
 0x429   :  { %5793 = vpow2.f32 %v3394_v55  ;;  %v3288_v48 = vsub.f32 %v7556_v1, %v3174_v50  ;;  %3506 = vadd.xlane.f32.xlu1 %v3505_v52  ;;  %v3291_v14 = vsub.f32 %v7562_v51, %v3183_v42  ;;  %5457 = vmatprep.subr.msk.bf16.mxu1 %vm1677_vm2, %v7855_v57 }
 0x42a   :  { %v7835_v31 = vpop.eup %5781  ;;  %5795 = vpow2.f32 %v3380_v11 }
 0x42b   :  { %v7837_v13 = vpop.eup %5783  ;;  %v3390_v56 = vmul.f32 1.442695, %v3288_v48  ;;  %v3396_v45 = vmul.f32 1.442695, %v3291_v14  ;;  %v3544_v60 = vsel %vm928_vm1, %v7835_v31, 0.0 }
 0x42c   :  { %v3198_v12 = vpop.xlane.xlu0 %3197  ;;  %3545 = vadd.xlane.f32.xlu0 %v3544_v60  ;;  %v3529_v23 = vsel %vm928_vm1, %v7837_v13, 0.0  ;;  %v3177_v54 = vpop.xlane.xlu1 %3176 }
 0x42d   :  { %5797 = vpow2.f32 %v3390_v56  ;;  %v3296_v1 = vsub.f32 %v7568_v10, %v3198_v12  ;;  %3530 = vadd.xlane.f32.xlu1 %v3529_v23  ;;  %v3289_v51 = vsub.f32 %v7574_v40, %v3177_v54 }
 0x42e   :  { %v7851_v28 = vpop.eup %5785  ;;  %5799 = vpow2.f32 %v3396_v45 }
 0x42f   :  { %v7857_v0 = vpop.eup %5787  ;;  %v3406_v10 = vmul.f32 1.442695, %v3296_v1  ;;  %v3392_v55 = vmul.f32 1.442695, %v3289_v51  ;;  %v3568_v40 = vsel %vm928_vm1, %v7851_v28, 0.0 }
 0x430   :  { %v3168_v11 = vpop.xlane.xlu0 %3167  ;;  %3569 = vadd.xlane.f32.xlu0 %v3568_v40  ;;  %v3547_v43 = vsel %vm928_vm1, %v7857_v0, 0.0  ;;  %v3201_v50 = vpop.xlane.xlu1 %3200 }
 0x431   :  { %5801 = vpow2.f32 %v3406_v10  ;;  %v3286_v52 = vsub.f32 %v7566_v17, %v3168_v11  ;;  %3548 = vadd.xlane.f32.xlu1 %v3547_v43  ;;  %v3297_v42 = vsub.f32 %v7580_v36, %v3201_v50 }
 0x432   :  { %v7869_v48 = vpop.eup %5789  ;;  %5803 = vpow2.f32 %v3392_v55 }
 0x433   :  { %v7871_v14 = vpop.eup %5791  ;;  %v3386_v56 = vmul.f32 1.442695, %v3286_v52  ;;  %v3408_v45 = vmul.f32 1.442695, %v3297_v42  ;;  %v3538_v60 = vsel %vm928_vm1, %v7869_v48, 0.0 }
 0x434   :  { %v3192_v12 = vpop.xlane.xlu0 %3191  ;;  %3539 = vadd.xlane.f32.xlu0 %v3538_v60  ;;  %v3571_v17 = vsel %vm928_vm1, %v7871_v14, 0.0  ;;  %v3171_v23 = vpop.xlane.xlu1 %3170 }
 0x435   :  { %5805 = vpow2.f32 %v3386_v56  ;;  %v3294_v36 = vsub.f32 %v7576_v59, %v3192_v12  ;;  %3572 = vadd.xlane.f32.xlu1 %v3571_v17  ;;  %v3287_v54 = vsub.f32 %v7586_v53, %v3171_v23 }
 0x436   :  { %v7879_v1 = vpop.eup %5793  ;;  %5807 = vpow2.f32 %v3408_v45 }
 0x437   :  { %v7881_v51 = vpop.eup %5795  ;;  %v3402_v22 = vmul.f32 1.442695, %v3294_v36  ;;  %v3388_v35 = vmul.f32 1.442695, %v3287_v54  ;;  %v3562_v10 = vsel %vm928_vm1, %v7879_v1, 0.0 }
 0x438   :  { %v3210_v55 = vpop.xlane.xlu0 %3209  ;;  %3563 = vadd.xlane.f32.xlu0 %v3562_v10  ;;  %v3541_v40 = vsel %vm928_vm1, %v7881_v51, 0.0  ;;  %v3195_v11 = vpop.xlane.xlu1 %3194 }
 0x439   :  { %5809 = vpow2.f32 %v3402_v22  ;;  %v3300_v59 = vsub.f32 %v7588_v58, %v3210_v55  ;;  %3542 = vadd.xlane.f32.xlu1 %v3541_v40  ;;  %v3295_v53 = vsub.f32 %v7594_v18, %v3195_v11  ;;  %v8814_v18 = vld [vmem:[#allocation67_spill] sm:$0xff] }
 0x43a   :  { %v7889_v43 = vpop.eup %5797  ;;  %5811 = vpow2.f32 %v3388_v35 }
 0x43b   :  { %8813 = vst [vmem:[#allocation80_spill] sm:$0xff] %v7889_v43  ;;  %v7891_v50 = vpop.eup %5799  ;;  %v3414_v52 = vmul.f32 1.442695, %v3300_v59  ;;  %v3404_v42 = vmul.f32 1.442695, %v3295_v53  ;;  %v3556_v56 = vsel %vm928_vm1, %v7889_v43, 0.0 }
 0x43c   :  { %v3234_v45 = vpop.xlane.xlu0 %3233  ;;  %3557 = vadd.xlane.f32.xlu0 %v3556_v56  ;;  %v3565_v60 = vsel %vm928_vm1, %v7891_v50, 0.0  ;;  %v3213_v12 = vpop.xlane.xlu1 %3212  ;;  %v8817_v59 = vld [vmem:[#allocation69_spill] sm:$0xff] }
 0x43d   :  { %5813 = vpow2.f32 %v3414_v52  ;;  %v3308_v58 = vsub.f32 %v7600_v29, %v3234_v45  ;;  %3566 = vadd.xlane.f32.xlu1 %v3565_v60  ;;  %v3301_v17 = vsub.f32 %v8814_v18, %v3213_v12  ;;  %v8816_v29 = vld [vmem:[#allocation66_spill] sm:$0xff] }
 0x43e   :  { %v7899_v23 = vpop.eup %5801  ;;  %5815 = vpow2.f32 %v3404_v42 }
 0x43f   :  { %8815 = vst [vmem:[#allocation67_spill] sm:$0xff] %v7899_v23  ;;  %v7901_v36 = vpop.eup %5803  ;;  %v3430_v54 = vmul.f32 1.442695, %v3308_v58  ;;  %v3416_v22 = vmul.f32 1.442695, %v3301_v17  ;;  %v3580_v35 = vsel %vm928_vm1, %v7899_v23, 0.0 }
 0x440   :  { %v3204_v10 = vpop.xlane.xlu0 %3203  ;;  %3581 = vadd.xlane.f32.xlu0 %v3580_v35  ;;  %v3559_v55 = vsel %vm928_vm1, %v7901_v36, 0.0  ;;  %v3237_v40 = vpop.xlane.xlu1 %3236  ;;  %v8819_v17 = vld [vmem:[#allocation68_spill] sm:$0xff]  ;;  %v8820_v35 = vld [vmem:[#allocation70_spill] sm:$0xff] }
 0x441   :  { %5817 = vpow2.f32 %v3430_v54  ;;  %v3298_v11 = vsub.f32 %v8816_v29, %v3204_v10  ;;  %3560 = vadd.xlane.f32.xlu1 %v3559_v55  ;;  %v3309_v53 = vsub.f32 %v8817_v59, %v3237_v40 }
 0x442   :  { %v7909_v52 = vpop.eup %5805  ;;  %5819 = vpow2.f32 %v3416_v22 }
 0x443   :  { %v7911_v42 = vpop.eup %5807  ;;  %v3410_v56 = vmul.f32 1.442695, %v3298_v11  ;;  %v3432_v45 = vmul.f32 1.442695, %v3309_v53  ;;  %v3550_v60 = vsel %vm928_vm1, %v7909_v52, 0.0 }
 0x444   :  { %8818 = vst [vmem:[#allocation66_spill] sm:$0xff] %v7911_v42  ;;  %v3228_v12 = vpop.xlane.xlu0 %3227  ;;  %3551 = vadd.xlane.f32.xlu0 %v3550_v60  ;;  %v3583_v58 = vsel %vm928_vm1, %v7911_v42, 0.0  ;;  %v3207_v18 = vpop.xlane.xlu1 %3206  ;;  %v8822_v60 = vld [vmem:[#allocation71_spill] sm:$0xff] }
 0x445   :  { %5821 = vpow2.f32 %v3410_v56  ;;  %v3306_v54 = vsub.f32 %v8819_v17, %v3228_v12  ;;  %3584 = vadd.xlane.f32.xlu1 %v3583_v58  ;;  %v3299_v10 = vsub.f32 %v8820_v35, %v3207_v18  ;;  %v8823_v58 = vld [vmem:[#allocation72_spill] sm:$0xff] }
 0x446   :  { %v7919_v22 = vpop.eup %5809  ;;  %5823 = vpow2.f32 %v3432_v45 }
 0x447   :  { %8821 = vst [vmem:[#allocation69_spill] sm:$0xff] %v7919_v22  ;;  %v7921_v55 = vpop.eup %5811  ;;  %v3426_v40 = vmul.f32 1.442695, %v3306_v54  ;;  %v3412_v29 = vmul.f32 1.442695, %v3299_v10  ;;  %v3574_v11 = vsel %vm928_vm1, %v7919_v22, 0.0 }
 0x448   :  { %v3222_v59 = vpop.xlane.xlu0 %3221  ;;  %3575 = vadd.xlane.f32.xlu0 %v3574_v11  ;;  %v3553_v53 = vsel %vm928_vm1, %v7921_v55, 0.0  ;;  %v3231_v56 = vpop.xlane.xlu1 %3230 }
 0x449   :  { %5825 = vpow2.f32 %v3426_v40  ;;  %v3304_v12 = vsub.f32 %v8822_v60, %v3222_v59  ;;  %3554 = vadd.xlane.f32.xlu1 %v3553_v53  ;;  %v3307_v18 = vsub.f32 %v8823_v58, %v3231_v56  ;;  %v8826_v59 = vld [vmem:[#allocation75_spill] sm:$0xff] }
 0x44a   :  { %v7929_v45 = vpop.eup %5813  ;;  %5827 = vpow2.f32 %v3412_v29 }
 0x44b   :  { %8824 = vst [vmem:[#allocation68_spill] sm:$0xff] %v7929_v45  ;;  %v7931_v17 = vpop.eup %5815  ;;  %v3422_v54 = vmul.f32 1.442695, %v3304_v12  ;;  %v3428_v35 = vmul.f32 1.442695, %v3307_v18  ;;  %v3592_v10 = vsel %vm928_vm1, %v7929_v45, 0.0 }
 0x44c   :  { %8825 = vst [vmem:[#allocation70_spill] sm:$0xff] %v7931_v17  ;;  %v3246_v11 = vpop.xlane.xlu0 %3245  ;;  %3593 = vadd.xlane.f32.xlu0 %v3592_v10  ;;  %v3577_v40 = vsel %vm928_vm1, %v7931_v17, 0.0  ;;  %v3225_v23 = vpop.xlane.xlu1 %3224  ;;  %v8829_v45 = vld [vmem:[#allocation73_spill] sm:$0xff] }
 0x44d   :  { %5829 = vpow2.f32 %v3422_v54  ;;  %3578 = vadd.xlane.f32.xlu1 %v3577_v40  ;;  %v3305_v53 = vsub.f32 %v8826_v59, %v3225_v23  ;;  %v8831_v23 = vld [vmem:[#allocation74_spill] sm:$0xff] }
 0x44e   :  { %v7938_v56 = vpop.eup %5817  ;;  %5831 = vpow2.f32 %v3428_v35  ;;  %v3312_v59 = vsub.f32 %v8831_v23, %v3246_v11 }
 0x44f   :  { %8827 = vst [vmem:[#allocation71_spill] sm:$0xff] %v7938_v56  ;;  %v7940_v29 = vpop.eup %5819  ;;  %v3424_v60 = vmul.f32 1.442695, %v3305_v53  ;;  %v3616_v12 = vsel %vm928_vm1, %v7938_v56, 0.0 }
 0x450   :  { %8828 = vst [vmem:[#allocation72_spill] sm:$0xff] %v7940_v29  ;;  %v3216_v58 = vpop.xlane.xlu0 %3215  ;;  %3617 = vadd.xlane.f32.xlu0 %v3616_v12  ;;  %v3595_v18 = vsel %vm928_vm1, %v7940_v29, 0.0  ;;  %v3249_v10 = vpop.xlane.xlu1 %3248 }
 0x451   :  { %v3302_v54 = vsub.f32 %v8829_v45, %v3216_v58  ;;  %3596 = vadd.xlane.f32.xlu1 %v3595_v18  ;;  %5833 = vpow2.f32 %v3424_v60  ;;  %v8833_v45 = vld [vmem:[#allocation76_spill] sm:$0xff]  ;;  %v8834_v18 = vld [vmem:[#allocation78_spill] sm:$0xff]  ;;  %v3438_v60 = vmul.f32 1.442695, %v3312_v59 }
 0x452   :  { %v7947_v40 = vpop.eup %5821 }
 0x453   :  { %8830 = vst [vmem:[#allocation75_spill] sm:$0xff] %v7947_v40  ;;  %v7950_v35 = vpop.eup %5823  ;;  %v3418_v53 = vmul.f32 1.442695, %v3302_v54  ;;  %v3586_v56 = vsel %vm928_vm1, %v7947_v40, 0.0  ;;  %v8837_v40 = vld [vmem:[#allocation77_spill] sm:$0xff] }
 0x454   :  { %8832 = vst [vmem:[#allocation73_spill] sm:$0xff] %v7950_v35  ;;  %3587 = vadd.xlane.f32.xlu0 %v3586_v56  ;;  %v3240_v12 = vpop.xlane.xlu0 %3239  ;;  %v3619_v29 = vsel %vm928_vm1, %v7950_v35, 0.0  ;;  %v3219_v17 = vpop.xlane.xlu1 %3218  ;;  %v3313_v43 = vsub.f32 %v8837_v40, %v3249_v10 }
 0x455   :  { %5835 = vpow2.f32 %v3418_v53  ;;  %v3310_v58 = vsub.f32 %v8833_v45, %v3240_v12  ;;  %3620 = vadd.xlane.f32.xlu1 %v3619_v29  ;;  %v3303_v22 = vsub.f32 %v8834_v18, %v3219_v17  ;;  %v8838_v17 = vld [vmem:[#allocation79_spill] sm:$0xff] }
 0x456   :  { %v7958_v11 = vpop.eup %5825  ;;  %v3440_v10 = vmul.f32 1.442695, %v3313_v43 }
 0x457   :  { %8835 = vst [vmem:[#allocation74_spill] sm:$0xff] %v7958_v11  ;;  %v7960_v23 = vpop.eup %5827  ;;  %v3434_v54 = vmul.f32 1.442695, %v3310_v58  ;;  %v3420_v42 = vmul.f32 1.442695, %v3303_v22  ;;  %v3610_v56 = vsel %vm928_vm1, %v7958_v11, 0.0 }
 0x458   :  { %8836 = vst [vmem:[#allocation76_spill] sm:$0xff] %v7960_v23  ;;  %3611 = vadd.xlane.f32.xlu0 %v3610_v56  ;;  %v3589_v53 = vsel %vm928_vm1, %v7960_v23, 0.0  ;;  %v3243_v12 = vpop.xlane.xlu1 %3242 }
 0x459   :  { %5837 = vpow2.f32 %v3434_v54  ;;  %3590 = vadd.xlane.f32.xlu1 %v3589_v53  ;;  %v3311_v29 = vsub.f32 %v8838_v17, %v3243_v12 }
 0x45a   :  { %v7968_v45 = vpop.eup %5829  ;;  %5839 = vpow2.f32 %v3420_v42 }
 0x45b   :  { %8839 = vst [vmem:[#allocation78_spill] sm:$0xff] %v7968_v45  ;;  %v7970_v59 = vpop.eup %5831  ;;  %5841 = vpow2.f32 %v3438_v60  ;;  %v3436_v22 = vmul.f32 1.442695, %v3311_v29  ;;  %v3604_v58 = vsel %vm928_vm1, %v7968_v45, 0.0 }
 0x45c   :  { %8840 = vst [vmem:[#allocation77_spill] sm:$0xff] %v7970_v59  ;;  %3605 = vadd.xlane.f32.xlu0 %v3604_v58  ;;  %v3613_v40 = vsel %vm928_vm1, %v7970_v59, 0.0 }
 0x45d   :  { %5843 = vpow2.f32 %v3436_v22  ;;  %3614 = vadd.xlane.f32.xlu1 %v3613_v40 }
 0x45e   :  { %v7976_v18 = vpop.eup %5833  ;;  %5845 = vpow2.f32 %v3440_v10 }
 0x45f   :  { %8841 = vst [vmem:[#allocation79_spill] sm:$0xff] %v7976_v18  ;;  %v3607_v42 = vsel %vm928_vm1, %v7976_v18, 0.0 }
 0x461   :  { %3608 = vadd.xlane.f32.xlu1 %v3607_v42 }
 0x462   :  { %v7980_v54 = vpop.eup %5835 }
 0x463   :  { %8842 = vst [vmem:[#allocation81_spill] sm:$0xff] %v7980_v54  ;;  %v3598_v60 = vsel %vm928_vm1, %v7980_v54, 0.0 }
 0x464   :  { %3599 = vadd.xlane.f32.xlu0 %v3598_v60 }
 0x466   :  { %v7984_v43 = vpop.eup %5837 }
 0x467   :  { %8843 = vst [vmem:[#allocation82_spill] sm:$0xff] %v7984_v43  ;;  %v7986_v56 = vpop.eup %5839  ;;  %v3622_v53 = vsel %vm928_vm1, %v7984_v43, 0.0 }
 0x468   :  { %8844 = vst [vmem:[#allocation83_spill] sm:$0xff] %v7986_v56  ;;  %v7990_v12 = vpop.eup %5841  ;;  %3623 = vadd.xlane.f32.xlu0 %v3622_v53  ;;  %v3601_v17 = vsel %vm928_vm1, %v7986_v56, 0.0 }
 0x469   :  { %8845 = vst [vmem:[#allocation84_spill] sm:$0xff] %v7990_v12  ;;  %3602 = vadd.xlane.f32.xlu1 %v3601_v17  ;;  %v3628_v22 = vsel %vm928_vm1, %v7990_v12, 0.0 }
 0x46a   :  { %v7994_v29 = vpop.eup %5843 }
 0x46b   :  { %8846 = vst [vmem:[#allocation85_spill] sm:$0xff] %v7994_v29  ;;  %v3625_v58 = vsel %vm928_vm1, %v7994_v29, 0.0  ;;  %v8000_v10 = vpop.eup %5845 }
 0x46c   :  { %3629 = vadd.xlane.f32.xlu0 %v3628_v22  ;;  %8847 = vst [vmem:[#allocation86_spill] sm:$0xff] %v8000_v10  ;;  %v3631_v40 = vsel %vm928_vm1, %v8000_v10, 0.0 }
 0x46d   :  { %3626 = vadd.xlane.f32.xlu1 %v3625_v58 }
 0x471   :  { %3632 = vadd.xlane.f32.xlu1 %v3631_v40 }
 0x472   :  { %v3450_v42 = vpop.xlane.xlu0 %3449 }
 0x476   :  { %v3453_v53 = vpop.xlane.xlu1 %3452 }
 0x477   :  { %5847 = vrcp.f32 %v3453_v53 }
 0x479   :  { %v3474_v60 = vpop.xlane.xlu0 %3473 }
 0x47d   :  { %v3444_v17 = vpop.xlane.xlu0 %3443 }
 0x47e   :  { %v3477_v43 = vpop.xlane.xlu1 %3476  ;;  %5849 = vrcp.f32 %v3444_v17 }
 0x47f   :  { %5851 = vrcp.f32 %v3450_v42 }
 0x481   :  { %v3468_v45 = vpop.xlane.xlu0 %3467 }
 0x482   :  { %v3447_v12 = vpop.xlane.xlu1 %3446 }
 0x483   :  { %5853 = vrcp.f32 %v3447_v12 }
 0x484   :  { %5855 = vrcp.f32 %v3477_v43  ;;  %v5848_v40 = vpop.eup %5847 }
 0x485   :  { %5857 = vrcp.f32 %v3468_v45  ;;  %v3462_v22 = vpop.xlane.xlu0 %3461  ;;  %v3701_v53 = vmul.f32 %v5848_v40, %v7673_v47  ;;  %v4047_v40 = vsel %vm1677_vm2, %v7855_v57, 0 }
 0x486   :  { %5859 = vrcp.f32 %v3474_v60  ;;  %v3471_v58 = vpop.xlane.xlu1 %3470  ;;  %v168_v60 = vld [vmem:[%s8590_s2 + $0x48] sm:$0xff] }
 0x487   :  { %5861 = vrcp.f32 %v3471_v58 }
 0x489   :  { %v3486_v29 = vpop.xlane.xlu0 %3485 }
 0x48a   :  { %v3465_v10 = vpop.xlane.xlu1 %3464 }
 0x48b   :  { %v5850_v54 = vpop.eup %5849  ;;  %5863 = vrcp.f32 %v3465_v10 }
 0x48c   :  { %v5852_v59 = vpop.eup %5851  ;;  %v3698_v45 = vmul.f32 %v5850_v54, %v7685_v7 }
 0x48d   :  { %v3456_v56 = vpop.xlane.xlu0 %3455  ;;  %v3700_v58 = vmul.f32 %v5852_v59, %v7667_v30 }
 0x48e   :  { %v3489_v18 = vpop.xlane.xlu1 %3488  ;;  %5865 = vrcp.f32 %v3456_v56  ;;  %v3967_v56 = vsel %vm1677_vm2, %v7853_v34, 0 }
 0x48f   :  { %5867 = vrcp.f32 %v3462_v22 }
 0x490   :  { %v5854_v11 = vpop.eup %5853 }
 0x491   :  { %v5856_v42 = vpop.eup %5855  ;;  %v3480_v12 = vpop.xlane.xlu0 %3479  ;;  %v3699_v43 = vmul.f32 %v5854_v11, %v7697_v49  ;;  %v3763_v49 = vpack.c.bf16 %v3701_v53, %v3700_v58  ;;  %v8014_v11 = vpack.c.bf16 %v168_v60, %v168_v60 }
 0x492   :  { %v5858_v17 = vpop.eup %5857  ;;  %v3459_v35 = vpop.xlane.xlu1 %3458  ;;  %v3709_v7 = vmul.f32 %v5856_v42, %v7687_v2 }
 0x493   :  { %v5860_v23 = vpop.eup %5859  ;;  %5869 = vrcp.f32 %v3459_v35  ;;  %v3762_v47 = vpack.c.bf16 %v3699_v43, %v3698_v45  ;;  %v3706_v30 = vmul.f32 %v5858_v17, %v7695_v25  ;;  %v170_v35 = vld [vmem:[%s8590_s2 + $0x58] sm:$0xff] }
 0x494   :  { %v5862_v10 = vpop.eup %5861  ;;  %5871 = vrcp.f32 %v3489_v18  ;;  %v3708_v34 = vmul.f32 %v5860_v23, %v7679_v63  ;;  %v8028_v25 = vpack.c.bf16 %v170_v35, %v170_v35 }
 0x495   :  { %5873 = vrcp.f32 %v3480_v12  ;;  %5352 = vmatprep.mubr.msk.bf16.mxu0 %vm928_vm1, %v3762_v47  ;;  %v3498_v54 = vpop.xlane.xlu0 %3497  ;;  %v3707_v59 = vmul.f32 %v5862_v10, %v7707_v27 }
 0x496   :  { %5875 = vrcp.f32 %v3486_v29  ;;  %5353 = vmatmul.mubr.msk.bf16.vlgmr.msra.gmra.mxu0 %vm928_vm1, %v3763_v49  ;;  %v3483_v2 = vpop.xlane.xlu1 %3482  ;;  %v3767_v22 = vpack.c.bf16 %v3709_v7, %v3708_v34 }
 0x497   :  { %5877 = vrcp.f32 %v3483_v2  ;;  %v3766_v18 = vpack.c.bf16 %v3707_v59, %v3706_v30  ;;  %5371 = vmatpush3.bf16.msra.mxu0 %v3967_v56 }
 0x498   :  { %5458 = vmatprep.subr.msk.bf16.mxu0 %vm1677_vm2, %v8014_v11  ;;  %v5864_v23 = vpop.eup %5863 }
 0x499   :  { %5362 = vmatprep.mubr.msk.bf16.mxu1 %vm928_vm1, %v3766_v18  ;;  %v3522_v27 = vpop.xlane.xlu0 %3521  ;;  %v3705_v45 = vmul.f32 %v5864_v23, %v7717_v46 }
 0x49a   :  { %5363 = vmatmul.mubr.msk.bf16.vlgmr.msra.gmra.mxu1 %vm928_vm1, %v3767_v22  ;;  %v3501_v63 = vpop.xlane.xlu1 %3500 }
 0x49b   :  { %5381 = vmatpush3.bf16.msra.mxu1 %v4047_v40  ;;  %v5866_v53 = vpop.eup %5865  ;;  %5879 = vrcp.f32 %v3501_v63 }
 0x49c   :  { %5459 = vmatprep.subr.msk.bf16.mxu1 %vm1677_vm2, %v8028_v25  ;;  %v5868_v57 = vpop.eup %5867  ;;  %v3702_v17 = vmul.f32 %v5866_v53, %v7725_v39 }
 0x49d   :  { %v3492_v29 = vpop.xlane.xlu0 %3491  ;;  %v3704_v10 = vmul.f32 %v5868_v57, %v7705_v3  ;;  %v172_v57 = vld [vmem:[%s8590_s2 + $0x68] sm:$0xff] }
 0x49e   :  { %v3525_v42 = vpop.xlane.xlu1 %3524  ;;  %5881 = vrcp.f32 %v3492_v29 }
 0x49f   :  { %5883 = vrcp.f32 %v3498_v54  ;;  %v3765_v59 = vpack.c.bf16 %v3705_v45, %v3704_v10 }
 0x4a0   :  { %v5870_v12 = vpop.eup %5869 }
 0x4a1   :  { %v5872_v43 = vpop.eup %5871  ;;  %v3516_v60 = vpop.xlane.xlu0 %3515  ;;  %v3703_v58 = vmul.f32 %v5870_v12, %v7737_v62 }
 0x4a2   :  { %v5874_v47 = vpop.eup %5873  ;;  %v3495_v56 = vpop.xlane.xlu1 %3494  ;;  %v3713_v46 = vmul.f32 %v5872_v43, %v7727_v19 }
 0x4a3   :  { %v5876_v7 = vpop.eup %5875  ;;  %5885 = vrcp.f32 %v3495_v56  ;;  %v3764_v49 = vpack.c.bf16 %v3703_v58, %v3702_v17  ;;  %v3710_v39 = vmul.f32 %v5874_v47, %v7735_v32  ;;  %v4127_v17 = vsel %vm1677_vm2, %v8014_v11, 0 }
 0x4a4   :  { %v5878_v30 = vpop.eup %5877  ;;  %5887 = vrcp.f32 %v3525_v42  ;;  %v3712_v54 = vmul.f32 %v5876_v7, %v7715_v24  ;;  %v8056_v47 = vpack.c.bf16 %v172_v57, %v172_v57  ;;  %v174_v7 = vld [vmem:[%s8590_s2 + $0x78] sm:$0xff]  ;;  %s5975_s2 = smov 4  }
 0x4a5   :  { %5889 = vrcp.f32 %v3516_v60  ;;  %5356 = vmatprep.mubr.msk.bf16.mxu0 %vm928_vm1, %v3764_v49  ;;  %v3510_v35 = vpop.xlane.xlu0 %3509  ;;  %v3711_v62 = vmul.f32 %v5878_v30, %v7747_v61 }
 0x4a6   :  { %5891 = vrcp.f32 %v3522_v27  ;;  %5357 = vmatmul.mubr.msk.bf16.gmra.mxu0 %vm928_vm1, %v3765_v59  ;;  %v3519_v3 = vpop.xlane.xlu1 %3518  ;;  %v3769_v2 = vpack.c.bf16 %v3713_v46, %v3712_v54  ;;  %v4207_v59 = vsel %vm1677_vm2, %v8028_v25, 0 }
 0x4a7   :  { %5893 = vrcp.f32 %v3519_v3  ;;  %v3768_v34 = vpack.c.bf16 %v3711_v62, %v3710_v39 }
 0x4a8   :  { %v5880_v22 = vpop.eup %5879 }
 0x4a9   :  { %5366 = vmatprep.mubr.msk.bf16.mxu1 %vm928_vm1, %v3768_v34  ;;  %v3534_v19 = vpop.xlane.xlu0 %3533  ;;  %v3717_v23 = vmul.f32 %v5880_v22, %v7763_v37 }
 0x4aa   :  { %5367 = vmatmul.mubr.msk.bf16.gmra.mxu1 %vm928_vm1, %v3769_v2  ;;  %v3513_v18 = vpop.xlane.xlu1 %3512 }
 0x4ab   :  { %v5882_v32 = vpop.eup %5881  ;;  %5895 = vrcp.f32 %v3513_v18 }
 0x4ac   :  { %v5884_v61 = vpop.eup %5883  ;;  %v3714_v53 = vmul.f32 %v5882_v32, %v7774_v5 }
 0x4ad   :  { %v3504_v40 = vpop.xlane.xlu0 %3503  ;;  %v3716_v45 = vmul.f32 %v5884_v61, %v7745_v8 }
 0x4ae   :  { %v3537_v63 = vpop.xlane.xlu1 %3536  ;;  %5897 = vrcp.f32 %v3504_v40 }
 0x4af   :  { %5899 = vrcp.f32 %v3510_v35 }
 0x4b0   :  { %v5886_v27 = vpop.eup %5885 }
 0x4b1   :  { %v5888_v29 = vpop.eup %5887  ;;  %v3528_v24 = vpop.xlane.xlu0 %3527  ;;  %v3715_v42 = vmul.f32 %v5886_v27, %v7787_v9  ;;  %v3771_v9 = vpack.c.bf16 %v3717_v23, %v3716_v45 }
 0x4b2   :  { %v5890_v12 = vpop.eup %5889  ;;  %v3507_v43 = vpop.xlane.xlu1 %3506  ;;  %v3725_v5 = vmul.f32 %v5888_v29, %v7777_v33 }
 0x4b3   :  { %v5892_v60 = vpop.eup %5891  ;;  %5901 = vrcp.f32 %v3507_v43  ;;  %v3770_v37 = vpack.c.bf16 %v3715_v42, %v3714_v53  ;;  %v3722_v8 = vmul.f32 %v5890_v12, %v7785_v26  ;;  %v8070_v26 = vpack.c.bf16 %v174_v7, %v174_v7 }
 0x4b4   :  { %v5894_v58 = vpop.eup %5893  ;;  %5903 = vrcp.f32 %v3537_v63  ;;  %v3724_v11 = vmul.f32 %v5892_v60, %v7761_v38 }
 0x4b5   :  { %5905 = vrcp.f32 %v3528_v24  ;;  %5372 = vmatprep.mubr.msk.bf16.mxu0 %vm928_vm1, %v3770_v37  ;;  %v3546_v56 = vpop.xlane.xlu0 %3545  ;;  %v3723_v10 = vmul.f32 %v5894_v58, %v7797_v16 }
 0x4b6   :  { %5907 = vrcp.f32 %v3534_v19  ;;  %5373 = vmatmul.mubr.msk.bf16.vlgmr.msra.gmra.mxu0 %vm928_vm1, %v3771_v9  ;;  %v3531_v33 = vpop.xlane.xlu1 %3530  ;;  %v3775_v30 = vpack.c.bf16 %v3725_v5, %v3724_v11 }
 0x4b7   :  { %5909 = vrcp.f32 %v3531_v33  ;;  %v3774_v49 = vpack.c.bf16 %v3723_v10, %v3722_v8  ;;  %5391 = vmatpush3.bf16.msra.mxu0 %v4127_v17 }
 0x4b8   :  { %5460 = vmatprep.subr.msk.bf16.mxu0 %vm1677_vm2, %v8056_v47  ;;  %v5896_v46 = vpop.eup %5895 }
 0x4b9   :  { %5382 = vmatprep.mubr.msk.bf16.mxu1 %vm928_vm1, %v3774_v49  ;;  %v3570_v16 = vpop.xlane.xlu0 %3569  ;;  %v3721_v54 = vmul.f32 %v5896_v46, %v7807_v21  ;;  %v4287_v49 = vsel %vm1677_vm2, %v8056_v47, 0  ;;  %v4367_v47 = vsel %vm1677_vm2, %v8070_v26, 0 }
 0x4ba   :  { %5383 = vmatmul.mubr.msk.bf16.vlgmr.msra.gmra.mxu1 %vm928_vm1, %v3775_v30  ;;  %v3549_v38 = vpop.xlane.xlu1 %3548 }
 0x4bb   :  { %5401 = vmatpush3.bf16.msra.mxu1 %v4207_v59  ;;  %v5898_v39 = vpop.eup %5897  ;;  %5911 = vrcp.f32 %v3549_v38 }
 0x4bc   :  { %5461 = vmatprep.subr.msk.bf16.mxu1 %vm1677_vm2, %v8070_v26  ;;  %v5900_v25 = vpop.eup %5899  ;;  %v3718_v19 = vmul.f32 %v5898_v39, %v7815_v44 }
 0x4bd   :  { %v3540_v35 = vpop.xlane.xlu0 %3539  ;;  %v3720_v32 = vmul.f32 %v5900_v25, %v7795_v6 }
 0x4be   :  { %v3573_v62 = vpop.xlane.xlu1 %3572  ;;  %5913 = vrcp.f32 %v3540_v35 }
 0x4bf   :  { %5915 = vrcp.f32 %v3546_v56  ;;  %v3773_v23 = vpack.c.bf16 %v3721_v54, %v3720_v32 }
 0x4c0   :  { %v5902_v3 = vpop.eup %5901 }
 0x4c1   :  { %v5904_v34 = vpop.eup %5903  ;;  %v3564_v2 = vpop.xlane.xlu0 %3563  ;;  %v3719_v18 = vmul.f32 %v5902_v3, %v7827_v4 }
 0x4c2   :  { %v5906_v22 = vpop.eup %5905  ;;  %v3543_v40 = vpop.xlane.xlu1 %3542  ;;  %v3729_v21 = vmul.f32 %v5904_v34, %v7817_v41 }
 0x4c3   :  { %v5908_v63 = vpop.eup %5907  ;;  %5917 = vrcp.f32 %v3543_v40  ;;  %v3772_v61 = vpack.c.bf16 %v3719_v18, %v3718_v19  ;;  %v3726_v44 = vmul.f32 %v5906_v22, %v7825_v20  ;;  %v8848_v18 = vld [vmem:[#allocation80_spill] sm:$0xff] }
 0x4c4   :  { %v5910_v27 = vpop.eup %5909  ;;  %5919 = vrcp.f32 %v3573_v62  ;;  %v3728_v24 = vmul.f32 %v5908_v63, %v7805_v15 }
 0x4c5   :  { %5921 = vrcp.f32 %v3564_v2  ;;  %5376 = vmatprep.mubr.msk.bf16.mxu0 %vm928_vm1, %v3772_v61  ;;  %v3558_v29 = vpop.xlane.xlu0 %3557  ;;  %v3727_v4 = vmul.f32 %v5910_v27, %v7837_v13  ;;  %v8849_v27 = vld [vmem:[#allocation66_spill] sm:$0xff] }
 0x4c6   :  { %5923 = vrcp.f32 %v3570_v16  ;;  %5377 = vmatmul.mubr.msk.bf16.gmra.mxu0 %vm928_vm1, %v3773_v23  ;;  %v3567_v6 = vpop.xlane.xlu1 %3566  ;;  %v3777_v42 = vpack.c.bf16 %v3729_v21, %v3728_v24 }
 0x4c7   :  { %5925 = vrcp.f32 %v3567_v6  ;;  %v3776_v53 = vpack.c.bf16 %v3727_v4, %v3726_v44  ;;  %v8852_v44 = vld [vmem:[#allocation67_spill] sm:$0xff] }
 0x4c8   :  { %v5912_v12 = vpop.eup %5911 }
 0x4c9   :  { %5386 = vmatprep.mubr.msk.bf16.mxu1 %vm928_vm1, %v3776_v53  ;;  %v3582_v41 = vpop.xlane.xlu0 %3581  ;;  %v3733_v37 = vmul.f32 %v5912_v12, %v7857_v0 }
 0x4ca   :  { %5387 = vmatmul.mubr.msk.bf16.gmra.mxu1 %vm928_vm1, %v3777_v42  ;;  %v3561_v57 = vpop.xlane.xlu1 %3560 }
 0x4cb   :  { %v5914_v20 = vpop.eup %5913  ;;  %5927 = vrcp.f32 %v3561_v57 }
 0x4cc   :  { %v5916_v13 = vpop.eup %5915  ;;  %v3730_v58 = vmul.f32 %v5914_v20, %v7869_v48 }
 0x4cd   :  { %v3552_v45 = vpop.xlane.xlu0 %3551  ;;  %v3732_v56 = vmul.f32 %v5916_v13, %v7835_v31 }
 0x4ce   :  { %v3585_v43 = vpop.xlane.xlu1 %3584  ;;  %5929 = vrcp.f32 %v3552_v45 }
 0x4cf   :  { %5931 = vrcp.f32 %v3558_v29  ;;  %v3779_v33 = vpack.c.bf16 %v3733_v37, %v3732_v56  ;;  %v8856_v56 = vld [vmem:[#allocation68_spill] sm:$0xff] }
 0x4d0   :  { %v5918_v60 = vpop.eup %5917 }
 0x4d1   :  { %v5920_v17 = vpop.eup %5919  ;;  %v3576_v15 = vpop.xlane.xlu0 %3575  ;;  %v3731_v5 = vmul.f32 %v5918_v60, %v7881_v51 }
 0x4d2   :  { %v5922_v9 = vpop.eup %5921  ;;  %v3555_v8 = vpop.xlane.xlu1 %3554  ;;  %v3741_v0 = vmul.f32 %v5920_v17, %v7871_v14  ;;  %v8854_v17 = vld [vmem:[#allocation75_spill] sm:$0xff] }
 0x4d3   :  { %v5924_v10 = vpop.eup %5923  ;;  %5933 = vrcp.f32 %v3555_v8  ;;  %v3778_v7 = vpack.c.bf16 %v3731_v5, %v3730_v58  ;;  %v3738_v51 = vmul.f32 %v5922_v9, %v7879_v1  ;;  %v8855_v58 = vld [vmem:[#allocation76_spill] sm:$0xff] }
 0x4d4   :  { %v5926_v11 = vpop.eup %5925  ;;  %5935 = vrcp.f32 %v3585_v43  ;;  %v3740_v30 = vmul.f32 %v5924_v10, %v7851_v28  ;;  %v8853_v43 = vld [vmem:[#allocation72_spill] sm:$0xff] }
 0x4d5   :  { %5937 = vrcp.f32 %v3576_v15  ;;  %5392 = vmatprep.mubr.msk.bf16.mxu0 %vm928_vm1, %v3778_v7  ;;  %v3594_v48 = vpop.xlane.xlu0 %3593  ;;  %v3739_v31 = vmul.f32 %v5926_v11, %v7891_v50 }
 0x4d6   :  { %5939 = vrcp.f32 %v3582_v41  ;;  %5393 = vmatmul.mubr.msk.bf16.vlgmr.msra.gmra.mxu0 %vm928_vm1, %v3779_v33  ;;  %v3579_v59 = vpop.xlane.xlu1 %3578  ;;  %v3783_v16 = vpack.c.bf16 %v3741_v0, %v3740_v30  ;;  %v8859_v30 = vld [vmem:[#allocation77_spill] sm:$0xff] }
 0x4d7   :  { %5941 = vrcp.f32 %v3579_v59  ;;  %v3782_v14 = vpack.c.bf16 %v3739_v31, %v3738_v51  ;;  %5411 = vmatpush3.bf16.msra.mxu0 %v4287_v49  ;;  %v8857_v49 = vld [vmem:[#allocation73_spill] sm:$0xff]  ;;  %v8858_v51 = vld [vmem:[#allocation74_spill] sm:$0xff] }
 0x4d8   :  { %v5928_v50 = vpop.eup %5927 }
 0x4d9   :  { %5402 = vmatprep.mubr.msk.bf16.mxu1 %vm928_vm1, %v3782_v14  ;;  %v3618_v38 = vpop.xlane.xlu0 %3617  ;;  %v3737_v25 = vmul.f32 %v5928_v50, %v7901_v36  ;;  %v8860_v14 = vld [vmem:[#allocation71_spill] sm:$0xff] }
 0x4da   :  { %5403 = vmatmul.mubr.msk.bf16.vlgmr.msra.gmra.mxu1 %vm928_vm1, %v3783_v16  ;;  %v3597_v1 = vpop.xlane.xlu1 %3596 }
 0x4db   :  { %5421 = vmatpush3.bf16.msra.mxu1 %v4367_v47  ;;  %v5930_v46 = vpop.eup %5929  ;;  %5943 = vrcp.f32 %v3597_v1 }
 0x4dc   :  { %v5932_v39 = vpop.eup %5931  ;;  %v3734_v26 = vmul.f32 %v5930_v46, %v7909_v52  ;;  %v8850_v52 = vld [vmem:[#allocation69_spill] sm:$0xff] }
 0x4dd   :  { %v3588_v28 = vpop.xlane.xlu0 %3587  ;;  %v3736_v22 = vmul.f32 %v5932_v39, %v8848_v18  ;;  %v8864_v18 = vld [vmem:[#allocation78_spill] sm:$0xff] }
 0x4de   :  { %v3621_v35 = vpop.xlane.xlu1 %3620  ;;  %5945 = vrcp.f32 %v3588_v28 }
 0x4df   :  { %5947 = vrcp.f32 %v3594_v48  ;;  %v3781_v61 = vpack.c.bf16 %v3737_v25, %v3736_v22  ;;  %v8861_v25 = vld [vmem:[#allocation79_spill] sm:$0xff] }
 0x4e0   :  { %v5934_v62 = vpop.eup %5933 }
 0x4e1   :  { %v5936_v3 = vpop.eup %5935  ;;  %v3735_v54 = vmul.f32 %v5934_v62, %v7921_v55  ;;  %v3612_v2 = vpop.xlane.xlu0 %3611  ;;  %v8851_v55 = vld [vmem:[#allocation70_spill] sm:$0xff] }
 0x4e2   :  { %v5938_v34 = vpop.eup %5937  ;;  %v3591_v19 = vpop.xlane.xlu1 %3590  ;;  %v3745_v36 = vmul.f32 %v5936_v3, %v8849_v27 }
 0x4e3   :  { %v5940_v40 = vpop.eup %5939  ;;  %5949 = vrcp.f32 %v3591_v19  ;;  %v3780_v32 = vpack.c.bf16 %v3735_v54, %v3734_v26  ;;  %v3742_v23 = vmul.f32 %v5938_v34, %v8850_v52  ;;  %v8862_v26 = vld [vmem:[#allocation81_spill] sm:$0xff]  ;;  %v8863_v34 = vld [vmem:[#allocation83_spill] sm:$0xff] }
 0x4e4   :  { %v5942_v63 = vpop.eup %5941  ;;  %5951 = vrcp.f32 %v3621_v35  ;;  %v3744_v4 = vmul.f32 %v5940_v40, %v8852_v44 }
 0x4e5   :  { %5953 = vrcp.f32 %v3612_v2  ;;  %5396 = vmatprep.mubr.msk.bf16.mxu0 %vm928_vm1, %v3780_v32  ;;  %v3743_v21 = vmul.f32 %v5942_v63, %v8851_v55  ;;  %v3606_v53 = vpop.xlane.xlu0 %3605 }
 0x4e6   :  { %5955 = vrcp.f32 %v3618_v38  ;;  %5397 = vmatmul.mubr.msk.bf16.gmra.mxu0 %vm928_vm1, %v3781_v61  ;;  %v3615_v29 = vpop.xlane.xlu1 %3614  ;;  %v3785_v24 = vpack.c.bf16 %v3745_v36, %v3744_v4  ;;  %v8865_v61 = vld [vmem:[#allocation82_spill] sm:$0xff]  ;;  %v8866_v36 = vld [vmem:[#allocation85_spill] sm:$0xff] }
 0x4e7   :  { %5957 = vrcp.f32 %v3615_v29  ;;  %v3784_v6 = vpack.c.bf16 %v3743_v21, %v3742_v23  ;;  %v8867_v29 = vld [vmem:[#allocation84_spill] sm:$0xff]  ;;  %v8868_v4 = vld [vmem:[#allocation86_spill] sm:$0xff] }
 0x4e8   :  { %v5944_v42 = vpop.eup %5943 }
 0x4e9   :  { %5406 = vmatprep.mubr.msk.bf16.mxu1 %vm928_vm1, %v3784_v6  ;;  %v3749_v13 = vmul.f32 %v5944_v42, %v8853_v43 }
 0x4ea   :  { %5407 = vmatmul.mubr.msk.bf16.gmra.mxu1 %vm928_vm1, %v3785_v24  ;;  %v3609_v41 = vpop.xlane.xlu1 %3608 }
 0x4eb   :  { %v5946_v12 = vpop.eup %5945  ;;  %5959 = vrcp.f32 %v3609_v41 }
 0x4ec   :  { %v5948_v45 = vpop.eup %5947  ;;  %v3746_v15 = vmul.f32 %v5946_v12, %v8854_v17 }
 0x4ed   :  { %v3600_v57 = vpop.xlane.xlu0 %3599  ;;  %v3748_v8 = vmul.f32 %v5948_v45, %v8856_v56 }
 0x4ee   :  { %5961 = vrcp.f32 %v3600_v57 }
 0x4ef   :  { %5963 = vrcp.f32 %v3606_v53  ;;  %v3787_v0 = vpack.c.bf16 %v3749_v13, %v3748_v8 }
 0x4f0   :  { %v5950_v20 = vpop.eup %5949 }
 0x4f1   :  { %v5952_v60 = vpop.eup %5951  ;;  %v3624_v37 = vpop.xlane.xlu0 %3623  ;;  %v3747_v5 = vmul.f32 %v5950_v20, %v8855_v58 }
 0x4f2   :  { %v5954_v9 = vpop.eup %5953  ;;  %v3603_v10 = vpop.xlane.xlu1 %3602  ;;  %v3757_v48 = vmul.f32 %v5952_v60, %v8857_v49 }
 0x4f3   :  { %v5956_v7 = vpop.eup %5955  ;;  %5965 = vrcp.f32 %v3603_v10  ;;  %v3786_v11 = vpack.c.bf16 %v3747_v5, %v3746_v15  ;;  %v3754_v31 = vmul.f32 %v5954_v9, %v8858_v51 }
 0x4f4   :  { %v5958_v33 = vpop.eup %5957  ;;  %5967 = vrcp.f32 %v3624_v37  ;;  %v3756_v16 = vmul.f32 %v5956_v7, %v8860_v14 }
 0x4f5   :  { %5412 = vmatprep.mubr.msk.bf16.mxu0 %vm928_vm1, %v3786_v11  ;;  %v3755_v59 = vmul.f32 %v5958_v33, %v8859_v30  ;;  %v3630_v47 = vpop.xlane.xlu0 %3629 }
 0x4f6   :  { %5413 = vmatmul.mubr.msk.bf16.vlgmr.msra.gmra.mxu0 %vm928_vm1, %v3787_v0  ;;  %v3627_v38 = vpop.xlane.xlu1 %3626  ;;  %v3791_v50 = vpack.c.bf16 %v3757_v48, %v3756_v16 }
 0x4f7   :  { %5969 = vrcp.f32 %v3627_v38  ;;  %v3790_v1 = vpack.c.bf16 %v3755_v59, %v3754_v31 }
 0x4f8   :  { %5971 = vrcp.f32 %v3630_v47  ;;  %v5960_v46 = vpop.eup %5959 }
 0x4f9   :  { %5422 = vmatprep.mubr.msk.bf16.mxu1 %vm928_vm1, %v3790_v1  ;;  %v3753_v3 = vmul.f32 %v5960_v46, %v8861_v25 }
 0x4fa   :  { %5423 = vmatmul.mubr.msk.bf16.vlgmr.msra.gmra.mxu1 %vm928_vm1, %v3791_v50  ;;  %v3633_v28 = vpop.xlane.xlu1 %3632 }
 0x4fb   :  { %5973 = vrcp.f32 %v3633_v28  ;;  %v5962_v35 = vpop.eup %5961 }
 0x4fc   :  { %v5964_v39 = vpop.eup %5963  ;;  %v3750_v54 = vmul.f32 %v5962_v35, %v8862_v26 }
 0x4fd   :  { %v3752_v22 = vmul.f32 %v5964_v39, %v8864_v18 }
 0x4ff   :  { %v3789_v63 = vpack.c.bf16 %v3753_v3, %v3752_v22 }
 0x500   :  { %v5966_v62 = vpop.eup %5965 }
 0x501   :  { %v3751_v2 = vmul.f32 %v5966_v62, %v8863_v34  ;;  %v5968_v19 = vpop.eup %5967 }
 0x502   :  { %v3758_v27 = vmul.f32 %v5968_v19, %v8865_v61 }
 0x503   :  { %v3788_v40 = vpack.c.bf16 %v3751_v2, %v3750_v54 }
 0x504   :  { %v5970_v32 = vpop.eup %5969 }
 0x505   :  { %5416 = vmatprep.mubr.msk.bf16.mxu0 %vm928_vm1, %v3788_v40  ;;  %v3759_v52 = vmul.f32 %v5970_v32, %v8866_v36  ;;  %v5972_v23 = vpop.eup %5971 }
 0x506   :  { %5417 = vmatmul.mubr.msk.bf16.gmra.mxu0 %vm928_vm1, %v3789_v63  ;;  %v3760_v44 = vmul.f32 %v5972_v23, %v8867_v29  ;;  %v8869_v29 = vld [vmem:[#allocation6_spill] sm:$0xff] }
 0x507   :  { %v3792_v55 = vpack.c.bf16 %v3759_v52, %v3758_v27 }
 0x508   :  { %v5974_v21 = vpop.eup %5973 }
 0x509   :  { %5426 = vmatprep.mubr.msk.bf16.mxu1 %vm928_vm1, %v3792_v55  ;;  %v3761_v6 = vmul.f32 %v5974_v21, %v8868_v4 }
 0x50b   :  { %v3793_v24 = vpack.c.bf16 %v3761_v6, %v3760_v44 }
 0x50d   :  { %5427 = vmatmul.mubr.msk.bf16.gmra.mxu1 %vm928_vm1, %v3793_v24 }
 0x556   :  { %v5354_v53 = vpop.f32.mrf.mxu0 }
 0x557   :  { %4502 = vrot.lane.b32.xlu1 %v5354_v53, %s5975_s2 }
 0x558   :  { %v3843_v42 = vpop.f32.mrf.mxu0 }
 0x55a   :  { %v5355_v41 = vpop.f32.mrf.mxu0  ;;  %v5364_v57 = vpop.f32.mrf.mxu1 }
 0x55b   :  { %4504 = vrot.lane.b32.xlu1 %v5355_v41, %s5975_s2  ;;  %4518 = vrot.lane.b32.xlu0 %v5364_v57, %s5975_s2 }
 0x55c   :  { %v3923_v12 = vpop.f32.mrf.mxu1  ;;  %v3846_v20 = vpop.f32.mrf.mxu0 }
 0x55e   :  { %v5365_v45 = vpop.f32.mrf.mxu1 }
 0x55f   :  { %4498 = vrot.lane.b32.xlu0 %v3843_v42, %s5975_s2  ;;  %4520 = vrot.lane.b32.xlu1 %v5365_v45, %s5975_s2  ;;  %v8870_v42 = vld [vmem:[#allocation3_spill] sm:$0xff] }
 0x560   :  { %v3926_v43 = vpop.f32.mrf.mxu1 }
 0x563   :  { %4514 = vrot.lane.b32.xlu0 %v3923_v12, %s5975_s2  ;;  %4500 = vrot.lane.b32.xlu1 %v3846_v20, %s5975_s2  ;;  %v8871_v12 = vld [vmem:[#allocation2_spill] sm:$0xff] }
 0x566   :  { %v5358_v13 = vpop.f32.mrf.mxu0 }
 0x567   :  { %4516 = vrot.lane.b32.xlu1 %v3926_v43, %s5975_s2  ;;  %4510 = vrot.lane.b32.xlu0 %v5358_v13, %s5975_s2 }
 0x568   :  { %v3859_v60 = vpop.f32.mrf.mxu0 }
 0x56a   :  { %v5359_v37 = vpop.f32.mrf.mxu0  ;;  %v5368_v17 = vpop.f32.mrf.mxu1 }
 0x56b   :  { %4512 = vrot.lane.b32.xlu1 %v5359_v37, %s5975_s2  ;;  %4526 = vrot.lane.b32.xlu0 %v5368_v17, %s5975_s2 }
 0x56c   :  { %v3939_v15 = vpop.f32.mrf.mxu1  ;;  %v3862_v5 = vpop.f32.mrf.mxu0 }
 0x56e   :  { %v5369_v58 = vpop.f32.mrf.mxu1 }
 0x56f   :  { %4506 = vrot.lane.b32.xlu0 %v3859_v60, %s5975_s2  ;;  %4528 = vrot.lane.b32.xlu1 %v5369_v58, %s5975_s2  ;;  %v8872_v60 = vld [vmem:[#allocation17_spill] sm:$0xff] }
 0x570   :  { %v3942_v9 = vpop.f32.mrf.mxu1 }
 0x573   :  { %4522 = vrot.lane.b32.xlu0 %v3939_v15, %s5975_s2  ;;  %4508 = vrot.lane.b32.xlu1 %v3862_v5, %s5975_s2  ;;  %v8873_v15 = vld [vmem:[#allocation9_spill] sm:$0xff] }
 0x576   :  { %v5374_v56 = vpop.f32.mrf.mxu0 }
 0x577   :  { %4524 = vrot.lane.b32.xlu1 %v3942_v9, %s5975_s2  ;;  %4534 = vrot.lane.b32.xlu0 %v5374_v56, %s5975_s2  ;;  %v8874_v56 = vld [vmem:[#allocation7_spill] sm:$0xff] }
 0x578   :  { %v4003_v8 = vpop.f32.mrf.mxu0 }
 0x57a   :  { %v5375_v10 = vpop.f32.mrf.mxu0  ;;  %v5384_v7 = vpop.f32.mrf.mxu1 }
 0x57b   :  { %4536 = vrot.lane.b32.xlu1 %v5375_v10, %s5975_s2  ;;  %4550 = vrot.lane.b32.xlu0 %v5384_v7, %s5975_s2  ;;  %v8875_v7 = vld [vmem:[#allocation4_spill] sm:$0xff] }
 0x57c   :  { %v4083_v11 = vpop.f32.mrf.mxu1  ;;  %v4006_v0 = vpop.f32.mrf.mxu0 }
 0x57e   :  { %v5385_v33 = vpop.f32.mrf.mxu1 }
 0x57f   :  { %4530 = vrot.lane.b32.xlu0 %v4003_v8, %s5975_s2  ;;  %4552 = vrot.lane.b32.xlu1 %v5385_v33, %s5975_s2 }
 0x580   :  { %v4086_v49 = vpop.f32.mrf.mxu1 }
 0x583   :  { %4546 = vrot.lane.b32.xlu0 %v4083_v11, %s5975_s2  ;;  %4532 = vrot.lane.b32.xlu1 %v4006_v0, %s5975_s2  ;;  %v8876_v0 = vld [vmem:[#allocation10_spill] sm:$0xff] }
 0x586   :  { %v5378_v48 = vpop.f32.mrf.mxu0 }
 0x587   :  { %4548 = vrot.lane.b32.xlu1 %v4086_v49, %s5975_s2  ;;  %4542 = vrot.lane.b32.xlu0 %v5378_v48, %s5975_s2 }
 0x588   :  { %v4019_v51 = vpop.f32.mrf.mxu0 }
 0x58a   :  { %v5379_v31 = vpop.f32.mrf.mxu0  ;;  %v5388_v30 = vpop.f32.mrf.mxu1 }
 0x58b   :  { %4544 = vrot.lane.b32.xlu1 %v5379_v31, %s5975_s2  ;;  %4558 = vrot.lane.b32.xlu0 %v5388_v30, %s5975_s2 }
 0x58c   :  { %v4099_v59 = vpop.f32.mrf.mxu1  ;;  %v4022_v16 = vpop.f32.mrf.mxu0 }
 0x58e   :  { %v5389_v14 = vpop.f32.mrf.mxu1 }
 0x58f   :  { %4538 = vrot.lane.b32.xlu0 %v4019_v51, %s5975_s2  ;;  %4560 = vrot.lane.b32.xlu1 %v5389_v14, %s5975_s2  ;;  %v8877_v51 = vld [vmem:[#allocation5_spill] sm:$0xff] }
 0x590   :  { %v4102_v47 = vpop.f32.mrf.mxu1 }
 0x593   :  { %4554 = vrot.lane.b32.xlu0 %v4099_v59, %s5975_s2  ;;  %4540 = vrot.lane.b32.xlu1 %v4022_v16, %s5975_s2  ;;  %v8878_v59 = vld [vmem:[#allocation11_spill] sm:$0xff] }
 0x596   :  { %v5394_v38 = vpop.f32.mrf.mxu0 }
 0x597   :  { %4556 = vrot.lane.b32.xlu1 %v4102_v47, %s5975_s2  ;;  %4566 = vrot.lane.b32.xlu0 %v5394_v38, %s5975_s2  ;;  %v8879_v47 = vld [vmem:[#allocation15_spill] sm:$0xff] }
 0x598   :  { %v4163_v1 = vpop.f32.mrf.mxu0 }
 0x59a   :  { %v5395_v50 = vpop.f32.mrf.mxu0  ;;  %v5404_v28 = vpop.f32.mrf.mxu1 }
 0x59b   :  { %4568 = vrot.lane.b32.xlu1 %v5395_v50, %s5975_s2  ;;  %4582 = vrot.lane.b32.xlu0 %v5404_v28, %s5975_s2  ;;  %v8880_v50 = vld [vmem:[#allocation12_spill] sm:$0xff] }
 0x59c   :  { %v4243_v46 = vpop.f32.mrf.mxu1  ;;  %v4166_v39 = vpop.f32.mrf.mxu0 }
 0x59e   :  { %v5405_v35 = vpop.f32.mrf.mxu1 }
 0x59f   :  { %4562 = vrot.lane.b32.xlu0 %v4163_v1, %s5975_s2  ;;  %4584 = vrot.lane.b32.xlu1 %v5405_v35, %s5975_s2  ;;  %v8881_v35 = vld [vmem:[#allocation16_spill] sm:$0xff] }
 0x5a0   :  { %v4246_v62 = vpop.f32.mrf.mxu1 }
 0x5a3   :  { %4578 = vrot.lane.b32.xlu0 %v4243_v46, %s5975_s2  ;;  %4564 = vrot.lane.b32.xlu1 %v4166_v39, %s5975_s2 }
 0x5a6   :  { %v5398_v25 = vpop.f32.mrf.mxu0 }
 0x5a7   :  { %4580 = vrot.lane.b32.xlu1 %v4246_v62, %s5975_s2  ;;  %4574 = vrot.lane.b32.xlu0 %v5398_v25, %s5975_s2  ;;  %v8882_v25 = vld [vmem:[#allocation8_spill] sm:$0xff] }
 0x5a8   :  { %v4179_v3 = vpop.f32.mrf.mxu0 }
 0x5aa   :  { %v5399_v26 = vpop.f32.mrf.mxu0  ;;  %v5408_v54 = vpop.f32.mrf.mxu1 }
 0x5ab   :  { %4576 = vrot.lane.b32.xlu1 %v5399_v26, %s5975_s2  ;;  %4590 = vrot.lane.b32.xlu0 %v5408_v54, %s5975_s2  ;;  %v8883_v54 = vld [vmem:[#allocation13_spill] sm:$0xff] }
 0x5ac   :  { %v4259_v34 = vpop.f32.mrf.mxu1  ;;  %v4182_v19 = vpop.f32.mrf.mxu0 }
 0x5ae   :  { %v5409_v2 = vpop.f32.mrf.mxu1 }
 0x5af   :  { %4570 = vrot.lane.b32.xlu0 %v4179_v3, %s5975_s2  ;;  %4592 = vrot.lane.b32.xlu1 %v5409_v2, %s5975_s2 }
 0x5b0   :  { %v4262_v18 = vpop.f32.mrf.mxu1 }
 0x5b3   :  { %4586 = vrot.lane.b32.xlu0 %v4259_v34, %s5975_s2  ;;  %4572 = vrot.lane.b32.xlu1 %v4182_v19, %s5975_s2  ;;  %v8884_v19 = vld [vmem:[#allocation18_spill] sm:$0xff] }
 0x5b6   :  { %v5414_v22 = vpop.f32.mrf.mxu0 }
 0x5b7   :  { %4588 = vrot.lane.b32.xlu1 %v4262_v18, %s5975_s2  ;;  %4598 = vrot.lane.b32.xlu0 %v5414_v22, %s5975_s2 }
 0x5b8   :  { %v4323_v40 = vpop.f32.mrf.mxu0 }
 0x5ba   :  { %v5415_v32 = vpop.f32.mrf.mxu0  ;;  %v5424_v63 = vpop.f32.mrf.mxu1 }
 0x5bb   :  { %4600 = vrot.lane.b32.xlu1 %v5415_v32, %s5975_s2  ;;  %4614 = vrot.lane.b32.xlu0 %v5424_v63, %s5975_s2 }
 0x5bc   :  { %v4403_v61 = vpop.f32.mrf.mxu1  ;;  %v4326_v36 = vpop.f32.mrf.mxu0 }
 0x5be   :  { %v5425_v27 = vpop.f32.mrf.mxu1 }
 0x5bf   :  { %4594 = vrot.lane.b32.xlu0 %v4323_v40, %s5975_s2  ;;  %4616 = vrot.lane.b32.xlu1 %v5425_v27, %s5975_s2  ;;  %v8885_v40 = vld [vmem:[#allocation14_spill] sm:$0xff] }
 0x5c0   :  { %v4406_v52 = vpop.f32.mrf.mxu1 }
 0x5c3   :  { %4610 = vrot.lane.b32.xlu0 %v4403_v61, %s5975_s2  ;;  %4596 = vrot.lane.b32.xlu1 %v4326_v36, %s5975_s2  ;;  %v8886_v61 = vld [vmem:[#allocation21_spill] sm:$0xff] }
 0x5c6   :  { %v5418_v23 = vpop.f32.mrf.mxu0 }
 0x5c7   :  { %4612 = vrot.lane.b32.xlu1 %v4406_v52, %s5975_s2  ;;  %4606 = vrot.lane.b32.xlu0 %v5418_v23, %s5975_s2  ;;  %v8887_v52 = vld [vmem:[#allocation20_spill] sm:$0xff] }
 0x5c8   :  { %v4339_v55 = vpop.f32.mrf.mxu0 }
 0x5c9   :  { %v4503_v21 = vpop.permute.xlu1 %4502 }
 0x5ca   :  { %v4692_v44 = vsel %vm287_vm0, %v8869_v29, %v4503_v21  ;;  %v5419_v4 = vpop.f32.mrf.mxu0  ;;  %v8888_v21 = vld [vmem:[#allocation19_spill] sm:$0xff] }
 0x5cb   :  { %4756 = vst.msk [vmem:[%s8591_s3 + $0x10] sm:$0xff] %vm928_vm1, %v4692_v44  ;;  %4602 = vrot.lane.b32.xlu0 %v4339_v55, %s5975_s2  ;;  %4608 = vrot.lane.b32.xlu1 %v5419_v4, %s5975_s2  ;;  %v8889_v4 = vld [vmem:[#allocation24_spill] sm:$0xff] }
 0x5cc   :  { %v4342_v53 = vpop.f32.mrf.mxu0 }
 0x5cd   :  { %v4519_v6 = vpop.permute.xlu0 %4518  ;;  %v5428_v24 = vpop.f32.mrf.mxu1 }
 0x5ce   :  { %v4700_v41 = vsel %vm287_vm0, %v8870_v42, %v4519_v6  ;;  %v4505_v57 = vpop.permute.xlu1 %4504 }
 0x5cf   :  { %4764 = vst.msk [vmem:[%s8591_s3 + $0x50] sm:$0xff] %vm928_vm1, %v4700_v41  ;;  %v4693_v45 = vsel %vm287_vm0, %v8871_v12, %v4505_v57  ;;  %4604 = vrot.lane.b32.xlu1 %v4342_v53, %s5975_s2  ;;  %v4419_v20 = vpop.f32.mrf.mxu1  ;;  %v8890_v53 = vld [vmem:[#allocation22_spill] sm:$0xff]  ;;  %v8891_v57 = vld [vmem:[#allocation23_spill] sm:$0xff] }
 0x5d0   :  { %4757 = vst.msk [vmem:[%s8591_s3 + $0x18] sm:$0xff] %vm928_vm1, %v4693_v45  ;;  %4618 = vrot.lane.b32.xlu0 %v4419_v20, %s5975_s2  ;;  %v8892_v20 = vld [vmem:[#allocation25_spill] sm:$0xff] }
 0x5d1   :  { %v4499_v43 = vpop.permute.xlu0 %4498  ;;  %v5429_v13 = vpop.f32.mrf.mxu1 }
 0x5d2   :  { %v4690_v37 = vsel %vm287_vm0, %v8872_v60, %v4499_v43  ;;  %v4521_v17 = vpop.permute.xlu1 %4520  ;;  %v8893_v60 = vld [vmem:[#allocation26_spill] sm:$0xff] }
 0x5d3   :  { %4754 = vst.msk [vmem:[%s8591_s3] sm:$0xff] %vm928_vm1, %v4690_v37  ;;  %v4701_v58 = vsel %vm287_vm0, %v8873_v15, %v4521_v17  ;;  %v4422_v5 = vpop.f32.mrf.mxu1  ;;  %v8894_v15 = vld [vmem:[#allocation28_spill] sm:$0xff] }
 0x5d4   :  { %4765 = vst.msk [vmem:[%s8591_s3 + $0x58] sm:$0xff] %vm928_vm1, %v4701_v58  ;;  %4622 = vrot.lane.b32.xlu0 %v5428_v24, %s5975_s2  ;;  %4620 = vrot.lane.b32.xlu1 %v4422_v5, %s5975_s2 }
 0x5d5   :  { %v4515_v9 = vpop.permute.xlu0 %4514 }
 0x5d6   :  { %v4698_v8 = vsel %vm287_vm0, %v8874_v56, %v4515_v9  ;;  %v4501_v10 = vpop.permute.xlu1 %4500  ;;  %v8895_v9 = vld [vmem:[#allocation29_spill] sm:$0xff] }
 0x5d7   :  { %4762 = vst.msk [vmem:[%s8591_s3 + $0x40] sm:$0xff] %vm928_vm1, %v4698_v8  ;;  %v4691_v11 = vsel %vm287_vm0, %v8875_v7, %v4501_v10  ;;  %v8896_v10 = vld [vmem:[#allocation27_spill] sm:$0xff] }
 0x5d8   :  { %4755 = vst.msk [vmem:[%s8591_s3 + $0x8] sm:$0xff] %vm928_vm1, %v4691_v11  ;;  %4624 = vrot.lane.b32.xlu1 %v5429_v13, %s5975_s2 }
 0x5d9   :  { %v4511_v33 = vpop.permute.xlu0 %4510 }
 0x5da   :  { %v4696_v49 = vsel %vm287_vm0, %v8876_v0, %v4511_v33  ;;  %v4517_v48 = vpop.permute.xlu1 %4516  ;;  %v8897_v33 = vld [vmem:[#allocation32_spill] sm:$0xff] }
 0x5db   :  { %4760 = vst.msk [vmem:[%s8591_s3 + $0x30] sm:$0xff] %vm928_vm1, %v4696_v49  ;;  %v4699_v31 = vsel %vm287_vm0, %v8877_v51, %v4517_v48  ;;  %v8898_v48 = vld [vmem:[#allocation30_spill] sm:$0xff] }
 0x5dc   :  { %4763 = vst.msk [vmem:[%s8591_s3 + $0x48] sm:$0xff] %vm928_vm1, %v4699_v31 }
 0x5dd   :  { %v4527_v30 = vpop.permute.xlu0 %4526 }
 0x5de   :  { %v4704_v14 = vsel %vm287_vm0, %v8878_v59, %v4527_v30  ;;  %v4513_v16 = vpop.permute.xlu1 %4512  ;;  %v8899_v30 = vld [vmem:[#allocation31_spill] sm:$0xff] }
 0x5df   :  { %4768 = vst.msk [vmem:[%s8591_s3 + $0x70] sm:$0xff] %vm928_vm1, %v4704_v14  ;;  %v4697_v38 = vsel %vm287_vm0, %v8879_v47, %v4513_v16  ;;  %v8900_v16 = vld [vmem:[#allocation33_spill] sm:$0xff] }
 0x5e0   :  { %4761 = vst.msk [vmem:[%s8591_s3 + $0x38] sm:$0xff] %vm928_vm1, %v4697_v38 }
 0x5e1   :  { %v4507_v1 = vpop.permute.xlu0 %4506 }
 0x5e2   :  { %v4694_v28 = vsel %vm287_vm0, %v8880_v50, %v4507_v1  ;;  %v4529_v46 = vpop.permute.xlu1 %4528  ;;  %v8901_v1 = vld [vmem:[#allocation34_spill] sm:$0xff] }
 0x5e3   :  { %4758 = vst.msk [vmem:[%s8591_s3 + $0x20] sm:$0xff] %vm928_vm1, %v4694_v28  ;;  %v4705_v39 = vsel %vm287_vm0, %v8881_v35, %v4529_v46  ;;  %v8902_v46 = vld [vmem:[#allocation36_spill] sm:$0xff] }
 0x5e4   :  { %4769 = vst.msk [vmem:[%s8591_s3 + $0x78] sm:$0xff] %vm928_vm1, %v4705_v39 }
 0x5e5   :  { %v4523_v62 = vpop.permute.xlu0 %4522 }
 0x5e6   :  { %v4702_v3 = vsel %vm287_vm0, %v8882_v25, %v4523_v62  ;;  %v4509_v26 = vpop.permute.xlu1 %4508  ;;  %v8903_v62 = vld [vmem:[#allocation37_spill] sm:$0xff] }
 0x5e7   :  { %4766 = vst.msk [vmem:[%s8591_s3 + $0x60] sm:$0xff] %vm928_vm1, %v4702_v3  ;;  %v4695_v34 = vsel %vm287_vm0, %v8883_v54, %v4509_v26  ;;  %v8904_v26 = vld [vmem:[#allocation35_spill] sm:$0xff] }
 0x5e8   :  { %4759 = vst.msk [vmem:[%s8591_s3 + $0x28] sm:$0xff] %vm928_vm1, %v4695_v34 }
 0x5e9   :  { %v4535_v2 = vpop.permute.xlu0 %4534 }
 0x5ea   :  { %v4708_v18 = vsel %vm287_vm0, %v8884_v19, %v4535_v2  ;;  %v4525_v22 = vpop.permute.xlu1 %4524  ;;  %v8905_v2 = vld [vmem:[#allocation40_spill] sm:$0xff] }
 0x5eb   :  { %4772 = vst.msk [vmem:[%s8591_s3 + $0x90] sm:$0xff] %vm928_vm1, %v4708_v18  ;;  %v4703_v32 = vsel %vm287_vm0, %v8885_v40, %v4525_v22  ;;  %v8906_v22 = vld [vmem:[#allocation38_spill] sm:$0xff] }
 0x5ec   :  { %4767 = vst.msk [vmem:[%s8591_s3 + $0x68] sm:$0xff] %vm928_vm1, %v4703_v32 }
 0x5ed   :  { %v4551_v63 = vpop.permute.xlu0 %4550 }
 0x5ee   :  { %v4716_v27 = vsel %vm287_vm0, %v8886_v61, %v4551_v63  ;;  %v4537_v36 = vpop.permute.xlu1 %4536  ;;  %v8907_v63 = vld [vmem:[#allocation39_spill] sm:$0xff] }
 0x5ef   :  { %4780 = vst.msk [vmem:[%s8591_s3 + $0xd0] sm:$0xff] %vm928_vm1, %v4716_v27  ;;  %v4709_v23 = vsel %vm287_vm0, %v8887_v52, %v4537_v36  ;;  %v8908_v36 = vld [vmem:[#allocation41_spill] sm:$0xff] }
 0x5f0   :  { %4773 = vst.msk [vmem:[%s8591_s3 + $0x98] sm:$0xff] %vm928_vm1, %v4709_v23 }
 0x5f1   :  { %v4531_v55 = vpop.permute.xlu0 %4530 }
 0x5f2   :  { %v4706_v29 = vsel %vm287_vm0, %v8888_v21, %v4531_v55  ;;  %v4553_v44 = vpop.permute.xlu1 %4552  ;;  %v8909_v55 = vld [vmem:[#allocation42_spill] sm:$0xff] }
 0x5f3   :  { %4770 = vst.msk [vmem:[%s8591_s3 + $0x80] sm:$0xff] %vm928_vm1, %v4706_v29  ;;  %v4717_v6 = vsel %vm287_vm0, %v8889_v4, %v4553_v44  ;;  %v8910_v44 = vld [vmem:[#allocation44_spill] sm:$0xff] }
 0x5f4   :  { %4781 = vst.msk [vmem:[%s8591_s3 + $0xd8] sm:$0xff] %vm928_vm1, %v4717_v6 }
 0x5f5   :  { %v4547_v24 = vpop.permute.xlu0 %4546 }
 0x5f6   :  { %v4714_v42 = vsel %vm287_vm0, %v8890_v53, %v4547_v24  ;;  %v4533_v41 = vpop.permute.xlu1 %4532  ;;  %v8911_v24 = vld [vmem:[#allocation45_spill] sm:$0xff] }
 0x5f7   :  { %4778 = vst.msk [vmem:[%s8591_s3 + $0xc0] sm:$0xff] %vm928_vm1, %v4714_v42  ;;  %v4707_v12 = vsel %vm287_vm0, %v8891_v57, %v4533_v41  ;;  %v8912_v41 = vld [vmem:[#allocation43_spill] sm:$0xff] }
 0x5f8   :  { %4771 = vst.msk [vmem:[%s8591_s3 + $0x88] sm:$0xff] %vm928_vm1, %v4707_v12 }
 0x5f9   :  { %v4543_v45 = vpop.permute.xlu0 %4542 }
 0x5fa   :  { %v4712_v43 = vsel %vm287_vm0, %v8892_v20, %v4543_v45  ;;  %v4549_v13 = vpop.permute.xlu1 %4548  ;;  %v8913_v45 = vld [vmem:[#allocation48_spill] sm:$0xff] }
 0x5fb   :  { %4776 = vst.msk [vmem:[%s8591_s3 + $0xb0] sm:$0xff] %vm928_vm1, %v4712_v43  ;;  %v4715_v37 = vsel %vm287_vm0, %v8893_v60, %v4549_v13  ;;  %v8914_v13 = vld [vmem:[#allocation46_spill] sm:$0xff] }
 0x5fc   :  { %4779 = vst.msk [vmem:[%s8591_s3 + $0xc8] sm:$0xff] %vm928_vm1, %v4715_v37 }
 0x5fd   :  { %v4559_v17 = vpop.permute.xlu0 %4558 }
 0x5fe   :  { %v4720_v58 = vsel %vm287_vm0, %v8894_v15, %v4559_v17  ;;  %v4545_v5 = vpop.permute.xlu1 %4544  ;;  %v8915_v17 = vld [vmem:[#allocation47_spill] sm:$0xff] }
 0x5ff   :  { %4784 = vst.msk [vmem:[%s8591_s3 + $0xf0] sm:$0xff] %vm928_vm1, %v4720_v58  ;;  %v4713_v56 = vsel %vm287_vm0, %v8895_v9, %v4545_v5  ;;  %v8916_v5 = vld [vmem:[#allocation49_spill] sm:$0xff] }
 0x600   :  { %4777 = vst.msk [vmem:[%s8591_s3 + $0xb8] sm:$0xff] %vm928_vm1, %v4713_v56 }
 0x601   :  { %v4539_v8 = vpop.permute.xlu0 %4538 }
 0x602   :  { %v4710_v7 = vsel %vm287_vm0, %v8896_v10, %v4539_v8  ;;  %v4561_v11 = vpop.permute.xlu1 %4560  ;;  %v8917_v8 = vld [vmem:[#allocation51_spill] sm:$0xff] }
 0x603   :  { %4774 = vst.msk [vmem:[%s8591_s3 + $0xa0] sm:$0xff] %vm928_vm1, %v4710_v7  ;;  %v4721_v0 = vsel %vm287_vm0, %v8897_v33, %v4561_v11  ;;  %v8918_v11 = vld [vmem:[#allocation52_spill] sm:$0xff] }
 0x604   :  { %4785 = vst.msk [vmem:[%s8591_s3 + $0xf8] sm:$0xff] %vm928_vm1, %v4721_v0 }
 0x605   :  { %v4555_v49 = vpop.permute.xlu0 %4554 }
 0x606   :  { %v4718_v51 = vsel %vm287_vm0, %v8898_v48, %v4555_v49  ;;  %v4541_v31 = vpop.permute.xlu1 %4540  ;;  %v8919_v49 = vld [vmem:[#allocation53_spill] sm:$0xff] }
 0x607   :  { %4782 = vst.msk [vmem:[%s8591_s3 + $0xe0] sm:$0xff] %vm928_vm1, %v4718_v51  ;;  %v4711_v59 = vsel %vm287_vm0, %v8899_v30, %v4541_v31  ;;  %v8920_v31 = vld [vmem:[#allocation50_spill] sm:$0xff] }
 0x608   :  { %4775 = vst.msk [vmem:[%s8591_s3 + $0xa8] sm:$0xff] %vm928_vm1, %v4711_v59 }
 0x609   :  { %v4567_v14 = vpop.permute.xlu0 %4566 }
 0x60a   :  { %v4724_v47 = vsel %vm287_vm0, %v8900_v16, %v4567_v14  ;;  %v4557_v38 = vpop.permute.xlu1 %4556  ;;  %v8921_v14 = vld [vmem:[#allocation57_spill] sm:$0xff] }
 0x60b   :  { %4788 = vst.msk [vmem:[%s8591_s3 + $0x110] sm:$0xff] %vm928_vm1, %v4724_v47  ;;  %v4719_v50 = vsel %vm287_vm0, %v8901_v1, %v4557_v38  ;;  %v8922_v38 = vld [vmem:[#allocation54_spill] sm:$0xff] }
 0x60c   :  { %4783 = vst.msk [vmem:[%s8591_s3 + $0xe8] sm:$0xff] %vm928_vm1, %v4719_v50 }
 0x60d   :  { %v4583_v28 = vpop.permute.xlu0 %4582 }
 0x60e   :  { %v4732_v35 = vsel %vm287_vm0, %v8902_v46, %v4583_v28  ;;  %v4569_v39 = vpop.permute.xlu1 %4568  ;;  %v8923_v28 = vld [vmem:[#allocation55_spill] sm:$0xff] }
 0x60f   :  { %4796 = vst.msk [vmem:[%s8591_s3 + $0x150] sm:$0xff] %vm928_vm1, %v4732_v35  ;;  %v4725_v25 = vsel %vm287_vm0, %v8903_v62, %v4569_v39  ;;  %v8924_v39 = vld [vmem:[#allocation56_spill] sm:$0xff] }
 0x610   :  { %4789 = vst.msk [vmem:[%s8591_s3 + $0x118] sm:$0xff] %vm928_vm1, %v4725_v25 }
 0x611   :  { %v4563_v3 = vpop.permute.xlu0 %4562 }
 0x612   :  { %v4722_v54 = vsel %vm287_vm0, %v8904_v26, %v4563_v3  ;;  %v4585_v34 = vpop.permute.xlu1 %4584  ;;  %v8925_v3 = vld [vmem:[#allocation60_spill] sm:$0xff] }
 0x613   :  { %4786 = vst.msk [vmem:[%s8591_s3 + $0x100] sm:$0xff] %vm928_vm1, %v4722_v54  ;;  %v4733_v19 = vsel %vm287_vm0, %v8905_v2, %v4585_v34  ;;  %v8926_v34 = vld [vmem:[#allocation58_spill] sm:$0xff] }
 0x614   :  { %4797 = vst.msk [vmem:[%s8591_s3 + $0x158] sm:$0xff] %vm928_vm1, %v4733_v19 }
 0x615   :  { %v4579_v18 = vpop.permute.xlu0 %4578 }
 0x616   :  { %v4730_v40 = vsel %vm287_vm0, %v8906_v22, %v4579_v18  ;;  %v4565_v32 = vpop.permute.xlu1 %4564  ;;  %v8927_v18 = vld [vmem:[#allocation59_spill] sm:$0xff] }
 0x617   :  { %4794 = vst.msk [vmem:[%s8591_s3 + $0x140] sm:$0xff] %vm928_vm1, %v4730_v40  ;;  %v4723_v61 = vsel %vm287_vm0, %v8907_v63, %v4565_v32  ;;  %v8928_v63 = vld [vmem:[#allocation61_spill] sm:$0xff] }
 0x618   :  { %4787 = vst.msk [vmem:[%s8591_s3 + $0x108] sm:$0xff] %vm928_vm1, %v4723_v61 }
 0x619   :  { %v4575_v27 = vpop.permute.xlu0 %4574 }
 0x61a   :  { %v4728_v52 = vsel %vm287_vm0, %v8908_v36, %v4575_v27  ;;  %v4581_v23 = vpop.permute.xlu1 %4580  ;;  %v8929_v27 = vld [vmem:[#allocation63_spill] sm:$0xff] }
 0x61b   :  { %4792 = vst.msk [vmem:[%s8591_s3 + $0x130] sm:$0xff] %vm928_vm1, %v4728_v52  ;;  %v4731_v21 = vsel %vm287_vm0, %v8909_v55, %v4581_v23  ;;  %v8930_v55 = vld [vmem:[#allocation62_spill] sm:$0xff] }
 0x61c   :  { %4795 = vst.msk [vmem:[%s8591_s3 + $0x148] sm:$0xff] %vm928_vm1, %v4731_v21 }
 0x61d   :  { %v4591_v29 = vpop.permute.xlu0 %4590 }
 0x61e   :  { %v4736_v4 = vsel %vm287_vm0, %v8910_v44, %v4591_v29  ;;  %v4577_v6 = vpop.permute.xlu1 %4576  ;;  %v8931_v29 = vld [vmem:[#allocation65_spill] sm:$0xff] }
 0x61f   :  { %4800 = vst.msk [vmem:[%s8591_s3 + $0x170] sm:$0xff] %vm928_vm1, %v4736_v4  ;;  %v4729_v53 = vsel %vm287_vm0, %v8911_v24, %v4577_v6  ;;  %v8932_v6 = vld [vmem:[#allocation64_spill] sm:$0xff] }
 0x620   :  { %4793 = vst.msk [vmem:[%s8591_s3 + $0x138] sm:$0xff] %vm928_vm1, %v4729_v53 }
 0x621   :  { %v4571_v42 = vpop.permute.xlu0 %4570 }
 0x622   :  { %v4726_v57 = vsel %vm287_vm0, %v8912_v41, %v4571_v42  ;;  %v4593_v12 = vpop.permute.xlu1 %4592 }
 0x623   :  { %4790 = vst.msk [vmem:[%s8591_s3 + $0x120] sm:$0xff] %vm928_vm1, %v4726_v57  ;;  %v4737_v20 = vsel %vm287_vm0, %v8913_v45, %v4593_v12 }
 0x624   :  { %4801 = vst.msk [vmem:[%s8591_s3 + $0x178] sm:$0xff] %vm928_vm1, %v4737_v20 }
 0x625   :  { %v4587_v43 = vpop.permute.xlu0 %4586 }
 0x626   :  { %v4734_v60 = vsel %vm287_vm0, %v8914_v13, %v4587_v43  ;;  %v4573_v37 = vpop.permute.xlu1 %4572 }
 0x627   :  { %4798 = vst.msk [vmem:[%s8591_s3 + $0x160] sm:$0xff] %vm928_vm1, %v4734_v60  ;;  %v4727_v15 = vsel %vm287_vm0, %v8915_v17, %v4573_v37 }
 0x628   :  { %4791 = vst.msk [vmem:[%s8591_s3 + $0x128] sm:$0xff] %vm928_vm1, %v4727_v15 }
 0x629   :  { %v4599_v58 = vpop.permute.xlu0 %4598 }
 0x62a   :  { %v4740_v9 = vsel %vm287_vm0, %v8916_v5, %v4599_v58  ;;  %v4589_v56 = vpop.permute.xlu1 %4588 }
 0x62b   :  { %4804 = vst.msk [vmem:[%s8591_s3 + $0x190] sm:$0xff] %vm928_vm1, %v4740_v9  ;;  %v4735_v10 = vsel %vm287_vm0, %v8917_v8, %v4589_v56 }
 0x62c   :  { %4799 = vst.msk [vmem:[%s8591_s3 + $0x168] sm:$0xff] %vm928_vm1, %v4735_v10 }
 0x62d   :  { %v4615_v7 = vpop.permute.xlu0 %4614 }
 0x62e   :  { %v4748_v33 = vsel %vm287_vm0, %v8918_v11, %v4615_v7  ;;  %v4601_v0 = vpop.permute.xlu1 %4600 }
 0x62f   :  { %4812 = vst.msk [vmem:[%s8591_s3 + $0x1d0] sm:$0xff] %vm928_vm1, %v4748_v33  ;;  %v4741_v48 = vsel %vm287_vm0, %v8919_v49, %v4601_v0 }
 0x630   :  { %4805 = vst.msk [vmem:[%s8591_s3 + $0x198] sm:$0xff] %vm928_vm1, %v4741_v48 }
 0x631   :  { %v4595_v51 = vpop.permute.xlu0 %4594 }
 0x632   :  { %v4738_v30 = vsel %vm287_vm0, %v8920_v31, %v4595_v51  ;;  %v4617_v59 = vpop.permute.xlu1 %4616 }
 0x633   :  { %4802 = vst.msk [vmem:[%s8591_s3 + $0x180] sm:$0xff] %vm928_vm1, %v4738_v30  ;;  %v4749_v16 = vsel %vm287_vm0, %v8921_v14, %v4617_v59 }
 0x634   :  { %4813 = vst.msk [vmem:[%s8591_s3 + $0x1d8] sm:$0xff] %vm928_vm1, %v4749_v16 }
 0x635   :  { %v4611_v47 = vpop.permute.xlu0 %4610 }
 0x636   :  { %v4746_v1 = vsel %vm287_vm0, %v8922_v38, %v4611_v47  ;;  %v4597_v50 = vpop.permute.xlu1 %4596 }
 0x637   :  { %4810 = vst.msk [vmem:[%s8591_s3 + $0x1c0] sm:$0xff] %vm928_vm1, %v4746_v1  ;;  %v4739_v46 = vsel %vm287_vm0, %v8923_v28, %v4597_v50 }
 0x638   :  { %4803 = vst.msk [vmem:[%s8591_s3 + $0x188] sm:$0xff] %vm928_vm1, %v4739_v46 }
 0x639   :  { %v4607_v35 = vpop.permute.xlu0 %4606 }
 0x63a   :  { %v4744_v62 = vsel %vm287_vm0, %v8924_v39, %v4607_v35  ;;  %v4613_v25 = vpop.permute.xlu1 %4612 }
 0x63b   :  { %4808 = vst.msk [vmem:[%s8591_s3 + $0x1b0] sm:$0xff] %vm928_vm1, %v4744_v62  ;;  %v4747_v26 = vsel %vm287_vm0, %v8925_v3, %v4613_v25 }
 0x63c   :  { %4811 = vst.msk [vmem:[%s8591_s3 + $0x1c8] sm:$0xff] %vm928_vm1, %v4747_v26 }
 0x63d   :  { %v4603_v54 = vpop.permute.xlu0 %4602 }
 0x63e   :  { %v4742_v2 = vsel %vm287_vm0, %v8926_v34, %v4603_v54  ;;  %v4609_v19 = vpop.permute.xlu1 %4608 }
 0x63f   :  { %4806 = vst.msk [vmem:[%s8591_s3 + $0x1a0] sm:$0xff] %vm928_vm1, %v4742_v2  ;;  %v4745_v22 = vsel %vm287_vm0, %v8927_v18, %v4609_v19 }
 0x640   :  { %4809 = vst.msk [vmem:[%s8591_s3 + $0x1b8] sm:$0xff] %vm928_vm1, %v4745_v22 }
 0x642   :  { %v4605_v40 = vpop.permute.xlu1 %4604  ;;  %v4619_v32 = vpop.permute.xlu0 %4618 }
 0x643   :  { %v4743_v61 = vsel %vm287_vm0, %v8928_v63, %v4605_v40  ;;  %v4750_v36 = vsel %vm287_vm0, %v8929_v27, %v4619_v32 }
 0x644   :  { %4807 = vst.msk [vmem:[%s8591_s3 + $0x1a8] sm:$0xff] %vm928_vm1, %v4743_v61  ;;  %4814 = vst.msk [vmem:[%s8591_s3 + $0x1e0] sm:$0xff] %vm928_vm1, %v4750_v36 }
 0x646   :  { %v4623_v52 = vpop.permute.xlu0 %4622  ;;  %v4621_v23 = vpop.permute.xlu1 %4620 }
 0x647   :  { %v4752_v21 = vsel %vm287_vm0, %v8930_v55, %v4623_v52  ;;  %v4751_v44 = vsel %vm287_vm0, %v8931_v29, %v4621_v23 }
 0x648   :  { %4816 = vst.msk [vmem:[%s8591_s3 + $0x1f0] sm:$0xff] %vm928_vm1, %v4752_v21  ;;  %4815 = vst.msk [vmem:[%s8591_s3 + $0x1e8] sm:$0xff] %vm928_vm1, %v4751_v44 }
 0x64a   :  { %v4625_v4 = vpop.permute.xlu1 %4624 }
 0x64b   :  { %v4753_v24 = vsel %vm287_vm0, %v8932_v6, %v4625_v4 }
 0x64c   :  { %4817 = vst.msk [vmem:[%s8591_s3 + $0x1f8] sm:$0xff] %vm928_vm1, %v4753_v24 }

</bundles_post_ra>
